<compile_context>
chip_gen: v5e
topology: v5e:2x2
jax: 0.10.0
libtpu: 0.0.40
codegen_flags: <defaults>
</compile_context>

<pallas_src>
import math
import functools

import jax
import jax.numpy as jnp
from jax.experimental import pallas as pl
from jax.experimental.pallas import tpu as pltpu


# ------------------------------------------------------------------
# Tiling helpers
# ------------------------------------------------------------------

_VMEM_LIMIT_BYTES = 48 * 1024 * 1024  # < v7x 64 MiB physical, > v5e 16 MiB default scoped


def _cparams(sem):
    return pltpu.CompilerParams(dimension_semantics=sem,
                                vmem_limit_bytes=_VMEM_LIMIT_BYTES)


def _round_up(x, m):
    return ((x + m - 1) // m) * m


def _pick_tile(dim, target, quantum):
    """Largest tile <= target that is a multiple of `quantum` and divides `dim`.
    Falls back to the full dim (always legal: block == array extent)."""
    if dim <= target:
        return dim
    t = (target // quantum) * quantum
    while t >= quantum:
        if dim % t == 0:
            return t
        t -= quantum
    return dim


def _row_tiling(M, target=512, quantum=16):
    """Row tile (bf16 quantum 16) + padded row count.  Non-divisible M is padded
    instead of degrading to tiny/full-dim tiles (perf review)."""
    tm = min(target, _round_up(M, quantum))
    Mp = _round_up(M, tm)
    return tm, Mp


def _pad_rows(a, Mp):
    M = a.shape[0]
    if M == Mp:
        return a
    return jnp.pad(a, ((0, Mp - M), (0, 0)))


def _ln_modulate(x, shift, scale, eps=1e-6):
    """LayerNorm (no affine, eps=1e-6 as in DiT) + adaLN modulate, in f32."""
    x = x.astype(jnp.float32)
    mu = jnp.mean(x, axis=-1, keepdims=True)
    var = jnp.mean(jnp.square(x - mu), axis=-1, keepdims=True)
    xn = (x - mu) * jax.lax.rsqrt(var + eps)
    return xn * (1.0 + scale.astype(jnp.float32)) + shift.astype(jnp.float32)


# ------------------------------------------------------------------
# Pallas kernels
# ------------------------------------------------------------------

def _linear_kernel(x_ref, w_ref, b_ref, o_ref):
    """y = x @ w + b.  bf16 MXU inputs, f32 accumulation.  M- and N-tiled."""
    y = jnp.dot(x_ref[...].astype(jnp.bfloat16), w_ref[...].astype(jnp.bfloat16),
                preferred_element_type=jnp.float32)
    o_ref[...] = (y + b_ref[...].astype(jnp.float32)).astype(o_ref.dtype)


def linear(x, w, b, *, out_dtype=jnp.bfloat16):
    M, K = x.shape
    N = w.shape[1]
    tm, Mp = _row_tiling(M)
    tn = _pick_tile(N, 512, 128)
    xp = _pad_rows(x, Mp)
    out = pl.pallas_call(
        _linear_kernel,
        out_shape=jax.ShapeDtypeStruct((Mp, N), out_dtype),
        grid=(Mp // tm, N // tn),
        in_specs=[
            pl.BlockSpec((tm, K), lambda i, j: (i, 0)),
            pl.BlockSpec((K, tn), lambda i, j: (0, j)),
            pl.BlockSpec((1, tn), lambda i, j: (0, j)),
        ],
        out_specs=pl.BlockSpec((tm, tn), lambda i, j: (i, j)),
        compiler_params=_cparams(("parallel", "parallel")),
    )(xp, w, b)
    return out[:M] if Mp != M else out


def _ln_mod_matmul_kernel(x_ref, sh_ref, sc_ref, w_ref, b_ref, o_ref, xm_ref):
    """(LN + adaLN-modulate) prologue fused with an N-tiled matmul.
    Prologue is computed once per row tile (j == 0) into VMEM scratch and
    reused for every output column tile (perf review: hoist prologue)."""
    @pl.when(pl.program_id(1) == 0)
    def _():
        xm_ref[...] = _ln_modulate(x_ref[...], sh_ref[...], sc_ref[...]
                                   ).astype(xm_ref.dtype)
    y = jnp.dot(xm_ref[...], w_ref[...].astype(jnp.bfloat16),
                preferred_element_type=jnp.float32)
    o_ref[...] = (y + b_ref[...].astype(jnp.float32)).astype(o_ref.dtype)


def ln_mod_matmul(x, mod, shift_blk, scale_blk, w, b, *, out_dtype=jnp.bfloat16):
    """out = LN_modulate(x, mod[:, shift], mod[:, scale]) @ w + b.
    shift/scale are H-wide column blocks of `mod` selected by index_map."""
    M, K = x.shape          # K == H
    N = w.shape[1]
    tm, Mp = _row_tiling(M)
    tn = _pick_tile(N, 512, 128)
    xp = _pad_rows(x, Mp)
    modp = _pad_rows(mod, Mp)
    out = pl.pallas_call(
        _ln_mod_matmul_kernel,
        out_shape=jax.ShapeDtypeStruct((Mp, N), out_dtype),
        grid=(Mp // tm, N // tn),
        in_specs=[
            pl.BlockSpec((tm, K), lambda i, j: (i, 0)),
            pl.BlockSpec((tm, K), lambda i, j: (i, shift_blk)),
            pl.BlockSpec((tm, K), lambda i, j: (i, scale_blk)),
            pl.BlockSpec((K, tn), lambda i, j: (0, j)),
            pl.BlockSpec((1, tn), lambda i, j: (0, j)),
        ],
        out_specs=pl.BlockSpec((tm, tn), lambda i, j: (i, j)),
        scratch_shapes=[pltpu.VMEM((tm, K), jnp.bfloat16)],
        compiler_params=_cparams(("parallel", "arbitrary")),
    )(xp, modp, modp, w, b)
    return out[:M] if Mp != M else out


def _ln_mod_geglu_kernel(x_ref, sh_ref, sc_ref, wv_ref, wg_ref, bv_ref, bg_ref,
                         o_ref, xm_ref):
    """LN + modulate + FF1 (value & gate halves) + GEGLU epilogue, N-tiled."""
    @pl.when(pl.program_id(1) == 0)
    def _():
        xm_ref[...] = _ln_modulate(x_ref[...], sh_ref[...], sc_ref[...]
                                   ).astype(xm_ref.dtype)
    xm = xm_ref[...]
    val = jnp.dot(xm, wv_ref[...].astype(jnp.bfloat16),
                  preferred_element_type=jnp.float32) + bv_ref[...].astype(jnp.float32)
    gate = jnp.dot(xm, wg_ref[...].astype(jnp.bfloat16),
                   preferred_element_type=jnp.float32) + bg_ref[...].astype(jnp.float32)
    # TODO(synk): reference FFN is ffn_type='conv1d_conv1d' gated-GLU with erf GELU;
    # linear gated-GLU with tanh-approx GELU is assumed here.
    o_ref[...] = (val * jax.nn.gelu(gate, approximate=True)).astype(o_ref.dtype)


def ln_mod_geglu(x, mod, shift_blk, scale_blk, wv, wg, bv, bg):
    M, K = x.shape          # K == H
    N = wv.shape[1]         # mlp hidden
    tm, Mp = _row_tiling(M)
    tn = _pick_tile(N, 512, 128)
    xp = _pad_rows(x, Mp)
    modp = _pad_rows(mod, Mp)
    out = pl.pallas_call(
        _ln_mod_geglu_kernel,
        out_shape=jax.ShapeDtypeStruct((Mp, N), jnp.bfloat16),
        grid=(Mp // tm, N // tn),
        in_specs=[
            pl.BlockSpec((tm, K), lambda i, j: (i, 0)),
            pl.BlockSpec((tm, K), lambda i, j: (i, shift_blk)),
            pl.BlockSpec((tm, K), lambda i, j: (i, scale_blk)),
            pl.BlockSpec((K, tn), lambda i, j: (0, j)),
            pl.BlockSpec((K, tn), lambda i, j: (0, j)),
            pl.BlockSpec((1, tn), lambda i, j: (0, j)),
            pl.BlockSpec((1, tn), lambda i, j: (0, j)),
        ],
        out_specs=pl.BlockSpec((tm, tn), lambda i, j: (i, j)),
        scratch_shapes=[pltpu.VMEM((tm, K), jnp.bfloat16)],
        compiler_params=_cparams(("parallel", "arbitrary")),
    )(xp, modp, modp, wv, wg, bv, bg)
    return out[:M] if Mp != M else out


def _mm_gated_res_kernel(x_ref, w_ref, b_ref, res_ref, gate_ref, o_ref):
    """o = res + gate * (x @ w + b)  -- projection matmul fused with gated residual."""
    y = jnp.dot(x_ref[...].astype(jnp.bfloat16), w_ref[...].astype(jnp.bfloat16),
                preferred_element_type=jnp.float32) + b_ref[...].astype(jnp.float32)
    o_ref[...] = (res_ref[...].astype(jnp.float32)
                  + gate_ref[...].astype(jnp.float32) * y).astype(o_ref.dtype)


def matmul_gated_residual(x, w, b, residual, mod, gate_blk):
    M, K = x.shape
    N = w.shape[1]          # == H (matches gate slice width)
    H = N
    tm, Mp = _row_tiling(M)
    tn = _pick_tile(N, 512, 128)
    gate_off = gate_blk * (H // tn)       # gate column offset in tn-block units
    xp = _pad_rows(x, Mp)
    resp = _pad_rows(residual, Mp)
    modp = _pad_rows(mod, Mp)
    out = pl.pallas_call(
        _mm_gated_res_kernel,
        out_shape=jax.ShapeDtypeStruct((Mp, N), jnp.bfloat16),
        grid=(Mp // tm, N // tn),
        in_specs=[
            pl.BlockSpec((tm, K), lambda i, j: (i, 0)),
            pl.BlockSpec((K, tn), lambda i, j: (0, j)),
            pl.BlockSpec((1, tn), lambda i, j: (0, j)),
            pl.BlockSpec((tm, tn), lambda i, j: (i, j)),
            pl.BlockSpec((tm, tn), lambda i, j: (i, gate_off + j)),
        ],
        out_specs=pl.BlockSpec((tm, tn), lambda i, j: (i, j)),
        compiler_params=_cparams(("parallel", "parallel")),
    )(xp, w, b, resp, modp)
    return out[:M] if Mp != M else out


def _flash_attn_kernel(q_ref, k_ref, v_ref, o_ref, *scratch, hpb, head_dim, scale):
    """Flash attention for one (batch, head-group, q-tile, kv-tile) grid step.
    `hpb` heads are packed into one lane-dense column block; each sub-head keeps
    its own online-softmax state (m, l, acc) in VMEM scratch."""
    m_refs = scratch[0:hpb]
    l_refs = scratch[hpb:2 * hpb]
    acc_refs = scratch[2 * hpb:3 * hpb]
    kv = pl.program_id(3)

    @pl.when(kv == 0)
    def _():
        for s in range(hpb):
            m_refs[s][...] = jnp.full_like(m_refs[s], -jnp.inf)
            l_refs[s][...] = jnp.zeros_like(l_refs[s])
            acc_refs[s][...] = jnp.zeros_like(acc_refs[s])

    q = q_ref[0]            # (tq,  hpb*hd) bf16
    k = k_ref[0]            # (tkv, hpb*hd) bf16
    v = v_ref[0]
    for s in range(hpb):
        lo, hi = s * head_dim, (s + 1) * head_dim
        qs = q[:, lo:hi]
        ks = k[:, lo:hi]
        vs = v[:, lo:hi]
        sc = jax.lax.dot_general(qs, ks, (((1,), (1,)), ((), ())),
                                 preferred_element_type=jnp.float32) * scale
        m_prev = m_refs[s][...]
        m_new = jnp.maximum(m_prev, jnp.max(sc, axis=-1, keepdims=True))
        alpha = jnp.exp(m_prev - m_new)
        p = jnp.exp(sc - m_new)
        l_refs[s][...] = alpha * l_refs[s][...] + jnp.sum(p, axis=-1, keepdims=True)
        acc_refs[s][...] = alpha * acc_refs[s][...] + jnp.dot(
            p.astype(vs.dtype), vs, preferred_element_type=jnp.float32)
        m_refs[s][...] = m_new

    @pl.when(kv == pl.num_programs(3) - 1)
    def _():
        outs = [acc_refs[s][...] * pl.reciprocal(l_refs[s][...], approx=True)
                for s in range(hpb)]
        o_ref[0] = jnp.concatenate(outs, axis=-1).astype(o_ref.dtype)
    # TODO(synk): varlen cu_seqlens / mask path and incremental_state (KV cache)
    # are not implemented (full bidirectional attention over T assumed).


def attention(qkv, num_heads, head_dim):
    """qkv: (B, T, 3H) bf16 -> (B, T, H).  q/k/v per head-group are selected as
    column blocks of the projection output (no XLA transpose); KV axis is
    flash-tiled with online softmax."""
    B, T, _ = qkv.shape
    H = num_heads * head_dim
    # Group heads so the column-block width is lane-dense (multiple of 128).
    hpb = None
    for cand in range(1, num_heads + 1):
        if num_heads % cand == 0 and (cand * head_dim) % 128 == 0:
            hpb = cand
            break
    if hpb is None:
        hpb = num_heads       # requires H % 128 == 0 (true for supported configs)
    nHb = num_heads // hpb
    W = hpb * head_dim
    tq = _pick_tile(T, 256, 8)
    tkv = _pick_tile(T, 512, 8)
    scratch = ([pltpu.VMEM((tq, 1), jnp.float32) for _ in range(hpb)]
               + [pltpu.VMEM((tq, 1), jnp.float32) for _ in range(hpb)]
               + [pltpu.VMEM((tq, head_dim), jnp.float32) for _ in range(hpb)])
    return pl.pallas_call(
        functools.partial(_flash_attn_kernel, hpb=hpb, head_dim=head_dim,
                          scale=1.0 / math.sqrt(head_dim)),
        out_shape=jax.ShapeDtypeStruct((B, T, H), jnp.bfloat16),
        grid=(B, nHb, T // tq, T // tkv),
        in_specs=[
            pl.BlockSpec((1, tq, W), lambda b, g, qi, kv: (b, qi, g)),
            pl.BlockSpec((1, tkv, W), lambda b, g, qi, kv: (b, kv, nHb + g)),
            pl.BlockSpec((1, tkv, W), lambda b, g, qi, kv: (b, kv, 2 * nHb + g)),
        ],
        out_specs=pl.BlockSpec((1, tq, W), lambda b, g, qi, kv: (b, qi, g)),
        scratch_shapes=scratch,
        compiler_params=_cparams(("parallel", "parallel", "parallel", "arbitrary")),
    )(qkv, qkv, qkv)


# ------------------------------------------------------------------
# Glue (embedding tables, gathers, timestep embedder) -- XLA
# ------------------------------------------------------------------

def sinusoidal_table(num_embeddings, embedding_dim, padding_idx):
    half = embedding_dim // 2
    emb = math.log(10000) / (half - 1)
    emb = jnp.exp(jnp.arange(half, dtype=jnp.float32) * -emb)
    emb = jnp.arange(num_embeddings, dtype=jnp.float32)[:, None] * emb[None, :]
    emb = jnp.concatenate([jnp.sin(emb), jnp.cos(emb)], axis=1)
    emb = emb.at[padding_idx, :].set(0.0)
    return emb


def timestep_embedding(t, dim, max_period=10000):
    half = dim // 2
    freqs = jnp.exp(-math.log(max_period) * jnp.arange(half, dtype=jnp.float32) / half)
    args = t[:, None].astype(jnp.float32) * freqs[None, :]
    return jnp.concatenate([jnp.cos(args), jnp.sin(args)], axis=-1)


def make_positions(position_ids, padding_idx):
    mask = (position_ids != padding_idx).astype(jnp.int32)
    return jnp.cumsum(mask, axis=1) * mask + padding_idx


def timestep_embedder(t, params, cfg):
    """Linear -> SiLU -> Linear; M = batch is tiny so left to XLA (perf review)."""
    t_freq = timestep_embedding(t, cfg["freq_dim"])
    h = jax.nn.silu(t_freq @ params["w_t1"] + params["b_t1"])
    return h @ params["w_t2"] + params["b_t2"]


def _layernorm(x, eps=1e-6):
    mu = jnp.mean(x, axis=-1, keepdims=True)
    var = jnp.mean(jnp.square(x - mu), axis=-1, keepdims=True)
    return (x - mu) * jax.lax.rsqrt(var + eps)


def init_params(key, cfg):
    H = cfg["hidden"]
    mh = int(H * cfg["mlp_ratio"])
    keys = iter(jax.random.split(key, 64 + 16 * cfg["depth"]))

    def w(shape, std=0.02):
        return (std * jax.random.normal(next(keys), shape, dtype=jnp.float32)
                ).astype(jnp.bfloat16)

    def b(n, std=0.02):
        return std * jax.random.normal(next(keys), (1, n), dtype=jnp.float32)

    def f32(shape, std=0.02):
        return std * jax.random.normal(next(keys), shape, dtype=jnp.float32)

    p = {
        "sem_emb": f32((cfg["semantic_vocab_size"], H)),
        # input linear kept f32 / XLA (K=16, MXU underfilled -- perf review)
        "w_in": f32((cfg["input_size"], H)), "b_in": f32((1, H)),
        # timestep embedder kept f32 / XLA (M = batch is tiny)
        "w_t1": f32((cfg["freq_dim"], H)), "b_t1": f32((H,)),
        "w_t2": f32((H, H)), "b_t2": f32((H,)),
        "w_fada": w((H, 2 * H)), "b_fada": b(2 * H),
        # final projection kept f32 / XLA (N=output_size=16 -- perf review)
        "w_out": f32((H, cfg["output_size"])), "b_out": f32((1, cfg["output_size"])),
        "sin_table": sinusoidal_table(cfg["max_seq_len"] + 1, H, padding_idx=0),
        "blocks": [],
    }
    for _ in range(cfg["depth"]):
        p["blocks"].append({
            "w_ada": w((H, 6 * H)), "b_ada": b(6 * H),
            "w_qkv": w((H, 3 * H)), "b_qkv": b(3 * H),
            "w_proj": w((H, H)), "b_proj": b(H),
            "w_ff1_v": w((H, mh)), "w_ff1_g": w((H, mh)),
            "b_ff1_v": b(mh), "b_ff1_g": b(mh),
            "w_ff2": w((mh, H)), "b_ff2": b(H),
        })
    return p


# ------------------------------------------------------------------
# DiTPrefix forward
# ------------------------------------------------------------------

def dit_prefix_forward(params, x, position_ids, t, condition, cfg):
    """
    x:            (B, T, input_size) float32
    position_ids: (B, T) int32
    t:            (B,)   float32 diffusion timesteps
    condition:    (B, T) int32 semantic tokens
    returns       (B, T, output_size) float32
    """
    B, T, C = x.shape
    H = cfg["hidden"]
    BT = B * T
    nH = cfg["num_heads"]
    hd = H // nH

    # --- embeddings / glue (XLA) ---
    cond_emb = params["sem_emb"][condition]                       # (B,T,H) f32
    positions = make_positions(position_ids, padding_idx=0)
    pos_emb = params["sin_table"][positions.reshape(-1)]          # (BT,H) f32

    # Input linear + positional add: K=input_size=16 underfills the MXU; left to
    # XLA per perf review (pallas_call overhead + padding would dominate).
    xf = (x.reshape(BT, C) @ params["w_in"] + params["b_in"] + pos_emb)
    xf = xf.astype(jnp.bfloat16)                                  # (BT,H)

    # TODO(synk): use_rope=False path only; rotary_pos_emb gather not implemented.

    # timestep embedder + c = t.unsqueeze(1) + condition  (tiny; XLA)
    t_emb = timestep_embedder(t, params, cfg)                     # (B,H) f32
    c = t_emb[:, None, :] + cond_emb                              # (B,T,H) f32
    # SiLU(c) is shared by every block's adaLN and the final adaLN -> compute once.
    c_act = jax.nn.silu(c).reshape(BT, H).astype(jnp.bfloat16)

    # TODO(synk): DiTBlock source not provided; standard DiT adaLN-Zero block
    # (self-attention + gated-GLU FFN) implemented; conv1d_conv1d FFN and the
    # varlen cu_seqlens/mask/incremental_state paths are not reproduced.
    for blk in params["blocks"]:
        # adaLN modulation: SiLU(c) @ W -> (BT, 6H) laid out as
        # [shift_msa | scale_msa | gate_msa | shift_mlp | scale_mlp | gate_mlp]
        mod = linear(c_act, blk["w_ada"], blk["b_ada"])                    # (BT,6H)

        # --- attention branch (LN+mod+QKV, flash attention, proj+gated residual) ---
        qkv = ln_mod_matmul(xf, mod, 0, 1, blk["w_qkv"], blk["b_qkv"])     # (BT,3H)
        attn = attention(qkv.reshape(B, T, 3 * H), nH, hd).reshape(BT, H)  # (BT,H)
        xf = matmul_gated_residual(attn, blk["w_proj"], blk["b_proj"], xf, mod, 2)

        # --- FFN branch (LN+mod+FF1+GEGLU, FF2+gated residual) ---
        y = ln_mod_geglu(xf, mod, 3, 4, blk["w_ff1_v"], blk["w_ff1_g"],
                         blk["b_ff1_v"], blk["b_ff1_g"])                   # (BT,mh)
        xf = matmul_gated_residual(y, blk["w_ff2"], blk["b_ff2"], xf, mod, 5)

    # TODO(synk): FinalLayer source not provided; standard DiT final layer assumed
    # (adaLN shift/scale + LayerNorm + linear).  The adaLN projection (H->2H) stays
    # in Pallas; the LN/modulate and the N=16 output linear are left to XLA per
    # the perf review (masked lane stores / MXU underfill at N=16).
    fmod = linear(c_act, params["w_fada"], params["b_fada"]).astype(jnp.float32)
    shift, scale = fmod[:, :H], fmod[:, H:]
    xn = _layernorm(xf.astype(jnp.float32)) * (1.0 + scale) + shift
    out = xn @ params["w_out"] + params["b_out"]                           # (BT,out)
    return out.reshape(B, T, cfg["output_size"])


# ------------------------------------------------------------------
# main
# ------------------------------------------------------------------

if __name__ == "__main__":
    cfg = dict(
        input_size=16,
        output_size=16,
        semantic_vocab_size=32,
        hidden=256,
        depth=2,
        num_heads=4,          # head_dim = 64 -> 2 heads per lane-dense column block
        mlp_ratio=4.0,
        max_seq_len=64,
        freq_dim=256,
    )
    B, T = 2, 16

    key = jax.random.PRNGKey(0)
    k_p, k_x, k_c, k_t = jax.random.split(key, 4)

    params = init_params(k_p, cfg)
    x = jax.random.normal(k_x, (B, T, cfg["input_size"]), dtype=jnp.float32)
    position_ids = jnp.broadcast_to(
        jnp.arange(1, T + 1, dtype=jnp.int32)[None, :], (B, T))
    condition = jax.random.randint(
        k_c, (B, T), 0, cfg["semantic_vocab_size"], dtype=jnp.int32)
    t = jax.random.uniform(k_t, (B,), dtype=jnp.float32)

    fwd = jax.jit(lambda p, a, b_, c_, d_: dit_prefix_forward(p, a, b_, c_, d_, cfg))
    out = fwd(params, x, position_ids, t, condition)
    out = jax.block_until_ready(out)

    assert out.shape == (B, T, cfg["output_size"]), out.shape
    assert bool(jnp.all(jnp.isfinite(out)))
    print("KERNEL_OK")
</pallas_src>

<mosaic_0001>
module attributes {stable_mosaic.version = 11 : i64} {
  func.func @_linear_kernel(%arg0: i32, %arg1: i32, %arg2: memref<32x256xbf16, #tpu.memory_space<vmem>>, %arg3: memref<256x512xbf16, #tpu.memory_space<vmem>>, %arg4: memref<1x512xf32, #tpu.memory_space<vmem>>, %arg5: memref<32x512xbf16, #tpu.memory_space<vmem>>) attributes {dimension_semantics = [#tpu.dimension_semantics<parallel>, #tpu.dimension_semantics<parallel>], iteration_bounds = array<i64: 1, 3>, scalar_prefetch = 0 : i64, scratch_operands = 0 : i64, tpu.core_type = #tpu.core_type<tc>, window_params = [{transform_indices = @transform_0, window_bounds = array<i64: 32, 256>}, {transform_indices = @transform_1, window_bounds = array<i64: 256, 512>}, {transform_indices = @transform_2, window_bounds = array<i64: 1, 512>}, {transform_indices = @transform_3, window_bounds = array<i64: 32, 512>}]} {
    %c0 = arith.constant 0 : index
    %c0_0 = arith.constant 0 : index
    %0 = vector.load %arg2[%c0, %c0_0] : memref<32x256xbf16, #tpu.memory_space<vmem>>, vector<32x256xbf16>
    %c0_1 = arith.constant 0 : index
    %c0_2 = arith.constant 0 : index
    %1 = vector.load %arg3[%c0_1, %c0_2] : memref<256x512xbf16, #tpu.memory_space<vmem>>, vector<256x512xbf16>
    %cst = arith.constant dense<0.000000e+00> : vector<32x512xf32>
    %2 = tpu.matmul %0, %1, %cst {dimension_numbers = #tpu.dot_dimension_numbers<[1], [0], [0], [1], [0, 0, 1, 1], [], []>} : vector<32x256xbf16>, vector<256x512xbf16>, vector<32x512xf32> -> vector<32x512xf32>
    %c0_3 = arith.constant 0 : index
    %c0_4 = arith.constant 0 : index
    %3 = vector.load %arg4[%c0_3, %c0_4] : memref<1x512xf32, #tpu.memory_space<vmem>>, vector<1x512xf32>
    %4 = vector.broadcast %3 : vector<1x512xf32> to vector<32x512xf32>
    %5 = arith.addf %2, %4 : vector<32x512xf32>
    %6 = arith.truncf %5 : vector<32x512xf32> to vector<32x512xbf16>
    %c0_5 = arith.constant 0 : index
    %c0_6 = arith.constant 0 : index
    %7 = vector.load %arg5[%c0_5, %c0_6] : memref<32x512xbf16, #tpu.memory_space<vmem>>, vector<32x512xbf16>
    tpu.vector_store %arg5[%c0_5, %c0_6], %6 {strides = array<i32>} : memref<32x512xbf16, #tpu.memory_space<vmem>>, vector<32x512xbf16>,
    return
  }
  func.func @transform_0(%arg0: i32, %arg1: i32) -> (i32, i32) {
    %c0_i32 = arith.constant 0 : i32
    %c0_i32_0 = arith.constant 0 : i32
    return %arg0, %c0_i32 : i32, i32
  }
  func.func @transform_1(%arg0: i32, %arg1: i32) -> (i32, i32) {
    %c0_i32 = arith.constant 0 : i32
    %c0_i32_0 = arith.constant 0 : i32
    return %c0_i32, %arg1 : i32, i32
  }
  func.func @transform_2(%arg0: i32, %arg1: i32) -> (i32, i32) {
    %c0_i32 = arith.constant 0 : i32
    %c0_i32_0 = arith.constant 0 : i32
    return %c0_i32, %arg1 : i32, i32
  }
  func.func @transform_3(%arg0: i32, %arg1: i32) -> (i32, i32) {
    %c0_i32 = arith.constant 0 : i32
    return %arg0, %arg1 : i32, i32
  }
}

module attributes {stable_mosaic.version = 11 : i64} {
  func.func @_ln_mod_matmul_kernel(%arg0: i32, %arg1: i32, %arg2: memref<32x256xbf16, #tpu.memory_space<vmem>>, %arg3: memref<32x256xbf16, #tpu.memory_space<vmem>>, %arg4: memref<32x256xbf16, #tpu.memory_space<vmem>>, %arg5: memref<256x384xbf16, #tpu.memory_space<vmem>>, %arg6: memref<1x384xf32, #tpu.memory_space<vmem>>, %arg7: memref<32x384xbf16, #tpu.memory_space<vmem>>, %arg8: memref<32x256xbf16, #tpu.memory_space<vmem>>) attributes {dimension_semantics = [#tpu.dimension_semantics<parallel>, #tpu.dimension_semantics<arbitrary>], iteration_bounds = array<i64: 1, 2>, scalar_prefetch = 0 : i64, scratch_operands = 1 : i64, tpu.core_type = #tpu.core_type<tc>, window_params = [{transform_indices = @transform_0, window_bounds = array<i64: 32, 256>}, {transform_indices = @transform_1, window_bounds = array<i64: 32, 256>}, {transform_indices = @transform_2, window_bounds = array<i64: 32, 256>}, {transform_indices = @transform_3, window_bounds = array<i64: 256, 384>}, {transform_indices = @transform_4, window_bounds = array<i64: 1, 384>}, {transform_indices = @transform_5, window_bounds = array<i64: 32, 384>}]} {
    %c0_i32 = arith.constant 0 : i32
    %0 = arith.cmpi eq, %arg1, %c0_i32 : i32
    %1 = arith.extui %0 : i1 to i32
    %c0_i32_0 = arith.constant 0 : i32
    %2 = arith.cmpi ne, %1, %c0_i32_0 : i32
    scf.if %2 {
      %c0_8 = arith.constant 0 : index
      %c0_9 = arith.constant 0 : index
      %11 = vector.load %arg2[%c0_8, %c0_9] : memref<32x256xbf16, #tpu.memory_space<vmem>>, vector<32x256xbf16>
      %c0_10 = arith.constant 0 : index
      %c0_11 = arith.constant 0 : index
      %12 = vector.load %arg3[%c0_10, %c0_11] : memref<32x256xbf16, #tpu.memory_space<vmem>>, vector<32x256xbf16>
      %c0_12 = arith.constant 0 : index
      %c0_13 = arith.constant 0 : index
      %13 = vector.load %arg4[%c0_12, %c0_13] : memref<32x256xbf16, #tpu.memory_space<vmem>>, vector<32x256xbf16>
      %14 = arith.extf %11 : vector<32x256xbf16> to vector<32x256xf32>
      %cst_14 = arith.constant dense<0.000000e+00> : vector<32xf32>
      %15 = vector.multi_reduction <add>, %14, %cst_14 [1] : vector<32x256xf32> to vector<32xf32>
      %16 = vector.shape_cast %15 : vector<32xf32> to vector<32x1xf32>
      %cst_15 = arith.constant 2.560000e+02 : f32
      %17 = vector.broadcast %cst_15 : f32 to vector<32x1xf32>
      %18 = arith.divf %16, %17 : vector<32x1xf32>
      %19 = vector.broadcast %18 : vector<32x1xf32> to vector<32x256xf32>
      %20 = arith.subf %14, %19 : vector<32x256xf32>
      %21 = arith.mulf %20, %20 : vector<32x256xf32>
      %cst_16 = arith.constant dense<0.000000e+00> : vector<32xf32>
      %22 = vector.multi_reduction <add>, %21, %cst_16 [1] : vector<32x256xf32> to vector<32xf32>
      %23 = vector.shape_cast %22 : vector<32xf32> to vector<32x1xf32>
      %cst_17 = arith.constant 2.560000e+02 : f32
      %24 = vector.broadcast %cst_17 : f32 to vector<32x1xf32>
      %25 = arith.divf %23, %24 : vector<32x1xf32>
      %26 = vector.broadcast %18 : vector<32x1xf32> to vector<32x256xf32>
      %27 = arith.subf %14, %26 : vector<32x256xf32>
      %cst_18 = arith.constant 9.99999997E-7 : f32
      %28 = vector.broadcast %cst_18 : f32 to vector<32x1xf32>
      %29 = arith.addf %25, %28 : vector<32x1xf32>
      %30 = math.rsqrt %29 : vector<32x1xf32>
      %31 = vector.broadcast %30 : vector<32x1xf32> to vector<32x256xf32>
      %32 = arith.mulf %27, %31 : vector<32x256xf32>
      %33 = arith.extf %13 : vector<32x256xbf16> to vector<32x256xf32>
      %cst_19 = arith.constant 1.000000e+00 : f32
      %34 = vector.broadcast %cst_19 : f32 to vector<32x256xf32>
      %35 = arith.addf %34, %33 : vector<32x256xf32>
      %36 = arith.mulf %32, %35 : vector<32x256xf32>
      %37 = arith.extf %12 : vector<32x256xbf16> to vector<32x256xf32>
      %38 = arith.addf %36, %37 : vector<32x256xf32>
      %39 = arith.truncf %38 : vector<32x256xf32> to vector<32x256xbf16>
      %c0_20 = arith.constant 0 : index
      %c0_21 = arith.constant 0 : index
      %40 = vector.load %arg8[%c0_20, %c0_21] : memref<32x256xbf16, #tpu.memory_space<vmem>>, vector<32x256xbf16>
      tpu.vector_store %arg8[%c0_20, %c0_21], %39 {strides = array<i32>} : memref<32x256xbf16, #tpu.memory_space<vmem>>, vector<32x256xbf16>,
    } else {
    }
    %c0 = arith.constant 0 : index
    %c0_1 = arith.constant 0 : index
    %3 = vector.load %arg8[%c0, %c0_1] : memref<32x256xbf16, #tpu.memory_space<vmem>>, vector<32x256xbf16>
    %c0_2 = arith.constant 0 : index
    %c0_3 = arith.constant 0 : index
    %4 = vector.load %arg5[%c0_2, %c0_3] : memref<256x384xbf16, #tpu.memory_space<vmem>>, vector<256x384xbf16>
    %cst = arith.constant dense<0.000000e+00> : vector<32x384xf32>
    %5 = tpu.matmul %3, %4, %cst {dimension_numbers = #tpu.dot_dimension_numbers<[1], [0], [0], [1], [0, 0, 1, 1], [], []>} : vector<32x256xbf16>, vector<256x384xbf16>, vector<32x384xf32> -> vector<32x384xf32>
    %c0_4 = arith.constant 0 : index
    %c0_5 = arith.constant 0 : index
    %6 = vector.load %arg6[%c0_4, %c0_5] : memref<1x384xf32, #tpu.memory_space<vmem>>, vector<1x384xf32>
    %7 = vector.broadcast %6 : vector<1x384xf32> to vector<32x384xf32>
    %8 = arith.addf %5, %7 : vector<32x384xf32>
    %9 = arith.truncf %8 : vector<32x384xf32> to vector<32x384xbf16>
    %c0_6 = arith.constant 0 : index
    %c0_7 = arith.constant 0 : index
    %10 = vector.load %arg7[%c0_6, %c0_7] : memref<32x384xbf16, #tpu.memory_space<vmem>>, vector<32x384xbf16>
    tpu.vector_store %arg7[%c0_6, %c0_7], %9 {strides = array<i32>} : memref<32x384xbf16, #tpu.memory_space<vmem>>, vector<32x384xbf16>,
    return
  }
  func.func @transform_0(%arg0: i32, %arg1: i32) -> (i32, i32) {
    %c0_i32 = arith.constant 0 : i32
    %c0_i32_0 = arith.constant 0 : i32
    return %arg0, %c0_i32 : i32, i32
  }
  func.func @transform_1(%arg0: i32, %arg1: i32) -> (i32, i32) {
    %c0_i32 = arith.constant 0 : i32
    %c0_i32_0 = arith.constant 0 : i32
    return %arg0, %c0_i32 : i32, i32
  }
  func.func @transform_2(%arg0: i32, %arg1: i32) -> (i32, i32) {
    %c1_i32 = arith.constant 1 : i32
    %c0_i32 = arith.constant 0 : i32
    return %arg0, %c1_i32 : i32, i32
  }
  func.func @transform_3(%arg0: i32, %arg1: i32) -> (i32, i32) {
    %c0_i32 = arith.constant 0 : i32
    %c0_i32_0 = arith.constant 0 : i32
    return %c0_i32, %arg1 : i32, i32
  }
  func.func @transform_4(%arg0: i32, %arg1: i32) -> (i32, i32) {
    %c0_i32 = arith.constant 0 : i32
    %c0_i32_0 = arith.constant 0 : i32
    return %c0_i32, %arg1 : i32, i32
  }
  func.func @transform_5(%arg0: i32, %arg1: i32) -> (i32, i32) {
    %c0_i32 = arith.constant 0 : i32
    return %arg0, %arg1 : i32, i32
  }
}

module attributes {stable_mosaic.version = 11 : i64} {
  func.func @_mm_gated_res_kernel(%arg0: i32, %arg1: i32, %arg2: memref<32x256xbf16, #tpu.memory_space<vmem>>, %arg3: memref<256x256xbf16, #tpu.memory_space<vmem>>, %arg4: memref<1x256xf32, #tpu.memory_space<vmem>>, %arg5: memref<32x256xbf16, #tpu.memory_space<vmem>>, %arg6: memref<32x256xbf16, #tpu.memory_space<vmem>>, %arg7: memref<32x256xbf16, #tpu.memory_space<vmem>>) attributes {dimension_semantics = [#tpu.dimension_semantics<parallel>, #tpu.dimension_semantics<parallel>], iteration_bounds = array<i64: 1, 1>, scalar_prefetch = 0 : i64, scratch_operands = 0 : i64, tpu.core_type = #tpu.core_type<tc>, window_params = [{transform_indices = @transform_0, window_bounds = array<i64: 32, 256>}, {transform_indices = @transform_1, window_bounds = array<i64: 256, 256>}, {transform_indices = @transform_2, window_bounds = array<i64: 1, 256>}, {transform_indices = @transform_3, window_bounds = array<i64: 32, 256>}, {transform_indices = @transform_4, window_bounds = array<i64: 32, 256>}, {transform_indices = @transform_5, window_bounds = array<i64: 32, 256>}]} {
    %c0 = arith.constant 0 : index
    %c0_0 = arith.constant 0 : index
    %0 = vector.load %arg2[%c0, %c0_0] : memref<32x256xbf16, #tpu.memory_space<vmem>>, vector<32x256xbf16>
    %c0_1 = arith.constant 0 : index
    %c0_2 = arith.constant 0 : index
    %1 = vector.load %arg3[%c0_1, %c0_2] : memref<256x256xbf16, #tpu.memory_space<vmem>>, vector<256x256xbf16>
    %cst = arith.constant dense<0.000000e+00> : vector<32x256xf32>
    %2 = tpu.matmul %0, %1, %cst {dimension_numbers = #tpu.dot_dimension_numbers<[1], [0], [0], [1], [0, 0, 1, 1], [], []>} : vector<32x256xbf16>, vector<256x256xbf16>, vector<32x256xf32> -> vector<32x256xf32>
    %c0_3 = arith.constant 0 : index
    %c0_4 = arith.constant 0 : index
    %3 = vector.load %arg4[%c0_3, %c0_4] : memref<1x256xf32, #tpu.memory_space<vmem>>, vector<1x256xf32>
    %4 = vector.broadcast %3 : vector<1x256xf32> to vector<32x256xf32>
    %5 = arith.addf %2, %4 : vector<32x256xf32>
    %c0_5 = arith.constant 0 : index
    %c0_6 = arith.constant 0 : index
    %6 = vector.load %arg5[%c0_5, %c0_6] : memref<32x256xbf16, #tpu.memory_space<vmem>>, vector<32x256xbf16>
    %7 = arith.extf %6 : vector<32x256xbf16> to vector<32x256xf32>
    %c0_7 = arith.constant 0 : index
    %c0_8 = arith.constant 0 : index
    %8 = vector.load %arg6[%c0_7, %c0_8] : memref<32x256xbf16, #tpu.memory_space<vmem>>, vector<32x256xbf16>
    %9 = arith.extf %8 : vector<32x256xbf16> to vector<32x256xf32>
    %10 = arith.mulf %9, %5 : vector<32x256xf32>
    %11 = arith.addf %7, %10 : vector<32x256xf32>
    %12 = arith.truncf %11 : vector<32x256xf32> to vector<32x256xbf16>
    %c0_9 = arith.constant 0 : index
    %c0_10 = arith.constant 0 : index
    %13 = vector.load %arg7[%c0_9, %c0_10] : memref<32x256xbf16, #tpu.memory_space<vmem>>, vector<32x256xbf16>
    tpu.vector_store %arg7[%c0_9, %c0_10], %12 {strides = array<i32>} : memref<32x256xbf16, #tpu.memory_space<vmem>>, vector<32x256xbf16>,
    return
  }
  func.func @transform_0(%arg0: i32, %arg1: i32) -> (i32, i32) {
    %c0_i32 = arith.constant 0 : i32
    %c0_i32_0 = arith.constant 0 : i32
    return %arg0, %c0_i32 : i32, i32
  }
  func.func @transform_1(%arg0: i32, %arg1: i32) -> (i32, i32) {
    %c0_i32 = arith.constant 0 : i32
    %c0_i32_0 = arith.constant 0 : i32
    return %c0_i32, %arg1 : i32, i32
  }
  func.func @transform_2(%arg0: i32, %arg1: i32) -> (i32, i32) {
    %c0_i32 = arith.constant 0 : i32
    %c0_i32_0 = arith.constant 0 : i32
    return %c0_i32, %arg1 : i32, i32
  }
  func.func @transform_3(%arg0: i32, %arg1: i32) -> (i32, i32) {
    %c0_i32 = arith.constant 0 : i32
    return %arg0, %arg1 : i32, i32
  }
  func.func @transform_4(%arg0: i32, %arg1: i32) -> (i32, i32) {
    %c2_i32 = arith.constant 2 : i32
    %0 = arith.addi %c2_i32, %arg1 : i32
    %c0_i32 = arith.constant 0 : i32
    return %arg0, %0 : i32, i32
  }
  func.func @transform_5(%arg0: i32, %arg1: i32) -> (i32, i32) {
    %c0_i32 = arith.constant 0 : i32
    return %arg0, %arg1 : i32, i32
  }
}

module attributes {stable_mosaic.version = 11 : i64} {
  func.func @_flash_attn_kernel(%arg0: i32, %arg1: i32, %arg2: i32, %arg3: i32, %arg4: memref<1x16x128xbf16, #tpu.memory_space<vmem>>, %arg5: memref<1x16x128xbf16, #tpu.memory_space<vmem>>, %arg6: memref<1x16x128xbf16, #tpu.memory_space<vmem>>, %arg7: memref<1x16x128xbf16, #tpu.memory_space<vmem>>, %arg8: memref<16x1xf32, #tpu.memory_space<vmem>>, %arg9: memref<16x1xf32, #tpu.memory_space<vmem>>, %arg10: memref<16x1xf32, #tpu.memory_space<vmem>>, %arg11: memref<16x1xf32, #tpu.memory_space<vmem>>, %arg12: memref<16x64xf32, #tpu.memory_space<vmem>>, %arg13: memref<16x64xf32, #tpu.memory_space<vmem>>) attributes {dimension_semantics = [#tpu.dimension_semantics<parallel>, #tpu.dimension_semantics<parallel>, #tpu.dimension_semantics<parallel>, #tpu.dimension_semantics<arbitrary>], iteration_bounds = array<i64: 2, 2, 1, 1>, scalar_prefetch = 0 : i64, scratch_operands = 6 : i64, tpu.core_type = #tpu.core_type<tc>, window_params = [{transform_indices = @transform_0, window_bounds = array<i64: 1, 16, 128>}, {transform_indices = @transform_1, window_bounds = array<i64: 1, 16, 128>}, {transform_indices = @transform_2, window_bounds = array<i64: 1, 16, 128>}, {transform_indices = @transform_3, window_bounds = array<i64: 1, 16, 128>}]} {
    %c0_i32 = arith.constant 0 : i32
    %0 = arith.cmpi eq, %arg3, %c0_i32 : i32
    %1 = arith.extui %0 : i1 to i32
    %c0_i32_0 = arith.constant 0 : i32
    %2 = arith.cmpi ne, %1, %c0_i32_0 : i32
    scf.if %2 {
      %cst_44 = arith.constant 0xFF800000 : f32
      %70 = vector.broadcast %cst_44 : f32 to vector<16x1xf32>
      %c0_45 = arith.constant 0 : index
      %c0_46 = arith.constant 0 : index
      %71 = vector.load %arg8[%c0_45, %c0_46] : memref<16x1xf32, #tpu.memory_space<vmem>>, vector<16x1xf32>
      tpu.vector_store %arg8[%c0_45, %c0_46], %70 {strides = array<i32>} : memref<16x1xf32, #tpu.memory_space<vmem>>, vector<16x1xf32>,
      %cst_47 = arith.constant 0.000000e+00 : f32
      %72 = vector.broadcast %cst_47 : f32 to vector<16x1xf32>
      %c0_48 = arith.constant 0 : index
      %c0_49 = arith.constant 0 : index
      %73 = vector.load %arg10[%c0_48, %c0_49] : memref<16x1xf32, #tpu.memory_space<vmem>>, vector<16x1xf32>
      tpu.vector_store %arg10[%c0_48, %c0_49], %72 {strides = array<i32>} : memref<16x1xf32, #tpu.memory_space<vmem>>, vector<16x1xf32>,
      %cst_50 = arith.constant 0.000000e+00 : f32
      %74 = vector.broadcast %cst_50 : f32 to vector<16x64xf32>
      %c0_51 = arith.constant 0 : index
      %c0_52 = arith.constant 0 : index
      %75 = vector.load %arg12[%c0_51, %c0_52] : memref<16x64xf32, #tpu.memory_space<vmem>>, vector<16x64xf32>
      tpu.vector_store %arg12[%c0_51, %c0_52], %74 {strides = array<i32>} : memref<16x64xf32, #tpu.memory_space<vmem>>, vector<16x64xf32>,
      %cst_53 = arith.constant 0xFF800000 : f32
      %76 = vector.broadcast %cst_53 : f32 to vector<16x1xf32>
      %c0_54 = arith.constant 0 : index
      %c0_55 = arith.constant 0 : index
      %77 = vector.load %arg9[%c0_54, %c0_55] : memref<16x1xf32, #tpu.memory_space<vmem>>, vector<16x1xf32>
      tpu.vector_store %arg9[%c0_54, %c0_55], %76 {strides = array<i32>} : memref<16x1xf32, #tpu.memory_space<vmem>>, vector<16x1xf32>,
      %cst_56 = arith.constant 0.000000e+00 : f32
      %78 = vector.broadcast %cst_56 : f32 to vector<16x1xf32>
      %c0_57 = arith.constant 0 : index
      %c0_58 = arith.constant 0 : index
      %79 = vector.load %arg11[%c0_57, %c0_58] : memref<16x1xf32, #tpu.memory_space<vmem>>, vector<16x1xf32>
      tpu.vector_store %arg11[%c0_57, %c0_58], %78 {strides = array<i32>} : memref<16x1xf32, #tpu.memory_space<vmem>>, vector<16x1xf32>,
      %cst_59 = arith.constant 0.000000e+00 : f32
      %80 = vector.broadcast %cst_59 : f32 to vector<16x64xf32>
      %c0_60 = arith.constant 0 : index
      %c0_61 = arith.constant 0 : index
      %81 = vector.load %arg13[%c0_60, %c0_61] : memref<16x64xf32, #tpu.memory_space<vmem>>, vector<16x64xf32>
      tpu.vector_store %arg13[%c0_60, %c0_61], %80 {strides = array<i32>} : memref<16x64xf32, #tpu.memory_space<vmem>>, vector<16x64xf32>,
    } else {
    }
    %c0 = arith.constant 0 : index
    %c0_1 = arith.constant 0 : index
    %c0_2 = arith.constant 0 : index
    %3 = vector.load %arg4[%c0, %c0_1, %c0_2] : memref<1x16x128xbf16, #tpu.memory_space<vmem>>, vector<1x16x128xbf16>
    %4 = vector.shape_cast %3 : vector<1x16x128xbf16> to vector<16x128xbf16>
    %c0_3 = arith.constant 0 : index
    %c0_4 = arith.constant 0 : index
    %c0_5 = arith.constant 0 : index
    %5 = vector.load %arg5[%c0_3, %c0_4, %c0_5] : memref<1x16x128xbf16, #tpu.memory_space<vmem>>, vector<1x16x128xbf16>
    %6 = vector.shape_cast %5 : vector<1x16x128xbf16> to vector<16x128xbf16>
    %c0_6 = arith.constant 0 : index
    %c0_7 = arith.constant 0 : index
    %c0_8 = arith.constant 0 : index
    %7 = vector.load %arg6[%c0_6, %c0_7, %c0_8] : memref<1x16x128xbf16, #tpu.memory_space<vmem>>, vector<1x16x128xbf16>
    %8 = vector.shape_cast %7 : vector<1x16x128xbf16> to vector<16x128xbf16>
    %9 = vector.extract_strided_slice %4 {offsets = [0, 0], sizes = [16, 64], strides = [1, 1]} : vector<16x128xbf16> to vector<16x64xbf16>
    %10 = vector.extract_strided_slice %6 {offsets = [0, 0], sizes = [16, 64], strides = [1, 1]} : vector<16x128xbf16> to vector<16x64xbf16>
    %11 = vector.extract_strided_slice %8 {offsets = [0, 0], sizes = [16, 64], strides = [1, 1]} : vector<16x128xbf16> to vector<16x64xbf16>
    %cst = arith.constant dense<0.000000e+00> : vector<16x16xf32>
    %12 = tpu.matmul %9, %10, %cst {dimension_numbers = #tpu.dot_dimension_numbers<[1], [1], [0], [0], [0, 0, 1, 0], [], []>} : vector<16x64xbf16>, vector<16x64xbf16>, vector<16x16xf32> -> vector<16x16xf32>
    %cst_9 = arith.constant 1.250000e-01 : f32
    %13 = vector.broadcast %cst_9 : f32 to vector<16x16xf32>
    %14 = arith.mulf %12, %13 : vector<16x16xf32>
    %c0_10 = arith.constant 0 : index
    %c0_11 = arith.constant 0 : index
    %15 = vector.load %arg8[%c0_10, %c0_11] : memref<16x1xf32, #tpu.memory_space<vmem>>, vector<16x1xf32>
    %cst_12 = arith.constant dense<0xFF800000> : vector<16xf32>
    %16 = vector.multi_reduction <maximumf>, %14, %cst_12 [1] : vector<16x16xf32> to vector<16xf32>
    %17 = vector.shape_cast %16 : vector<16xf32> to vector<16x1xf32>
    %18 = arith.maximumf %15, %17 : vector<16x1xf32>
    %19 = arith.subf %15, %18 : vector<16x1xf32>
    %20 = math.exp %19 : vector<16x1xf32>
    %21 = vector.broadcast %18 : vector<16x1xf32> to vector<16x16xf32>
    %22 = arith.subf %14, %21 : vector<16x16xf32>
    %23 = math.exp %22 : vector<16x16xf32>
    %c0_13 = arith.constant 0 : index
    %c0_14 = arith.constant 0 : index
    %24 = vector.load %arg10[%c0_13, %c0_14] : memref<16x1xf32, #tpu.memory_space<vmem>>, vector<16x1xf32>
    %25 = arith.mulf %20, %24 : vector<16x1xf32>
    %cst_15 = arith.constant dense<0.000000e+00> : vector<16xf32>
    %26 = vector.multi_reduction <add>, %23, %cst_15 [1] : vector<16x16xf32> to vector<16xf32>
    %27 = vector.shape_cast %26 : vector<16xf32> to vector<16x1xf32>
    %28 = arith.addf %25, %27 : vector<16x1xf32>
    %c0_16 = arith.constant 0 : index
    %c0_17 = arith.constant 0 : index
    %29 = vector.load %arg10[%c0_16, %c0_17] : memref<16x1xf32, #tpu.memory_space<vmem>>, vector<16x1xf32>
    tpu.vector_store %arg10[%c0_16, %c0_17], %28 {strides = array<i32>} : memref<16x1xf32, #tpu.memory_space<vmem>>, vector<16x1xf32>,
    %c0_18 = arith.constant 0 : index
    %c0_19 = arith.constant 0 : index
    %30 = vector.load %arg12[%c0_18, %c0_19] : memref<16x64xf32, #tpu.memory_space<vmem>>, vector<16x64xf32>
    %31 = vector.broadcast %20 : vector<16x1xf32> to vector<16x64xf32>
    %32 = arith.mulf %31, %30 : vector<16x64xf32>
    %33 = arith.truncf %23 : vector<16x16xf32> to vector<16x16xbf16>
    %cst_20 = arith.constant dense<0.000000e+00> : vector<16x64xf32>
    %34 = tpu.matmul %33, %11, %cst_20 {dimension_numbers = #tpu.dot_dimension_numbers<[1], [0], [0], [1], [0, 0, 1, 1], [], []>} : vector<16x16xbf16>, vector<16x64xbf16>, vector<16x64xf32> -> vector<16x64xf32>
    %35 = arith.addf %32, %34 : vector<16x64xf32>
    %c0_21 = arith.constant 0 : index
    %c0_22 = arith.constant 0 : index
    %36 = vector.load %arg12[%c0_21, %c0_22] : memref<16x64xf32, #tpu.memory_space<vmem>>, vector<16x64xf32>
    tpu.vector_store %arg12[%c0_21, %c0_22], %35 {strides = array<i32>} : memref<16x64xf32, #tpu.memory_space<vmem>>, vector<16x64xf32>,
    %c0_23 = arith.constant 0 : index
    %c0_24 = arith.constant 0 : index
    %37 = vector.load %arg8[%c0_23, %c0_24] : memref<16x1xf32, #tpu.memory_space<vmem>>, vector<16x1xf32>
    tpu.vector_store %arg8[%c0_23, %c0_24], %18 {strides = array<i32>} : memref<16x1xf32, #tpu.memory_space<vmem>>, vector<16x1xf32>,
    %38 = vector.extract_strided_slice %4 {offsets = [0, 64], sizes = [16, 64], strides = [1, 1]} : vector<16x128xbf16> to vector<16x64xbf16>
    %39 = vector.extract_strided_slice %6 {offsets = [0, 64], sizes = [16, 64], strides = [1, 1]} : vector<16x128xbf16> to vector<16x64xbf16>
    %40 = vector.extract_strided_slice %8 {offsets = [0, 64], sizes = [16, 64], strides = [1, 1]} : vector<16x128xbf16> to vector<16x64xbf16>
    %cst_25 = arith.constant dense<0.000000e+00> : vector<16x16xf32>
    %41 = tpu.matmul %38, %39, %cst_25 {dimension_numbers = #tpu.dot_dimension_numbers<[1], [1], [0], [0], [0, 0, 1, 0], [], []>} : vector<16x64xbf16>, vector<16x64xbf16>, vector<16x16xf32> -> vector<16x16xf32>
    %cst_26 = arith.constant 1.250000e-01 : f32
    %42 = vector.broadcast %cst_26 : f32 to vector<16x16xf32>
    %43 = arith.mulf %41, %42 : vector<16x16xf32>
    %c0_27 = arith.constant 0 : index
    %c0_28 = arith.constant 0 : index
    %44 = vector.load %arg9[%c0_27, %c0_28] : memref<16x1xf32, #tpu.memory_space<vmem>>, vector<16x1xf32>
    %cst_29 = arith.constant dense<0xFF800000> : vector<16xf32>
    %45 = vector.multi_reduction <maximumf>, %43, %cst_29 [1] : vector<16x16xf32> to vector<16xf32>
    %46 = vector.shape_cast %45 : vector<16xf32> to vector<16x1xf32>
    %47 = arith.maximumf %44, %46 : vector<16x1xf32>
    %48 = arith.subf %44, %47 : vector<16x1xf32>
    %49 = math.exp %48 : vector<16x1xf32>
    %50 = vector.broadcast %47 : vector<16x1xf32> to vector<16x16xf32>
    %51 = arith.subf %43, %50 : vector<16x16xf32>
    %52 = math.exp %51 : vector<16x16xf32>
    %c0_30 = arith.constant 0 : index
    %c0_31 = arith.constant 0 : index
    %53 = vector.load %arg11[%c0_30, %c0_31] : memref<16x1xf32, #tpu.memory_space<vmem>>, vector<16x1xf32>
    %54 = arith.mulf %49, %53 : vector<16x1xf32>
    %cst_32 = arith.constant dense<0.000000e+00> : vector<16xf32>
    %55 = vector.multi_reduction <add>, %52, %cst_32 [1] : vector<16x16xf32> to vector<16xf32>
    %56 = vector.shape_cast %55 : vector<16xf32> to vector<16x1xf32>
    %57 = arith.addf %54, %56 : vector<16x1xf32>
    %c0_33 = arith.constant 0 : index
    %c0_34 = arith.constant 0 : index
    %58 = vector.load %arg11[%c0_33, %c0_34] : memref<16x1xf32, #tpu.memory_space<vmem>>, vector<16x1xf32>
    tpu.vector_store %arg11[%c0_33, %c0_34], %57 {strides = array<i32>} : memref<16x1xf32, #tpu.memory_space<vmem>>, vector<16x1xf32>,
    %c0_35 = arith.constant 0 : index
    %c0_36 = arith.constant 0 : index
    %59 = vector.load %arg13[%c0_35, %c0_36] : memref<16x64xf32, #tpu.memory_space<vmem>>, vector<16x64xf32>
    %60 = vector.broadcast %49 : vector<16x1xf32> to vector<16x64xf32>
    %61 = arith.mulf %60, %59 : vector<16x64xf32>
    %62 = arith.truncf %52 : vector<16x16xf32> to vector<16x16xbf16>
    %cst_37 = arith.constant dense<0.000000e+00> : vector<16x64xf32>
    %63 = tpu.matmul %62, %40, %cst_37 {dimension_numbers = #tpu.dot_dimension_numbers<[1], [0], [0], [1], [0, 0, 1, 1], [], []>} : vector<16x16xbf16>, vector<16x64xbf16>, vector<16x64xf32> -> vector<16x64xf32>
    %64 = arith.addf %61, %63 : vector<16x64xf32>
    %c0_38 = arith.constant 0 : index
    %c0_39 = arith.constant 0 : index
    %65 = vector.load %arg13[%c0_38, %c0_39] : memref<16x64xf32, #tpu.memory_space<vmem>>, vector<16x64xf32>
    tpu.vector_store %arg13[%c0_38, %c0_39], %64 {strides = array<i32>} : memref<16x64xf32, #tpu.memory_space<vmem>>, vector<16x64xf32>,
    %c0_40 = arith.constant 0 : index
    %c0_41 = arith.constant 0 : index
    %66 = vector.load %arg9[%c0_40, %c0_41] : memref<16x1xf32, #tpu.memory_space<vmem>>, vector<16x1xf32>
    tpu.vector_store %arg9[%c0_40, %c0_41], %47 {strides = array<i32>} : memref<16x1xf32, #tpu.memory_space<vmem>>, vector<16x1xf32>,
    %c0_i32_42 = arith.constant 0 : i32
    %67 = arith.cmpi eq, %arg3, %c0_i32_42 : i32
    %68 = arith.extui %67 : i1 to i32
    %c0_i32_43 = arith.constant 0 : i32
    %69 = arith.cmpi ne, %68, %c0_i32_43 : i32
    scf.if %69 {
      %c0_44 = arith.constant 0 : index
      %c0_45 = arith.constant 0 : index
      %70 = vector.load %arg12[%c0_44, %c0_45] : memref<16x64xf32, #tpu.memory_space<vmem>>, vector<16x64xf32>
      %c0_46 = arith.constant 0 : index
      %c0_47 = arith.constant 0 : index
      %71 = vector.load %arg10[%c0_46, %c0_47] : memref<16x1xf32, #tpu.memory_space<vmem>>, vector<16x1xf32>
      %72 = tpu.reciprocal %71 {approx = true} : vector<16x1xf32> -> vector<16x1xf32>
      %73 = vector.broadcast %72 : vector<16x1xf32> to vector<16x64xf32>
      %74 = arith.mulf %70, %73 : vector<16x64xf32>
      %c0_48 = arith.constant 0 : index
      %c0_49 = arith.constant 0 : index
      %75 = vector.load %arg13[%c0_48, %c0_49] : memref<16x64xf32, #tpu.memory_space<vmem>>, vector<16x64xf32>
      %c0_50 = arith.constant 0 : index
      %c0_51 = arith.constant 0 : index
      %76 = vector.load %arg11[%c0_50, %c0_51] : memref<16x1xf32, #tpu.memory_space<vmem>>, vector<16x1xf32>
      %77 = tpu.reciprocal %76 {approx = true} : vector<16x1xf32> -> vector<16x1xf32>
      %78 = vector.broadcast %77 : vector<16x1xf32> to vector<16x64xf32>
      %79 = arith.mulf %75, %78 : vector<16x64xf32>
      %80 = tpu.concatenate %74, %79 in 1 : vector<16x64xf32>, vector<16x64xf32> -> vector<16x128xf32>
      %81 = arith.truncf %80 : vector<16x128xf32> to vector<16x128xbf16>
      %c0_52 = arith.constant 0 : index
      %c0_53 = arith.constant 0 : index
      %c0_54 = arith.constant 0 : index
      %82 = vector.load %arg7[%c0_52, %c0_53, %c0_54] : memref<1x16x128xbf16, #tpu.memory_space<vmem>>, vector<1x16x128xbf16>
      %83 = vector.shape_cast %82 : vector<1x16x128xbf16> to vector<16x128xbf16>
      %84 = vector.shape_cast %81 : vector<16x128xbf16> to vector<1x16x128xbf16>
      tpu.vector_store %arg7[%c0_52, %c0_53, %c0_54], %84 {strides = array<i32>} : memref<1x16x128xbf16, #tpu.memory_space<vmem>>, vector<1x16x128xbf16>,
    } else {
    }
    return
  }
  func.func @transform_0(%arg0: i32, %arg1: i32, %arg2: i32, %arg3: i32) -> (i32, i32, i32) {
    %c0_i32 = arith.constant 0 : i32
    return %arg0, %arg2, %arg1 : i32, i32, i32
  }
  func.func @transform_1(%arg0: i32, %arg1: i32, %arg2: i32, %arg3: i32) -> (i32, i32, i32) {
    %c2_i32 = arith.constant 2 : i32
    %0 = arith.addi %c2_i32, %arg1 : i32
    %c0_i32 = arith.constant 0 : i32
    return %arg0, %arg3, %0 : i32, i32, i32
  }
  func.func @transform_2(%arg0: i32, %arg1: i32, %arg2: i32, %arg3: i32) -> (i32, i32, i32) {
    %c4_i32 = arith.constant 4 : i32
    %0 = arith.addi %c4_i32, %arg1 : i32
    %c0_i32 = arith.constant 0 : i32
    return %arg0, %arg3, %0 : i32, i32, i32
  }
  func.func @transform_3(%arg0: i32, %arg1: i32, %arg2: i32, %arg3: i32) -> (i32, i32, i32) {
    %c0_i32 = arith.constant 0 : i32
    return %arg0, %arg2, %arg1 : i32, i32, i32
  }
}

module attributes {stable_mosaic.version = 11 : i64} {
  func.func @_ln_mod_geglu_kernel(%arg0: i32, %arg1: i32, %arg2: memref<32x256xbf16, #tpu.memory_space<vmem>>, %arg3: memref<32x256xbf16, #tpu.memory_space<vmem>>, %arg4: memref<32x256xbf16, #tpu.memory_space<vmem>>, %arg5: memref<256x512xbf16, #tpu.memory_space<vmem>>, %arg6: memref<256x512xbf16, #tpu.memory_space<vmem>>, %arg7: memref<1x512xf32, #tpu.memory_space<vmem>>, %arg8: memref<1x512xf32, #tpu.memory_space<vmem>>, %arg9: memref<32x512xbf16, #tpu.memory_space<vmem>>, %arg10: memref<32x256xbf16, #tpu.memory_space<vmem>>) attributes {dimension_semantics = [#tpu.dimension_semantics<parallel>, #tpu.dimension_semantics<arbitrary>], iteration_bounds = array<i64: 1, 2>, scalar_prefetch = 0 : i64, scratch_operands = 1 : i64, tpu.core_type = #tpu.core_type<tc>, window_params = [{transform_indices = @transform_0, window_bounds = array<i64: 32, 256>}, {transform_indices = @transform_1, window_bounds = array<i64: 32, 256>}, {transform_indices = @transform_2, window_bounds = array<i64: 32, 256>}, {transform_indices = @transform_3, window_bounds = array<i64: 256, 512>}, {transform_indices = @transform_4, window_bounds = array<i64: 256, 512>}, {transform_indices = @transform_5, window_bounds = array<i64: 1, 512>}, {transform_indices = @transform_6, window_bounds = array<i64: 1, 512>}, {transform_indices = @transform_7, window_bounds = array<i64: 32, 512>}]} {
    %c0_i32 = arith.constant 0 : i32
    %0 = arith.cmpi eq, %arg1, %c0_i32 : i32
    %1 = arith.extui %0 : i1 to i32
    %c0_i32_0 = arith.constant 0 : i32
    %2 = arith.cmpi ne, %1, %c0_i32_0 : i32
    scf.if %2 {
      %c0_17 = arith.constant 0 : index
      %c0_18 = arith.constant 0 : index
      %30 = vector.load %arg2[%c0_17, %c0_18] : memref<32x256xbf16, #tpu.memory_space<vmem>>, vector<32x256xbf16>
      %c0_19 = arith.constant 0 : index
      %c0_20 = arith.constant 0 : index
      %31 = vector.load %arg3[%c0_19, %c0_20] : memref<32x256xbf16, #tpu.memory_space<vmem>>, vector<32x256xbf16>
      %c0_21 = arith.constant 0 : index
      %c0_22 = arith.constant 0 : index
      %32 = vector.load %arg4[%c0_21, %c0_22] : memref<32x256xbf16, #tpu.memory_space<vmem>>, vector<32x256xbf16>
      %33 = arith.extf %30 : vector<32x256xbf16> to vector<32x256xf32>
      %cst_23 = arith.constant dense<0.000000e+00> : vector<32xf32>
      %34 = vector.multi_reduction <add>, %33, %cst_23 [1] : vector<32x256xf32> to vector<32xf32>
      %35 = vector.shape_cast %34 : vector<32xf32> to vector<32x1xf32>
      %cst_24 = arith.constant 2.560000e+02 : f32
      %36 = vector.broadcast %cst_24 : f32 to vector<32x1xf32>
      %37 = arith.divf %35, %36 : vector<32x1xf32>
      %38 = vector.broadcast %37 : vector<32x1xf32> to vector<32x256xf32>
      %39 = arith.subf %33, %38 : vector<32x256xf32>
      %40 = arith.mulf %39, %39 : vector<32x256xf32>
      %cst_25 = arith.constant dense<0.000000e+00> : vector<32xf32>
      %41 = vector.multi_reduction <add>, %40, %cst_25 [1] : vector<32x256xf32> to vector<32xf32>
      %42 = vector.shape_cast %41 : vector<32xf32> to vector<32x1xf32>
      %cst_26 = arith.constant 2.560000e+02 : f32
      %43 = vector.broadcast %cst_26 : f32 to vector<32x1xf32>
      %44 = arith.divf %42, %43 : vector<32x1xf32>
      %45 = vector.broadcast %37 : vector<32x1xf32> to vector<32x256xf32>
      %46 = arith.subf %33, %45 : vector<32x256xf32>
      %cst_27 = arith.constant 9.99999997E-7 : f32
      %47 = vector.broadcast %cst_27 : f32 to vector<32x1xf32>
      %48 = arith.addf %44, %47 : vector<32x1xf32>
      %49 = math.rsqrt %48 : vector<32x1xf32>
      %50 = vector.broadcast %49 : vector<32x1xf32> to vector<32x256xf32>
      %51 = arith.mulf %46, %50 : vector<32x256xf32>
      %52 = arith.extf %32 : vector<32x256xbf16> to vector<32x256xf32>
      %cst_28 = arith.constant 1.000000e+00 : f32
      %53 = vector.broadcast %cst_28 : f32 to vector<32x256xf32>
      %54 = arith.addf %53, %52 : vector<32x256xf32>
      %55 = arith.mulf %51, %54 : vector<32x256xf32>
      %56 = arith.extf %31 : vector<32x256xbf16> to vector<32x256xf32>
      %57 = arith.addf %55, %56 : vector<32x256xf32>
      %58 = arith.truncf %57 : vector<32x256xf32> to vector<32x256xbf16>
      %c0_29 = arith.constant 0 : index
      %c0_30 = arith.constant 0 : index
      %59 = vector.load %arg10[%c0_29, %c0_30] : memref<32x256xbf16, #tpu.memory_space<vmem>>, vector<32x256xbf16>
      tpu.vector_store %arg10[%c0_29, %c0_30], %58 {strides = array<i32>} : memref<32x256xbf16, #tpu.memory_space<vmem>>, vector<32x256xbf16>,
    } else {
    }
    %c0 = arith.constant 0 : index
    %c0_1 = arith.constant 0 : index
    %3 = vector.load %arg10[%c0, %c0_1] : memref<32x256xbf16, #tpu.memory_space<vmem>>, vector<32x256xbf16>
    %c0_2 = arith.constant 0 : index
    %c0_3 = arith.constant 0 : index
    %4 = vector.load %arg5[%c0_2, %c0_3] : memref<256x512xbf16, #tpu.memory_space<vmem>>, vector<256x512xbf16>
    %cst = arith.constant dense<0.000000e+00> : vector<32x512xf32>
    %5 = tpu.matmul %3, %4, %cst {dimension_numbers = #tpu.dot_dimension_numbers<[1], [0], [0], [1], [0, 0, 1, 1], [], []>} : vector<32x256xbf16>, vector<256x512xbf16>, vector<32x512xf32> -> vector<32x512xf32>
    %c0_4 = arith.constant 0 : index
    %c0_5 = arith.constant 0 : index
    %6 = vector.load %arg7[%c0_4, %c0_5] : memref<1x512xf32, #tpu.memory_space<vmem>>, vector<1x512xf32>
    %7 = vector.broadcast %6 : vector<1x512xf32> to vector<32x512xf32>
    %8 = arith.addf %5, %7 : vector<32x512xf32>
    %c0_6 = arith.constant 0 : index
    %c0_7 = arith.constant 0 : index
    %9 = vector.load %arg6[%c0_6, %c0_7] : memref<256x512xbf16, #tpu.memory_space<vmem>>, vector<256x512xbf16>
    %cst_8 = arith.constant dense<0.000000e+00> : vector<32x512xf32>
    %10 = tpu.matmul %3, %9, %cst_8 {dimension_numbers = #tpu.dot_dimension_numbers<[1], [0], [0], [1], [0, 0, 1, 1], [], []>} : vector<32x256xbf16>, vector<256x512xbf16>, vector<32x512xf32> -> vector<32x512xf32>
    %c0_9 = arith.constant 0 : index
    %c0_10 = arith.constant 0 : index
    %11 = vector.load %arg8[%c0_9, %c0_10] : memref<1x512xf32, #tpu.memory_space<vmem>>, vector<1x512xf32>
    %12 = vector.broadcast %11 : vector<1x512xf32> to vector<32x512xf32>
    %13 = arith.addf %10, %12 : vector<32x512xf32>
    %14 = arith.mulf %13, %13 : vector<32x512xf32>
    %15 = arith.mulf %13, %14 : vector<32x512xf32>
    %cst_11 = arith.constant 4.471500e-02 : f32
    %16 = vector.broadcast %cst_11 : f32 to vector<32x512xf32>
    %17 = arith.mulf %16, %15 : vector<32x512xf32>
    %18 = arith.addf %13, %17 : vector<32x512xf32>
    %cst_12 = arith.constant 0.797884583 : f32
    %19 = vector.broadcast %cst_12 : f32 to vector<32x512xf32>
    %20 = arith.mulf %19, %18 : vector<32x512xf32>
    %21 = math.tanh %20 : vector<32x512xf32>
    %cst_13 = arith.constant 1.000000e+00 : f32
    %22 = vector.broadcast %cst_13 : f32 to vector<32x512xf32>
    %23 = arith.addf %22, %21 : vector<32x512xf32>
    %cst_14 = arith.constant 5.000000e-01 : f32
    %24 = vector.broadcast %cst_14 : f32 to vector<32x512xf32>
    %25 = arith.mulf %24, %23 : vector<32x512xf32>
    %26 = arith.mulf %13, %25 : vector<32x512xf32>
    %27 = arith.mulf %8, %26 : vector<32x512xf32>
    %28 = arith.truncf %27 : vector<32x512xf32> to vector<32x512xbf16>
    %c0_15 = arith.constant 0 : index
    %c0_16 = arith.constant 0 : index
    %29 = vector.load %arg9[%c0_15, %c0_16] : memref<32x512xbf16, #tpu.memory_space<vmem>>, vector<32x512xbf16>
    tpu.vector_store %arg9[%c0_15, %c0_16], %28 {strides = array<i32>} : memref<32x512xbf16, #tpu.memory_space<vmem>>, vector<32x512xbf16>,
    return
  }
  func.func @transform_0(%arg0: i32, %arg1: i32) -> (i32, i32) {
    %c0_i32 = arith.constant 0 : i32
    %c0_i32_0 = arith.constant 0 : i32
    return %arg0, %c0_i32 : i32, i32
  }
  func.func @transform_1(%arg0: i32, %arg1: i32) -> (i32, i32) {
    %c3_i32 = arith.constant 3 : i32
    %c0_i32 = arith.constant 0 : i32
    return %arg0, %c3_i32 : i32, i32
  }
  func.func @transform_2(%arg0: i32, %arg1: i32) -> (i32, i32) {
    %c4_i32 = arith.constant 4 : i32
    %c0_i32 = arith.constant 0 : i32
    return %arg0, %c4_i32 : i32, i32
  }
  func.func @transform_3(%arg0: i32, %arg1: i32) -> (i32, i32) {
    %c0_i32 = arith.constant 0 : i32
    %c0_i32_0 = arith.constant 0 : i32
    return %c0_i32, %arg1 : i32, i32
  }
  func.func @transform_4(%arg0: i32, %arg1: i32) -> (i32, i32) {
    %c0_i32 = arith.constant 0 : i32
    %c0_i32_0 = arith.constant 0 : i32
    return %c0_i32, %arg1 : i32, i32
  }
  func.func @transform_5(%arg0: i32, %arg1: i32) -> (i32, i32) {
    %c0_i32 = arith.constant 0 : i32
    %c0_i32_0 = arith.constant 0 : i32
    return %c0_i32, %arg1 : i32, i32
  }
  func.func @transform_6(%arg0: i32, %arg1: i32) -> (i32, i32) {
    %c0_i32 = arith.constant 0 : i32
    %c0_i32_0 = arith.constant 0 : i32
    return %c0_i32, %arg1 : i32, i32
  }
  func.func @transform_7(%arg0: i32, %arg1: i32) -> (i32, i32) {
    %c0_i32 = arith.constant 0 : i32
    return %arg0, %arg1 : i32, i32
  }
}

module attributes {stable_mosaic.version = 11 : i64} {
  func.func @_linear_kernel(%arg0: i32, %arg1: i32, %arg2: memref<32x256xbf16, #tpu.memory_space<vmem>>, %arg3: memref<256x512xbf16, #tpu.memory_space<vmem>>, %arg4: memref<1x512xf32, #tpu.memory_space<vmem>>, %arg5: memref<32x512xbf16, #tpu.memory_space<vmem>>) attributes {dimension_semantics = [#tpu.dimension_semantics<parallel>, #tpu.dimension_semantics<parallel>], iteration_bounds = array<i64: 1, 3>, scalar_prefetch = 0 : i64, scratch_operands = 0 : i64, tpu.core_type = #tpu.core_type<tc>, window_params = [{transform_indices = @transform_0, window_bounds = array<i64: 32, 256>}, {transform_indices = @transform_1, window_bounds = array<i64: 256, 512>}, {transform_indices = @transform_2, window_bounds = array<i64: 1, 512>}, {transform_indices = @transform_3, window_bounds = array<i64: 32, 512>}]} {
    %c0 = arith.constant 0 : index
    %c0_0 = arith.constant 0 : index
    %0 = vector.load %arg2[%c0, %c0_0] : memref<32x256xbf16, #tpu.memory_space<vmem>>, vector<32x256xbf16>
    %c0_1 = arith.constant 0 : index
    %c0_2 = arith.constant 0 : index
    %1 = vector.load %arg3[%c0_1, %c0_2] : memref<256x512xbf16, #tpu.memory_space<vmem>>, vector<256x512xbf16>
    %cst = arith.constant dense<0.000000e+00> : vector<32x512xf32>
    %2 = tpu.matmul %0, %1, %cst {dimension_numbers = #tpu.dot_dimension_numbers<[1], [0], [0], [1], [0, 0, 1, 1], [], []>} : vector<32x256xbf16>, vector<256x512xbf16>, vector<32x512xf32> -> vector<32x512xf32>
    %c0_3 = arith.constant 0 : index
    %c0_4 = arith.constant 0 : index
    %3 = vector.load %arg4[%c0_3, %c0_4] : memref<1x512xf32, #tpu.memory_space<vmem>>, vector<1x512xf32>
    %4 = vector.broadcast %3 : vector<1x512xf32> to vector<32x512xf32>
    %5 = arith.addf %2, %4 : vector<32x512xf32>
    %6 = arith.truncf %5 : vector<32x512xf32> to vector<32x512xbf16>
    %c0_5 = arith.constant 0 : index
    %c0_6 = arith.constant 0 : index
    %7 = vector.load %arg5[%c0_5, %c0_6] : memref<32x512xbf16, #tpu.memory_space<vmem>>, vector<32x512xbf16>
    tpu.vector_store %arg5[%c0_5, %c0_6], %6 {strides = array<i32>} : memref<32x512xbf16, #tpu.memory_space<vmem>>, vector<32x512xbf16>,
    return
  }
  func.func @transform_0(%arg0: i32, %arg1: i32) -> (i32, i32) {
    %c0_i32 = arith.constant 0 : i32
    %c0_i32_0 = arith.constant 0 : i32
    return %arg0, %c0_i32 : i32, i32
  }
  func.func @transform_1(%arg0: i32, %arg1: i32) -> (i32, i32) {
    %c0_i32 = arith.constant 0 : i32
    %c0_i32_0 = arith.constant 0 : i32
    return %c0_i32, %arg1 : i32, i32
  }
  func.func @transform_2(%arg0: i32, %arg1: i32) -> (i32, i32) {
    %c0_i32 = arith.constant 0 : i32
    %c0_i32_0 = arith.constant 0 : i32
    return %c0_i32, %arg1 : i32, i32
  }
  func.func @transform_3(%arg0: i32, %arg1: i32) -> (i32, i32) {
    %c0_i32 = arith.constant 0 : i32
    return %arg0, %arg1 : i32, i32
  }
}

module attributes {stable_mosaic.version = 11 : i64} {
  func.func @_mm_gated_res_kernel(%arg0: i32, %arg1: i32, %arg2: memref<32x1024xbf16, #tpu.memory_space<vmem>>, %arg3: memref<1024x256xbf16, #tpu.memory_space<vmem>>, %arg4: memref<1x256xf32, #tpu.memory_space<vmem>>, %arg5: memref<32x256xbf16, #tpu.memory_space<vmem>>, %arg6: memref<32x256xbf16, #tpu.memory_space<vmem>>, %arg7: memref<32x256xbf16, #tpu.memory_space<vmem>>) attributes {dimension_semantics = [#tpu.dimension_semantics<parallel>, #tpu.dimension_semantics<parallel>], iteration_bounds = array<i64: 1, 1>, scalar_prefetch = 0 : i64, scratch_operands = 0 : i64, tpu.core_type = #tpu.core_type<tc>, window_params = [{transform_indices = @transform_0, window_bounds = array<i64: 32, 1024>}, {transform_indices = @transform_1, window_bounds = array<i64: 1024, 256>}, {transform_indices = @transform_2, window_bounds = array<i64: 1, 256>}, {transform_indices = @transform_3, window_bounds = array<i64: 32, 256>}, {transform_indices = @transform_4, window_bounds = array<i64: 32, 256>}, {transform_indices = @transform_5, window_bounds = array<i64: 32, 256>}]} {
    %c0 = arith.constant 0 : index
    %c0_0 = arith.constant 0 : index
    %0 = vector.load %arg2[%c0, %c0_0] : memref<32x1024xbf16, #tpu.memory_space<vmem>>, vector<32x1024xbf16>
    %c0_1 = arith.constant 0 : index
    %c0_2 = arith.constant 0 : index
    %1 = vector.load %arg3[%c0_1, %c0_2] : memref<1024x256xbf16, #tpu.memory_space<vmem>>, vector<1024x256xbf16>
    %cst = arith.constant dense<0.000000e+00> : vector<32x256xf32>
    %2 = tpu.matmul %0, %1, %cst {dimension_numbers = #tpu.dot_dimension_numbers<[1], [0], [0], [1], [0, 0, 1, 1], [], []>} : vector<32x1024xbf16>, vector<1024x256xbf16>, vector<32x256xf32> -> vector<32x256xf32>
    %c0_3 = arith.constant 0 : index
    %c0_4 = arith.constant 0 : index
    %3 = vector.load %arg4[%c0_3, %c0_4] : memref<1x256xf32, #tpu.memory_space<vmem>>, vector<1x256xf32>
    %4 = vector.broadcast %3 : vector<1x256xf32> to vector<32x256xf32>
    %5 = arith.addf %2, %4 : vector<32x256xf32>
    %c0_5 = arith.constant 0 : index
    %c0_6 = arith.constant 0 : index
    %6 = vector.load %arg5[%c0_5, %c0_6] : memref<32x256xbf16, #tpu.memory_space<vmem>>, vector<32x256xbf16>
    %7 = arith.extf %6 : vector<32x256xbf16> to vector<32x256xf32>
    %c0_7 = arith.constant 0 : index
    %c0_8 = arith.constant 0 : index
    %8 = vector.load %arg6[%c0_7, %c0_8] : memref<32x256xbf16, #tpu.memory_space<vmem>>, vector<32x256xbf16>
    %9 = arith.extf %8 : vector<32x256xbf16> to vector<32x256xf32>
    %10 = arith.mulf %9, %5 : vector<32x256xf32>
    %11 = arith.addf %7, %10 : vector<32x256xf32>
    %12 = arith.truncf %11 : vector<32x256xf32> to vector<32x256xbf16>
    %c0_9 = arith.constant 0 : index
    %c0_10 = arith.constant 0 : index
    %13 = vector.load %arg7[%c0_9, %c0_10] : memref<32x256xbf16, #tpu.memory_space<vmem>>, vector<32x256xbf16>
    tpu.vector_store %arg7[%c0_9, %c0_10], %12 {strides = array<i32>} : memref<32x256xbf16, #tpu.memory_space<vmem>>, vector<32x256xbf16>,
    return
  }
  func.func @transform_0(%arg0: i32, %arg1: i32) -> (i32, i32) {
    %c0_i32 = arith.constant 0 : i32
    %c0_i32_0 = arith.constant 0 : i32
    return %arg0, %c0_i32 : i32, i32
  }
  func.func @transform_1(%arg0: i32, %arg1: i32) -> (i32, i32) {
    %c0_i32 = arith.constant 0 : i32
    %c0_i32_0 = arith.constant 0 : i32
    return %c0_i32, %arg1 : i32, i32
  }
  func.func @transform_2(%arg0: i32, %arg1: i32) -> (i32, i32) {
    %c0_i32 = arith.constant 0 : i32
    %c0_i32_0 = arith.constant 0 : i32
    return %c0_i32, %arg1 : i32, i32
  }
  func.func @transform_3(%arg0: i32, %arg1: i32) -> (i32, i32) {
    %c0_i32 = arith.constant 0 : i32
    return %arg0, %arg1 : i32, i32
  }
  func.func @transform_4(%arg0: i32, %arg1: i32) -> (i32, i32) {
    %c5_i32 = arith.constant 5 : i32
    %0 = arith.addi %c5_i32, %arg1 : i32
    %c0_i32 = arith.constant 0 : i32
    return %arg0, %0 : i32, i32
  }
  func.func @transform_5(%arg0: i32, %arg1: i32) -> (i32, i32) {
    %c0_i32 = arith.constant 0 : i32
    return %arg0, %arg1 : i32, i32
  }
}

module attributes {stable_mosaic.version = 11 : i64} {
  func.func @_ln_mod_matmul_kernel(%arg0: i32, %arg1: i32, %arg2: memref<32x256xbf16, #tpu.memory_space<vmem>>, %arg3: memref<32x256xbf16, #tpu.memory_space<vmem>>, %arg4: memref<32x256xbf16, #tpu.memory_space<vmem>>, %arg5: memref<256x384xbf16, #tpu.memory_space<vmem>>, %arg6: memref<1x384xf32, #tpu.memory_space<vmem>>, %arg7: memref<32x384xbf16, #tpu.memory_space<vmem>>, %arg8: memref<32x256xbf16, #tpu.memory_space<vmem>>) attributes {dimension_semantics = [#tpu.dimension_semantics<parallel>, #tpu.dimension_semantics<arbitrary>], iteration_bounds = array<i64: 1, 2>, scalar_prefetch = 0 : i64, scratch_operands = 1 : i64, tpu.core_type = #tpu.core_type<tc>, window_params = [{transform_indices = @transform_0, window_bounds = array<i64: 32, 256>}, {transform_indices = @transform_1, window_bounds = array<i64: 32, 256>}, {transform_indices = @transform_2, window_bounds = array<i64: 32, 256>}, {transform_indices = @transform_3, window_bounds = array<i64: 256, 384>}, {transform_indices = @transform_4, window_bounds = array<i64: 1, 384>}, {transform_indices = @transform_5, window_bounds = array<i64: 32, 384>}]} {
    %c0_i32 = arith.constant 0 : i32
    %0 = arith.cmpi eq, %arg1, %c0_i32 : i32
    %1 = arith.extui %0 : i1 to i32
    %c0_i32_0 = arith.constant 0 : i32
    %2 = arith.cmpi ne, %1, %c0_i32_0 : i32
    scf.if %2 {
      %c0_8 = arith.constant 0 : index
      %c0_9 = arith.constant 0 : index
      %11 = vector.load %arg2[%c0_8, %c0_9] : memref<32x256xbf16, #tpu.memory_space<vmem>>, vector<32x256xbf16>
      %c0_10 = arith.constant 0 : index
      %c0_11 = arith.constant 0 : index
      %12 = vector.load %arg3[%c0_10, %c0_11] : memref<32x256xbf16, #tpu.memory_space<vmem>>, vector<32x256xbf16>
      %c0_12 = arith.constant 0 : index
      %c0_13 = arith.constant 0 : index
      %13 = vector.load %arg4[%c0_12, %c0_13] : memref<32x256xbf16, #tpu.memory_space<vmem>>, vector<32x256xbf16>
      %14 = arith.extf %11 : vector<32x256xbf16> to vector<32x256xf32>
      %cst_14 = arith.constant dense<0.000000e+00> : vector<32xf32>
      %15 = vector.multi_reduction <add>, %14, %cst_14 [1] : vector<32x256xf32> to vector<32xf32>
      %16 = vector.shape_cast %15 : vector<32xf32> to vector<32x1xf32>
      %cst_15 = arith.constant 2.560000e+02 : f32
      %17 = vector.broadcast %cst_15 : f32 to vector<32x1xf32>
      %18 = arith.divf %16, %17 : vector<32x1xf32>
      %19 = vector.broadcast %18 : vector<32x1xf32> to vector<32x256xf32>
      %20 = arith.subf %14, %19 : vector<32x256xf32>
      %21 = arith.mulf %20, %20 : vector<32x256xf32>
      %cst_16 = arith.constant dense<0.000000e+00> : vector<32xf32>
      %22 = vector.multi_reduction <add>, %21, %cst_16 [1] : vector<32x256xf32> to vector<32xf32>
      %23 = vector.shape_cast %22 : vector<32xf32> to vector<32x1xf32>
      %cst_17 = arith.constant 2.560000e+02 : f32
      %24 = vector.broadcast %cst_17 : f32 to vector<32x1xf32>
      %25 = arith.divf %23, %24 : vector<32x1xf32>
      %26 = vector.broadcast %18 : vector<32x1xf32> to vector<32x256xf32>
      %27 = arith.subf %14, %26 : vector<32x256xf32>
      %cst_18 = arith.constant 9.99999997E-7 : f32
      %28 = vector.broadcast %cst_18 : f32 to vector<32x1xf32>
      %29 = arith.addf %25, %28 : vector<32x1xf32>
      %30 = math.rsqrt %29 : vector<32x1xf32>
      %31 = vector.broadcast %30 : vector<32x1xf32> to vector<32x256xf32>
      %32 = arith.mulf %27, %31 : vector<32x256xf32>
      %33 = arith.extf %13 : vector<32x256xbf16> to vector<32x256xf32>
      %cst_19 = arith.constant 1.000000e+00 : f32
      %34 = vector.broadcast %cst_19 : f32 to vector<32x256xf32>
      %35 = arith.addf %34, %33 : vector<32x256xf32>
      %36 = arith.mulf %32, %35 : vector<32x256xf32>
      %37 = arith.extf %12 : vector<32x256xbf16> to vector<32x256xf32>
      %38 = arith.addf %36, %37 : vector<32x256xf32>
      %39 = arith.truncf %38 : vector<32x256xf32> to vector<32x256xbf16>
      %c0_20 = arith.constant 0 : index
      %c0_21 = arith.constant 0 : index
      %40 = vector.load %arg8[%c0_20, %c0_21] : memref<32x256xbf16, #tpu.memory_space<vmem>>, vector<32x256xbf16>
      tpu.vector_store %arg8[%c0_20, %c0_21], %39 {strides = array<i32>} : memref<32x256xbf16, #tpu.memory_space<vmem>>, vector<32x256xbf16>,
    } else {
    }
    %c0 = arith.constant 0 : index
    %c0_1 = arith.constant 0 : index
    %3 = vector.load %arg8[%c0, %c0_1] : memref<32x256xbf16, #tpu.memory_space<vmem>>, vector<32x256xbf16>
    %c0_2 = arith.constant 0 : index
    %c0_3 = arith.constant 0 : index
    %4 = vector.load %arg5[%c0_2, %c0_3] : memref<256x384xbf16, #tpu.memory_space<vmem>>, vector<256x384xbf16>
    %cst = arith.constant dense<0.000000e+00> : vector<32x384xf32>
    %5 = tpu.matmul %3, %4, %cst {dimension_numbers = #tpu.dot_dimension_numbers<[1], [0], [0], [1], [0, 0, 1, 1], [], []>} : vector<32x256xbf16>, vector<256x384xbf16>, vector<32x384xf32> -> vector<32x384xf32>
    %c0_4 = arith.constant 0 : index
    %c0_5 = arith.constant 0 : index
    %6 = vector.load %arg6[%c0_4, %c0_5] : memref<1x384xf32, #tpu.memory_space<vmem>>, vector<1x384xf32>
    %7 = vector.broadcast %6 : vector<1x384xf32> to vector<32x384xf32>
    %8 = arith.addf %5, %7 : vector<32x384xf32>
    %9 = arith.truncf %8 : vector<32x384xf32> to vector<32x384xbf16>
    %c0_6 = arith.constant 0 : index
    %c0_7 = arith.constant 0 : index
    %10 = vector.load %arg7[%c0_6, %c0_7] : memref<32x384xbf16, #tpu.memory_space<vmem>>, vector<32x384xbf16>
    tpu.vector_store %arg7[%c0_6, %c0_7], %9 {strides = array<i32>} : memref<32x384xbf16, #tpu.memory_space<vmem>>, vector<32x384xbf16>,
    return
  }
  func.func @transform_0(%arg0: i32, %arg1: i32) -> (i32, i32) {
    %c0_i32 = arith.constant 0 : i32
    %c0_i32_0 = arith.constant 0 : i32
    return %arg0, %c0_i32 : i32, i32
  }
  func.func @transform_1(%arg0: i32, %arg1: i32) -> (i32, i32) {
    %c0_i32 = arith.constant 0 : i32
    %c0_i32_0 = arith.constant 0 : i32
    return %arg0, %c0_i32 : i32, i32
  }
  func.func @transform_2(%arg0: i32, %arg1: i32) -> (i32, i32) {
    %c1_i32 = arith.constant 1 : i32
    %c0_i32 = arith.constant 0 : i32
    return %arg0, %c1_i32 : i32, i32
  }
  func.func @transform_3(%arg0: i32, %arg1: i32) -> (i32, i32) {
    %c0_i32 = arith.constant 0 : i32
    %c0_i32_0 = arith.constant 0 : i32
    return %c0_i32, %arg1 : i32, i32
  }
  func.func @transform_4(%arg0: i32, %arg1: i32) -> (i32, i32) {
    %c0_i32 = arith.constant 0 : i32
    %c0_i32_0 = arith.constant 0 : i32
    return %c0_i32, %arg1 : i32, i32
  }
  func.func @transform_5(%arg0: i32, %arg1: i32) -> (i32, i32) {
    %c0_i32 = arith.constant 0 : i32
    return %arg0, %arg1 : i32, i32
  }
}

module attributes {stable_mosaic.version = 11 : i64} {
  func.func @_mm_gated_res_kernel(%arg0: i32, %arg1: i32, %arg2: memref<32x256xbf16, #tpu.memory_space<vmem>>, %arg3: memref<256x256xbf16, #tpu.memory_space<vmem>>, %arg4: memref<1x256xf32, #tpu.memory_space<vmem>>, %arg5: memref<32x256xbf16, #tpu.memory_space<vmem>>, %arg6: memref<32x256xbf16, #tpu.memory_space<vmem>>, %arg7: memref<32x256xbf16, #tpu.memory_space<vmem>>) attributes {dimension_semantics = [#tpu.dimension_semantics<parallel>, #tpu.dimension_semantics<parallel>], iteration_bounds = array<i64: 1, 1>, scalar_prefetch = 0 : i64, scratch_operands = 0 : i64, tpu.core_type = #tpu.core_type<tc>, window_params = [{transform_indices = @transform_0, window_bounds = array<i64: 32, 256>}, {transform_indices = @transform_1, window_bounds = array<i64: 256, 256>}, {transform_indices = @transform_2, window_bounds = array<i64: 1, 256>}, {transform_indices = @transform_3, window_bounds = array<i64: 32, 256>}, {transform_indices = @transform_4, window_bounds = array<i64: 32, 256>}, {transform_indices = @transform_5, window_bounds = array<i64: 32, 256>}]} {
    %c0 = arith.constant 0 : index
    %c0_0 = arith.constant 0 : index
    %0 = vector.load %arg2[%c0, %c0_0] : memref<32x256xbf16, #tpu.memory_space<vmem>>, vector<32x256xbf16>
    %c0_1 = arith.constant 0 : index
    %c0_2 = arith.constant 0 : index
    %1 = vector.load %arg3[%c0_1, %c0_2] : memref<256x256xbf16, #tpu.memory_space<vmem>>, vector<256x256xbf16>
    %cst = arith.constant dense<0.000000e+00> : vector<32x256xf32>
    %2 = tpu.matmul %0, %1, %cst {dimension_numbers = #tpu.dot_dimension_numbers<[1], [0], [0], [1], [0, 0, 1, 1], [], []>} : vector<32x256xbf16>, vector<256x256xbf16>, vector<32x256xf32> -> vector<32x256xf32>
    %c0_3 = arith.constant 0 : index
    %c0_4 = arith.constant 0 : index
    %3 = vector.load %arg4[%c0_3, %c0_4] : memref<1x256xf32, #tpu.memory_space<vmem>>, vector<1x256xf32>
    %4 = vector.broadcast %3 : vector<1x256xf32> to vector<32x256xf32>
    %5 = arith.addf %2, %4 : vector<32x256xf32>
    %c0_5 = arith.constant 0 : index
    %c0_6 = arith.constant 0 : index
    %6 = vector.load %arg5[%c0_5, %c0_6] : memref<32x256xbf16, #tpu.memory_space<vmem>>, vector<32x256xbf16>
    %7 = arith.extf %6 : vector<32x256xbf16> to vector<32x256xf32>
    %c0_7 = arith.constant 0 : index
    %c0_8 = arith.constant 0 : index
    %8 = vector.load %arg6[%c0_7, %c0_8] : memref<32x256xbf16, #tpu.memory_space<vmem>>, vector<32x256xbf16>
    %9 = arith.extf %8 : vector<32x256xbf16> to vector<32x256xf32>
    %10 = arith.mulf %9, %5 : vector<32x256xf32>
    %11 = arith.addf %7, %10 : vector<32x256xf32>
    %12 = arith.truncf %11 : vector<32x256xf32> to vector<32x256xbf16>
    %c0_9 = arith.constant 0 : index
    %c0_10 = arith.constant 0 : index
    %13 = vector.load %arg7[%c0_9, %c0_10] : memref<32x256xbf16, #tpu.memory_space<vmem>>, vector<32x256xbf16>
    tpu.vector_store %arg7[%c0_9, %c0_10], %12 {strides = array<i32>} : memref<32x256xbf16, #tpu.memory_space<vmem>>, vector<32x256xbf16>,
    return
  }
  func.func @transform_0(%arg0: i32, %arg1: i32) -> (i32, i32) {
    %c0_i32 = arith.constant 0 : i32
    %c0_i32_0 = arith.constant 0 : i32
    return %arg0, %c0_i32 : i32, i32
  }
  func.func @transform_1(%arg0: i32, %arg1: i32) -> (i32, i32) {
    %c0_i32 = arith.constant 0 : i32
    %c0_i32_0 = arith.constant 0 : i32
    return %c0_i32, %arg1 : i32, i32
  }
  func.func @transform_2(%arg0: i32, %arg1: i32) -> (i32, i32) {
    %c0_i32 = arith.constant 0 : i32
    %c0_i32_0 = arith.constant 0 : i32
    return %c0_i32, %arg1 : i32, i32
  }
  func.func @transform_3(%arg0: i32, %arg1: i32) -> (i32, i32) {
    %c0_i32 = arith.constant 0 : i32
    return %arg0, %arg1 : i32, i32
  }
  func.func @transform_4(%arg0: i32, %arg1: i32) -> (i32, i32) {
    %c2_i32 = arith.constant 2 : i32
    %0 = arith.addi %c2_i32, %arg1 : i32
    %c0_i32 = arith.constant 0 : i32
    return %arg0, %0 : i32, i32
  }
  func.func @transform_5(%arg0: i32, %arg1: i32) -> (i32, i32) {
    %c0_i32 = arith.constant 0 : i32
    return %arg0, %arg1 : i32, i32
  }
}

module attributes {stable_mosaic.version = 11 : i64} {
  func.func @_mm_gated_res_kernel(%arg0: i32, %arg1: i32, %arg2: memref<32x1024xbf16, #tpu.memory_space<vmem>>, %arg3: memref<1024x256xbf16, #tpu.memory_space<vmem>>, %arg4: memref<1x256xf32, #tpu.memory_space<vmem>>, %arg5: memref<32x256xbf16, #tpu.memory_space<vmem>>, %arg6: memref<32x256xbf16, #tpu.memory_space<vmem>>, %arg7: memref<32x256xbf16, #tpu.memory_space<vmem>>) attributes {dimension_semantics = [#tpu.dimension_semantics<parallel>, #tpu.dimension_semantics<parallel>], iteration_bounds = array<i64: 1, 1>, scalar_prefetch = 0 : i64, scratch_operands = 0 : i64, tpu.core_type = #tpu.core_type<tc>, window_params = [{transform_indices = @transform_0, window_bounds = array<i64: 32, 1024>}, {transform_indices = @transform_1, window_bounds = array<i64: 1024, 256>}, {transform_indices = @transform_2, window_bounds = array<i64: 1, 256>}, {transform_indices = @transform_3, window_bounds = array<i64: 32, 256>}, {transform_indices = @transform_4, window_bounds = array<i64: 32, 256>}, {transform_indices = @transform_5, window_bounds = array<i64: 32, 256>}]} {
    %c0 = arith.constant 0 : index
    %c0_0 = arith.constant 0 : index
    %0 = vector.load %arg2[%c0, %c0_0] : memref<32x1024xbf16, #tpu.memory_space<vmem>>, vector<32x1024xbf16>
    %c0_1 = arith.constant 0 : index
    %c0_2 = arith.constant 0 : index
    %1 = vector.load %arg3[%c0_1, %c0_2] : memref<1024x256xbf16, #tpu.memory_space<vmem>>, vector<1024x256xbf16>
    %cst = arith.constant dense<0.000000e+00> : vector<32x256xf32>
    %2 = tpu.matmul %0, %1, %cst {dimension_numbers = #tpu.dot_dimension_numbers<[1], [0], [0], [1], [0, 0, 1, 1], [], []>} : vector<32x1024xbf16>, vector<1024x256xbf16>, vector<32x256xf32> -> vector<32x256xf32>
    %c0_3 = arith.constant 0 : index
    %c0_4 = arith.constant 0 : index
    %3 = vector.load %arg4[%c0_3, %c0_4] : memref<1x256xf32, #tpu.memory_space<vmem>>, vector<1x256xf32>
    %4 = vector.broadcast %3 : vector<1x256xf32> to vector<32x256xf32>
    %5 = arith.addf %2, %4 : vector<32x256xf32>
    %c0_5 = arith.constant 0 : index
    %c0_6 = arith.constant 0 : index
    %6 = vector.load %arg5[%c0_5, %c0_6] : memref<32x256xbf16, #tpu.memory_space<vmem>>, vector<32x256xbf16>
    %7 = arith.extf %6 : vector<32x256xbf16> to vector<32x256xf32>
    %c0_7 = arith.constant 0 : index
    %c0_8 = arith.constant 0 : index
    %8 = vector.load %arg6[%c0_7, %c0_8] : memref<32x256xbf16, #tpu.memory_space<vmem>>, vector<32x256xbf16>
    %9 = arith.extf %8 : vector<32x256xbf16> to vector<32x256xf32>
    %10 = arith.mulf %9, %5 : vector<32x256xf32>
    %11 = arith.addf %7, %10 : vector<32x256xf32>
    %12 = arith.truncf %11 : vector<32x256xf32> to vector<32x256xbf16>
    %c0_9 = arith.constant 0 : index
    %c0_10 = arith.constant 0 : index
    %13 = vector.load %arg7[%c0_9, %c0_10] : memref<32x256xbf16, #tpu.memory_space<vmem>>, vector<32x256xbf16>
    tpu.vector_store %arg7[%c0_9, %c0_10], %12 {strides = array<i32>} : memref<32x256xbf16, #tpu.memory_space<vmem>>, vector<32x256xbf16>,
    return
  }
  func.func @transform_0(%arg0: i32, %arg1: i32) -> (i32, i32) {
    %c0_i32 = arith.constant 0 : i32
    %c0_i32_0 = arith.constant 0 : i32
    return %arg0, %c0_i32 : i32, i32
  }
  func.func @transform_1(%arg0: i32, %arg1: i32) -> (i32, i32) {
    %c0_i32 = arith.constant 0 : i32
    %c0_i32_0 = arith.constant 0 : i32
    return %c0_i32, %arg1 : i32, i32
  }
  func.func @transform_2(%arg0: i32, %arg1: i32) -> (i32, i32) {
    %c0_i32 = arith.constant 0 : i32
    %c0_i32_0 = arith.constant 0 : i32
    return %c0_i32, %arg1 : i32, i32
  }
  func.func @transform_3(%arg0: i32, %arg1: i32) -> (i32, i32) {
    %c0_i32 = arith.constant 0 : i32
    return %arg0, %arg1 : i32, i32
  }
  func.func @transform_4(%arg0: i32, %arg1: i32) -> (i32, i32) {
    %c5_i32 = arith.constant 5 : i32
    %0 = arith.addi %c5_i32, %arg1 : i32
    %c0_i32 = arith.constant 0 : i32
    return %arg0, %0 : i32, i32
  }
  func.func @transform_5(%arg0: i32, %arg1: i32) -> (i32, i32) {
    %c0_i32 = arith.constant 0 : i32
    return %arg0, %arg1 : i32, i32
  }
}

module attributes {stable_mosaic.version = 11 : i64} {
  func.func @_linear_kernel(%arg0: i32, %arg1: i32, %arg2: memref<32x256xbf16, #tpu.memory_space<vmem>>, %arg3: memref<256x512xbf16, #tpu.memory_space<vmem>>, %arg4: memref<1x512xf32, #tpu.memory_space<vmem>>, %arg5: memref<32x512xbf16, #tpu.memory_space<vmem>>) attributes {dimension_semantics = [#tpu.dimension_semantics<parallel>, #tpu.dimension_semantics<parallel>], iteration_bounds = array<i64: 1, 1>, scalar_prefetch = 0 : i64, scratch_operands = 0 : i64, tpu.core_type = #tpu.core_type<tc>, window_params = [{transform_indices = @transform_0, window_bounds = array<i64: 32, 256>}, {transform_indices = @transform_1, window_bounds = array<i64: 256, 512>}, {transform_indices = @transform_2, window_bounds = array<i64: 1, 512>}, {transform_indices = @transform_3, window_bounds = array<i64: 32, 512>}]} {
    %c0 = arith.constant 0 : index
    %c0_0 = arith.constant 0 : index
    %0 = vector.load %arg2[%c0, %c0_0] : memref<32x256xbf16, #tpu.memory_space<vmem>>, vector<32x256xbf16>
    %c0_1 = arith.constant 0 : index
    %c0_2 = arith.constant 0 : index
    %1 = vector.load %arg3[%c0_1, %c0_2] : memref<256x512xbf16, #tpu.memory_space<vmem>>, vector<256x512xbf16>
    %cst = arith.constant dense<0.000000e+00> : vector<32x512xf32>
    %2 = tpu.matmul %0, %1, %cst {dimension_numbers = #tpu.dot_dimension_numbers<[1], [0], [0], [1], [0, 0, 1, 1], [], []>} : vector<32x256xbf16>, vector<256x512xbf16>, vector<32x512xf32> -> vector<32x512xf32>
    %c0_3 = arith.constant 0 : index
    %c0_4 = arith.constant 0 : index
    %3 = vector.load %arg4[%c0_3, %c0_4] : memref<1x512xf32, #tpu.memory_space<vmem>>, vector<1x512xf32>
    %4 = vector.broadcast %3 : vector<1x512xf32> to vector<32x512xf32>
    %5 = arith.addf %2, %4 : vector<32x512xf32>
    %6 = arith.truncf %5 : vector<32x512xf32> to vector<32x512xbf16>
    %c0_5 = arith.constant 0 : index
    %c0_6 = arith.constant 0 : index
    %7 = vector.load %arg5[%c0_5, %c0_6] : memref<32x512xbf16, #tpu.memory_space<vmem>>, vector<32x512xbf16>
    tpu.vector_store %arg5[%c0_5, %c0_6], %6 {strides = array<i32>} : memref<32x512xbf16, #tpu.memory_space<vmem>>, vector<32x512xbf16>,
    return
  }
  func.func @transform_0(%arg0: i32, %arg1: i32) -> (i32, i32) {
    %c0_i32 = arith.constant 0 : i32
    %c0_i32_0 = arith.constant 0 : i32
    return %arg0, %c0_i32 : i32, i32
  }
  func.func @transform_1(%arg0: i32, %arg1: i32) -> (i32, i32) {
    %c0_i32 = arith.constant 0 : i32
    %c0_i32_0 = arith.constant 0 : i32
    return %c0_i32, %arg1 : i32, i32
  }
  func.func @transform_2(%arg0: i32, %arg1: i32) -> (i32, i32) {
    %c0_i32 = arith.constant 0 : i32
    %c0_i32_0 = arith.constant 0 : i32
    return %c0_i32, %arg1 : i32, i32
  }
  func.func @transform_3(%arg0: i32, %arg1: i32) -> (i32, i32) {
    %c0_i32 = arith.constant 0 : i32
    return %arg0, %arg1 : i32, i32
  }
}

</mosaic_0001>

<bundles_post_ra>
// kernel: _lambda_.16
= control target key start
LH: loop header
LB: loop body
LE: loop exit
PB: predicated region body
PF: predicated region fallthrough
CT: control target
= control target key end

     0   :  { %s897_s0 = inlined_call_operand.vmem [shape: bf16[32,256], index: 0, kind: input, shape index: {}]   ;;  %s898_s1 = inlined_call_operand.vmem [shape: bf16[256,256], index: 1, kind: input, shape index: {}]   ;;  %s899_s2 = inlined_call_operand.vmem [shape: f32[1,256], index: 2, kind: input, shape index: {}]   ;;  %s900_s3 = inlined_call_operand.vmem [shape: bf16[32,256], index: 3, kind: input, shape index: {}]   ;;  %s901_s4 = inlined_call_operand.vmem [shape: bf16[32,1536], index: 4, kind: input, shape index: {}]   ;;  %s902_s5 = inlined_call_operand.vmem [shape: bf16[32,256], index: 5, kind: output, shape index: {}]  }
   0x1   :  { %v506_v0 = vld [vmem:[%s898_s1 + $0x70] sm:$0xf]  ;;  %v595_v1 = vld [vmem:[%s898_s1 + $0x74] sm:$0xf0]  ;;  %v594_v5 = vld [vmem:[%s898_s1 + $0x74] sm:$0xf] }
   0x2   :  { %v570_v2 = vld [vmem:[%s898_s1 + $0xf0] sm:$0xf]  ;;  %v507_v3 = vor.u32 %v595_v1, %v506_v0  ;;  %v611_v4 = vld [vmem:[%s898_s1 + $0xf4] sm:$0xf0]  ;;  %v508_v6 = vld [vmem:[%s898_s1 + $0x78] sm:$0xf0] }
   0x3   :  { %v571_v7 = vor.u32 %v611_v4, %v570_v2  ;;  %v511_v8 = vor.u32 %v594_v5, %v508_v6  ;;  %v610_v9 = vld [vmem:[%s898_s1 + $0xf4] sm:$0xf]  ;;  %v572_v10 = vld [vmem:[%s898_s1 + $0xf8] sm:$0xf0]  ;;  %v498_v11 = vld [vmem:[%s898_s1 + $0x60] sm:$0xf] }
   0x4   :  { %295 = vmatpush.bf16.msra.mxu0 %v507_v3  ;;  %v575_v12 = vor.u32 %v610_v9, %v572_v10  ;;  %v593_v13 = vld [vmem:[%s898_s1 + $0x64] sm:$0xf0]  ;;  %v562_v14 = vld [vmem:[%s898_s1 + $0xe0] sm:$0xf]  ;;  %v592_v18 = vld [vmem:[%s898_s1 + $0x64] sm:$0xf] }
   0x5   :  { %v609_v15 = vld [vmem:[%s898_s1 + $0xe4] sm:$0xf0]  ;;  %314 = vmatpush.bf16.msra.mxu1 %v571_v7  ;;  %333 = vmatpush.bf16.msra.mxu2 %v511_v8  ;;  %v499_v16 = vor.u32 %v593_v13, %v498_v11  ;;  %v500_v19 = vld [vmem:[%s898_s1 + $0x68] sm:$0xf0]  ;;  %v608_v20 = vld [vmem:[%s898_s1 + $0xe4] sm:$0xf] }
   0x6   :  { %v563_v17 = vor.u32 %v609_v15, %v562_v14  ;;  %352 = vmatpush.bf16.msra.mxu3 %v575_v12  ;;  %v503_v21 = vor.u32 %v592_v18, %v500_v19  ;;  %v564_v22 = vld [vmem:[%s898_s1 + $0xe8] sm:$0xf0]  ;;  %v490_v23 = vld [vmem:[%s898_s1 + $0x50] sm:$0xf]  ;;  %v591_v24 = vld [vmem:[%s898_s1 + $0x54] sm:$0xf0] }
   0x7   :  { %v567_v25 = vor.u32 %v608_v20, %v564_v22  ;;  %v554_v26 = vld [vmem:[%s898_s1 + $0xd0] sm:$0xf]  ;;  %v607_v27 = vld [vmem:[%s898_s1 + $0xd4] sm:$0xf0]  ;;  %v590_v28 = vld [vmem:[%s898_s1 + $0x54] sm:$0xf]  ;;  %v491_v29 = vor.u32 %v591_v24, %v490_v23 }
   0x8   :  { %296 = vmatpush.bf16.msra.mxu0 %v499_v16  ;;  %v492_v30 = vld [vmem:[%s898_s1 + $0x58] sm:$0xf0]  ;;  %v606_v31 = vld [vmem:[%s898_s1 + $0xd4] sm:$0xf]  ;;  %v555_v33 = vor.u32 %v607_v27, %v554_v26  ;;  %v482_v35 = vld [vmem:[%s898_s1 + $0x40] sm:$0xf] }
   0x9   :  { %v556_v32 = vld [vmem:[%s898_s1 + $0xd8] sm:$0xf0]  ;;  %315 = vmatpush.bf16.msra.mxu1 %v563_v17  ;;  %334 = vmatpush.bf16.msra.mxu2 %v503_v21  ;;  %v495_v34 = vor.u32 %v590_v28, %v492_v30  ;;  %v589_v36 = vld [vmem:[%s898_s1 + $0x44] sm:$0xf0]  ;;  %v546_v37 = vld [vmem:[%s898_s1 + $0xc0] sm:$0xf] }
   0xa   :  { %353 = vmatpush.bf16.msra.mxu3 %v567_v25  ;;  %v559_v38 = vor.u32 %v606_v31, %v556_v32  ;;  %v605_v39 = vld [vmem:[%s898_s1 + $0xc4] sm:$0xf0]  ;;  %v588_v40 = vld [vmem:[%s898_s1 + $0x44] sm:$0xf]  ;;  %v484_v41 = vld [vmem:[%s898_s1 + $0x48] sm:$0xf0]  ;;  %v483_v44 = vor.u32 %v589_v36, %v482_v35 }
   0xb   :  { %v604_v42 = vld [vmem:[%s898_s1 + $0xc4] sm:$0xf]  ;;  %v548_v43 = vld [vmem:[%s898_s1 + $0xc8] sm:$0xf0]  ;;  %v547_v45 = vor.u32 %v605_v39, %v546_v37  ;;  %v487_v46 = vor.u32 %v588_v40, %v484_v41  ;;  %v474_v47 = vld [vmem:[%s898_s1 + $0x30] sm:$0xf] }
   0xc   :  { %297 = vmatpush.bf16.msra.mxu0 %v491_v29  ;;  %v587_v48 = vld [vmem:[%s898_s1 + $0x34] sm:$0xf0]  ;;  %v538_v49 = vld [vmem:[%s898_s1 + $0xb0] sm:$0xf]  ;;  %v551_v50 = vor.u32 %v604_v42, %v548_v43  ;;  %v586_v52 = vld [vmem:[%s898_s1 + $0x34] sm:$0xf] }
   0xd   :  { %316 = vmatpush.bf16.msra.mxu1 %v555_v33  ;;  %335 = vmatpush.bf16.msra.mxu2 %v495_v34  ;;  %v603_v51 = vld [vmem:[%s898_s1 + $0xb4] sm:$0xf0]  ;;  %v476_v53 = vld [vmem:[%s898_s1 + $0x38] sm:$0xf0]  ;;  %v602_v54 = vld [vmem:[%s898_s1 + $0xb4] sm:$0xf]  ;;  %v475_v56 = vor.u32 %v587_v48, %v474_v47 }
   0xe   :  { %354 = vmatpush.bf16.msra.mxu3 %v559_v38  ;;  %v540_v55 = vld [vmem:[%s898_s1 + $0xb8] sm:$0xf0]  ;;  %v539_v57 = vor.u32 %v603_v51, %v538_v49  ;;  %v479_v58 = vor.u32 %v586_v52, %v476_v53  ;;  %v466_v59 = vld [vmem:[%s898_s1 + $0x20] sm:$0xf]  ;;  %v585_v60 = vld [vmem:[%s898_s1 + $0x24] sm:$0xf0] }
   0xf   :  { %v530_v61 = vld [vmem:[%s898_s1 + $0xa0] sm:$0xf]  ;;  %v543_v62 = vor.u32 %v602_v54, %v540_v55  ;;  %v601_v63 = vld [vmem:[%s898_s1 + $0xa4] sm:$0xf0]  ;;  %v584_v0 = vld [vmem:[%s898_s1 + $0x24] sm:$0xf]  ;;  %v467_v4 = vor.u32 %v585_v60, %v466_v59 }
  0x10   :  { %298 = vmatpush.bf16.msra.mxu0 %v483_v44  ;;  %v468_v1 = vld [vmem:[%s898_s1 + $0x28] sm:$0xf0]  ;;  %v600_v2 = vld [vmem:[%s898_s1 + $0xa4] sm:$0xf]  ;;  %v531_v5 = vor.u32 %v601_v63, %v530_v61  ;;  %v458_v7 = vld [vmem:[%s898_s1 + $0x10] sm:$0xf] }
  0x11   :  { %317 = vmatpush.bf16.msra.mxu1 %v547_v45  ;;  %336 = vmatpush.bf16.msra.mxu2 %v487_v46  ;;  %v532_v3 = vld [vmem:[%s898_s1 + $0xa8] sm:$0xf0]  ;;  %v471_v6 = vor.u32 %v584_v0, %v468_v1  ;;  %v583_v8 = vld [vmem:[%s898_s1 + $0x14] sm:$0xf0]  ;;  %v522_v9 = vld [vmem:[%s898_s1 + $0x90] sm:$0xf] }
  0x12   :  { %355 = vmatpush.bf16.msra.mxu3 %v551_v50  ;;  %v535_v10 = vor.u32 %v600_v2, %v532_v3  ;;  %v599_v11 = vld [vmem:[%s898_s1 + $0x94] sm:$0xf0]  ;;  %v582_v12 = vld [vmem:[%s898_s1 + $0x14] sm:$0xf]  ;;  %v460_v13 = vld [vmem:[%s898_s1 + $0x18] sm:$0xf0]  ;;  %v459_v16 = vor.u32 %v583_v8, %v458_v7 }
  0x13   :  { %v598_v14 = vld [vmem:[%s898_s1 + $0x94] sm:$0xf]  ;;  %v524_v15 = vld [vmem:[%s898_s1 + $0x98] sm:$0xf0]  ;;  %v523_v17 = vor.u32 %v599_v11, %v522_v9  ;;  %v463_v18 = vor.u32 %v582_v12, %v460_v13  ;;  %v450_v19 = vld [vmem:[%s898_s1] sm:$0xf] }
  0x14   :  { %299 = vmatpush.bf16.msra.mxu0 %v475_v56  ;;  %v581_v20 = vld [vmem:[%s898_s1 + $0x4] sm:$0xf0]  ;;  %v514_v21 = vld [vmem:[%s898_s1 + $0x80] sm:$0xf]  ;;  %v527_v22 = vor.u32 %v598_v14, %v524_v15  ;;  %v580_v24 = vld [vmem:[%s898_s1 + $0x4] sm:$0xf] }
  0x15   :  { %318 = vmatpush.bf16.msra.mxu1 %v539_v57  ;;  %337 = vmatpush.bf16.msra.mxu2 %v479_v58  ;;  %v597_v23 = vld [vmem:[%s898_s1 + $0x84] sm:$0xf0]  ;;  %v452_v25 = vld [vmem:[%s898_s1 + $0x8] sm:$0xf0]  ;;  %v596_v26 = vld [vmem:[%s898_s1 + $0x84] sm:$0xf]  ;;  %v451_v28 = vor.u32 %v581_v20, %v450_v19 }
  0x16   :  { %356 = vmatpush.bf16.msra.mxu3 %v543_v62  ;;  %v516_v27 = vld [vmem:[%s898_s1 + $0x88] sm:$0xf0]  ;;  %v434_v29 = vld [vmem:[%s897_s0] sm:$0xf]  ;;  %v577_v30 = vld [vmem:[%s897_s0 + $0x4] sm:$0xf0]  ;;  %v515_v31 = vor.u32 %v597_v23, %v514_v21  ;;  %v455_v32 = vor.u32 %v580_v24, %v452_v25 }
  0x17   :  { %v576_v33 = vld [vmem:[%s897_s0 + $0x4] sm:$0xf]  ;;  %v436_v34 = vld [vmem:[%s897_s0 + $0x8] sm:$0xf0]  ;;  %v519_v35 = vor.u32 %v596_v26, %v516_v27  ;;  %v435_v36 = vor.u32 %v577_v30, %v434_v29  ;;  %v442_v38 = vld [vmem:[%s897_s0 + $0x10] sm:$0xf] }
  0x18   :  { %300 = vmatpush.bf16.msra.mxu0 %v467_v4  ;;  %v439_v37 = vor.u32 %v576_v33, %v436_v34  ;;  %v579_v39 = vld [vmem:[%s897_s0 + $0x14] sm:$0xf0]  ;;  %v578_v40 = vld [vmem:[%s897_s0 + $0x14] sm:$0xf]  ;;  %v444_v41 = vld [vmem:[%s897_s0 + $0x18] sm:$0xf0] }
  0x19   :  { %319 = vmatpush.bf16.msra.mxu1 %v531_v5  ;;  %338 = vmatpush.bf16.msra.mxu2 %v471_v6  ;;  %v443_v42 = vor.u32 %v579_v39, %v442_v38  ;;  %v447_v43 = vor.u32 %v578_v40, %v444_v41  ;;  %v109_v44 = vld [vmem:[%s899_s2] sm:$0x3]  ;;  %v428_v48 = vld [vmem:[%s901_s4 + $0x10] sm:$0xff]  ;;  %v372_v7 = vld [vmem:[%s900_s3 + $0x8] sm:$0xff] }
  0x1a   :  { %357 = vmatpush.bf16.msra.mxu3 %v535_v10  ;;  %v111_v45 = vperm.slane %v109_v44, 0  ;;  %v387_v51 = vunpack.c.l.bf16 %v428_v48  ;;  %v112_v52 = vperm.slane %v109_v44, 1  ;;  %v371_v53 = vld [vmem:[%s900_s3] sm:$0xff]  ;;  %v388_v59 = vunpack.c.h.bf16 %v428_v48  ;;  %v430_v15 = vld [vmem:[%s901_s4 + $0x70] sm:$0xff] }
  0x1b   :  { %v375_v55 = vunpack.c.l.bf16 %v371_v53  ;;  %v376_v63 = vunpack.c.h.bf16 %v371_v53  ;;  %v429_v1 = vld [vmem:[%s901_s4 + $0x40] sm:$0xff]  ;;  %v378_v19 = vunpack.c.h.bf16 %v372_v7  ;;  %v373_v23 = vld [vmem:[%s900_s3 + $0x10] sm:$0xff]  ;;  %v391_v24 = vunpack.c.l.bf16 %v430_v15 }
  0x1c   :  { %301 = vmatpush.bf16.msra.mxu0 %v459_v16  ;;  %v389_v6 = vunpack.c.l.bf16 %v429_v1  ;;  %v390_v12 = vunpack.c.h.bf16 %v429_v1  ;;  %v377_v16 = vunpack.c.l.bf16 %v372_v7  ;;  %v379_v27 = vunpack.c.l.bf16 %v373_v23  ;;  %v431_v38 = vld [vmem:[%s901_s4 + $0xa0] sm:$0xff] }
  0x1d   :  { %320 = vmatpush.bf16.msra.mxu1 %v523_v17  ;;  %339 = vmatpush.bf16.msra.mxu2 %v463_v18  ;;  %v392_v33 = vunpack.c.h.bf16 %v430_v15  ;;  %v393_v44 = vunpack.c.l.bf16 %v431_v38 }
  0x1e   :  { %358 = vmatpush.bf16.msra.mxu3 %v527_v22 }
  0x20   :  { %302 = vmatpush.bf16.msra.mxu0 %v451_v28 }
  0x21   :  { %321 = vmatpush.bf16.msra.mxu1 %v515_v31  ;;  %340 = vmatpush.bf16.msra.mxu2 %v455_v32 }
  0x22   :  { %359 = vmatpush.bf16.msra.mxu3 %v519_v35 }
  0x23   :  { %303 = vmatmul.bf16.vlgmr.msra.gmra.mxu0 %v435_v36 }
  0x24   :  { %322 = vmatmul.bf16.vlgmr.msra.gmra.mxu1 %v439_v37  ;;  %341 = vmatmul.bf16.vlgmr.msra.gmra.mxu2 %v435_v36  ;;  %v380_v36 = vunpack.c.h.bf16 %v373_v23 }
  0x25   :  { %360 = vmatmul.bf16.vlgmr.msra.gmra.mxu3 %v439_v37 }
  0x33   :  { %308 = vmatmul.bf16.gmra.mxu0 %v443_v42 }
  0x34   :  { %327 = vmatmul.bf16.gmra.mxu1 %v447_v43  ;;  %346 = vmatmul.bf16.gmra.mxu2 %v443_v42 }
  0x35   :  { %365 = vmatmul.bf16.gmra.mxu3 %v447_v43 }
  0xa0   :  { %v304_v46 = vpop.f32.mrf.mxu0 }
  0xa1   :  { %v305_v47 = vadd.f32 %v304_v46, %v111_v45  ;;  %v323_v49 = vpop.f32.mrf.mxu1  ;;  %v374_v46 = vld [vmem:[%s900_s3 + $0x18] sm:$0xff] }
  0xa3   :  { %v324_v50 = vadd.f32 %v323_v49, %v305_v47 }
  0xa5   :  { %v395_v56 = vmul.f32 %v387_v51, %v324_v50  ;;  %v394_v50 = vunpack.c.h.bf16 %v431_v38 }
  0xa7   :  { %v342_v54 = vpop.f32.mrf.mxu2  ;;  %v403_v2 = vadd.f32 %v395_v56, %v375_v55  ;;  %v382_v55 = vunpack.c.h.bf16 %v374_v46 }
  0xa8   :  { %v343_v57 = vadd.f32 %v342_v54, %v112_v52  ;;  %v361_v58 = vpop.f32.mrf.mxu3  ;;  %v306_v60 = vpop.f32.mrf.mxu0 }
  0xa9   :  { %v325_v61 = vpop.f32.mrf.mxu1  ;;  %v307_v0 = vadd.f32 %v306_v60, %v111_v45 }
  0xaa   :  { %v362_v62 = vadd.f32 %v361_v58, %v343_v57 }
  0xab   :  { %v326_v5 = vadd.f32 %v325_v61, %v307_v0 }
  0xac   :  { %v396_v3 = vmul.f32 %v388_v59, %v362_v62 }
  0xad   :  { %v397_v17 = vmul.f32 %v389_v6, %v326_v5 }
  0xae   :  { %v404_v4 = vadd.f32 %v396_v3, %v376_v63 }
  0xaf   :  { %v344_v8 = vpop.f32.mrf.mxu2  ;;  %v405_v25 = vadd.f32 %v397_v17, %v377_v16 }
  0xb0   :  { %v411_v9 = vpack.c.bf16 %v404_v4, %v403_v2  ;;  %v345_v10 = vadd.f32 %v344_v8, %v112_v52  ;;  %v363_v11 = vpop.f32.mrf.mxu3  ;;  %v309_v13 = vpop.f32.mrf.mxu0 }
  0xb1   :  { %v310_v14 = vadd.f32 %v309_v13, %v111_v45  ;;  %v328_v20 = vpop.f32.mrf.mxu1 }
  0xb2   :  { %415 = vst [vmem:[%s902_s5] sm:$0xff] %v411_v9  ;;  %v364_v18 = vadd.f32 %v363_v11, %v345_v10 }
  0xb3   :  { %v329_v22 = vadd.f32 %v328_v20, %v310_v14 }
  0xb4   :  { %v398_v21 = vmul.f32 %v390_v12, %v364_v18 }
  0xb5   :  { %v399_v30 = vmul.f32 %v391_v24, %v329_v22 }
  0xb6   :  { %v406_v26 = vadd.f32 %v398_v21, %v378_v19 }
  0xb7   :  { %v347_v28 = vpop.f32.mrf.mxu2  ;;  %v407_v39 = vadd.f32 %v399_v30, %v379_v27 }
  0xb8   :  { %v412_v29 = vpack.c.bf16 %v406_v26, %v405_v25  ;;  %v348_v31 = vadd.f32 %v347_v28, %v112_v52  ;;  %v366_v32 = vpop.f32.mrf.mxu3  ;;  %v311_v34 = vpop.f32.mrf.mxu0 }
  0xb9   :  { %v312_v37 = vadd.f32 %v311_v34, %v111_v45  ;;  %v330_v41 = vpop.f32.mrf.mxu1  ;;  %v381_v45 = vunpack.c.l.bf16 %v374_v46 }
  0xba   :  { %416 = vst [vmem:[%s902_s5 + $0x8] sm:$0xff] %v412_v29  ;;  %v367_v35 = vadd.f32 %v366_v32, %v348_v31 }
  0xbb   :  { %v331_v43 = vadd.f32 %v330_v41, %v312_v37 }
  0xbc   :  { %v400_v40 = vmul.f32 %v392_v33, %v367_v35 }
  0xbd   :  { %v401_v53 = vmul.f32 %v393_v44, %v331_v43 }
  0xbe   :  { %v408_v42 = vadd.f32 %v400_v40, %v380_v36 }
  0xbf   :  { %v349_v47 = vpop.f32.mrf.mxu2  ;;  %v409_v57 = vadd.f32 %v401_v53, %v381_v45 }
  0xc0   :  { %v413_v48 = vpack.c.bf16 %v408_v42, %v407_v39  ;;  %v350_v49 = vadd.f32 %v349_v47, %v112_v52  ;;  %v368_v51 = vpop.f32.mrf.mxu3 }
  0xc2   :  { %417 = vst [vmem:[%s902_s5 + $0x10] sm:$0xff] %v413_v48  ;;  %v369_v54 = vadd.f32 %v368_v51, %v350_v49 }
  0xc4   :  { %v402_v56 = vmul.f32 %v394_v50, %v369_v54 }
  0xc6   :  { %v410_v58 = vadd.f32 %v402_v56, %v382_v55 }
  0xc8   :  { %v414_v59 = vpack.c.bf16 %v410_v58, %v409_v57 }
  0xca   :  { %418 = vst [vmem:[%s902_s5 + $0x18] sm:$0xff] %v414_v59 }

// kernel: _lambda_.13
= control target key start
LH: loop header
LB: loop body
LE: loop exit
PB: predicated region body
PF: predicated region fallthrough
CT: control target
= control target key end

     0   :  { %s1553_s12 = smov 0   ;;  %s1555_s13 = smov 0   ;;  %s1961_s0 = inlined_call_operand.vmem [shape: bf16[32,256], index: 0, kind: input, shape index: {}]   ;;  %s1962_s1 = inlined_call_operand.vmem [shape: bf16[256,1536], index: 1, kind: input, shape index: {}]   ;;  %s1963_s2 = inlined_call_operand.vmem [shape: f32[1,1536], index: 2, kind: input, shape index: {}]   ;;  %s1964_s3 = inlined_call_operand.vmem [shape: bf16[32,1536], index: 3, kind: output, shape index: {}]  }
   0x1   :  { %s1557_s14 = smov 0   ;;  %s1559_s15 = smov 0  }
   0x2   :  { %s1561_s16 = smov 0  }
   0x3 LB: > { %s22_s17 = sadd.s32 1, %s1527_s15  ;;  %s1094_s18 = sadd.s32 4294967295, %s1531_s16   ;;  %s1531_s16 = sphi %s1561_s16, %s13_s16   ;;  %s1527_s15 = sphi %s1559_s15, %s1969_s15   ;;  %s1523_s14 = sphi %s1557_s14, %s1968_s14   ;;  %s1519_s13 = sphi %s1555_s13, %s1967_s13   ;;  %s1515_s12 = sphi %s1553_s12, %s1966_s12  }
   0x4   : > { %p23_p0 = scmp.ge.s32.totalorder %s22_s17, 3  ;;  %p65_p1 = scmp.ne.s32.totalorder %s1519_s13, %s1515_s12 }
   0x5   : > { %p66_p2 = scmp.eq.s32.totalorder %s1531_s16, 0  ;;  %p123_p4 = scmp.eq.s32.totalorder %s1094_s18, 2 }
   0x6   : > { %s1971_s17 = smov (%p23_p0, %s22_s17), 0  ;;  %s58_s20 = sadd.s32 1, %s1519_s13 }
   0x7   : > { %p67_p3 = por %p66_p2, %p65_p1  ;;  %s55_s19 = ssub.s32 %s1527_s15, %s1971_s17 }
   0x8   : > { %p56_p5 = scmp.eq.s32.totalorder %s55_s19, 0  ;;  %p1588_p6 = por %p123_p4, %p65_p1 }
   0x9   : > { %p1098_p7 = scmp.ge.s32.totalorder %s1531_s16, 3 }
   0xa   : > { %s1593_s22 = scalar_select %p56_p5, %s1519_s13, %s58_s20  }
   0xb   : > { %155 = sbr.rel (%p1098_p7) target bundleno = 84 (0x54), region = 20 }
  0x10   : > { %158 = sbr.rel (!%p67_p3) target bundleno = 84 (0x54), region = 24  ;;  %s160_s23 = sand.u32 (%p67_p3), 1, %s1519_s13  }
  0x11   : > { %s1383_s24 = sshll.u32 (%p67_p3), %s1527_s15, 4  ;;  %s1099_s25 = sshll.u32 (%p67_p3), %s160_s23, 9 }
  0x12   : > { %s1601_s28 = scalar_lea.vmem (%p67_p3), %s1962_s1, %s1383_s24  ;;  %s1606_s29 = scalar_lea.vmem (%p67_p3), [#allocation2], %s1099_s25 }
  0x13   : > { %v178_v0 = vld [vmem:[%s1601_s28] sm:$0xff] (%p67_p3)  ;;  %v180_v1 = vld [vmem:[%s1601_s28 + $0x8] sm:$0xff] (%p67_p3)  ;;  %v182_v2 = vld [vmem:[%s1601_s28 + $0x30] sm:$0xff] (%p67_p3) }
  0x14   : > { %179 = vst [vmem:[%s1606_s29] sm:$0xff] (%p67_p3), %v178_v0  ;;  %v184_v3 = vld [vmem:[%s1601_s28 + $0x38] sm:$0xff] (%p67_p3)  ;;  %v186_v4 = vld [vmem:[%s1601_s28 + $0x60] sm:$0xff] (%p67_p3)  ;;  %v188_v5 = vld [vmem:[%s1601_s28 + $0x68] sm:$0xff] (%p67_p3) }
  0x15   : > { %181 = vst [vmem:[%s1606_s29 + $0x8] sm:$0xff] %v180_v1  ;;  %v190_v6 = vld [vmem:[%s1601_s28 + $0x90] sm:$0xff]  ;;  %v192_v7 = vld [vmem:[%s1601_s28 + $0x98] sm:$0xff]  ;;  %v194_v8 = vld [vmem:[%s1601_s28 + $0xc0] sm:$0xff] }
  0x16   : > { %183 = vst [vmem:[%s1606_s29 + $0x10] sm:$0xff] %v182_v2  ;;  %v196_v9 = vld [vmem:[%s1601_s28 + $0xc8] sm:$0xff]  ;;  %v198_v10 = vld [vmem:[%s1601_s28 + $0xf0] sm:$0xff]  ;;  %v200_v11 = vld [vmem:[%s1601_s28 + $0xf8] sm:$0xff] }
  0x17   : > { %185 = vst [vmem:[%s1606_s29 + $0x18] sm:$0xff] %v184_v3  ;;  %v202_v12 = vld [vmem:[%s1601_s28 + $0x120] sm:$0xff]  ;;  %v204_v13 = vld [vmem:[%s1601_s28 + $0x128] sm:$0xff]  ;;  %v206_v14 = vld [vmem:[%s1601_s28 + $0x150] sm:$0xff] }
  0x18   : > { %187 = vst [vmem:[%s1606_s29 + $0x20] sm:$0xff] %v186_v4  ;;  %v208_v15 = vld [vmem:[%s1601_s28 + $0x158] sm:$0xff]  ;;  %v210_v16 = vld [vmem:[%s1601_s28 + $0x180] sm:$0xff]  ;;  %v212_v17 = vld [vmem:[%s1601_s28 + $0x188] sm:$0xff] }
  0x19   : > { %189 = vst [vmem:[%s1606_s29 + $0x28] sm:$0xff] %v188_v5  ;;  %v214_v18 = vld [vmem:[%s1601_s28 + $0x1b0] sm:$0xff]  ;;  %v216_v19 = vld [vmem:[%s1601_s28 + $0x1b8] sm:$0xff]  ;;  %v218_v20 = vld [vmem:[%s1601_s28 + $0x1e0] sm:$0xff] }
  0x1a   : > { %191 = vst [vmem:[%s1606_s29 + $0x30] sm:$0xff] %v190_v6  ;;  %v220_v21 = vld [vmem:[%s1601_s28 + $0x1e8] sm:$0xff]  ;;  %v222_v22 = vld [vmem:[%s1601_s28 + $0x210] sm:$0xff]  ;;  %v224_v23 = vld [vmem:[%s1601_s28 + $0x218] sm:$0xff] }
  0x1b   : > { %193 = vst [vmem:[%s1606_s29 + $0x38] sm:$0xff] %v192_v7  ;;  %v226_v24 = vld [vmem:[%s1601_s28 + $0x240] sm:$0xff]  ;;  %v228_v25 = vld [vmem:[%s1601_s28 + $0x248] sm:$0xff]  ;;  %v230_v26 = vld [vmem:[%s1601_s28 + $0x270] sm:$0xff] }
  0x1c   : > { %195 = vst [vmem:[%s1606_s29 + $0x40] sm:$0xff] %v194_v8  ;;  %v232_v27 = vld [vmem:[%s1601_s28 + $0x278] sm:$0xff]  ;;  %v234_v28 = vld [vmem:[%s1601_s28 + $0x2a0] sm:$0xff]  ;;  %v236_v29 = vld [vmem:[%s1601_s28 + $0x2a8] sm:$0xff] }
  0x1d   : > { %197 = vst [vmem:[%s1606_s29 + $0x48] sm:$0xff] %v196_v9  ;;  %v238_v30 = vld [vmem:[%s1601_s28 + $0x2d0] sm:$0xff]  ;;  %v240_v31 = vld [vmem:[%s1601_s28 + $0x2d8] sm:$0xff]  ;;  %v242_v32 = vld [vmem:[%s1601_s28 + $0x300] sm:$0xff] }
  0x1e   : > { %199 = vst [vmem:[%s1606_s29 + $0x50] sm:$0xff] %v198_v10  ;;  %v244_v33 = vld [vmem:[%s1601_s28 + $0x308] sm:$0xff]  ;;  %v246_v34 = vld [vmem:[%s1601_s28 + $0x330] sm:$0xff]  ;;  %v248_v35 = vld [vmem:[%s1601_s28 + $0x338] sm:$0xff] }
  0x1f   : > { %201 = vst [vmem:[%s1606_s29 + $0x58] sm:$0xff] %v200_v11  ;;  %v250_v36 = vld [vmem:[%s1601_s28 + $0x360] sm:$0xff]  ;;  %v252_v37 = vld [vmem:[%s1601_s28 + $0x368] sm:$0xff]  ;;  %v254_v38 = vld [vmem:[%s1601_s28 + $0x390] sm:$0xff] }
  0x20   : > { %203 = vst [vmem:[%s1606_s29 + $0x60] sm:$0xff] %v202_v12  ;;  %v256_v39 = vld [vmem:[%s1601_s28 + $0x398] sm:$0xff]  ;;  %v258_v40 = vld [vmem:[%s1601_s28 + $0x3c0] sm:$0xff]  ;;  %v260_v41 = vld [vmem:[%s1601_s28 + $0x3c8] sm:$0xff] }
  0x21   : > { %205 = vst [vmem:[%s1606_s29 + $0x68] sm:$0xff] %v204_v13  ;;  %v262_v42 = vld [vmem:[%s1601_s28 + $0x3f0] sm:$0xff]  ;;  %v264_v43 = vld [vmem:[%s1601_s28 + $0x3f8] sm:$0xff]  ;;  %v266_v44 = vld [vmem:[%s1601_s28 + $0x420] sm:$0xff] }
  0x22   : > { %207 = vst [vmem:[%s1606_s29 + $0x70] sm:$0xff] %v206_v14  ;;  %v268_v45 = vld [vmem:[%s1601_s28 + $0x428] sm:$0xff]  ;;  %v270_v46 = vld [vmem:[%s1601_s28 + $0x450] sm:$0xff]  ;;  %v272_v47 = vld [vmem:[%s1601_s28 + $0x458] sm:$0xff] }
  0x23   : > { %209 = vst [vmem:[%s1606_s29 + $0x78] sm:$0xff] %v208_v15  ;;  %v274_v48 = vld [vmem:[%s1601_s28 + $0x480] sm:$0xff]  ;;  %v276_v49 = vld [vmem:[%s1601_s28 + $0x488] sm:$0xff]  ;;  %v278_v50 = vld [vmem:[%s1601_s28 + $0x4b0] sm:$0xff] }
  0x24   : > { %211 = vst [vmem:[%s1606_s29 + $0x80] sm:$0xff] %v210_v16  ;;  %v280_v51 = vld [vmem:[%s1601_s28 + $0x4b8] sm:$0xff]  ;;  %v282_v52 = vld [vmem:[%s1601_s28 + $0x4e0] sm:$0xff]  ;;  %v284_v53 = vld [vmem:[%s1601_s28 + $0x4e8] sm:$0xff] }
  0x25   : > { %213 = vst [vmem:[%s1606_s29 + $0x88] sm:$0xff] %v212_v17  ;;  %v286_v54 = vld [vmem:[%s1601_s28 + $0x510] sm:$0xff]  ;;  %v288_v55 = vld [vmem:[%s1601_s28 + $0x518] sm:$0xff]  ;;  %v290_v56 = vld [vmem:[%s1601_s28 + $0x540] sm:$0xff] }
  0x26   : > { %215 = vst [vmem:[%s1606_s29 + $0x90] sm:$0xff] %v214_v18  ;;  %v292_v57 = vld [vmem:[%s1601_s28 + $0x548] sm:$0xff]  ;;  %v294_v58 = vld [vmem:[%s1601_s28 + $0x570] sm:$0xff]  ;;  %v296_v59 = vld [vmem:[%s1601_s28 + $0x578] sm:$0xff] }
  0x27   : > { %217 = vst [vmem:[%s1606_s29 + $0x98] sm:$0xff] %v216_v19  ;;  %v298_v60 = vld [vmem:[%s1601_s28 + $0x5a0] sm:$0xff]  ;;  %v300_v61 = vld [vmem:[%s1601_s28 + $0x5a8] sm:$0xff]  ;;  %v302_v62 = vld [vmem:[%s1601_s28 + $0x5d0] sm:$0xff] }
  0x28   : > { %219 = vst [vmem:[%s1606_s29 + $0xa0] sm:$0xff] %v218_v20  ;;  %v304_v63 = vld [vmem:[%s1601_s28 + $0x5d8] sm:$0xff] }
  0x29   : > { %221 = vst [vmem:[%s1606_s29 + $0xa8] sm:$0xff] %v220_v21 }
  0x2a   : > { %223 = vst [vmem:[%s1606_s29 + $0xb0] sm:$0xff] %v222_v22 }
  0x2b   : > { %225 = vst [vmem:[%s1606_s29 + $0xb8] sm:$0xff] %v224_v23 }
  0x2c   : > { %227 = vst [vmem:[%s1606_s29 + $0xc0] sm:$0xff] %v226_v24 }
  0x2d   : > { %229 = vst [vmem:[%s1606_s29 + $0xc8] sm:$0xff] %v228_v25 }
  0x2e   : > { %231 = vst [vmem:[%s1606_s29 + $0xd0] sm:$0xff] %v230_v26 }
  0x2f   : > { %233 = vst [vmem:[%s1606_s29 + $0xd8] sm:$0xff] %v232_v27 }
  0x30   : > { %235 = vst [vmem:[%s1606_s29 + $0xe0] sm:$0xff] %v234_v28 }
  0x31   : > { %237 = vst [vmem:[%s1606_s29 + $0xe8] sm:$0xff] %v236_v29 }
  0x32   : > { %239 = vst [vmem:[%s1606_s29 + $0xf0] sm:$0xff] %v238_v30 }
  0x33   : > { %241 = vst [vmem:[%s1606_s29 + $0xf8] sm:$0xff] %v240_v31 }
  0x34   : > { %243 = vst [vmem:[%s1606_s29 + $0x100] sm:$0xff] %v242_v32 }
  0x35   : > { %245 = vst [vmem:[%s1606_s29 + $0x108] sm:$0xff] %v244_v33 }
  0x36   : > { %247 = vst [vmem:[%s1606_s29 + $0x110] sm:$0xff] %v246_v34 }
  0x37   : > { %249 = vst [vmem:[%s1606_s29 + $0x118] sm:$0xff] %v248_v35 }
  0x38   : > { %251 = vst [vmem:[%s1606_s29 + $0x120] sm:$0xff] %v250_v36 }
  0x39   : > { %253 = vst [vmem:[%s1606_s29 + $0x128] sm:$0xff] %v252_v37 }
  0x3a   : > { %255 = vst [vmem:[%s1606_s29 + $0x130] sm:$0xff] %v254_v38 }
  0x3b   : > { %257 = vst [vmem:[%s1606_s29 + $0x138] sm:$0xff] %v256_v39 }
  0x3c   : > { %259 = vst [vmem:[%s1606_s29 + $0x140] sm:$0xff] %v258_v40 }
  0x3d   : > { %261 = vst [vmem:[%s1606_s29 + $0x148] sm:$0xff] %v260_v41 }
  0x3e   : > { %263 = vst [vmem:[%s1606_s29 + $0x150] sm:$0xff] %v262_v42 }
  0x3f   : > { %265 = vst [vmem:[%s1606_s29 + $0x158] sm:$0xff] %v264_v43 }
  0x40   : > { %267 = vst [vmem:[%s1606_s29 + $0x160] sm:$0xff] %v266_v44 }
  0x41   : > { %269 = vst [vmem:[%s1606_s29 + $0x168] sm:$0xff] %v268_v45 }
  0x42   : > { %271 = vst [vmem:[%s1606_s29 + $0x170] sm:$0xff] %v270_v46 }
  0x43   : > { %273 = vst [vmem:[%s1606_s29 + $0x178] sm:$0xff] %v272_v47 }
  0x44   : > { %275 = vst [vmem:[%s1606_s29 + $0x180] sm:$0xff] %v274_v48 }
  0x45   : > { %277 = vst [vmem:[%s1606_s29 + $0x188] sm:$0xff] %v276_v49 }
  0x46   : > { %279 = vst [vmem:[%s1606_s29 + $0x190] sm:$0xff] %v278_v50 }
  0x47   : > { %281 = vst [vmem:[%s1606_s29 + $0x198] sm:$0xff] %v280_v51 }
  0x48   : > { %283 = vst [vmem:[%s1606_s29 + $0x1a0] sm:$0xff] %v282_v52 }
  0x49   : > { %285 = vst [vmem:[%s1606_s29 + $0x1a8] sm:$0xff] %v284_v53 }
  0x4a   : > { %287 = vst [vmem:[%s1606_s29 + $0x1b0] sm:$0xff] %v286_v54 }
  0x4b   : > { %289 = vst [vmem:[%s1606_s29 + $0x1b8] sm:$0xff] %v288_v55 }
  0x4c   : > { %291 = vst [vmem:[%s1606_s29 + $0x1c0] sm:$0xff] %v290_v56 }
  0x4d   : > { %293 = vst [vmem:[%s1606_s29 + $0x1c8] sm:$0xff] %v292_v57 }
  0x4e   : > { %295 = vst [vmem:[%s1606_s29 + $0x1d0] sm:$0xff] %v294_v58 }
  0x4f   : > { %297 = vst [vmem:[%s1606_s29 + $0x1d8] sm:$0xff] %v296_v59 }
  0x50   : > { %299 = vst [vmem:[%s1606_s29 + $0x1e0] sm:$0xff] %v298_v60 }
  0x51   : > { %301 = vst [vmem:[%s1606_s29 + $0x1e8] sm:$0xff] %v300_v61 }
  0x52   : > { %303 = vst [vmem:[%s1606_s29 + $0x1f0] sm:$0xff] %v302_v62 }
  0x53   : > { %305 = vst [vmem:[%s1606_s29 + $0x1f8] sm:$0xff] %v304_v63 }
  0x54 PF: > { %p1102_p8 = scmp.ge.s32.totalorder %s1531_s16, 1  ;;  %p318_p9 = scmp.lt.s32.totalorder %s1531_s16, 4 }
  0x56   : > { %p319_p10 = pnand %p1102_p8, %p318_p9 }
  0x57   : > { %s325_s30 = sand.u32 (!%p319_p10), 1, %s1515_s12  }
  0x58   : > { %322 = sbr.rel (%p319_p10) target bundleno = 331 (0x14b), region = 51  ;;  %s1103_s4 = sshll.u32 (!%p319_p10), %s325_s30, 9 }
  0x59   : > { %s1738_s5 = scalar_lea.vmem (!%p319_p10), [#allocation2], %s1103_s4  ;;  %s1105_s4 = sshll.u32 (!%p319_p10), %s1523_s14, 2 }
  0x5a   : > { %p366_p11 = scmp.lt.s32.totalorder (!%p319_p10), %s1105_s4, 11  ;;  %s1104_s8 = sshll.u32 (!%p319_p10), %s325_s30, 6 }
  0x5b   : > { %s1922_s9 = scalar_lea.vmem (!%p319_p10), [#allocation3], %s1104_s8 }
  0x5d   : > { %v1236_v0 = vld [vmem:[%s1738_s5 + $0xe0] sm:$0xf]  ;;  %v1418_v1 = vld [vmem:[%s1738_s5 + $0xec] sm:$0xf0]  ;;  %v1416_v5 = vld [vmem:[%s1738_s5 + $0xe4] sm:$0xf] }
  0x5e   : > { %v1364_v2 = vld [vmem:[%s1738_s5 + $0x1e0] sm:$0xf]  ;;  %v1237_v3 = vor.u32 %v1418_v1, %v1236_v0  ;;  %v1450_v4 = vld [vmem:[%s1738_s5 + $0x1ec] sm:$0xf0]  ;;  %v1238_v6 = vld [vmem:[%s1738_s5 + $0xf0] sm:$0xf0] }
  0x5f   : > { %v1365_v7 = vor.u32 %v1450_v4, %v1364_v2  ;;  %v1241_v8 = vor.u32 %v1416_v5, %v1238_v6  ;;  %v1448_v9 = vld [vmem:[%s1738_s5 + $0x1e4] sm:$0xf]  ;;  %v1366_v10 = vld [vmem:[%s1738_s5 + $0x1f0] sm:$0xf0]  ;;  %v1220_v11 = vld [vmem:[%s1738_s5 + $0xc0] sm:$0xf] }
  0x60   : > { %790 = vmatpush.bf16.msra.mxu0 %v1237_v3  ;;  %v1369_v12 = vor.u32 %v1448_v9, %v1366_v10  ;;  %v1414_v13 = vld [vmem:[%s1738_s5 + $0xcc] sm:$0xf0]  ;;  %v1348_v14 = vld [vmem:[%s1738_s5 + $0x1c0] sm:$0xf]  ;;  %v1412_v18 = vld [vmem:[%s1738_s5 + $0xc4] sm:$0xf] }
  0x61   : > { %v1446_v15 = vld [vmem:[%s1738_s5 + $0x1cc] sm:$0xf0]  ;;  %809 = vmatpush.bf16.msra.mxu1 %v1365_v7  ;;  %828 = vmatpush.bf16.msra.mxu2 %v1241_v8  ;;  %v1221_v16 = vor.u32 %v1414_v13, %v1220_v11  ;;  %v1222_v19 = vld [vmem:[%s1738_s5 + $0xd0] sm:$0xf0]  ;;  %v1444_v20 = vld [vmem:[%s1738_s5 + $0x1c4] sm:$0xf] }
  0x62   : > { %v1349_v17 = vor.u32 %v1446_v15, %v1348_v14  ;;  %847 = vmatpush.bf16.msra.mxu3 %v1369_v12  ;;  %v1225_v21 = vor.u32 %v1412_v18, %v1222_v19  ;;  %v1350_v22 = vld [vmem:[%s1738_s5 + $0x1d0] sm:$0xf0]  ;;  %v1204_v23 = vld [vmem:[%s1738_s5 + $0xa0] sm:$0xf]  ;;  %v1410_v24 = vld [vmem:[%s1738_s5 + $0xac] sm:$0xf0] }
  0x63   : > { %v1353_v25 = vor.u32 %v1444_v20, %v1350_v22  ;;  %v1332_v26 = vld [vmem:[%s1738_s5 + $0x1a0] sm:$0xf]  ;;  %v1442_v27 = vld [vmem:[%s1738_s5 + $0x1ac] sm:$0xf0]  ;;  %v1408_v28 = vld [vmem:[%s1738_s5 + $0xa4] sm:$0xf]  ;;  %v1205_v29 = vor.u32 %v1410_v24, %v1204_v23 }
  0x64   : > { %791 = vmatpush.bf16.msra.mxu0 %v1221_v16  ;;  %v1206_v30 = vld [vmem:[%s1738_s5 + $0xb0] sm:$0xf0]  ;;  %v1440_v31 = vld [vmem:[%s1738_s5 + $0x1a4] sm:$0xf]  ;;  %v1333_v33 = vor.u32 %v1442_v27, %v1332_v26  ;;  %v1188_v35 = vld [vmem:[%s1738_s5 + $0x80] sm:$0xf] }
  0x65   : > { %v1334_v32 = vld [vmem:[%s1738_s5 + $0x1b0] sm:$0xf0]  ;;  %810 = vmatpush.bf16.msra.mxu1 %v1349_v17  ;;  %829 = vmatpush.bf16.msra.mxu2 %v1225_v21  ;;  %v1209_v34 = vor.u32 %v1408_v28, %v1206_v30  ;;  %v1406_v36 = vld [vmem:[%s1738_s5 + $0x8c] sm:$0xf0]  ;;  %v1316_v37 = vld [vmem:[%s1738_s5 + $0x180] sm:$0xf] }
  0x66   : > { %848 = vmatpush.bf16.msra.mxu3 %v1353_v25  ;;  %v1337_v38 = vor.u32 %v1440_v31, %v1334_v32  ;;  %v1438_v39 = vld [vmem:[%s1738_s5 + $0x18c] sm:$0xf0]  ;;  %v1404_v40 = vld [vmem:[%s1738_s5 + $0x84] sm:$0xf]  ;;  %v1190_v41 = vld [vmem:[%s1738_s5 + $0x90] sm:$0xf0]  ;;  %v1189_v44 = vor.u32 %v1406_v36, %v1188_v35 }
  0x67   : > { %v1436_v42 = vld [vmem:[%s1738_s5 + $0x184] sm:$0xf]  ;;  %v1318_v43 = vld [vmem:[%s1738_s5 + $0x190] sm:$0xf0]  ;;  %v1317_v45 = vor.u32 %v1438_v39, %v1316_v37  ;;  %v1193_v46 = vor.u32 %v1404_v40, %v1190_v41  ;;  %v1172_v47 = vld [vmem:[%s1738_s5 + $0x60] sm:$0xf] }
  0x68   : > { %792 = vmatpush.bf16.msra.mxu0 %v1205_v29  ;;  %v1402_v48 = vld [vmem:[%s1738_s5 + $0x6c] sm:$0xf0]  ;;  %v1300_v49 = vld [vmem:[%s1738_s5 + $0x160] sm:$0xf]  ;;  %v1321_v50 = vor.u32 %v1436_v42, %v1318_v43  ;;  %v1400_v52 = vld [vmem:[%s1738_s5 + $0x64] sm:$0xf] }
  0x69   : > { %811 = vmatpush.bf16.msra.mxu1 %v1333_v33  ;;  %830 = vmatpush.bf16.msra.mxu2 %v1209_v34  ;;  %v1434_v51 = vld [vmem:[%s1738_s5 + $0x16c] sm:$0xf0]  ;;  %v1174_v53 = vld [vmem:[%s1738_s5 + $0x70] sm:$0xf0]  ;;  %v1432_v54 = vld [vmem:[%s1738_s5 + $0x164] sm:$0xf]  ;;  %v1173_v56 = vor.u32 %v1402_v48, %v1172_v47 }
  0x6a   : > { %849 = vmatpush.bf16.msra.mxu3 %v1337_v38  ;;  %v1302_v55 = vld [vmem:[%s1738_s5 + $0x170] sm:$0xf0]  ;;  %v1301_v57 = vor.u32 %v1434_v51, %v1300_v49  ;;  %v1177_v58 = vor.u32 %v1400_v52, %v1174_v53  ;;  %v1156_v59 = vld [vmem:[%s1738_s5 + $0x40] sm:$0xf]  ;;  %v1398_v60 = vld [vmem:[%s1738_s5 + $0x4c] sm:$0xf0] }
  0x6b   : > { %v1284_v61 = vld [vmem:[%s1738_s5 + $0x140] sm:$0xf]  ;;  %v1305_v62 = vor.u32 %v1432_v54, %v1302_v55  ;;  %v1430_v63 = vld [vmem:[%s1738_s5 + $0x14c] sm:$0xf0]  ;;  %v1396_v0 = vld [vmem:[%s1738_s5 + $0x44] sm:$0xf]  ;;  %v1157_v4 = vor.u32 %v1398_v60, %v1156_v59 }
  0x6c   : > { %793 = vmatpush.bf16.msra.mxu0 %v1189_v44  ;;  %v1158_v1 = vld [vmem:[%s1738_s5 + $0x50] sm:$0xf0]  ;;  %v1428_v2 = vld [vmem:[%s1738_s5 + $0x144] sm:$0xf]  ;;  %v1285_v5 = vor.u32 %v1430_v63, %v1284_v61  ;;  %v1140_v7 = vld [vmem:[%s1738_s5 + $0x20] sm:$0xf] }
  0x6d   : > { %812 = vmatpush.bf16.msra.mxu1 %v1317_v45  ;;  %831 = vmatpush.bf16.msra.mxu2 %v1193_v46  ;;  %v1286_v3 = vld [vmem:[%s1738_s5 + $0x150] sm:$0xf0]  ;;  %v1161_v6 = vor.u32 %v1396_v0, %v1158_v1  ;;  %v1394_v8 = vld [vmem:[%s1738_s5 + $0x2c] sm:$0xf0]  ;;  %v1268_v9 = vld [vmem:[%s1738_s5 + $0x120] sm:$0xf] }
  0x6e   : > { %850 = vmatpush.bf16.msra.mxu3 %v1321_v50  ;;  %v1289_v10 = vor.u32 %v1428_v2, %v1286_v3  ;;  %v1426_v11 = vld [vmem:[%s1738_s5 + $0x12c] sm:$0xf0]  ;;  %v1392_v12 = vld [vmem:[%s1738_s5 + $0x24] sm:$0xf]  ;;  %v1142_v13 = vld [vmem:[%s1738_s5 + $0x30] sm:$0xf0]  ;;  %v1141_v16 = vor.u32 %v1394_v8, %v1140_v7 }
  0x6f   : > { %v1424_v14 = vld [vmem:[%s1738_s5 + $0x124] sm:$0xf]  ;;  %v1270_v15 = vld [vmem:[%s1738_s5 + $0x130] sm:$0xf0]  ;;  %v1124_v17 = vld [vmem:[%s1738_s5] sm:$0xf]  ;;  %v1269_v19 = vor.u32 %v1426_v11, %v1268_v9  ;;  %v1145_v20 = vor.u32 %v1392_v12, %v1142_v13 }
  0x70   : > { %794 = vmatpush.bf16.msra.mxu0 %v1173_v56  ;;  %v1390_v18 = vld [vmem:[%s1738_s5 + $0xc] sm:$0xf0]  ;;  %v1252_v21 = vld [vmem:[%s1738_s5 + $0x100] sm:$0xf]  ;;  %v1388_v23 = vld [vmem:[%s1738_s5 + $0x4] sm:$0xf]  ;;  %v1273_v24 = vor.u32 %v1424_v14, %v1270_v15 }
  0x71   : > { %813 = vmatpush.bf16.msra.mxu1 %v1301_v57  ;;  %832 = vmatpush.bf16.msra.mxu2 %v1177_v58  ;;  %v1422_v22 = vld [vmem:[%s1738_s5 + $0x10c] sm:$0xf0]  ;;  %v1126_v25 = vld [vmem:[%s1738_s5 + $0x10] sm:$0xf0]  ;;  %v1420_v26 = vld [vmem:[%s1738_s5 + $0x104] sm:$0xf]  ;;  %v1125_v31 = vor.u32 %v1390_v18, %v1124_v17 }
  0x72   : > { %851 = vmatpush.bf16.msra.mxu3 %v1305_v62  ;;  %v1254_v27 = vld [vmem:[%s1738_s5 + $0x110] sm:$0xf0]  ;;  %v1108_v28 = vld [vmem:[%s1961_s0] sm:$0xf]  ;;  %v1417_v29 = vld [vmem:[%s1738_s5 + $0xec] sm:$0xf]  ;;  %v1253_v35 = vor.u32 %v1422_v22, %v1252_v21  ;;  %v1129_v36 = vor.u32 %v1388_v23, %v1126_v25 }
  0x73   : > { %v1246_v30 = vld [vmem:[%s1738_s5 + $0xf8] sm:$0xf0]  ;;  %v1385_v32 = vld [vmem:[%s1961_s0 + $0x4] sm:$0xf0]  ;;  %v1451_v34 = vld [vmem:[%s1738_s5 + $0x1f4] sm:$0xf0]  ;;  %v1257_v39 = vor.u32 %v1420_v26, %v1254_v27 }
  0x74   : > { %795 = vmatpush.bf16.msra.mxu0 %v1157_v4  ;;  %v1372_v33 = vld [vmem:[%s1738_s5 + $0x1e8] sm:$0xf]  ;;  %v1384_v37 = vld [vmem:[%s1961_s0 + $0x4] sm:$0xf]  ;;  %v1110_v38 = vld [vmem:[%s1961_s0 + $0x8] sm:$0xf0]  ;;  %v1249_v40 = vor.u32 %v1417_v29, %v1246_v30  ;;  %v1823_v44 = vor.u32 %v1385_v32, %v1108_v28 }
  0x75   : > { %814 = vmatpush.bf16.msra.mxu1 %v1285_v5  ;;  %833 = vmatpush.bf16.msra.mxu2 %v1161_v6  ;;  %v1244_v41 = vld [vmem:[%s1738_s5 + $0xe8] sm:$0xf]  ;;  %v1419_v42 = vld [vmem:[%s1738_s5 + $0xf4] sm:$0xf0]  ;;  %v1449_v43 = vld [vmem:[%s1738_s5 + $0x1ec] sm:$0xf]  ;;  %v1373_v45 = vor.u32 %v1451_v34, %v1372_v33  ;;  %v1828_v49 = vor.u32 %v1384_v37, %v1110_v38 }
  0x76   : > { %852 = vmatpush.bf16.msra.mxu3 %v1289_v10  ;;  %v1374_v46 = vld [vmem:[%s1738_s5 + $0x1f8] sm:$0xf0]  ;;  %v1413_v47 = vld [vmem:[%s1738_s5 + $0xcc] sm:$0xf]  ;;  %v1356_v50 = vld [vmem:[%s1738_s5 + $0x1c8] sm:$0xf]  ;;  %v1245_v52 = vor.u32 %v1419_v42, %v1244_v41 }
  0x77   : > { %v1230_v48 = vld [vmem:[%s1738_s5 + $0xd8] sm:$0xf0]  ;;  %v1447_v51 = vld [vmem:[%s1738_s5 + $0x1d4] sm:$0xf0]  ;;  %v1377_v53 = vor.u32 %v1449_v43, %v1374_v46  ;;  %v1228_v55 = vld [vmem:[%s1738_s5 + $0xc8] sm:$0xf] }
  0x78   : > { %796 = vmatpush.bf16.msra.mxu0 %v1141_v16  ;;  %v1233_v54 = vor.u32 %v1413_v47, %v1230_v48  ;;  %v1415_v56 = vld [vmem:[%s1738_s5 + $0xd4] sm:$0xf0]  ;;  %v1445_v57 = vld [vmem:[%s1738_s5 + $0x1cc] sm:$0xf]  ;;  %v1357_v58 = vor.u32 %v1447_v51, %v1356_v50  ;;  %v1358_v59 = vld [vmem:[%s1738_s5 + $0x1d8] sm:$0xf0] }
  0x79   : > { %815 = vmatpush.bf16.msra.mxu1 %v1269_v19  ;;  %834 = vmatpush.bf16.msra.mxu2 %v1145_v20  ;;  %v1409_v60 = vld [vmem:[%s1738_s5 + $0xac] sm:$0xf]  ;;  %v1214_v61 = vld [vmem:[%s1738_s5 + $0xb8] sm:$0xf0]  ;;  %v1340_v62 = vld [vmem:[%s1738_s5 + $0x1a8] sm:$0xf]  ;;  %v1229_v0 = vor.u32 %v1415_v56, %v1228_v55  ;;  %v1361_v1 = vor.u32 %v1445_v57, %v1358_v59 }
  0x7a   : > { %853 = vmatpush.bf16.msra.mxu3 %v1273_v24  ;;  %v1443_v63 = vld [vmem:[%s1738_s5 + $0x1b4] sm:$0xf0]  ;;  %v1217_v2 = vor.u32 %v1409_v60, %v1214_v61  ;;  %v1212_v3 = vld [vmem:[%s1738_s5 + $0xa8] sm:$0xf]  ;;  %v1441_v5 = vld [vmem:[%s1738_s5 + $0x1ac] sm:$0xf] }
  0x7b   : > { %v1411_v4 = vld [vmem:[%s1738_s5 + $0xb4] sm:$0xf0]  ;;  %v1341_v6 = vor.u32 %v1443_v63, %v1340_v62  ;;  %v1342_v7 = vld [vmem:[%s1738_s5 + $0x1b8] sm:$0xf0]  ;;  %v1405_v8 = vld [vmem:[%s1738_s5 + $0x8c] sm:$0xf] }
  0x7c   : > { %797 = vmatpush.bf16.msra.mxu0 %v1125_v31  ;;  %v1198_v9 = vld [vmem:[%s1738_s5 + $0x98] sm:$0xf0]  ;;  %v1324_v10 = vld [vmem:[%s1738_s5 + $0x188] sm:$0xf]  ;;  %v1439_v11 = vld [vmem:[%s1738_s5 + $0x194] sm:$0xf0]  ;;  %v1213_v12 = vor.u32 %v1411_v4, %v1212_v3  ;;  %v1345_v14 = vor.u32 %v1441_v5, %v1342_v7 }
  0x7d   : > { %816 = vmatpush.bf16.msra.mxu1 %v1253_v35  ;;  %835 = vmatpush.bf16.msra.mxu2 %v1129_v36  ;;  %v1196_v13 = vld [vmem:[%s1738_s5 + $0x88] sm:$0xf]  ;;  %v1201_v15 = vor.u32 %v1405_v8, %v1198_v9  ;;  %v1407_v16 = vld [vmem:[%s1738_s5 + $0x94] sm:$0xf0]  ;;  %v1437_v17 = vld [vmem:[%s1738_s5 + $0x18c] sm:$0xf]  ;;  %v1325_v19 = vor.u32 %v1439_v11, %v1324_v10 }
  0x7e   : > { %854 = vmatpush.bf16.msra.mxu3 %v1257_v39  ;;  %v1326_v18 = vld [vmem:[%s1738_s5 + $0x198] sm:$0xf0]  ;;  %v1116_v20 = vld [vmem:[%s1961_s0 + $0x10] sm:$0xf]  ;;  %v1401_v21 = vld [vmem:[%s1738_s5 + $0x6c] sm:$0xf]  ;;  %v1197_v26 = vor.u32 %v1407_v16, %v1196_v13 }
  0x7f   : > { %798 = vmatmul.bf16.vlgmr.msra.gmra.mxu0 %v1823_v44  ;;  %v1182_v22 = vld [vmem:[%s1738_s5 + $0x78] sm:$0xf0]  ;;  %v1387_v23 = vld [vmem:[%s1961_s0 + $0x14] sm:$0xf0]  ;;  %v1308_v24 = vld [vmem:[%s1738_s5 + $0x168] sm:$0xf]  ;;  %v1329_v29 = vor.u32 %v1437_v17, %v1326_v18 }
  0x80   : > { %817 = vmatmul.bf16.vlgmr.msra.gmra.mxu1 %v1828_v49  ;;  %836 = vmatmul.bf16.vlgmr.msra.gmra.mxu2 %v1823_v44  ;;  %v1435_v25 = vld [vmem:[%s1738_s5 + $0x174] sm:$0xf0]  ;;  %v1386_v27 = vld [vmem:[%s1961_s0 + $0x14] sm:$0xf]  ;;  %v1118_v28 = vld [vmem:[%s1961_s0 + $0x18] sm:$0xf0]  ;;  %v1185_v30 = vor.u32 %v1401_v21, %v1182_v22  ;;  %v1875_v34 = vor.u32 %v1387_v23, %v1116_v20 }
  0x81   : > { %904 = vmatpush.bf16.msrb.mxu2 %v1249_v40  ;;  %885 = vmatpush.bf16.msrb.mxu1 %v1373_v45  ;;  %v1180_v31 = vld [vmem:[%s1738_s5 + $0x68] sm:$0xf]  ;;  %v1403_v32 = vld [vmem:[%s1738_s5 + $0x74] sm:$0xf0]  ;;  %v1433_v33 = vld [vmem:[%s1738_s5 + $0x16c] sm:$0xf]  ;;  %v1309_v35 = vor.u32 %v1435_v25, %v1308_v24  ;;  %v1880_v39 = vor.u32 %v1386_v27, %v1118_v28 }
  0x82   : > { %855 = vmatmul.bf16.vlgmr.msra.gmra.mxu3 %v1828_v49  ;;  %866 = vmatpush.bf16.msrb.mxu0 %v1245_v52  ;;  %v1310_v36 = vld [vmem:[%s1738_s5 + $0x178] sm:$0xf0]  ;;  %v1397_v37 = vld [vmem:[%s1738_s5 + $0x4c] sm:$0xf]  ;;  %v1292_v40 = vld [vmem:[%s1738_s5 + $0x148] sm:$0xf]  ;;  %v1181_v42 = vor.u32 %v1403_v32, %v1180_v31 }
  0x83   : > { %923 = vmatpush.bf16.msrb.mxu3 %v1377_v53  ;;  %v1166_v38 = vld [vmem:[%s1738_s5 + $0x58] sm:$0xf0]  ;;  %v1431_v41 = vld [vmem:[%s1738_s5 + $0x154] sm:$0xf0]  ;;  %v1313_v43 = vor.u32 %v1433_v33, %v1310_v36  ;;  %v1164_v46 = vld [vmem:[%s1738_s5 + $0x48] sm:$0xf] }
  0x84   : > { %v1169_v45 = vor.u32 %v1397_v37, %v1166_v38  ;;  %v1399_v47 = vld [vmem:[%s1738_s5 + $0x54] sm:$0xf0]  ;;  %v1429_v48 = vld [vmem:[%s1738_s5 + $0x14c] sm:$0xf]  ;;  %v1293_v50 = vor.u32 %v1431_v41, %v1292_v40  ;;  %v1294_v51 = vld [vmem:[%s1738_s5 + $0x158] sm:$0xf0] }
  0x85   : > { %905 = vmatpush.bf16.msrb.mxu2 %v1233_v54  ;;  %886 = vmatpush.bf16.msrb.mxu1 %v1357_v58  ;;  %v1393_v52 = vld [vmem:[%s1738_s5 + $0x2c] sm:$0xf]  ;;  %v1150_v53 = vld [vmem:[%s1738_s5 + $0x38] sm:$0xf0]  ;;  %v1276_v54 = vld [vmem:[%s1738_s5 + $0x128] sm:$0xf]  ;;  %v1165_v56 = vor.u32 %v1399_v47, %v1164_v46  ;;  %v1297_v57 = vor.u32 %v1429_v48, %v1294_v51 }
  0x86   : > { %867 = vmatpush.bf16.msrb.mxu0 %v1229_v0  ;;  %v1427_v55 = vld [vmem:[%s1738_s5 + $0x134] sm:$0xf0]  ;;  %v1153_v58 = vor.u32 %v1393_v52, %v1150_v53  ;;  %v1148_v59 = vld [vmem:[%s1738_s5 + $0x28] sm:$0xf]  ;;  %v1425_v61 = vld [vmem:[%s1738_s5 + $0x12c] sm:$0xf] }
  0x87   : > { %924 = vmatpush.bf16.msrb.mxu3 %v1361_v1  ;;  %v1395_v60 = vld [vmem:[%s1738_s5 + $0x34] sm:$0xf0]  ;;  %v1277_v62 = vor.u32 %v1427_v55, %v1276_v54  ;;  %v1278_v63 = vld [vmem:[%s1738_s5 + $0x138] sm:$0xf0]  ;;  %v1389_v0 = vld [vmem:[%s1738_s5 + $0xc] sm:$0xf] }
  0x88   : > { %v1134_v1 = vld [vmem:[%s1738_s5 + $0x18] sm:$0xf0]  ;;  %v1423_v3 = vld [vmem:[%s1738_s5 + $0x114] sm:$0xf0]  ;;  %v1149_v4 = vor.u32 %v1395_v60, %v1148_v59  ;;  %v1281_v5 = vor.u32 %v1425_v61, %v1278_v63  ;;  %v1132_v7 = vld [vmem:[%s1738_s5 + $0x8] sm:$0xf] }
  0x89   : > { %906 = vmatpush.bf16.msrb.mxu2 %v1217_v2  ;;  %887 = vmatpush.bf16.msrb.mxu1 %v1341_v6  ;;  %v1260_v2 = vld [vmem:[%s1738_s5 + $0x108] sm:$0xf]  ;;  %v1137_v6 = vor.u32 %v1389_v0, %v1134_v1  ;;  %v1391_v8 = vld [vmem:[%s1738_s5 + $0x14] sm:$0xf0]  ;;  %v1421_v10 = vld [vmem:[%s1738_s5 + $0x10c] sm:$0xf] }
  0x8a   : > { %868 = vmatpush.bf16.msrb.mxu0 %v1213_v12  ;;  %v1261_v9 = vor.u32 %v1423_v3, %v1260_v2  ;;  %v1262_v11 = vld [vmem:[%s1738_s5 + $0x118] sm:$0xf0]  ;;  %v1133_v12 = vor.u32 %v1391_v8, %v1132_v7  ;;  %s1973_s4 = smov (!%p366_p11, %s1105_s4), 11  ;;  %s1452_s12 = sshll.u32 (%p1588_p6), %s1523_s14, 4 }
  0x8b   : > { %925 = vmatpush.bf16.msrb.mxu3 %v1345_v14  ;;  %v1265_v13 = vor.u32 %v1421_v10, %v1262_v11  ;;  %s368_s7 = scalar_lea.vmem %s1963_s2, %s1973_s4  ;;  %s970_s11 = scalar_lea.vmem (%p1588_p6), %s1964_s3, %s1452_s12 }
  0x8c   : > { %v440_v14 = vld [vmem:[%s368_s7] sm:$0xf] }
  0x8d   : > { %907 = vmatpush.bf16.msrb.mxu2 %v1201_v15  ;;  %888 = vmatpush.bf16.msrb.mxu1 %v1325_v19  ;;  %v443_v17 = vperm.slane %v440_v14, 1 }
  0x8e   : > { %869 = vmatpush.bf16.msrb.mxu0 %v1197_v26 }
  0x8f   : > { %926 = vmatpush.bf16.msrb.mxu3 %v1329_v29  ;;  %803 = vmatmul.bf16.gmra.mxu0 %v1875_v34 }
  0x90   : > { %822 = vmatmul.bf16.gmra.mxu1 %v1880_v39  ;;  %841 = vmatmul.bf16.gmra.mxu2 %v1875_v34 }
  0x91   : > { %908 = vmatpush.bf16.msrb.mxu2 %v1185_v30  ;;  %889 = vmatpush.bf16.msrb.mxu1 %v1309_v35 }
  0x92   : > { %860 = vmatmul.bf16.gmra.mxu3 %v1880_v39  ;;  %870 = vmatpush.bf16.msrb.mxu0 %v1181_v42 }
  0x93   : > { %927 = vmatpush.bf16.msrb.mxu3 %v1313_v43 }
  0x95   : > { %909 = vmatpush.bf16.msrb.mxu2 %v1169_v45  ;;  %890 = vmatpush.bf16.msrb.mxu1 %v1293_v50  ;;  %v444_v50 = vperm.slane %v440_v14, 2 }
  0x96   : > { %871 = vmatpush.bf16.msrb.mxu0 %v1165_v56 }
  0x97   : > { %928 = vmatpush.bf16.msrb.mxu3 %v1297_v57  ;;  %v445_v57 = vperm.slane %v440_v14, 3 }
  0x99   : > { %910 = vmatpush.bf16.msrb.mxu2 %v1153_v58  ;;  %891 = vmatpush.bf16.msrb.mxu1 %v1277_v62 }
  0x9a   : > { %872 = vmatpush.bf16.msrb.mxu0 %v1149_v4 }
  0x9b   : > { %929 = vmatpush.bf16.msrb.mxu3 %v1281_v5 }
  0x9d   : > { %911 = vmatpush.bf16.msrb.mxu2 %v1137_v6  ;;  %892 = vmatpush.bf16.msrb.mxu1 %v1261_v9 }
  0x9e   : > { %873 = vmatpush.bf16.msrb.mxu0 %v1133_v12 }
  0x9f   : > { %930 = vmatpush.bf16.msrb.mxu3 %v1265_v13 }
  0xa0   : > { %893 = vmatmul.bf16.vlgmr.msrb.gmra.mxu1 %v1828_v49  ;;  %912 = vmatmul.bf16.vlgmr.msrb.gmra.mxu2 %v1823_v44 }
  0xa1   : > { %874 = vmatmul.bf16.vlgmr.msrb.gmra.mxu0 %v1823_v44  ;;  %v442_v44 = vperm.slane %v440_v14, 0 }
  0xa2   : > { %931 = vmatmul.bf16.vlgmr.msrb.gmra.mxu3 %v1828_v49 }
  0xb0   : > { %898 = vmatmul.bf16.gmra.mxu1 %v1880_v39  ;;  %917 = vmatmul.bf16.gmra.mxu2 %v1875_v34 }
  0xb1   : > { %879 = vmatmul.bf16.gmra.mxu0 %v1875_v34 }
  0xb2   : > { %936 = vmatmul.bf16.gmra.mxu3 %v1880_v39 }
  0xfc   : > { %v799_v15 = vpop.f32.mrf.mxu0 }
  0xfd   : > { %v818_v49 = vpop.f32.mrf.mxu1  ;;  %v800_v16 = vadd.f32 %v799_v15, %v442_v44 }
  0xff   : > { %v819_v19 = vadd.f32 %v818_v49, %v800_v16 }
 0x103   : > { %v837_v18 = vpop.f32.mrf.mxu2 }
 0x104   : > { %v838_v20 = vadd.f32 %v837_v18, %v443_v17  ;;  %v801_v22 = vpop.f32.mrf.mxu0 }
 0x105   : > { %v856_v21 = vpop.f32.mrf.mxu3  ;;  %v820_v23 = vpop.f32.mrf.mxu1  ;;  %v802_v26 = vadd.f32 %v801_v22, %v442_v44 }
 0x106   : > { %v857_v24 = vadd.f32 %v856_v21, %v838_v20 }
 0x107   : > { %v821_v32 = vadd.f32 %v820_v23, %v802_v26 }
 0x108   : > { %v942_v25 = vpack.c.bf16 %v857_v24, %v819_v19 }
 0x10a   : > { %950 = vst [vmem:[%s1922_s9] sm:$0xff] %v942_v25 }
 0x10b   : > { %v839_v27 = vpop.f32.mrf.mxu2 }
 0x10c   : > { %v840_v28 = vadd.f32 %v839_v27, %v443_v17  ;;  %v804_v30 = vpop.f32.mrf.mxu0 }
 0x10d   : > { %v858_v29 = vpop.f32.mrf.mxu3  ;;  %v823_v31 = vpop.f32.mrf.mxu1  ;;  %v805_v35 = vadd.f32 %v804_v30, %v442_v44 }
 0x10e   : > { %v859_v33 = vadd.f32 %v858_v29, %v840_v28 }
 0x10f   : > { %v824_v37 = vadd.f32 %v823_v31, %v805_v35 }
 0x110   : > { %v944_v34 = vpack.c.bf16 %v859_v33, %v821_v32 }
 0x111   : > { %v983_v25 = vld [vmem:[%s1922_s9] sm:$0xff] (%p1588_p6) }
 0x112   : > { %952 = vst [vmem:[%s1922_s9 + $0x10] sm:$0xff] %v944_v34 }
 0x113   : > { %v842_v36 = vpop.f32.mrf.mxu2  ;;  %984 = vst [vmem:[%s970_s11] sm:$0xff] (%p1588_p6), %v983_v25 }
 0x114   : > { %v843_v38 = vadd.f32 %v842_v36, %v443_v17  ;;  %v806_v40 = vpop.f32.mrf.mxu0 }
 0x115   : > { %v861_v39 = vpop.f32.mrf.mxu3  ;;  %v825_v41 = vpop.f32.mrf.mxu1  ;;  %v807_v45 = vadd.f32 %v806_v40, %v442_v44 }
 0x116   : > { %v862_v42 = vadd.f32 %v861_v39, %v843_v38 }
 0x117   : > { %v826_v52 = vadd.f32 %v825_v41, %v807_v45 }
 0x118   : > { %v946_v43 = vpack.c.bf16 %v862_v42, %v824_v37 }
 0x119   : > { %v987_v27 = vld [vmem:[%s1922_s9 + $0x10] sm:$0xff] (%p1588_p6) }
 0x11a   : > { %954 = vst [vmem:[%s1922_s9 + $0x20] sm:$0xff] %v946_v43 }
 0x11b   : > { %v844_v46 = vpop.f32.mrf.mxu2  ;;  %988 = vst [vmem:[%s970_s11 + $0x30] sm:$0xff] (%p1588_p6), %v987_v27 }
 0x11c   : > { %v845_v47 = vadd.f32 %v844_v46, %v443_v17 }
 0x11d   : > { %v863_v48 = vpop.f32.mrf.mxu3  ;;  %v894_v54 = vpop.f32.mrf.mxu1 }
 0x11e   : > { %v875_v51 = vpop.f32.mrf.mxu0  ;;  %v864_v53 = vadd.f32 %v863_v48, %v845_v47 }
 0x11f   : > { %v876_v56 = vadd.f32 %v875_v51, %v444_v50 }
 0x120   : > { %v948_v55 = vpack.c.bf16 %v864_v53, %v826_v52 }
 0x121   : > { %v895_v60 = vadd.f32 %v894_v54, %v876_v56  ;;  %v991_v29 = vld [vmem:[%s1922_s9 + $0x20] sm:$0xff] (%p1588_p6) }
 0x122   : > { %956 = vst [vmem:[%s1922_s9 + $0x30] sm:$0xff] %v948_v55 }
 0x123   : > { %v913_v58 = vpop.f32.mrf.mxu2  ;;  %992 = vst [vmem:[%s970_s11 + $0x60] sm:$0xff] (%p1588_p6), %v991_v29 }
 0x124   : > { %v914_v61 = vadd.f32 %v913_v58, %v445_v57 }
 0x125   : > { %v932_v59 = vpop.f32.mrf.mxu3  ;;  %v896_v1 = vpop.f32.mrf.mxu1 }
 0x126   : > { %v877_v62 = vpop.f32.mrf.mxu0  ;;  %v933_v63 = vadd.f32 %v932_v59, %v914_v61 }
 0x127   : > { %v878_v2 = vadd.f32 %v877_v62, %v444_v50 }
 0x128   : > { %v943_v0 = vpack.c.bf16 %v933_v63, %v895_v60 }
 0x129   : > { %v897_v7 = vadd.f32 %v896_v1, %v878_v2  ;;  %v995_v31 = vld [vmem:[%s1922_s9 + $0x30] sm:$0xff] (%p1588_p6) }
 0x12a   : > { %951 = vst [vmem:[%s1922_s9 + $0x8] sm:$0xff] %v943_v0 }
 0x12b   : > { %v915_v3 = vpop.f32.mrf.mxu2  ;;  %996 = vst [vmem:[%s970_s11 + $0x90] sm:$0xff] (%p1588_p6), %v995_v31 }
 0x12c   : > { %v916_v5 = vadd.f32 %v915_v3, %v445_v57 }
 0x12d   : > { %v934_v4 = vpop.f32.mrf.mxu3  ;;  %v899_v11 = vpop.f32.mrf.mxu1 }
 0x12e   : > { %v880_v6 = vpop.f32.mrf.mxu0  ;;  %v935_v8 = vadd.f32 %v934_v4, %v916_v5 }
 0x12f   : > { %v881_v10 = vadd.f32 %v880_v6, %v444_v50 }
 0x130   : > { %v945_v9 = vpack.c.bf16 %v935_v8, %v897_v7 }
 0x131   : > { %v900_v14 = vadd.f32 %v899_v11, %v881_v10  ;;  %v985_v26 = vld [vmem:[%s1922_s9 + $0x8] sm:$0xff] (%p1588_p6) }
 0x132   : > { %953 = vst [vmem:[%s1922_s9 + $0x18] sm:$0xff] %v945_v9 }
 0x133   : > { %v918_v12 = vpop.f32.mrf.mxu2  ;;  %986 = vst [vmem:[%s970_s11 + $0x8] sm:$0xff] (%p1588_p6), %v985_v26 }
 0x134   : > { %v919_v44 = vadd.f32 %v918_v12, %v445_v57 }
 0x135   : > { %v937_v13 = vpop.f32.mrf.mxu3  ;;  %v901_v20 = vpop.f32.mrf.mxu1 }
 0x136   : > { %v938_v15 = vadd.f32 %v937_v13, %v919_v44  ;;  %v882_v49 = vpop.f32.mrf.mxu0 }
 0x137   : > { %v883_v17 = vadd.f32 %v882_v49, %v444_v50 }
 0x138   : > { %v947_v16 = vpack.c.bf16 %v938_v15, %v900_v14 }
 0x139   : > { %v902_v22 = vadd.f32 %v901_v20, %v883_v17  ;;  %v989_v28 = vld [vmem:[%s1922_s9 + $0x18] sm:$0xff] (%p1588_p6) }
 0x13a   : > { %955 = vst [vmem:[%s1922_s9 + $0x28] sm:$0xff] %v947_v16 }
 0x13b   : > { %v920_v18 = vpop.f32.mrf.mxu2  ;;  %990 = vst [vmem:[%s970_s11 + $0x38] sm:$0xff] (%p1588_p6), %v989_v28 }
 0x13c   : > { %v921_v19 = vadd.f32 %v920_v18, %v445_v57 }
 0x13d   : > { %v939_v21 = vpop.f32.mrf.mxu3 }
 0x13e   : > { %v940_v23 = vadd.f32 %v939_v21, %v921_v19  ;;  %964 = sbr.rel (!%p1588_p6) target bundleno = 331 (0x14b), region = 59 }
 0x140   : > { %v949_v24 = vpack.c.bf16 %v940_v23, %v902_v22 }
 0x141   : > { %v993_v30 = vld [vmem:[%s1922_s9 + $0x28] sm:$0xff] (%p1588_p6) }
 0x142   : > { %957 = vst [vmem:[%s1922_s9 + $0x38] sm:$0xff] %v949_v24 }
 0x143   : > { %994 = vst [vmem:[%s970_s11 + $0x68] sm:$0xff] %v993_v30 }
 0x149   : > { %v997_v32 = vld [vmem:[%s1922_s9 + $0x38] sm:$0xff] }
 0x14a   : > { %998 = vst [vmem:[%s970_s11 + $0x98] sm:$0xff] %v997_v32 }
 0x14b PF: > { %s13_s16 = sadd.s32 1, %s1531_s16   ;;  %s1966_s12 = smov %s1519_s13 }
 0x14c   : > { %p10_p12 = scmp.ge.s32.totalorder %s13_s16, 5   ;;  %s1967_s13 = smov %s1593_s22 }
 0x14d   : > { %s1968_s14 = smov %s1527_s15  ;;  %s1969_s15 = smov %s1971_s17 }
 0x14e   :  { %12 = sbr.rel (!%p10_p12) target bundleno = 3 (0x3), region = 119 }

// kernel: _lambda_.14
= control target key start
LH: loop header
LB: loop body
LE: loop exit
PB: predicated region body
PF: predicated region fallthrough
CT: control target
= control target key end

     0   :  { %10 = vsyncpa [#allocation6], 0  ;;  %s2090_s0 = inlined_call_operand.vmem [shape: bf16[32,256], index: 0, kind: input, shape index: {}]   ;;  %s2091_s1 = inlined_call_operand.vmem [shape: bf16[32,1536], index: 1, kind: input, shape index: {}, may-alias: {1,2}]   ;;  %s2092_s2 = inlined_call_operand.vmem [shape: bf16[32,1536], index: 2, kind: input, shape index: {}, may-alias: {1,2}]   ;;  %s2093_s3 = inlined_call_operand.hbm [shape: bf16[256,768], index: 3, kind: input, shape index: {}]   ;;  %s2094_s4 = inlined_call_operand.vmem [shape: f32[1,768], index: 4, kind: input, shape index: {}]   ;;  %s2095_s5 = inlined_call_operand.vmem [shape: bf16[32,768], index: 5, kind: output, shape index: {}]  }
   0x1   :  { %12 = vsyncpa [#allocation6 + $0x1], 0  ;;  %s1758_s18 = smov 0   ;;  %s1760_s19 = smov 0  }
   0x2   :  { %s1762_s20 = smov 0   ;;  %s1764_s21 = smov 0  }
   0x3   :  { %s1766_s22 = smov 0   ;;  %s1768_s23 = smov 0  }
   0x4 LB: > { %s1787_s24 = sadd.s32 4294967295, %s1722_s23   ;;  %s27_s25 = sadd.s32 1, %s1718_s22  ;;  %s1722_s23 = sphi %s1768_s23, %s18_s23   ;;  %s1718_s22 = sphi %s1766_s22, %s2104_s22   ;;  %s1714_s21 = sphi %s1764_s21, %s2103_s21   ;;  %s1710_s20 = sphi %s1762_s20, %s2102_s20   ;;  %s1706_s19 = sphi %s1760_s19, %s2101_s19   ;;  %s1702_s18 = sphi %s1758_s18, %s2100_s18  }
   0x5   : > { %p28_p0 = scmp.ge.s32.totalorder %s27_s25, 2  ;;  %s115_s26 = sadd.s32 1, %s1710_s20 }
   0x6   : > { %p122_p1 = scmp.ne.s32.totalorder %s1710_s20, %s1706_s19  ;;  %p123_p2 = scmp.eq.s32.totalorder %s1722_s23, 0 }
   0x7   : > { %s2106_s25 = smov (%p28_p0, %s27_s25), 0  ;;  %p128_p4 = scmp.ne.s32.totalorder %s1706_s19, %s1702_s18 }
   0x8   : > { %p1796_p3 = por %p123_p2, %p122_p1  ;;  %s112_s28 = ssub.s32 %s1718_s22, %s2106_s25 }
   0x9   : > { %p129_p5 = scmp.eq.s32.totalorder %s1787_s24, 0  ;;  %p113_p6 = scmp.eq.s32.totalorder %s112_s28, 0 }
   0xa   : > { %p180_p7 = scmp.eq.s32.totalorder %s1787_s24, 1  ;;  %p1269_p9 = scmp.ge.s32.totalorder %s1722_s23, 1 }
   0xb   : > { %p1805_p8 = por %p129_p5, %p128_p4  ;;  %p193_p11 = scmp.lt.s32.totalorder %s1722_s23, 3 }
   0xc   : > { %s1811_s30 = scalar_select %p113_p6, %s1710_s20, %s115_s26  }
   0xd   : > { %p1813_p10 = por %p180_p7, %p122_p1  ;;  %p1818_p12 = pnand %p1269_p9, %p193_p11 }
   0xe   : > { %p1271_p13 = scmp.ne.s32.totalorder (!%p1818_p12), %s1787_s24, 0 }
   0xf   : > { %197 = sbr.rel (%p1818_p12) target bundleno = 40 (0x28), region = 12 }
  0x14   : > { %211 = sbr.rel (%p1271_p13) target bundleno = 30 (0x1e), region = 20 }
  0x19   : > { %v250_v0 = vld [vmem:[%s2091_s1] sm:$0xff]  ;;  %v252_v1 = vld [vmem:[%s2091_s1 + $0x30] sm:$0xff] }
  0x1a   : > { %v254_v2 = vld [vmem:[%s2091_s1 + $0x60] sm:$0xff]  ;;  %251 = vst [vmem:[#allocation3 + $0x10] sm:$0xff] %v250_v0  ;;  %v256_v3 = vld [vmem:[%s2091_s1 + $0x90] sm:$0xff] }
  0x1b   : > { %253 = vst [vmem:[#allocation3] sm:$0xff] %v252_v1 }
  0x1c   : > { %255 = vst [vmem:[#allocation3 + $0x18] sm:$0xff] %v254_v2 }
  0x1d   : > { %257 = vst [vmem:[#allocation3 + $0x8] sm:$0xff] %v256_v3 }
  0x1e PF: > { %263 = sbr.rel (%p1271_p13) target bundleno = 40 (0x28), region = 58 }
  0x23   : > { %v1273_v4 = vld [vmem:[%s2092_s2 + $0x8] sm:$0xff]  ;;  %v1274_v5 = vld [vmem:[%s2092_s2 + $0x38] sm:$0xff] }
  0x24   : > { %v1275_v6 = vld [vmem:[%s2092_s2 + $0x68] sm:$0xff]  ;;  %304 = vst [vmem:[#allocation4] sm:$0xff] %v1273_v4  ;;  %v1276_v7 = vld [vmem:[%s2092_s2 + $0x98] sm:$0xff] }
  0x25   : > { %306 = vst [vmem:[#allocation4 + $0x18] sm:$0xff] %v1274_v5 }
  0x26   : > { %308 = vst [vmem:[#allocation4 + $0x8] sm:$0xff] %v1275_v6 }
  0x27   : > { %310 = vst [vmem:[#allocation4 + $0x10] sm:$0xff] %v1276_v7 }
  0x28 PF: > { %p1579_p0 = scmp.lt.s32.totalorder %s1722_s23, 2  ;;  %s321_s10 = sand.u32 1, %s1710_s20  }
  0x29   : > { %s1500_s11 = smul.u32 12, %s1718_s22  ;;  %s322_s24 = scalar_lea.sflag [#allocation6], %s321_s10 }
  0x2a   : > { %s1570_s12 = smul.u32 384, %s321_s10  ;;  %p1576_p1 = pnand %p1579_p0, %p1796_p3 }
  0x2b   : > { %s330_s15 = scalar_lea.hbm %s2093_s3, %s1500_s11  ;;  %s1724_s26 = smov 384  }
  0x2c   : > { %s331_s16 = sshll.u32 %s330_s15, 4  ;;  %s325_s17 = scalar_lea.vmem [#allocation5], %s1570_s12  ;;  %s332_s16 = int_to_ptr.hbm [resolvable:$true] %s331_s16 }
  0x2d   : > { %s333_s18 = sshll.u32 %s325_s17, 4  ;;  %s1725_s28 = smov 192   ;;  %s334_s18 = int_to_ptr.vmem [resolvable:$true] %s333_s18 }
  0x2e   : > { %s1726_s8 = smov 12   ;;  %353 = sbr.rel (%p1818_p12) target bundleno = 567 (0x237), region = 108 }
  0x2f   : > { %1578 = dma.hbm_to_vmem [thread:$0]  (!%p1576_p1), %s332_s16, 6144, %s334_s18, %s322_s24, %s1724_s26, %s1725_s28, %s1726_s8  }
  0x30   : > { %s361_s9 = sand.u32 (!%p1818_p12), 1, %s1706_s19  }
  0x31   : > { %s1571_s13 = smul.u32 (!%p1818_p12), 384, %s361_s9  ;;  %s362_s11 = scalar_lea.sflag (!%p1818_p12), [#allocation6], %s361_s9 }
  0x33   : > { %s1860_s27 = scalar_lea.vmem [#allocation5], %s1571_s13 }
  0x34   : > { %1697 = dma.done.wait (%p1805_p8), %s362_s11, 6144  }
  0x35   : > { %1699 = vsyncadd (%p1805_p8), %s362_s11, 4294961152  ;;  %s1572_s10 = smul.u32 48, %s361_s9  ;;  %p1280_p3 = scmp.ne.s32.totalorder %s1714_s21, 0 }
  0x36   : > { %s412_s12 = smul.u32 3, %s1714_s21 }
  0x37   : > { %s1873_s16 = scalar_lea.vmem [#allocation7], %s1572_s10  ;;  %422 = sbr.rel (%p1280_p3) target bundleno = 345 (0x159), region = 124 }
  0x38   : > { %p413_p2 = scmp.lt.s32.totalorder %s412_s12, 5 }
  0x3a   : > { %s2108_s12 = smov (!%p413_p2, %s412_s12), 5 }
  0x3b   : > { %s415_s15 = scalar_lea.vmem %s2094_s4, %s2108_s12 }
  0x3c   : > { %v425_v8 = vld [vmem:[%s2090_s0 + $0x10] sm:$0xff]  ;;  %v423_v9 = vld [vmem:[%s2090_s0] sm:$0xff]  ;;  %v426_v14 = vld [vmem:[%s2090_s0 + $0x18] sm:$0xff]  ;;  %v1727_v24 = vmov 256.0  }
  0x3d   : > { %v439_v10 = vunpack.c.l.bf16 %v425_v8  ;;  %v440_v11 = vunpack.c.h.bf16 %v425_v8  ;;  %v435_v12 = vunpack.c.l.bf16 %v423_v9  ;;  %v436_v13 = vunpack.c.h.bf16 %v423_v9  ;;  %v424_v15 = vld [vmem:[%s2090_s0 + $0x8] sm:$0xff]  ;;  %v431_v5 = vld [vmem:[#allocation4] sm:$0xff] }
  0x3e   : > { %v441_v18 = vunpack.c.l.bf16 %v426_v14  ;;  %v442_v19 = vunpack.c.h.bf16 %v426_v14  ;;  %v437_v20 = vunpack.c.l.bf16 %v424_v15  ;;  %v438_v21 = vunpack.c.h.bf16 %v424_v15  ;;  %v433_v7 = vld [vmem:[#allocation4 + $0x8] sm:$0xff] }
  0x3f   : > { %v449_v16 = vadd.f32 %v440_v11, %v439_v10  ;;  %v443_v17 = vadd.f32 %v436_v13, %v435_v12  ;;  %1632 = vrcp.f32 %v1727_v24  ;;  %v551_v14 = vunpack.c.h.bf16 %v431_v5 }
  0x40   : > { %v452_v22 = vadd.f32 %v442_v19, %v441_v18  ;;  %v446_v23 = vadd.f32 %v438_v21, %v437_v20 }
  0x41   : > { %450 = vadd.xlane.f32.xlu1 %v449_v16  ;;  %444 = vadd.xlane.f32.xlu0 %v443_v17  ;;  %v554_v17 = vunpack.c.l.bf16 %v433_v7  ;;  %v559_v24 = vadd.f32 1.0, %v551_v14 }
  0x45   : > { %v1633_v25 = vpop.eup %1632 }
  0x46   : > { %v456_v26 = vmul.f32 256.0, %v1633_v25  ;;  %vm460_vm0 = vweird.f32 %v1633_v25 }
  0x48   : > { %v457_v27 = vsub.f32 1.0, %v456_v26 }
  0x49   : > { %453 = vadd.xlane.f32.xlu1 %v452_v22  ;;  %447 = vadd.xlane.f32.xlu0 %v446_v23  ;;  %v429_v22 = vld [vmem:[#allocation3 + $0x18] sm:$0xff] }
  0x4a   : > { %v458_v28 = vmul.f32 %v1633_v25, %v457_v27  ;;  %v434_v27 = vld [vmem:[#allocation4 + $0x10] sm:$0xff] }
  0x4c   : > { %v459_v29 = vadd.f32 %v1633_v25, %v458_v28 }
  0x4e   : > { %v461_v30 = vsel %vm460_vm0, %v1633_v25, %v459_v29  ;;  %v562_v29 = vadd.f32 1.0, %v554_v17 }
  0xb4   : > { %v451_v31 = vpop.xlane.xlu1 %450  ;;  %v445_v32 = vpop.xlane.xlu0 %444 }
  0xb5   : > { %v464_v33 = vmul.f32 %v461_v30, %v451_v31  ;;  %v462_v34 = vmul.f32 %v461_v30, %v445_v32  ;;  %v578_v32 = vunpack.c.l.bf16 %v429_v22 }
  0xb7   : > { %v1888_v35 = vsub.f32 %v439_v10, %v464_v33  ;;  %v1890_v36 = vsub.f32 %v440_v11, %v464_v33  ;;  %v1892_v37 = vsub.f32 %v435_v12, %v462_v34  ;;  %v1894_v38 = vsub.f32 %v436_v13, %v462_v34  ;;  %v427_v12 = vld [vmem:[#allocation3 + $0x10] sm:$0xff] }
  0xb8   : > { %v550_v13 = vunpack.c.l.bf16 %v431_v5  ;;  %v575_v25 = vunpack.c.h.bf16 %v427_v12  ;;  %v579_v33 = vunpack.c.h.bf16 %v429_v22 }
  0xb9   : > { %v478_v39 = vmul.f32 %v1888_v35, %v1888_v35  ;;  %v479_v40 = vmul.f32 %v1890_v36, %v1890_v36  ;;  %v474_v41 = vmul.f32 %v1892_v37, %v1892_v37  ;;  %v475_v42 = vmul.f32 %v1894_v38, %v1894_v38 }
  0xba   : > { %v558_v23 = vadd.f32 1.0, %v550_v13 }
  0xbb   : > { %v488_v43 = vadd.f32 %v479_v40, %v478_v39  ;;  %v482_v44 = vadd.f32 %v475_v42, %v474_v41  ;;  %v432_v39 = vld [vmem:[#allocation4 + $0x18] sm:$0xff]  ;;  %v556_v42 = vunpack.c.l.bf16 %v434_v27 }
  0xbc   : > { %v454_v45 = vpop.xlane.xlu1 %453  ;;  %v448_v46 = vpop.xlane.xlu0 %447 }
  0xbd   : > { %v465_v47 = vmul.f32 %v461_v30, %v454_v45  ;;  %v463_v48 = vmul.f32 %v461_v30, %v448_v46  ;;  %489 = vadd.xlane.f32.xlu0 %v488_v43  ;;  %483 = vadd.xlane.f32.xlu2 %v482_v44  ;;  %v557_v45 = vunpack.c.h.bf16 %v434_v27 }
  0xbf   : > { %v1904_v49 = vsub.f32 %v441_v18, %v465_v47  ;;  %v1906_v50 = vsub.f32 %v442_v19, %v465_v47  ;;  %v1908_v51 = vsub.f32 %v437_v20, %v463_v48  ;;  %v1910_v52 = vsub.f32 %v438_v21, %v463_v48 }
  0xc0   : > { %v555_v18 = vunpack.c.h.bf16 %v433_v7  ;;  %v574_v20 = vunpack.c.l.bf16 %v427_v12  ;;  %v430_v7 = vld [vmem:[#allocation3 + $0x8] sm:$0xff]  ;;  %v428_v12 = vld [vmem:[#allocation3] sm:$0xff] }
  0xc1   : > { %v480_v53 = vmul.f32 %v1904_v49, %v1904_v49  ;;  %v481_v54 = vmul.f32 %v1906_v50, %v1906_v50  ;;  %v476_v55 = vmul.f32 %v1908_v51, %v1908_v51  ;;  %v477_v56 = vmul.f32 %v1910_v52, %v1910_v52 }
  0xc2   : > { %v576_v22 = vunpack.c.l.bf16 %v428_v12 }
  0xc3   : > { %v491_v57 = vadd.f32 %v481_v54, %v480_v53  ;;  %v485_v58 = vadd.f32 %v477_v56, %v476_v55  ;;  %v552_v53 = vunpack.c.l.bf16 %v432_v39  ;;  %v553_v54 = vunpack.c.h.bf16 %v432_v39 }
  0xc5   : > { %492 = vadd.xlane.f32.xlu1 %v491_v57  ;;  %486 = vadd.xlane.f32.xlu2 %v485_v58  ;;  %v560_v13 = vadd.f32 1.0, %v552_v53 }
 0x130   : > { %v484_v59 = vpop.xlane.xlu2 %483  ;;  %v490_v60 = vpop.xlane.xlu0 %489 }
 0x131   : > { %v494_v61 = vmul.f32 %v484_v59, %v461_v30  ;;  %v496_v62 = vmul.f32 %v490_v60, %v461_v30 }
 0x133   : > { %v498_v63 = vadd.f32 1e-06, %v494_v61  ;;  %v500_v0 = vadd.f32 1e-06, %v496_v62  ;;  %v564_v61 = vadd.f32 1.0, %v556_v42 }
 0x135   : > { %1634 = vrsqrt.f32 %v498_v63  ;;  %vm508_vm3 = vweird.f32 %v498_v63  ;;  %vm528_vm5 = vweird.f32 %v500_v0 }
 0x136   : > { %1636 = vrsqrt.f32 %v500_v0 }
 0x138   : > { %v493_v1 = vpop.xlane.xlu1 %492  ;;  %v487_v2 = vpop.xlane.xlu2 %486 }
 0x139   : > { %v497_v3 = vmul.f32 %v493_v1, %v461_v30  ;;  %v495_v4 = vmul.f32 %v487_v2, %v461_v30  ;;  %v563_v30 = vadd.f32 1.0, %v555_v18  ;;  %v565_v1 = vadd.f32 1.0, %v557_v45 }
 0x13a   : > { %v561_v18 = vadd.f32 1.0, %v553_v54 }
 0x13b   : > { %v1635_v6 = vpop.eup %1634  ;;  %v1920_v8 = vadd.f32 1e-06, %v497_v3  ;;  %v1922_v9 = vadd.f32 1e-06, %v495_v4 }
 0x13c   : > { %v1637_v10 = vpop.eup %1636  ;;  %v503_v11 = vmul.f32 %v1635_v6, %v498_v63  ;;  %vm509_vm1 = vweird.f32 %v1635_v6 }
 0x13d   : > { %v523_v15 = vmul.f32 %v1637_v10, %v500_v0  ;;  %1638 = vrsqrt.f32 %v1920_v8  ;;  %vm529_vm2 = vweird.f32 %v1637_v10  ;;  %vm510_vm4 = vmor %vm508_vm3, %vm509_vm1  ;;  %vm538_vm9 = vweird.f32 %v1920_v8 }
 0x13e   : > { %v504_v16 = vmul.f32 %v1635_v6, %v503_v11  ;;  %1640 = vrsqrt.f32 %v1922_v9  ;;  %vm530_vm6 = vmor %vm528_vm5, %vm529_vm2  ;;  %vm518_vm11 = vweird.f32 %v1922_v9 }
 0x13f   : > { %v524_v19 = vmul.f32 %v1637_v10, %v523_v15 }
 0x140   : > { %v505_v21 = vmul.f32 0.5, %v504_v16  ;;  %v580_v16 = vunpack.c.l.bf16 %v430_v7 }
 0x141   : > { %v525_v26 = vmul.f32 0.5, %v524_v19  ;;  %v581_v19 = vunpack.c.h.bf16 %v430_v7 }
 0x142   : > { %v506_v28 = vsub.f32 1.5, %v505_v21 }
 0x143   : > { %v1639_v31 = vpop.eup %1638  ;;  %v526_v34 = vsub.f32 1.5, %v525_v26 }
 0x144   : > { %v1641_v40 = vpop.eup %1640  ;;  %v507_v41 = vmul.f32 %v1635_v6, %v506_v28  ;;  %v533_v43 = vmul.f32 %v1639_v31, %v1920_v8  ;;  %vm539_vm7 = vweird.f32 %v1639_v31 }
 0x145   : > { %v527_v44 = vmul.f32 %v1637_v10, %v526_v34  ;;  %v513_v46 = vmul.f32 %v1641_v40, %v1922_v9  ;;  %vm519_vm8 = vweird.f32 %v1641_v40  ;;  %vm540_vm10 = vmor %vm538_vm9, %vm539_vm7 }
 0x146   : > { %v511_v47 = vsel %vm510_vm4, %v1635_v6, %v507_v41  ;;  %v534_v48 = vmul.f32 %v1639_v31, %v533_v43  ;;  %vm520_vm12 = vmor %vm518_vm11, %vm519_vm8 }
 0x147   : > { %v542_v55 = vmul.f32 %v511_v47, %v1892_v37  ;;  %v543_v56 = vmul.f32 %v511_v47, %v1894_v38  ;;  %v531_v57 = vsel %vm530_vm6, %v1637_v10, %v527_v44  ;;  %v514_v58 = vmul.f32 %v1641_v40, %v513_v46 }
 0x148   : > { %v546_v59 = vmul.f32 %v531_v57, %v1888_v35  ;;  %v547_v60 = vmul.f32 %v531_v57, %v1890_v36  ;;  %v535_v62 = vmul.f32 0.5, %v534_v48 }
 0x149   : > { %v566_v63 = vmul.f32 %v558_v23, %v542_v55  ;;  %v567_v0 = vmul.f32 %v559_v24, %v543_v56  ;;  %v515_v2 = vmul.f32 0.5, %v514_v58  ;;  %v577_v23 = vunpack.c.h.bf16 %v428_v12 }
 0x14a   : > { %v570_v3 = vmul.f32 %v562_v29, %v546_v59  ;;  %v571_v4 = vmul.f32 %v563_v30, %v547_v60  ;;  %v536_v5 = vsub.f32 1.5, %v535_v62 }
 0x14b   : > { %v582_v6 = vadd.f32 %v574_v20, %v566_v63  ;;  %v583_v37 = vadd.f32 %v575_v25, %v567_v0  ;;  %v516_v38 = vsub.f32 1.5, %v515_v2 }
 0x14c   : > { %v586_v10 = vadd.f32 %v578_v32, %v570_v3  ;;  %v587_v11 = vadd.f32 %v579_v33, %v571_v4  ;;  %v537_v35 = vmul.f32 %v1639_v31, %v536_v5 }
 0x14d   : > { %v590_v36 = vpack.c.bf16 %v583_v37, %v582_v6  ;;  %v517_v14 = vmul.f32 %v1641_v40, %v516_v38 }
 0x14e   : > { %v592_v15 = vpack.c.bf16 %v587_v11, %v586_v10  ;;  %v541_v17 = vsel %vm540_vm10, %v1639_v31, %v537_v35 }
 0x14f   : > { %594 = vst [vmem:[#allocation2] sm:$0xff] %v590_v36  ;;  %v548_v20 = vmul.f32 %v541_v17, %v1904_v49  ;;  %v549_v21 = vmul.f32 %v541_v17, %v1906_v50  ;;  %v521_v8 = vsel %vm520_vm12, %v1641_v40, %v517_v14 }
 0x150   : > { %596 = vst [vmem:[#allocation2 + $0x10] sm:$0xff] %v592_v15  ;;  %v544_v24 = vmul.f32 %v521_v8, %v1908_v51  ;;  %v545_v9 = vmul.f32 %v521_v8, %v1910_v52 }
 0x151   : > { %v572_v25 = vmul.f32 %v564_v61, %v548_v20  ;;  %v573_v26 = vmul.f32 %v565_v1, %v549_v21 }
 0x152   : > { %v568_v27 = vmul.f32 %v560_v13, %v544_v24  ;;  %v569_v28 = vmul.f32 %v561_v18, %v545_v9 }
 0x153   : > { %v588_v29 = vadd.f32 %v580_v16, %v572_v25  ;;  %v589_v30 = vadd.f32 %v581_v19, %v573_v26 }
 0x154   : > { %v584_v31 = vadd.f32 %v576_v22, %v568_v27  ;;  %v585_v32 = vadd.f32 %v577_v23, %v569_v28 }
 0x155   : > { %v593_v33 = vpack.c.bf16 %v589_v30, %v588_v29 }
 0x156   : > { %v591_v49 = vpack.c.bf16 %v585_v32, %v584_v31 }
 0x157   : > { %597 = vst [vmem:[#allocation2 + $0x18] sm:$0xff] %v593_v33 }
 0x158   : > { %595 = vst [vmem:[#allocation2 + $0x8] sm:$0xff] %v591_v49 }
 0x159 PF: > { %v1383_v50 = vld [vmem:[%s1860_s27 + $0xa8] sm:$0xf]  ;;  %v1527_v51 = vld [vmem:[%s1860_s27 + $0xb0] sm:$0xf0]  ;;  %v1526_v40 = vld [vmem:[%s1860_s27 + $0xac] sm:$0xf] }
 0x15a   : > { %v1479_v52 = vld [vmem:[%s1860_s27 + $0x168] sm:$0xf]  ;;  %v1384_v34 = vor.u32 %v1527_v51, %v1383_v50  ;;  %v1551_v39 = vld [vmem:[%s1860_s27 + $0x170] sm:$0xf0]  ;;  %v1385_v41 = vld [vmem:[%s1860_s27 + $0xb4] sm:$0xf0] }
 0x15b   : > { %v1480_v42 = vor.u32 %v1551_v39, %v1479_v52  ;;  %v1388_v43 = vor.u32 %v1526_v40, %v1385_v41  ;;  %v1550_v44 = vld [vmem:[%s1860_s27 + $0x16c] sm:$0xf]  ;;  %v1481_v45 = vld [vmem:[%s1860_s27 + $0x174] sm:$0xf0]  ;;  %v1371_v46 = vld [vmem:[%s1860_s27 + $0x90] sm:$0xf] }
 0x15c   : > { %950 = vmatpush.bf16.msra.mxu0 %v1384_v34  ;;  %v1484_v47 = vor.u32 %v1550_v44, %v1481_v45  ;;  %v1524_v48 = vld [vmem:[%s1860_s27 + $0x98] sm:$0xf0]  ;;  %v1467_v53 = vld [vmem:[%s1860_s27 + $0x150] sm:$0xf]  ;;  %v1523_v57 = vld [vmem:[%s1860_s27 + $0x94] sm:$0xf] }
 0x15d   : > { %v1548_v54 = vld [vmem:[%s1860_s27 + $0x158] sm:$0xf0]  ;;  %969 = vmatpush.bf16.msra.mxu1 %v1480_v42  ;;  %988 = vmatpush.bf16.msra.mxu2 %v1388_v43  ;;  %v1372_v55 = vor.u32 %v1524_v48, %v1371_v46  ;;  %v1373_v58 = vld [vmem:[%s1860_s27 + $0x9c] sm:$0xf0]  ;;  %v1547_v59 = vld [vmem:[%s1860_s27 + $0x154] sm:$0xf] }
 0x15e   : > { %v1468_v56 = vor.u32 %v1548_v54, %v1467_v53  ;;  %1007 = vmatpush.bf16.msra.mxu3 %v1484_v47  ;;  %v1376_v60 = vor.u32 %v1523_v57, %v1373_v58  ;;  %v1469_v61 = vld [vmem:[%s1860_s27 + $0x15c] sm:$0xf0]  ;;  %v1359_v62 = vld [vmem:[%s1860_s27 + $0x78] sm:$0xf]  ;;  %v1521_v63 = vld [vmem:[%s1860_s27 + $0x80] sm:$0xf0] }
 0x15f   : > { %v1472_v0 = vor.u32 %v1547_v59, %v1469_v61  ;;  %v1455_v1 = vld [vmem:[%s1860_s27 + $0x138] sm:$0xf]  ;;  %v1545_v2 = vld [vmem:[%s1860_s27 + $0x140] sm:$0xf0]  ;;  %v1520_v3 = vld [vmem:[%s1860_s27 + $0x7c] sm:$0xf]  ;;  %v1360_v4 = vor.u32 %v1521_v63, %v1359_v62 }
 0x160   : > { %951 = vmatpush.bf16.msra.mxu0 %v1372_v55  ;;  %v1361_v5 = vld [vmem:[%s1860_s27 + $0x84] sm:$0xf0]  ;;  %v1544_v6 = vld [vmem:[%s1860_s27 + $0x13c] sm:$0xf]  ;;  %v1456_v7 = vor.u32 %v1545_v2, %v1455_v1  ;;  %v1347_v10 = vld [vmem:[%s1860_s27 + $0x60] sm:$0xf] }
 0x161   : > { %v1457_v37 = vld [vmem:[%s1860_s27 + $0x144] sm:$0xf0]  ;;  %970 = vmatpush.bf16.msra.mxu1 %v1468_v56  ;;  %989 = vmatpush.bf16.msra.mxu2 %v1376_v60  ;;  %v1364_v38 = vor.u32 %v1520_v3, %v1361_v5  ;;  %v1518_v11 = vld [vmem:[%s1860_s27 + $0x68] sm:$0xf0]  ;;  %v1443_v35 = vld [vmem:[%s1860_s27 + $0x120] sm:$0xf] }
 0x162   : > { %1008 = vmatpush.bf16.msra.mxu3 %v1472_v0  ;;  %v1460_v36 = vor.u32 %v1544_v6, %v1457_v37  ;;  %v1542_v12 = vld [vmem:[%s1860_s27 + $0x128] sm:$0xf0]  ;;  %v1517_v13 = vld [vmem:[%s1860_s27 + $0x64] sm:$0xf]  ;;  %v1349_v14 = vld [vmem:[%s1860_s27 + $0x6c] sm:$0xf0]  ;;  %v1348_v17 = vor.u32 %v1518_v11, %v1347_v10 }
 0x163   : > { %v1541_v15 = vld [vmem:[%s1860_s27 + $0x124] sm:$0xf]  ;;  %v1445_v16 = vld [vmem:[%s1860_s27 + $0x12c] sm:$0xf0]  ;;  %v1444_v18 = vor.u32 %v1542_v12, %v1443_v35  ;;  %v1352_v19 = vor.u32 %v1517_v13, %v1349_v14  ;;  %v1335_v20 = vld [vmem:[%s1860_s27 + $0x48] sm:$0xf] }
 0x164   : > { %952 = vmatpush.bf16.msra.mxu0 %v1360_v4  ;;  %v1515_v21 = vld [vmem:[%s1860_s27 + $0x50] sm:$0xf0]  ;;  %v1431_v8 = vld [vmem:[%s1860_s27 + $0x108] sm:$0xf]  ;;  %v1448_v22 = vor.u32 %v1541_v15, %v1445_v16  ;;  %v1514_v24 = vld [vmem:[%s1860_s27 + $0x4c] sm:$0xf] }
 0x165   : > { %971 = vmatpush.bf16.msra.mxu1 %v1456_v7  ;;  %990 = vmatpush.bf16.msra.mxu2 %v1364_v38  ;;  %v1539_v23 = vld [vmem:[%s1860_s27 + $0x110] sm:$0xf0]  ;;  %v1337_v9 = vld [vmem:[%s1860_s27 + $0x54] sm:$0xf0]  ;;  %v1538_v25 = vld [vmem:[%s1860_s27 + $0x10c] sm:$0xf]  ;;  %v1336_v27 = vor.u32 %v1515_v21, %v1335_v20 }
 0x166   : > { %1009 = vmatpush.bf16.msra.mxu3 %v1460_v36  ;;  %v1433_v26 = vld [vmem:[%s1860_s27 + $0x114] sm:$0xf0]  ;;  %v1432_v28 = vor.u32 %v1539_v23, %v1431_v8  ;;  %v1340_v29 = vor.u32 %v1514_v24, %v1337_v9  ;;  %v1323_v30 = vld [vmem:[%s1860_s27 + $0x30] sm:$0xf]  ;;  %v1512_v31 = vld [vmem:[%s1860_s27 + $0x38] sm:$0xf0] }
 0x167   : > { %v1419_v32 = vld [vmem:[%s1860_s27 + $0xf0] sm:$0xf]  ;;  %v1436_v33 = vor.u32 %v1538_v25, %v1433_v26  ;;  %v1536_v49 = vld [vmem:[%s1860_s27 + $0xf8] sm:$0xf0]  ;;  %v1511_v50 = vld [vmem:[%s1860_s27 + $0x34] sm:$0xf]  ;;  %v1324_v39 = vor.u32 %v1512_v31, %v1323_v30 }
 0x168   : > { %953 = vmatpush.bf16.msra.mxu0 %v1348_v17  ;;  %v1325_v51 = vld [vmem:[%s1860_s27 + $0x3c] sm:$0xf0]  ;;  %v1535_v52 = vld [vmem:[%s1860_s27 + $0xf4] sm:$0xf]  ;;  %v1420_v40 = vor.u32 %v1536_v49, %v1419_v32  ;;  %v1311_v42 = vld [vmem:[%s1860_s27 + $0x18] sm:$0xf] }
 0x169   : > { %972 = vmatpush.bf16.msra.mxu1 %v1444_v18  ;;  %991 = vmatpush.bf16.msra.mxu2 %v1352_v19  ;;  %v1421_v34 = vld [vmem:[%s1860_s27 + $0xfc] sm:$0xf0]  ;;  %v1328_v41 = vor.u32 %v1511_v50, %v1325_v51  ;;  %v1509_v43 = vld [vmem:[%s1860_s27 + $0x20] sm:$0xf0]  ;;  %v1407_v44 = vld [vmem:[%s1860_s27 + $0xd8] sm:$0xf] }
 0x16a   : > { %1010 = vmatpush.bf16.msra.mxu3 %v1448_v22  ;;  %v1424_v45 = vor.u32 %v1535_v52, %v1421_v34  ;;  %v1533_v46 = vld [vmem:[%s1860_s27 + $0xe0] sm:$0xf0]  ;;  %v1508_v47 = vld [vmem:[%s1860_s27 + $0x1c] sm:$0xf]  ;;  %v1313_v48 = vld [vmem:[%s1860_s27 + $0x24] sm:$0xf0]  ;;  %v1312_v55 = vor.u32 %v1509_v43, %v1311_v42 }
 0x16b   : > { %v1532_v53 = vld [vmem:[%s1860_s27 + $0xdc] sm:$0xf]  ;;  %v1409_v54 = vld [vmem:[%s1860_s27 + $0xe4] sm:$0xf0]  ;;  %v1299_v56 = vld [vmem:[%s1860_s27] sm:$0xf]  ;;  %v1408_v58 = vor.u32 %v1533_v46, %v1407_v44  ;;  %v1316_v59 = vor.u32 %v1508_v47, %v1313_v48 }
 0x16c   : > { %954 = vmatpush.bf16.msra.mxu0 %v1336_v27  ;;  %v1506_v57 = vld [vmem:[%s1860_s27 + $0x8] sm:$0xf0]  ;;  %v1395_v60 = vld [vmem:[%s1860_s27 + $0xc0] sm:$0xf]  ;;  %v1505_v62 = vld [vmem:[%s1860_s27 + $0x4] sm:$0xf]  ;;  %v1412_v63 = vor.u32 %v1532_v53, %v1409_v54 }
 0x16d   : > { %973 = vmatpush.bf16.msra.mxu1 %v1432_v28  ;;  %992 = vmatpush.bf16.msra.mxu2 %v1340_v29  ;;  %v1530_v61 = vld [vmem:[%s1860_s27 + $0xc8] sm:$0xf0]  ;;  %v1301_v0 = vld [vmem:[%s1860_s27 + $0xc] sm:$0xf0]  ;;  %v1529_v1 = vld [vmem:[%s1860_s27 + $0xc4] sm:$0xf]  ;;  %v1300_v6 = vor.u32 %v1506_v57, %v1299_v56 }
 0x16e   : > { %1011 = vmatpush.bf16.msra.mxu3 %v1436_v33  ;;  %v1397_v2 = vld [vmem:[%s1860_s27 + $0xcc] sm:$0xf0]  ;;  %v1283_v3 = vld [vmem:[#allocation2] sm:$0xf]  ;;  %v1528_v5 = vld [vmem:[%s1860_s27 + $0xb8] sm:$0xf0]  ;;  %v1396_v10 = vor.u32 %v1530_v61, %v1395_v60  ;;  %v1304_v11 = vor.u32 %v1505_v62, %v1301_v0 }
 0x16f   : > { %v1391_v4 = vld [vmem:[%s1860_s27 + $0xb0] sm:$0xf]  ;;  %v1502_v37 = vld [vmem:[#allocation2 + $0x4] sm:$0xf0]  ;;  %v1552_v38 = vld [vmem:[%s1860_s27 + $0x178] sm:$0xf0]  ;;  %v1400_v12 = vor.u32 %v1529_v1, %v1397_v2 }
 0x170   : > { %955 = vmatpush.bf16.msra.mxu0 %v1324_v39  ;;  %v1487_v7 = vld [vmem:[%s1860_s27 + $0x170] sm:$0xf]  ;;  %v1501_v35 = vld [vmem:[#allocation2 + $0x4] sm:$0xf]  ;;  %v1285_v36 = vld [vmem:[#allocation2 + $0x8] sm:$0xf0]  ;;  %v1392_v13 = vor.u32 %v1528_v5, %v1391_v4  ;;  %v2007_v14 = vor.u32 %v1502_v37, %v1283_v3 }
 0x171   : > { %974 = vmatpush.bf16.msra.mxu1 %v1420_v40  ;;  %993 = vmatpush.bf16.msra.mxu2 %v1328_v41  ;;  %v1488_v15 = vor.u32 %v1552_v38, %v1487_v7  ;;  %v1379_v16 = vld [vmem:[%s1860_s27 + $0x98] sm:$0xf]  ;;  %v1525_v17 = vld [vmem:[%s1860_s27 + $0xa0] sm:$0xf0]  ;;  %v2011_v18 = vor.u32 %v1501_v35, %v1285_v36  ;;  %v1367_v22 = vld [vmem:[%s1860_s27 + $0x80] sm:$0xf] }
 0x172   : > { %1012 = vmatpush.bf16.msra.mxu3 %v1424_v45  ;;  %v1475_v19 = vld [vmem:[%s1860_s27 + $0x158] sm:$0xf]  ;;  %v1549_v20 = vld [vmem:[%s1860_s27 + $0x160] sm:$0xf0]  ;;  %v1380_v21 = vor.u32 %v1525_v17, %v1379_v16  ;;  %v1522_v23 = vld [vmem:[%s1860_s27 + $0x88] sm:$0xf0] }
 0x173   : > { %v1476_v8 = vor.u32 %v1549_v20, %v1475_v19  ;;  %v1463_v24 = vld [vmem:[%s1860_s27 + $0x140] sm:$0xf]  ;;  %v1546_v9 = vld [vmem:[%s1860_s27 + $0x148] sm:$0xf0]  ;;  %v1368_v25 = vor.u32 %v1522_v23, %v1367_v22  ;;  %v1355_v27 = vld [vmem:[%s1860_s27 + $0x68] sm:$0xf] }
 0x174   : > { %956 = vmatpush.bf16.msra.mxu0 %v1312_v55  ;;  %v1464_v26 = vor.u32 %v1546_v9, %v1463_v24  ;;  %v1519_v28 = vld [vmem:[%s1860_s27 + $0x70] sm:$0xf0]  ;;  %v1451_v29 = vld [vmem:[%s1860_s27 + $0x128] sm:$0xf]  ;;  %v1291_v33 = vld [vmem:[#allocation2 + $0x10] sm:$0xf] }
 0x175   : > { %975 = vmatpush.bf16.msra.mxu1 %v1408_v58  ;;  %994 = vmatpush.bf16.msra.mxu2 %v1316_v59  ;;  %v1543_v30 = vld [vmem:[%s1860_s27 + $0x130] sm:$0xf0]  ;;  %v1356_v31 = vor.u32 %v1519_v28, %v1355_v27  ;;  %v1343_v49 = vld [vmem:[%s1860_s27 + $0x50] sm:$0xf]  ;;  %v1516_v50 = vld [vmem:[%s1860_s27 + $0x58] sm:$0xf0] }
 0x176   : > { %1013 = vmatpush.bf16.msra.mxu3 %v1412_v63  ;;  %v1452_v32 = vor.u32 %v1543_v30, %v1451_v29  ;;  %v1504_v51 = vld [vmem:[#allocation2 + $0x14] sm:$0xf0]  ;;  %v1439_v52 = vld [vmem:[%s1860_s27 + $0x110] sm:$0xf]  ;;  %v1540_v34 = vld [vmem:[%s1860_s27 + $0x118] sm:$0xf0]  ;;  %v1344_v41 = vor.u32 %v1516_v50, %v1343_v49 }
 0x177   : > { %v1503_v39 = vld [vmem:[#allocation2 + $0x14] sm:$0xf]  ;;  %v1293_v40 = vld [vmem:[#allocation2 + $0x18] sm:$0xf0]  ;;  %v1292_v42 = vor.u32 %v1504_v51, %v1291_v33  ;;  %v1440_v43 = vor.u32 %v1540_v34, %v1439_v52  ;;  %v1331_v44 = vld [vmem:[%s1860_s27 + $0x38] sm:$0xf] }
 0x178   : > { %957 = vmatpush.bf16.msra.mxu0 %v1300_v6  ;;  %v1513_v45 = vld [vmem:[%s1860_s27 + $0x40] sm:$0xf0]  ;;  %v1296_v46 = vor.u32 %v1503_v39, %v1293_v40  ;;  %v1427_v47 = vld [vmem:[%s1860_s27 + $0xf8] sm:$0xf]  ;;  %v1319_v55 = vld [vmem:[%s1860_s27 + $0x20] sm:$0xf] }
 0x179   : > { %976 = vmatpush.bf16.msra.mxu1 %v1396_v10  ;;  %995 = vmatpush.bf16.msra.mxu2 %v1304_v11  ;;  %v1537_v48 = vld [vmem:[%s1860_s27 + $0x100] sm:$0xf0]  ;;  %v1332_v53 = vor.u32 %v1513_v45, %v1331_v44  ;;  %v1510_v56 = vld [vmem:[%s1860_s27 + $0x28] sm:$0xf0]  ;;  %v1415_v57 = vld [vmem:[%s1860_s27 + $0xe0] sm:$0xf] }
 0x17a   : > { %1014 = vmatpush.bf16.msra.mxu3 %v1400_v12  ;;  %v1428_v54 = vor.u32 %v1537_v48, %v1427_v47  ;;  %v1534_v58 = vld [vmem:[%s1860_s27 + $0xe8] sm:$0xf0]  ;;  %v1320_v59 = vor.u32 %v1510_v56, %v1319_v55  ;;  %v1307_v61 = vld [vmem:[%s1860_s27 + $0x8] sm:$0xf]  ;;  %v1507_v62 = vld [vmem:[%s1860_s27 + $0x10] sm:$0xf0] }
 0x17b   : > { %958 = vmatmul.bf16.vlgmr.msra.gmra.mxu0 %v2007_v14  ;;  %v1416_v60 = vor.u32 %v1534_v58, %v1415_v57  ;;  %v1403_v63 = vld [vmem:[%s1860_s27 + $0xc8] sm:$0xf]  ;;  %v1531_v0 = vld [vmem:[%s1860_s27 + $0xd0] sm:$0xf0]  ;;  %v1308_v1 = vor.u32 %v1507_v62, %v1307_v61  ;;  %v666_v3 = vld [vmem:[%s415_s15] sm:$0x7] }
 0x17c   : > { %977 = vmatmul.bf16.vlgmr.msra.gmra.mxu1 %v2011_v18  ;;  %996 = vmatmul.bf16.vlgmr.msra.gmra.mxu2 %v2007_v14  ;;  %v1404_v2 = vor.u32 %v1531_v0, %v1403_v63  ;;  %v668_v4 = vperm.slane %v666_v3, 0  ;;  %v669_v7 = vperm.slane %v666_v3, 1  ;;  %s1553_s27 = smul.u32 (%p1813_p10), 12, %s1714_s21 }
 0x17d   : > { %1554 = vmatpush.bf16.msrb.mxu2 %v1392_v13  ;;  %1045 = vmatpush.bf16.msrb.mxu1 %v1488_v15 }
 0x17e   : > { %1015 = vmatmul.bf16.vlgmr.msra.gmra.mxu3 %v2011_v18  ;;  %1026 = vmatpush.bf16.msrb.mxu0 %v1392_v13  ;;  %s1092_s7 = scalar_lea.vmem (%p1813_p10), %s2095_s5, %s1553_s27 }
 0x17f   : > { %1562 = vmatpush.bf16.msrb.mxu3 %v1488_v15 }
 0x181   : > { %1555 = vmatpush.bf16.msrb.mxu2 %v1380_v21  ;;  %1046 = vmatpush.bf16.msrb.mxu1 %v1476_v8 }
 0x182   : > { %1027 = vmatpush.bf16.msrb.mxu0 %v1380_v21 }
 0x183   : > { %1563 = vmatpush.bf16.msrb.mxu3 %v1476_v8 }
 0x185   : > { %1556 = vmatpush.bf16.msrb.mxu2 %v1368_v25  ;;  %1047 = vmatpush.bf16.msrb.mxu1 %v1464_v26 }
 0x186   : > { %1028 = vmatpush.bf16.msrb.mxu0 %v1368_v25 }
 0x187   : > { %1564 = vmatpush.bf16.msrb.mxu3 %v1464_v26 }
 0x189   : > { %1557 = vmatpush.bf16.msrb.mxu2 %v1356_v31  ;;  %1048 = vmatpush.bf16.msrb.mxu1 %v1452_v32 }
 0x18a   : > { %1029 = vmatpush.bf16.msrb.mxu0 %v1356_v31 }
 0x18b   : > { %1565 = vmatpush.bf16.msrb.mxu3 %v1452_v32  ;;  %963 = vmatmul.bf16.gmra.mxu0 %v1292_v42  ;;  %v670_v32 = vperm.slane %v666_v3, 2 }
 0x18c   : > { %982 = vmatmul.bf16.gmra.mxu1 %v1296_v46  ;;  %1001 = vmatmul.bf16.gmra.mxu2 %v1292_v42 }
 0x18d   : > { %1558 = vmatpush.bf16.msrb.mxu2 %v1344_v41  ;;  %1049 = vmatpush.bf16.msrb.mxu1 %v1440_v43 }
 0x18e   : > { %1020 = vmatmul.bf16.gmra.mxu3 %v1296_v46  ;;  %1030 = vmatpush.bf16.msrb.mxu0 %v1344_v41 }
 0x18f   : > { %1566 = vmatpush.bf16.msrb.mxu3 %v1440_v43 }
 0x191   : > { %1559 = vmatpush.bf16.msrb.mxu2 %v1332_v53  ;;  %1050 = vmatpush.bf16.msrb.mxu1 %v1428_v54 }
 0x192   : > { %1031 = vmatpush.bf16.msrb.mxu0 %v1332_v53 }
 0x193   : > { %1567 = vmatpush.bf16.msrb.mxu3 %v1428_v54 }
 0x195   : > { %1560 = vmatpush.bf16.msrb.mxu2 %v1320_v59  ;;  %1051 = vmatpush.bf16.msrb.mxu1 %v1416_v60 }
 0x196   : > { %1032 = vmatpush.bf16.msrb.mxu0 %v1320_v59 }
 0x197   : > { %1568 = vmatpush.bf16.msrb.mxu3 %v1416_v60 }
 0x199   : > { %1561 = vmatpush.bf16.msrb.mxu2 %v1308_v1  ;;  %1052 = vmatpush.bf16.msrb.mxu1 %v1404_v2 }
 0x19a   : > { %1033 = vmatpush.bf16.msrb.mxu0 %v1308_v1 }
 0x19b   : > { %1569 = vmatpush.bf16.msrb.mxu3 %v1404_v2 }
 0x19c   : > { %1039 = vmatmul.bf16.vlgmr.msrb.gmra.mxu2 %v1292_v42  ;;  %1053 = vmatmul.bf16.vlgmr.msrb.gmra.mxu1 %v2011_v18 }
 0x19d   : > { %1034 = vmatmul.bf16.vlgmr.msrb.gmra.mxu0 %v2007_v14 }
 0x19e   : > { %1058 = vmatmul.bf16.vlgmr.msrb.gmra.mxu3 %v1296_v46 }
 0x1f8   : > { %v959_v5 = vpop.f32.mrf.mxu0 }
 0x1f9   : > { %v978_v6 = vpop.f32.mrf.mxu1  ;;  %v960_v37 = vadd.f32 %v959_v5, %v668_v4 }
 0x1fb   : > { %v979_v10 = vadd.f32 %v978_v6, %v960_v37 }
 0x1ff   : > { %v997_v38 = vpop.f32.mrf.mxu2 }
 0x200   : > { %v998_v11 = vadd.f32 %v997_v38, %v669_v7  ;;  %v961_v36 = vpop.f32.mrf.mxu0 }
 0x201   : > { %v1016_v35 = vpop.f32.mrf.mxu3  ;;  %v980_v12 = vpop.f32.mrf.mxu1  ;;  %v962_v15 = vadd.f32 %v961_v36, %v668_v4 }
 0x202   : > { %v1017_v13 = vadd.f32 %v1016_v35, %v998_v11 }
 0x203   : > { %v981_v21 = vadd.f32 %v980_v12, %v962_v15 }
 0x204   : > { %v1064_v14 = vpack.c.bf16 %v1017_v13, %v979_v10 }
 0x206   : > { %1072 = vst [vmem:[%s1873_s16] sm:$0xff] %v1064_v14 }
 0x207   : > { %v999_v16 = vpop.f32.mrf.mxu2 }
 0x208   : > { %v1000_v17 = vadd.f32 %v999_v16, %v669_v7  ;;  %v964_v19 = vpop.f32.mrf.mxu0 }
 0x209   : > { %v1018_v18 = vpop.f32.mrf.mxu3  ;;  %v983_v20 = vpop.f32.mrf.mxu1  ;;  %v965_v23 = vadd.f32 %v964_v19, %v668_v4 }
 0x20a   : > { %v1019_v8 = vadd.f32 %v1018_v18, %v1000_v17 }
 0x20b   : > { %v984_v9 = vadd.f32 %v983_v20, %v965_v23 }
 0x20c   : > { %v1066_v22 = vpack.c.bf16 %v1019_v8, %v981_v21 }
 0x20d   : > { %v1107_v63 = vld [vmem:[%s1873_s16] sm:$0xff] (%p1813_p10) }
 0x20e   : > { %1074 = vst [vmem:[%s1873_s16 + $0xc] sm:$0xff] %v1066_v22 }
 0x20f   : > { %v1002_v24 = vpop.f32.mrf.mxu2  ;;  %1108 = vst [vmem:[%s1092_s7] sm:$0xff] (%p1813_p10), %v1107_v63 }
 0x210   : > { %v1003_v25 = vadd.f32 %v1002_v24, %v669_v7  ;;  %v966_v27 = vpop.f32.mrf.mxu0 }
 0x211   : > { %v1021_v26 = vpop.f32.mrf.mxu3  ;;  %v985_v28 = vpop.f32.mrf.mxu1  ;;  %v967_v31 = vadd.f32 %v966_v27, %v668_v4 }
 0x212   : > { %v1022_v29 = vadd.f32 %v1021_v26, %v1003_v25 }
 0x213   : > { %v986_v52 = vadd.f32 %v985_v28, %v967_v31 }
 0x214   : > { %v1068_v30 = vpack.c.bf16 %v1022_v29, %v984_v9 }
 0x215   : > { %v1109_v0 = vld [vmem:[%s1873_s16 + $0xc] sm:$0xff] (%p1813_p10) }
 0x216   : > { %1076 = vst [vmem:[%s1873_s16 + $0x18] sm:$0xff] %v1068_v30 }
 0x217   : > { %v1004_v33 = vpop.f32.mrf.mxu2  ;;  %1110 = vst [vmem:[%s1092_s7 + $0x18] sm:$0xff] (%p1813_p10), %v1109_v0 }
 0x218   : > { %v1005_v49 = vadd.f32 %v1004_v33, %v669_v7 }
 0x219   : > { %v1023_v50 = vpop.f32.mrf.mxu3  ;;  %v1054_v40 = vpop.f32.mrf.mxu1 }
 0x21a   : > { %v1035_v51 = vpop.f32.mrf.mxu0  ;;  %v1024_v34 = vadd.f32 %v1023_v50, %v1005_v49 }
 0x21b   : > { %v1036_v39 = vadd.f32 %v1035_v51, %v670_v32 }
 0x21c   : > { %v1070_v41 = vpack.c.bf16 %v1024_v34, %v986_v52 }
 0x21d   : > { %v1055_v42 = vadd.f32 %v1054_v40, %v1036_v39  ;;  %v1111_v1 = vld [vmem:[%s1873_s16 + $0x18] sm:$0xff] (%p1813_p10) }
 0x21e   : > { %1078 = vst [vmem:[%s1873_s16 + $0x24] sm:$0xff] %v1070_v41 }
 0x21f   : > { %v1065_v43 = vpack.c.bf16 %v1055_v42, %v1055_v42  ;;  %v1040_v44 = vpop.f32.mrf.mxu2  ;;  %1112 = vst [vmem:[%s1092_s7 + $0x30] sm:$0xff] (%p1813_p10), %v1111_v1 }
 0x220   : > { %v1041_v45 = vadd.f32 %v1040_v44, %v670_v32 }
 0x221   : > { %1073 = vst [vmem:[%s1873_s16 + $0x8] sm:$0xf] %v1065_v43  ;;  %v1059_v46 = vpop.f32.mrf.mxu3  ;;  %v1056_v54 = vpop.f32.mrf.mxu1 }
 0x222   : > { %v1037_v47 = vpop.f32.mrf.mxu0  ;;  %v1060_v48 = vadd.f32 %v1059_v46, %v1041_v45 }
 0x223   : > { %v1038_v53 = vadd.f32 %v1037_v47, %v670_v32 }
 0x224   : > { %v1069_v55 = vpack.c.bf16 %v1060_v48, %v1060_v48 }
 0x225   : > { %v1057_v56 = vadd.f32 %v1056_v54, %v1038_v53  ;;  %v1113_v2 = vld [vmem:[%s1873_s16 + $0x24] sm:$0xff] (%p1813_p10) }
 0x226   : > { %1077 = vst [vmem:[%s1873_s16 + $0x20] sm:$0xf] %v1069_v55 }
 0x227   : > { %v1067_v57 = vpack.c.bf16 %v1057_v56, %v1057_v56  ;;  %v1042_v58 = vpop.f32.mrf.mxu2  ;;  %1114 = vst [vmem:[%s1092_s7 + $0x48] sm:$0xff] (%p1813_p10), %v1113_v2 }
 0x228   : > { %v1043_v59 = vadd.f32 %v1042_v58, %v670_v32  ;;  %v1490_v3 = vld [vmem:[%s1873_s16 + $0x8] sm:$0xf] (%p1813_p10) }
 0x229   : > { %1075 = vst [vmem:[%s1873_s16 + $0x14] sm:$0xf] %v1067_v57  ;;  %v1061_v60 = vpop.f32.mrf.mxu3 }
 0x22a   : > { %v1062_v61 = vadd.f32 %v1061_v60, %v1043_v59  ;;  %1086 = sbr.rel (!%p1813_p10) target bundleno = 567 (0x237), region = 128  ;;  %1491 = vst [vmem:[%s1092_s7 + $0x8] sm:$0xf] (%p1813_p10), %v1490_v3 }
 0x22c   : > { %v1071_v62 = vpack.c.bf16 %v1062_v61, %v1062_v61 }
 0x22d   : > { %v1494_v5 = vld [vmem:[%s1873_s16 + $0x20] sm:$0xf] (%p1813_p10) }
 0x22e   : > { %1079 = vst [vmem:[%s1873_s16 + $0x2c] sm:$0xf] %v1071_v62 }
 0x22f   : > { %1495 = vst [vmem:[%s1092_s7 + $0x38] sm:$0xf] %v1494_v5 }
 0x230   : > { %v1492_v4 = vld [vmem:[%s1873_s16 + $0x14] sm:$0xf] }
 0x231   : > { %1493 = vst [vmem:[%s1092_s7 + $0x20] sm:$0xf] %v1492_v4 }
 0x235   : > { %v1496_v6 = vld [vmem:[%s1873_s16 + $0x2c] sm:$0xf] }
 0x236   : > { %1497 = vst [vmem:[%s1092_s7 + $0x50] sm:$0xf] %v1496_v6 }
 0x237 PF: > { %s18_s23 = sadd.s32 1, %s1722_s23   ;;  %s2100_s18 = smov %s1706_s19 }
 0x238   : > { %p15_p4 = scmp.ge.s32.totalorder %s18_s23, 4   ;;  %s2101_s19 = smov %s1710_s20 }
 0x239   : > { %s2102_s20 = smov %s1811_s30  ;;  %s2103_s21 = smov %s1718_s22 }
 0x23a   : > { %s2104_s22 = smov %s2106_s25  ;;  %17 = sbr.rel (!%p15_p4) target bundleno = 4 (0x4), region = 208 }
 0x23f   :  { %1146 = vsyncpa [#allocation6], 1 }
 0x240   :  { %1148 = vsyncpa [#allocation6 + $0x1], 1 }

// kernel: _lambda_.15
= control target key start
LH: loop header
LB: loop body
LE: loop exit
PB: predicated region body
PF: predicated region fallthrough
CT: control target
= control target key end

     0   :  { %s1473_s0 = inlined_call_operand.vmem [shape: bf16[2,16,768], index: 0, kind: input, shape index: {}, may-alias: {0,1,2}]   ;;  %s1474_s1 = inlined_call_operand.vmem [shape: bf16[2,16,768], index: 1, kind: input, shape index: {}, may-alias: {0,1,2}]   ;;  %s1475_s2 = inlined_call_operand.vmem [shape: bf16[2,16,768], index: 2, kind: input, shape index: {}, may-alias: {0,1,2}]   ;;  %s1476_s3 = inlined_call_operand.vmem [shape: bf16[2,16,256], index: 3, kind: output, shape index: {}]  }
   0x1   :  { %1479 = sst [smem:[#allocation15_spill]] %s1476_s3 }
   0x2   :  { %s1203_s12 = smov 0   ;;  %s1205_s13 = smov 0  }
   0x3   :  { %s1207_s14 = smov 0   ;;  %s1209_s15 = smov 0  }
   0x4   :  { %s1211_s16 = smov 0   ;;  %s1213_s17 = smov 0  }
   0x5   :  { %s1215_s18 = smov 0   ;;  %s1217_s19 = smov 0  }
   0x6   :  { %s1219_s20 = smov 0   ;;  %s1221_s21 = smov 0  }
   0x7   :  { %s1223_s22 = smov 0  }
   0x8 LB: > { %s35_s24 = sadd.s32 1, %s1169_s20  ;;  %s39_s25 = sadd.s32 1, %s1173_s21  ;;  %s1177_s22 = sphi %s1223_s22, %s13_s22   ;;  %s1173_s21 = sphi %s1221_s21, %s1501_s21   ;;  %s1169_s20 = sphi %s1219_s20, %s1500_s20   ;;  %s1165_s19 = sphi %s1217_s19, %s1499_s19   ;;  %s1161_s18 = sphi %s1215_s18, %s1498_s18   ;;  %s1157_s17 = sphi %s1213_s17, %s1497_s17   ;;  %s1153_s16 = sphi %s1211_s16, %s1496_s16   ;;  %s1149_s15 = sphi %s1209_s15, %s1495_s15   ;;  %s1145_s14 = sphi %s1207_s14, %s1494_s14   ;;  %s1141_s13 = sphi %s1205_s13, %s1493_s13   ;;  %s1137_s12 = sphi %s1203_s12, %s1492_s12  }
   0x9   : > { %p37_p0 = scmp.ge.s32.totalorder %s35_s24, 2  ;;  %s50_s26 = sadd.s32 1, %s1157_s17 }
   0xa   : > { %p57_p1 = scmp.ne.s32.totalorder %s1157_s17, %s1153_s16  ;;  %p58_p2 = scmp.eq.s32.totalorder %s1177_s22, 0 }
   0xb   : > { %s1503_s24 = smov (%p37_p0, %s35_s24), 0  ;;  %s1505_s25 = smov (!%p37_p0, %s39_s25), %s1173_s21 }
   0xc   : > { %1480 = sst [smem:[#allocation12_spill]] %s1503_s24  ;;  %s46_s27 = ssub.s32 %s1169_s20, %s1503_s24 }
   0xd   : > { %p41_p3 = scmp.ge.s32.totalorder %s1505_s25, 2  ;;  %s73_s28 = sadd.s32 2, %s1169_s20 }
   0xe   : > { %p1276_p4 = por %p58_p2, %p57_p1  ;;  %s74_s30 = sadd.s32 2, %s1503_s24 }
   0xf   : > { %s1507_s25 = smov (%p41_p3, %s1505_s25), 0  ;;  %s78_s4 = ssub.s32 %s73_s28, %s74_s30 }
  0x10   : > { %1482 = sst [smem:[#allocation13_spill]] %s1507_s25  ;;  %s82_s5 = sadd.s32 1, %s1149_s15 }
  0x11   : > { %s43_s6 = ssub.s32 %s1173_s21, %s1507_s25  ;;  %p89_p5 = scmp.ne.s32.totalorder %s1149_s15, %s1145_s14 }
  0x12   : > { %s47_s7 = sor.u32 %s46_s27, %s43_s6  ;;  %s79_s8 = sor.u32 %s78_s4, %s43_s6 }
  0x13   : > { %p48_p6 = scmp.eq.s32.totalorder %s47_s7, 0  ;;  %p80_p7 = scmp.eq.s32.totalorder %s79_s8, 0 }
  0x14   : > { %p1290_p8 = por %p89_p5, %p58_p2  ;;  %s105_s10 = sadd.s32 4, %s1169_s20 }
  0x15   : > { %s1296_s11 = scalar_select %p48_p6, %s1157_s17, %s50_s26  }
  0x16   : > { %s1299_s28 = scalar_select %p80_p7, %s1149_s15, %s82_s5  }
  0x17   : > { %1484 = sst [smem:[#allocation14_spill]] %s1296_s11  ;;  %s106_s30 = sadd.s32 4, %s1503_s24 }
  0x18   : > { %s114_s23 = sadd.s32 1, %s1141_s13  ;;  %s110_s25 = ssub.s32 %s105_s10, %s106_s30 }
  0x19   : > { %p121_p9 = scmp.ne.s32.totalorder %s1141_s13, %s1137_s12  ;;  %s111_s27 = sor.u32 %s110_s25, %s43_s6 }
  0x1a   : > { %s1485_s3 = sadd.s32 4294967295, %s1177_s22   ;;  %p112_p11 = scmp.eq.s32.totalorder %s111_s27, 0 }
  0x1b   : > { %p155_p10 = scmp.eq.s32.totalorder %s1485_s3, 3  ;;  %p1309_p12 = por %p121_p9, %p58_p2 }
  0x1c   : > { %s1321_s26 = scalar_select %p112_p11, %s1141_s13, %s114_s23  }
  0x1d   : > { %p1316_p13 = por %p155_p10, %p57_p1  ;;  %p921_p0 = scmp.ge.s32.totalorder %s1177_s22, 4 }
  0x1f   : > { %177 = sbr.rel (%p921_p0) target bundleno = 63 (0x3f), region = 16 }
  0x24   : > { %180 = sbr.rel (!%p1276_p4) target bundleno = 45 (0x2d), region = 20  ;;  %s182_s3 = sand.u32 (%p1276_p4), 1, %s1157_s17  }
  0x25   : > { %s966_s25 = smul.u32 (%p1276_p4), 12, %s1173_s21  ;;  %s922_s5 = sshll.u32 (%p1276_p4), %s182_s3, 3 }
  0x26   : > { %s184_s23 = scalar_lea.vmem (%p1276_p4), [#allocation8], %s922_s5 }
  0x27   : > { %s189_s6 = sadd.s32 (%p1276_p4), %s1169_s20, %s966_s25 }
  0x28   : > { %s923_s8 = sshll.u32 (%p1276_p4), %s189_s6, 2 }
  0x29   : > { %s191_s27 = scalar_lea.vmem %s1473_s0, %s923_s8 }
  0x2a   : > { %v208_v0 = vld [vmem:[%s191_s27] sm:$0xf]  ;;  %v210_v1 = vld [vmem:[%s191_s27 + $0x18] sm:$0xf] }
  0x2b   : > { %209 = vst [vmem:[%s184_s23] sm:$0xf] %v208_v0 }
  0x2c   : > { %211 = vst [vmem:[%s184_s23 + $0x4] sm:$0xf] %v210_v1 }
  0x2d PF: > { %239 = sbr.rel (!%p1290_p8) target bundleno = 54 (0x36), region = 61  ;;  %s241_s29 = sand.u32 (%p1290_p8), 1, %s1149_s15  }
  0x2e   : > { %s814_s3 = smul.u32 (%p1290_p8), 12, %s1173_s21  ;;  %s924_s25 = sshll.u32 (%p1290_p8), %s241_s29, 3 }
  0x2f   : > { %s243_s5 = scalar_lea.vmem (%p1290_p8), [#allocation9], %s924_s25 }
  0x30   : > { %s815_s6 = sadd.s32 (%p1290_p8), %s1169_s20, %s814_s3 }
  0x31   : > { %s925_s24 = sshll.u32 (%p1290_p8), %s815_s6, 2 }
  0x32   : > { %s817_s8 = scalar_lea.vmem %s1474_s1, %s925_s24 }
  0x33   : > { %v926_v2 = vld [vmem:[%s817_s8 + $0x8] sm:$0xf]  ;;  %v927_v3 = vld [vmem:[%s817_s8 + $0x20] sm:$0xf] }
  0x34   : > { %269 = vst [vmem:[%s243_s5] sm:$0xf] %v926_v2 }
  0x35   : > { %271 = vst [vmem:[%s243_s5 + $0x4] sm:$0xf] %v927_v3 }
  0x36 PF: > { %299 = sbr.rel (!%p1309_p12) target bundleno = 63 (0x3f), region = 102  ;;  %s301_s9 = sand.u32 (%p1309_p12), 1, %s1141_s13  }
  0x37   : > { %s823_s30 = smul.u32 (%p1309_p12), 12, %s1173_s21  ;;  %s928_s27 = sshll.u32 (%p1309_p12), %s301_s9, 3 }
  0x38   : > { %s303_s25 = scalar_lea.vmem (%p1309_p12), [#allocation10], %s928_s27 }
  0x39   : > { %s824_s23 = sadd.s32 (%p1309_p12), %s1169_s20, %s823_s30 }
  0x3a   : > { %s929_s29 = sshll.u32 (%p1309_p12), %s824_s23, 2 }
  0x3b   : > { %s826_s24 = scalar_lea.vmem %s1475_s2, %s929_s29 }
  0x3c   : > { %v930_v4 = vld [vmem:[%s826_s24 + $0x10] sm:$0xf]  ;;  %v931_v5 = vld [vmem:[%s826_s24 + $0x28] sm:$0xf] }
  0x3d   : > { %329 = vst [vmem:[%s303_s25] sm:$0xf] %v930_v4 }
  0x3e   : > { %331 = vst [vmem:[%s303_s25 + $0x4] sm:$0xf] %v931_v5 }
  0x3f PF: > { %p932_p1 = scmp.ge.s32.totalorder %s1177_s22, 1  ;;  %p358_p2 = scmp.lt.s32.totalorder %s1177_s22, 5 }
  0x41   : > { %p359_p3 = pnand %p932_p1, %p358_p2 }
  0x42   : > { %s372_s4 = sand.u32 (!%p359_p3), 1, %s1145_s14   ;;  %s365_s10 = sand.u32 (!%p359_p3), 1, %s1153_s16  }
  0x43   : > { %362 = sbr.rel (%p359_p3) target bundleno = 910 (0x38e), region = 143  ;;  %s934_s6 = sshll.u32 (!%p359_p3), %s372_s4, 3 }
  0x44   : > { %s374_s8 = scalar_lea.vmem (!%p359_p3), [#allocation9], %s934_s6  ;;  %s1352_s5 = sshll.u32 (!%p359_p3), %s365_s10, 3 }
  0x45   : > { %s1179_s9 = smov (!%p359_p3), 64   ;;  %s367_s30 = scalar_lea.vmem (!%p359_p3), [#allocation8], %s1352_s5 }
  0x46   : > { %s379_s14 = sand.u32 (!%p359_p3), 1, %s1137_s12   ;;  %s408_s12 = scalar_lea.vmem (!%p359_p3), [#allocation11], %s1352_s5 }
  0x47   : > { %s935_s16 = sshll.u32 (!%p359_p3), %s379_s14, 3 }
  0x48   : > { %vm425_vm0 = vcmask 523264   ;;  %v959_v6 = vld [vmem:[%s374_s8] sm:$0xff]  ;;  %v958_v8 = vld [vmem:[%s367_s30] sm:$0xff]  ;;  %vm475_vm1 = vcmask 130048   ;;  %vm420_vm2 = vcmask 7168   ;;  %v1180_v15 = vmov -inf  }
  0x49   : > { %567 = vrot.lane.b32.xlu0 %v959_v6, %s1179_s9  ;;  %v455_v7 = vsel %vm425_vm0, %v959_v6, 0  ;;  %421 = vst.msk [vmem:[#allocation2] sm:$0xff] %vm420_vm2, %v1180_v15  ;;  %v1181_v16 = vmov 0   ;;  %v1182_v30 = vmov 0.0   ;;  %s381_s27 = scalar_lea.vmem [#allocation10], %s935_s16  ;;  %s954_s23 = sshll.u32 (%p1316_p13), %s1165_s19, 2 }
  0x4a   : > { %464 = vmatpush.bf16.xpose.msra.mxu0 %v455_v7  ;;  %1060 = vset.pattern.permute.xlu1 %v1181_v16  ;;  %422 = vst.msk [vmem:[#allocation2 + $0x8] sm:$0xff] %vm420_vm2, %v1180_v15  ;;  %v960_v31 = vld [vmem:[%s381_s27] sm:$0xff]  ;;  %s742_s29 = sadd.s32 (%p1316_p13), %s1161_s18, %s954_s23  ;;  %s1488_s25 = sld [smem:[#allocation15_spill]] (%p1316_p13) }
  0x4b   : > { %1059 = vset.pattern.permute.xlu2 %v1181_v16  ;;  %1061 = vset.pattern.permute.xlu0 %v1181_v16  ;;  %428 = vst.msk [vmem:[#allocation3] sm:$0xff] %vm420_vm2, %v1180_v15  ;;  %s955_s3 = sshll.u32 (%p1316_p13), %s742_s29, 2 }
  0x4c   : > { %429 = vst.msk [vmem:[#allocation3 + $0x8] sm:$0xff] %vm420_vm2, %v1180_v15  ;;  %552 = vmatpush.bf16.msra.mxu1 %v960_v31 }
  0x4d   : > { %423 = vst.msk [vmem:[#allocation4] sm:$0xff] %vm420_vm2, %v1182_v30 }
  0x4e   : > { %424 = vst.msk [vmem:[#allocation4 + $0x8] sm:$0xff] %vm420_vm2, %v1182_v30 }
  0x4f   : > { %426 = vst.msk [vmem:[#allocation6] sm:$0xff] %vm425_vm0, %v1182_v30 }
  0x50   : > { %v1369_v17 = vld [vmem:[#allocation2] sm:$0xff]  ;;  %427 = vst.msk [vmem:[#allocation6 + $0x8] sm:$0xff] %vm425_vm0, %v1182_v30  ;;  %s744_s4 = scalar_lea.vmem (%p1316_p13), %s1488_s25, %s955_s3 }
  0x51   : > { %565 = vrot.lane.b32.xlu0 %v958_v8, %s1179_s9  ;;  %945 = vmatmul.msk.bf16.vlgmr.msra.gmra.mxu0 %vm425_vm0, %v958_v8  ;;  %430 = vst.msk [vmem:[#allocation5] sm:$0xff] %vm420_vm2, %v1182_v30  ;;  %v1396_v40 = vld [vmem:[#allocation2 + $0x8] sm:$0xff] }
  0x52   : > { %431 = vst.msk [vmem:[#allocation5 + $0x8] sm:$0xff] %vm420_vm2, %v1182_v30  ;;  %v591_v32 = vld [vmem:[#allocation3] sm:$0xff] }
  0x53   : > { %432 = vst.msk [vmem:[#allocation7] sm:$0xff] %vm425_vm0, %v1182_v30  ;;  %v592_v36 = vld [vmem:[#allocation3 + $0x8] sm:$0xff] }
  0x54   : > { %433 = vst.msk [vmem:[#allocation7 + $0x8] sm:$0xff] %vm425_vm0, %v1182_v30 }
  0x58   : > { %v623_v15 = vld [vmem:[#allocation5] sm:$0xff] }
  0xbb   : > { %v568_v9 = vpop.permute.xlu0 %567 }
  0xbc   : > { %v573_v10 = vsel %vm425_vm0, %v568_v9, 0  ;;  %v506_v9 = vld [vmem:[#allocation4] sm:$0xff] }
  0xbd   : > { %582 = vmatpush.bf16.xpose.msra.mxu2 %v573_v10 }
  0xc3   : > { %v566_v11 = vpop.permute.xlu0 %565 }
  0xc4   : > { %951 = vmatmul.msk.bf16.vlgmr.msra.gmra.mxu2 %vm425_vm0, %v566_v11 }
  0xce   : > { %v466_v12 = vpop.f32.mrf.mxu0 }
  0xcf   : > { %v1361_v13 = vmul.f32 0.125, %v466_v12 }
  0xd1   : > { %v476_v14 = vsel %vm475_vm1, %v1361_v13, -inf }
  0xd2   : > { %477 = vmax.xlane.f32.xlu0 %v476_v14 }
  0xd6   : > { %v468_v26 = vpop.f32.mrf.mxu0 }
  0xd7   : > { %v1380_v28 = vmul.f32 0.125, %v468_v26 }
  0xd9   : > { %v479_v29 = vsel %vm475_vm1, %v1380_v28, -inf }
 0x145   : > { %v478_v18 = vpop.xlane.xlu0 %477 }
 0x146   : > { %v1372_v19 = vmax.f32 %v1369_v17, %v478_v18 }
 0x147   : > { %v584_v20 = vpop.f32.mrf.mxu2 }
 0x148   : > { %v589_v21 = vmul.f32 0.125, %v584_v20  ;;  %v484_v22 = vsub.f32 %v1369_v17, %v1372_v19  ;;  %563 = vst.msk [vmem:[#allocation2] sm:$0xff] %vm420_vm2, %v1372_v19  ;;  %v624_v17 = vld [vmem:[#allocation5 + $0x8] sm:$0xff] }
 0x14a   : > { %v593_v23 = vsel %vm475_vm1, %v589_v21, -inf  ;;  %v486_v7 = vmul.f32 1.442695, %v484_v22 }
 0x14b   : > { %594 = vmax.xlane.f32.xlu1 %v593_v23 }
 0x14f   : > { %v586_v24 = vpop.f32.mrf.mxu2 }
 0x150   : > { %v590_v25 = vmul.f32 0.125, %v586_v24 }
 0x152   : > { %v596_v27 = vsel %vm475_vm1, %v590_v25, -inf }
 0x153   : > { %597 = vmax.xlane.f32.xlu1 %v596_v27 }
 0x15b   : > { %480 = vmax.xlane.f32.xlu1 %v479_v29  ;;  %v637_v29 = vld [vmem:[#allocation7] sm:$0xff] }
 0x174   : > { %492 = vperm.xlu1 %1060, %v1372_v19  }
 0x1be   : > { %v595_v33 = vpop.xlane.xlu1 %594 }
 0x1bf   : > { %v599_v34 = vmax.f32 %v591_v32, %v595_v33 }
 0x1c1   : > { %v601_v35 = vsub.f32 %v591_v32, %v599_v34  ;;  %676 = vst.msk [vmem:[#allocation3] sm:$0xff] %vm420_vm2, %v599_v34  ;;  %609 = vperm.xlu2 %1059, %v599_v34  }
 0x1c3   : > { %v603_v63 = vmul.f32 1.442695, %v601_v35 }
 0x1c6   : > { %v598_v37 = vpop.xlane.xlu1 %597 }
 0x1c7   : > { %v600_v38 = vmax.f32 %v592_v36, %v598_v37 }
 0x1c9   : > { %v602_v39 = vsub.f32 %v592_v36, %v600_v38  ;;  %677 = vst.msk [vmem:[#allocation3 + $0x8] sm:$0xff] %vm420_vm2, %v600_v38  ;;  %614 = vperm.xlu2 %1059, %v600_v38  }
 0x1cb   : > { %v605_v5 = vmul.f32 1.442695, %v602_v39 }
 0x1ce   : > { %v481_v41 = vpop.xlane.xlu1 %480 }
 0x1cf   : > { %v1399_v42 = vmax.f32 %v1396_v40, %v481_v41 }
 0x1d1   : > { %652 = vrot.lane.b32.xlu2 %v960_v31, %s1179_s9  ;;  %v485_v43 = vsub.f32 %v1396_v40, %v1399_v42  ;;  %564 = vst.msk [vmem:[#allocation2 + $0x8] sm:$0xff] %vm420_vm2, %v1399_v42  ;;  %v638_v40 = vld [vmem:[#allocation7 + $0x8] sm:$0xff] }
 0x1d3   : > { %v488_v23 = vmul.f32 1.442695, %v485_v43 }
 0x1d9   : > { %497 = vperm.xlu2 %1059, %v1399_v42  }
 0x1e6   : > { %v493_v44 = vpop.permute.xlu1 %492 }
 0x1e7   : > { %v500_v45 = vsub.f32 %v1361_v13, %v493_v44 }
 0x1e9   : > { %v502_v46 = vmul.f32 1.442695, %v500_v45 }
 0x1eb   : > { %1067 = vpow2.f32 %v502_v46  ;;  %v521_v46 = vld [vmem:[#allocation6] sm:$0xff] }
 0x1f1   : > { %v1068_v47 = vpop.eup %1067 }
 0x1f2   : > { %v510_v48 = vsel %vm475_vm1, %v1068_v47, 0.0 }
 0x1f3   : > { %511 = vadd.xlane.f32.xlu0 %v510_v48 }
 0x21b   : > { %v610_v49 = vpop.permute.xlu2 %609 }
 0x21c   : > { %v617_v50 = vsub.f32 %v589_v21, %v610_v49 }
 0x21e   : > { %v619_v51 = vmul.f32 1.442695, %v617_v50 }
 0x220   : > { %1069 = vpow2.f32 %v619_v51  ;;  %v522_v51 = vld [vmem:[#allocation6 + $0x8] sm:$0xff] }
 0x223   : > { %v615_v52 = vpop.permute.xlu2 %614 }
 0x224   : > { %v618_v53 = vsub.f32 %v590_v25, %v615_v52 }
 0x226   : > { %v1070_v54 = vpop.eup %1069  ;;  %v621_v55 = vmul.f32 1.442695, %v618_v53 }
 0x227   : > { %v627_v56 = vsel %vm475_vm1, %v1070_v54, 0.0 }
 0x228   : > { %1071 = vpow2.f32 %v621_v55  ;;  %628 = vadd.xlane.f32.xlu2 %v627_v56 }
 0x22b   : > { %v653_v57 = vpop.permute.xlu2 %652 }
 0x22c   : > { %665 = vmatpush.bf16.msra.mxu3 %v653_v57 }
 0x22e   : > { %v1072_v58 = vpop.eup %1071 }
 0x22f   : > { %v630_v59 = vsel %vm475_vm1, %v1072_v58, 0.0  ;;  %v651_v60 = vpack.c.bf16 %v1072_v58, %v1070_v54 }
 0x230   : > { %631 = vadd.xlane.f32.xlu1 %v630_v59 }
 0x231   : > { %952 = vmatmul.msk.bf16.vlgmr.msra.gmra.mxu3 %vm475_vm1, %v651_v60 }
 0x233   : > { %v498_v61 = vpop.permute.xlu2 %497 }
 0x234   : > { %v501_v62 = vsub.f32 %v1380_v28, %v498_v61  ;;  %v507_v28 = vld [vmem:[#allocation4 + $0x8] sm:$0xff] }
 0x236   : > { %v504_v0 = vmul.f32 1.442695, %v501_v62 }
 0x238   : > { %1073 = vpow2.f32 %v504_v0 }
 0x239   : > { %1075 = vpow2.f32 %v603_v63 }
 0x23a   : > { %1077 = vpow2.f32 %v605_v5 }
 0x23b   : > { %1079 = vpow2.f32 %v486_v7 }
 0x23e   : > { %v1074_v1 = vpop.eup %1073 }
 0x23f   : > { %v1076_v2 = vpop.eup %1075  ;;  %v513_v3 = vsel %vm475_vm1, %v1074_v1, 0.0  ;;  %v535_v4 = vpack.c.bf16 %v1074_v1, %v1068_v47 }
 0x240   : > { %641 = vperm.xlu2 %1059, %v1076_v2   ;;  %514 = vadd.xlane.f32.xlu0 %v513_v3  ;;  %v1078_v6 = vpop.eup %1077  ;;  %v625_v16 = vmul.f32 %v1076_v2, %v623_v15 }
 0x241   : > { %950 = vmatmul.msk.bf16.vlgmr.msra.gmra.mxu1 %vm475_vm1, %v535_v4  ;;  %v1080_v8 = vpop.eup %1079  ;;  %v626_v19 = vmul.f32 %v1078_v6, %v624_v17 }
 0x242   : > { %v508_v10 = vmul.f32 %v1080_v8, %v506_v9 }
 0x254   : > { %646 = vperm.xlu0 %1061, %v1078_v6  }
 0x266   : > { %v512_v11 = vpop.xlane.xlu0 %511 }
 0x267   : > { %v516_v12 = vadd.f32 %v512_v11, %v508_v10 }
 0x269   : > { %519 = vst.msk [vmem:[#allocation4] sm:$0xff] %vm420_vm2, %v516_v12 }
 0x270   : > { %v683_v13 = vld [vmem:[#allocation4] sm:$0xff] }
 0x271   : > { %1081 = vrcp.f32 %v683_v13 }
 0x277   : > { %v1082_v14 = vpop.eup %1081 }
 0x278   : > { %689 = vperm.xlu0 %1061, %v1082_v14  }
 0x29b   : > { %v629_v18 = vpop.xlane.xlu2 %628 }
 0x29c   : > { %v633_v20 = vadd.f32 %v629_v18, %v625_v16 }
 0x29e   : > { %635 = vst.msk [vmem:[#allocation5] sm:$0xff] %vm420_vm2, %v633_v20 }
 0x2a3   : > { %v632_v21 = vpop.xlane.xlu1 %631  ;;  %v642_v30 = vpop.permute.xlu2 %641 }
 0x2a4   : > { %v634_v22 = vadd.f32 %v632_v21, %v626_v19  ;;  %v649_v32 = vmul.f32 %v642_v30, %v637_v29 }
 0x2a5   : > { %v701_v24 = vld [vmem:[#allocation5] sm:$0xff] }
 0x2a6   : > { %636 = vst.msk [vmem:[#allocation5 + $0x8] sm:$0xff] %vm420_vm2, %v634_v22  ;;  %1083 = vrcp.f32 %v701_v24 }
 0x2a7   : > { %1085 = vpow2.f32 %v488_v23 }
 0x2ac   : > { %v1084_v25 = vpop.eup %1083 }
 0x2ad   : > { %707 = vperm.xlu1 %1060, %v1084_v25   ;;  %v702_v26 = vld [vmem:[#allocation5 + $0x8] sm:$0xff]  ;;  %v1086_v27 = vpop.eup %1085 }
 0x2ae   : > { %1087 = vrcp.f32 %v702_v26  ;;  %v509_v31 = vmul.f32 %v1086_v27, %v507_v28 }
 0x2b3   : > { %v515_v33 = vpop.xlane.xlu0 %514 }
 0x2b4   : > { %v1088_v34 = vpop.eup %1087  ;;  %v517_v35 = vadd.f32 %v515_v33, %v509_v31  ;;  %v667_v36 = vpop.f32.mrf.mxu3 }
 0x2b5   : > { %v672_v37 = vadd.f32 %v667_v36, %v649_v32  ;;  %712 = vperm.xlu2 %1059, %v1088_v34  }
 0x2b6   : > { %520 = vst.msk [vmem:[#allocation4 + $0x8] sm:$0xff] %vm420_vm2, %v517_v35 }
 0x2b7   : > { %674 = vst.msk [vmem:[#allocation7] sm:$0xff] %vm425_vm0, %v672_v37 }
 0x2bc   : > { %v669_v43 = vpop.f32.mrf.mxu3 }
 0x2bd   : > { %525 = vperm.xlu2 %1059, %v1080_v8   ;;  %v684_v38 = vld [vmem:[#allocation4 + $0x8] sm:$0xff] }
 0x2be   : > { %1089 = vrcp.f32 %v684_v38  ;;  %v554_v47 = vpop.f32.mrf.mxu1  ;;  %v699_v54 = vld [vmem:[#allocation7] sm:$0xff] }
 0x2c4   : > { %v1090_v39 = vpop.eup %1089 }
 0x2c5   : > { %694 = vperm.xlu1 %1060, %v1090_v39   ;;  %530 = vperm.xlu2 %1059, %v1086_v27  }
 0x2c6   : > { %v647_v41 = vpop.permute.xlu0 %646  ;;  %v556_v59 = vpop.f32.mrf.mxu1 }
 0x2c7   : > { %v650_v42 = vmul.f32 %v647_v41, %v638_v40 }
 0x2c9   : > { %v673_v44 = vadd.f32 %v669_v43, %v650_v42 }
 0x2cb   : > { %675 = vst.msk [vmem:[#allocation7 + $0x8] sm:$0xff] %vm425_vm0, %v673_v44 }
 0x2d2   : > { %v700_v52 = vld [vmem:[#allocation7 + $0x8] sm:$0xff] }
 0x2ea   : > { %v690_v0 = vpop.permute.xlu0 %689 }
 0x30f   : > { %v713_v45 = vpop.permute.xlu2 %712 }
 0x310   : > { %v716_v56 = vmul.f32 %v713_v45, %v700_v52 }
 0x317   : > { %v526_v48 = vpop.permute.xlu2 %525 }
 0x318   : > { %v533_v49 = vmul.f32 %v526_v48, %v521_v46 }
 0x31a   : > { %v559_v50 = vadd.f32 %v554_v47, %v533_v49 }
 0x31c   : > { %561 = vst.msk [vmem:[#allocation6] sm:$0xff] %vm425_vm0, %v559_v50 }
 0x31f   : > { %v531_v53 = vpop.permute.xlu2 %530  ;;  %v708_v55 = vpop.permute.xlu1 %707 }
 0x320   : > { %v534_v57 = vmul.f32 %v531_v53, %v522_v51  ;;  %v715_v58 = vmul.f32 %v708_v55, %v699_v54 }
 0x322   : > { %v560_v60 = vadd.f32 %v556_v59, %v534_v57  ;;  %v1062_v61 = vpack.i.bf16 %v716_v56, %v715_v58 }
 0x323   : > { %v681_v63 = vld [vmem:[#allocation6] sm:$0xff] }
 0x324   : > { %562 = vst.msk [vmem:[#allocation6 + $0x8] sm:$0xff] %vm425_vm0, %v560_v60  ;;  %1063 = vrot.lane.b32.xlu2 %v1062_v61, %s1179_s9  ;;  %v697_v4 = vmul.f32 %v690_v0, %v681_v63 }
 0x32b   : > { %v682_v1 = vld [vmem:[#allocation6 + $0x8] sm:$0xff] }
 0x337   : > { %v695_v62 = vpop.permute.xlu1 %694 }
 0x338   : > { %v698_v3 = vmul.f32 %v695_v62, %v682_v1 }
 0x37e   : > { %v1064_v2 = vpop.permute.xlu2 %1063 }
 0x37f   : > { %v1066_v5 = vunpack.i.h.bf16 %v1064_v2  ;;  %v1065_v6 = vunpack.i.l.bf16 %v1064_v2 }
 0x380   : > { %737 = sbr.rel (!%p1316_p13) target bundleno = 910 (0x38e), region = 167 }
 0x381   : > { %v725_v7 = vsel %vm425_vm0, %v697_v4, %v1065_v6  ;;  %v726_v8 = vsel %vm425_vm0, %v698_v3, %v1066_v5 }
 0x382   : > { %v964_v9 = vpack.c.bf16 %v726_v8, %v725_v7 }
 0x384   : > { %965 = vst [vmem:[%s408_s12] sm:$0xff] %v964_v9  }
 0x38b   : > { %v761_v10 = vld [vmem:[%s408_s12] sm:$0xf]  ;;  %v763_v11 = vld [vmem:[%s408_s12 + $0x4] sm:$0xf] }
 0x38c   : > { %762 = vst [vmem:[%s744_s4] sm:$0xf] %v761_v10 }
 0x38d   : > { %764 = vst [vmem:[%s744_s4 + $0x8] sm:$0xf] %v763_v11 }
 0x38e PF: > { %s13_s22 = sadd.s32 1, %s1177_s22   ;;  %s1489_s18 = sld [smem:[#allocation14_spill]] }
 0x38f   : > { %p10_p4 = scmp.ge.s32.totalorder %s13_s22, 6   ;;  %s1490_s7 = sld [smem:[#allocation12_spill]] }
 0x390   : > { %s1491_s6 = sld [smem:[#allocation13_spill]]  ;;  %s1492_s12 = smov %s1141_s13 }
 0x391   : > { %s1493_s13 = smov %s1321_s26  ;;  %s1494_s14 = smov %s1149_s15 }
 0x392   : > { %s1495_s15 = smov %s1299_s28  ;;  %s1496_s16 = smov %s1157_s17 }
 0x393   : > { %s1499_s19 = smov %s1173_s21  ;;  %12 = sbr.rel (!%p10_p4) target bundleno = 8 (0x8), region = 255 }
 0x394   : > { %s1497_s17 = smov %s1489_s18  ;;  %s1498_s18 = smov %s1169_s20 }
 0x395   : > { %s1500_s20 = smov %s1490_s7 }
 0x396   : > { %s1501_s21 = smov %s1491_s6 }

// kernel: _lambda_.19
= control target key start
LH: loop header
LB: loop body
LE: loop exit
PB: predicated region body
PF: predicated region fallthrough
CT: control target
= control target key end

     0   :  { %8 = vsyncpa [#allocation3], 0  ;;  %s1795_s0 = inlined_call_operand.vmem [shape: bf16[32,256], index: 0, kind: input, shape index: {}]   ;;  %s1796_s1 = inlined_call_operand.hbm [shape: bf16[256,1536], index: 1, kind: input, shape index: {}]   ;;  %s1797_s2 = inlined_call_operand.vmem [shape: f32[1,1536], index: 2, kind: input, shape index: {}]   ;;  %s1798_s3 = inlined_call_operand.vmem [shape: bf16[32,1536], index: 3, kind: output, shape index: {}]  }
   0x1   :  { %10 = vsyncpa [#allocation3 + $0x1], 0  ;;  %s1497_s12 = smov 0   ;;  %s1499_s13 = smov 0  }
   0x2   :  { %s1501_s14 = smov 0   ;;  %s1503_s15 = smov 0  }
   0x3   :  { %s1505_s16 = smov 0   ;;  %s1507_s17 = smov 0  }
   0x4 LB: > { %s975_s18 = sadd.s32 4294967295, %s1472_s17   ;;  %s25_s19 = sadd.s32 1, %s1468_s16  ;;  %s1472_s17 = sphi %s1507_s17, %s16_s17   ;;  %s1468_s16 = sphi %s1505_s16, %s1806_s16   ;;  %s1464_s15 = sphi %s1503_s15, %s1805_s15   ;;  %s1460_s14 = sphi %s1501_s14, %s1804_s14   ;;  %s1456_s13 = sphi %s1499_s13, %s1803_s13   ;;  %s1452_s12 = sphi %s1497_s12, %s1802_s12  }
   0x5   : > { %p26_p0 = scmp.ge.s32.totalorder %s25_s19, 3  ;;  %s61_s20 = sadd.s32 1, %s1460_s14 }
   0x6   : > { %p68_p1 = scmp.ne.s32.totalorder %s1460_s14, %s1456_s13  ;;  %p69_p2 = scmp.eq.s32.totalorder %s1472_s17, 0 }
   0x7   : > { %s1808_s19 = smov (%p26_p0, %s25_s19), 0  ;;  %p74_p4 = scmp.ne.s32.totalorder %s1456_s13, %s1452_s12 }
   0x8   : > { %p1533_p3 = por %p69_p2, %p68_p1  ;;  %s58_s22 = ssub.s32 %s1468_s16, %s1808_s19 }
   0x9   : > { %p75_p5 = scmp.eq.s32.totalorder %s975_s18, 0  ;;  %p59_p6 = scmp.eq.s32.totalorder %s58_s22, 0 }
   0xa   : > { %p126_p7 = scmp.eq.s32.totalorder %s975_s18, 2  ;;  %p1340_p10 = scmp.lt.s32.totalorder %s1472_s17, 3 }
   0xb   : > { %p1540_p8 = por %p75_p5, %p74_p4  ;;  %s162_s26 = sand.u32 1, %s1460_s14  }
   0xc   : > { %s1545_s24 = scalar_select %p59_p6, %s1460_s14, %s61_s20  }
   0xd   : > { %p1547_p9 = por %p126_p7, %p68_p1  ;;  %s1264_s27 = sshll.u32 %s1468_s16, 4 }
   0xe   : > { %s980_s28 = sshll.u32 %s162_s26, 9  ;;  %s171_s4 = scalar_lea.hbm %s1796_s1, %s1264_s27 }
   0xf   : > { %s172_s5 = sshll.u32 %s171_s4, 4  ;;  %s166_s6 = scalar_lea.vmem [#allocation2], %s980_s28  ;;  %s173_s5 = int_to_ptr.hbm [resolvable:$true] %s172_s5 }
  0x10   : > { %s174_s7 = sshll.u32 %s166_s6, 4  ;;  %p1337_p11 = pnand %p1340_p10, %p1533_p3  ;;  %s175_s7 = int_to_ptr.vmem [resolvable:$true] %s174_s7 }
  0x11   : > { %p983_p12 = scmp.ge.s32.totalorder %s1472_s17, 1  ;;  %s163_s8 = scalar_lea.sflag [#allocation3], %s162_s26 }
  0x12   : > { %s1474_s9 = smov 768   ;;  %s1475_s10 = smov 256  }
  0x13   : > { %s1476_s11 = smov 16   ;;  %p190_p13 = scmp.lt.s32.totalorder %s1472_s17, 4 }
  0x14   : > { %1339 = dma.hbm_to_vmem [thread:$0]  (!%p1337_p11), %s173_s5, 8192, %s175_s7, %s163_s8, %s1474_s9, %s1475_s10, %s1476_s11  }
  0x15   : > { %p191_p0 = pnand %p983_p12, %p190_p13 }
  0x16   : > { %s1562_s12 = sand.u32 (!%p191_p0), 1, %s1456_s13  }
  0x17   : > { %194 = sbr.rel (%p191_p0) target bundleno = 268 (0x10c), region = 32  ;;  %s984_s18 = sshll.u32 (!%p191_p0), %s1562_s12, 9 }
  0x18   : > { %s197_s20 = scalar_lea.sflag (!%p191_p0), [#allocation3], %s1562_s12  ;;  %s1566_s22 = scalar_lea.vmem (!%p191_p0), [#allocation2], %s984_s18 }
  0x1c   : > { %1447 = dma.done.wait (%p1540_p8), %s197_s20, 8192  }
  0x1d   : > { %1449 = vsyncadd (%p1540_p8), %s197_s20, 4294959104  ;;  %v1117_v0 = vld [vmem:[%s1566_s22 + $0xe0] sm:$0xf]  ;;  %v1299_v1 = vld [vmem:[%s1566_s22 + $0xec] sm:$0xf0]  ;;  %s986_s20 = sshll.u32 %s1464_s15, 2 }
  0x1e   : > { %v1245_v2 = vld [vmem:[%s1566_s22 + $0x1e0] sm:$0xf]  ;;  %v1118_v3 = vor.u32 %v1299_v1, %v1117_v0  ;;  %v1331_v4 = vld [vmem:[%s1566_s22 + $0x1ec] sm:$0xf0]  ;;  %v1297_v5 = vld [vmem:[%s1566_s22 + $0xe4] sm:$0xf] }
  0x1f   : > { %v1119_v6 = vld [vmem:[%s1566_s22 + $0xf0] sm:$0xf0]  ;;  %v1246_v7 = vor.u32 %v1331_v4, %v1245_v2  ;;  %v1329_v9 = vld [vmem:[%s1566_s22 + $0x1e4] sm:$0xf]  ;;  %v1101_v11 = vld [vmem:[%s1566_s22 + $0xc0] sm:$0xf] }
  0x20   : > { %v1122_v8 = vor.u32 %v1297_v5, %v1119_v6  ;;  %v1247_v10 = vld [vmem:[%s1566_s22 + $0x1f0] sm:$0xf0]  ;;  %666 = vmatpush.bf16.msra.mxu0 %v1118_v3  ;;  %v1295_v13 = vld [vmem:[%s1566_s22 + $0xcc] sm:$0xf0]  ;;  %v1229_v14 = vld [vmem:[%s1566_s22 + $0x1c0] sm:$0xf] }
  0x21   : > { %v1250_v12 = vor.u32 %v1329_v9, %v1247_v10  ;;  %v1327_v15 = vld [vmem:[%s1566_s22 + $0x1cc] sm:$0xf0]  ;;  %685 = vmatpush.bf16.msra.mxu1 %v1246_v7  ;;  %v1102_v16 = vor.u32 %v1295_v13, %v1101_v11  ;;  %v1293_v18 = vld [vmem:[%s1566_s22 + $0xc4] sm:$0xf]  ;;  %v1103_v19 = vld [vmem:[%s1566_s22 + $0xd0] sm:$0xf0] }
  0x22   : > { %704 = vmatpush.bf16.msra.mxu2 %v1122_v8  ;;  %v1230_v17 = vor.u32 %v1327_v15, %v1229_v14  ;;  %v1325_v20 = vld [vmem:[%s1566_s22 + $0x1c4] sm:$0xf]  ;;  %v1106_v21 = vor.u32 %v1293_v18, %v1103_v19  ;;  %v1231_v22 = vld [vmem:[%s1566_s22 + $0x1d0] sm:$0xf0]  ;;  %v1085_v23 = vld [vmem:[%s1566_s22 + $0xa0] sm:$0xf] }
  0x23   : > { %723 = vmatpush.bf16.msra.mxu3 %v1250_v12  ;;  %v1291_v24 = vld [vmem:[%s1566_s22 + $0xac] sm:$0xf0]  ;;  %v1234_v25 = vor.u32 %v1325_v20, %v1231_v22  ;;  %v1213_v26 = vld [vmem:[%s1566_s22 + $0x1a0] sm:$0xf]  ;;  %v1289_v28 = vld [vmem:[%s1566_s22 + $0xa4] sm:$0xf] }
  0x24   : > { %v1323_v27 = vld [vmem:[%s1566_s22 + $0x1ac] sm:$0xf0]  ;;  %667 = vmatpush.bf16.msra.mxu0 %v1102_v16  ;;  %v1086_v29 = vor.u32 %v1291_v24, %v1085_v23  ;;  %v1087_v30 = vld [vmem:[%s1566_s22 + $0xb0] sm:$0xf0]  ;;  %v1321_v31 = vld [vmem:[%s1566_s22 + $0x1a4] sm:$0xf] }
  0x25   : > { %v1215_v32 = vld [vmem:[%s1566_s22 + $0x1b0] sm:$0xf0]  ;;  %686 = vmatpush.bf16.msra.mxu1 %v1230_v17  ;;  %v1214_v33 = vor.u32 %v1323_v27, %v1213_v26  ;;  %v1090_v34 = vor.u32 %v1289_v28, %v1087_v30  ;;  %v1069_v35 = vld [vmem:[%s1566_s22 + $0x80] sm:$0xf]  ;;  %v1287_v36 = vld [vmem:[%s1566_s22 + $0x8c] sm:$0xf0] }
  0x26   : > { %705 = vmatpush.bf16.msra.mxu2 %v1106_v21  ;;  %v1197_v37 = vld [vmem:[%s1566_s22 + $0x180] sm:$0xf]  ;;  %v1218_v38 = vor.u32 %v1321_v31, %v1215_v32  ;;  %v1319_v39 = vld [vmem:[%s1566_s22 + $0x18c] sm:$0xf0]  ;;  %v1285_v40 = vld [vmem:[%s1566_s22 + $0x84] sm:$0xf]  ;;  %v1070_v44 = vor.u32 %v1287_v36, %v1069_v35 }
  0x27   : > { %724 = vmatpush.bf16.msra.mxu3 %v1234_v25  ;;  %v1071_v41 = vld [vmem:[%s1566_s22 + $0x90] sm:$0xf0]  ;;  %v1317_v42 = vld [vmem:[%s1566_s22 + $0x184] sm:$0xf]  ;;  %v1198_v45 = vor.u32 %v1319_v39, %v1197_v37  ;;  %v1053_v47 = vld [vmem:[%s1566_s22 + $0x60] sm:$0xf] }
  0x28   : > { %v1199_v43 = vld [vmem:[%s1566_s22 + $0x190] sm:$0xf0]  ;;  %668 = vmatpush.bf16.msra.mxu0 %v1086_v29  ;;  %v1074_v46 = vor.u32 %v1285_v40, %v1071_v41  ;;  %v1283_v48 = vld [vmem:[%s1566_s22 + $0x6c] sm:$0xf0]  ;;  %v1181_v49 = vld [vmem:[%s1566_s22 + $0x160] sm:$0xf] }
  0x29   : > { %687 = vmatpush.bf16.msra.mxu1 %v1214_v33  ;;  %v1202_v50 = vor.u32 %v1317_v42, %v1199_v43  ;;  %v1315_v51 = vld [vmem:[%s1566_s22 + $0x16c] sm:$0xf0]  ;;  %v1281_v52 = vld [vmem:[%s1566_s22 + $0x64] sm:$0xf]  ;;  %v1055_v53 = vld [vmem:[%s1566_s22 + $0x70] sm:$0xf0]  ;;  %v1054_v56 = vor.u32 %v1283_v48, %v1053_v47 }
  0x2a   : > { %706 = vmatpush.bf16.msra.mxu2 %v1090_v34  ;;  %v1313_v54 = vld [vmem:[%s1566_s22 + $0x164] sm:$0xf]  ;;  %v1183_v55 = vld [vmem:[%s1566_s22 + $0x170] sm:$0xf0]  ;;  %v1182_v57 = vor.u32 %v1315_v51, %v1181_v49  ;;  %v1058_v58 = vor.u32 %v1281_v52, %v1055_v53  ;;  %v1037_v59 = vld [vmem:[%s1566_s22 + $0x40] sm:$0xf] }
  0x2b   : > { %725 = vmatpush.bf16.msra.mxu3 %v1218_v38  ;;  %v1279_v60 = vld [vmem:[%s1566_s22 + $0x4c] sm:$0xf0]  ;;  %v1165_v61 = vld [vmem:[%s1566_s22 + $0x140] sm:$0xf]  ;;  %v1186_v62 = vor.u32 %v1313_v54, %v1183_v55  ;;  %v1277_v0 = vld [vmem:[%s1566_s22 + $0x44] sm:$0xf] }
  0x2c   : > { %669 = vmatpush.bf16.msra.mxu0 %v1070_v44  ;;  %v1311_v63 = vld [vmem:[%s1566_s22 + $0x14c] sm:$0xf0]  ;;  %v1039_v1 = vld [vmem:[%s1566_s22 + $0x50] sm:$0xf0]  ;;  %v1309_v2 = vld [vmem:[%s1566_s22 + $0x144] sm:$0xf]  ;;  %v1038_v4 = vor.u32 %v1279_v60, %v1037_v59 }
  0x2d   : > { %688 = vmatpush.bf16.msra.mxu1 %v1198_v45  ;;  %v1167_v3 = vld [vmem:[%s1566_s22 + $0x150] sm:$0xf0]  ;;  %v1166_v5 = vor.u32 %v1311_v63, %v1165_v61  ;;  %v1042_v6 = vor.u32 %v1277_v0, %v1039_v1  ;;  %v1021_v7 = vld [vmem:[%s1566_s22 + $0x20] sm:$0xf]  ;;  %v1275_v8 = vld [vmem:[%s1566_s22 + $0x2c] sm:$0xf0] }
  0x2e   : > { %707 = vmatpush.bf16.msra.mxu2 %v1074_v46  ;;  %v1149_v9 = vld [vmem:[%s1566_s22 + $0x120] sm:$0xf]  ;;  %v1170_v10 = vor.u32 %v1309_v2, %v1167_v3  ;;  %v1307_v11 = vld [vmem:[%s1566_s22 + $0x12c] sm:$0xf0]  ;;  %v1273_v12 = vld [vmem:[%s1566_s22 + $0x24] sm:$0xf]  ;;  %v1022_v16 = vor.u32 %v1275_v8, %v1021_v7 }
  0x2f   : > { %726 = vmatpush.bf16.msra.mxu3 %v1202_v50  ;;  %v1023_v13 = vld [vmem:[%s1566_s22 + $0x30] sm:$0xf0]  ;;  %v1305_v14 = vld [vmem:[%s1566_s22 + $0x124] sm:$0xf]  ;;  %v1005_v17 = vld [vmem:[%s1566_s22] sm:$0xf]  ;;  %v1150_v19 = vor.u32 %v1307_v11, %v1149_v9 }
  0x30   : > { %670 = vmatpush.bf16.msra.mxu0 %v1054_v56  ;;  %v1151_v15 = vld [vmem:[%s1566_s22 + $0x130] sm:$0xf0]  ;;  %v1271_v18 = vld [vmem:[%s1566_s22 + $0xc] sm:$0xf0]  ;;  %v1026_v20 = vor.u32 %v1273_v12, %v1023_v13  ;;  %v1133_v21 = vld [vmem:[%s1566_s22 + $0x100] sm:$0xf] }
  0x31   : > { %689 = vmatpush.bf16.msra.mxu1 %v1182_v57  ;;  %v1303_v22 = vld [vmem:[%s1566_s22 + $0x10c] sm:$0xf0]  ;;  %v1269_v23 = vld [vmem:[%s1566_s22 + $0x4] sm:$0xf]  ;;  %v1154_v24 = vor.u32 %v1305_v14, %v1151_v15  ;;  %v1007_v25 = vld [vmem:[%s1566_s22 + $0x10] sm:$0xf0]  ;;  %v1006_v31 = vor.u32 %v1271_v18, %v1005_v17 }
  0x32   : > { %708 = vmatpush.bf16.msra.mxu2 %v1058_v58  ;;  %v1301_v26 = vld [vmem:[%s1566_s22 + $0x104] sm:$0xf]  ;;  %v1135_v27 = vld [vmem:[%s1566_s22 + $0x110] sm:$0xf0]  ;;  %v989_v28 = vld [vmem:[%s1795_s0] sm:$0xf]  ;;  %v1134_v35 = vor.u32 %v1303_v22, %v1133_v21  ;;  %v1010_v36 = vor.u32 %v1269_v23, %v1007_v25 }
  0x33   : > { %727 = vmatpush.bf16.msra.mxu3 %v1186_v62  ;;  %v1298_v29 = vld [vmem:[%s1566_s22 + $0xec] sm:$0xf]  ;;  %v1127_v30 = vld [vmem:[%s1566_s22 + $0xf8] sm:$0xf0]  ;;  %v1266_v32 = vld [vmem:[%s1795_s0 + $0x4] sm:$0xf0]  ;;  %v1138_v39 = vor.u32 %v1301_v26, %v1135_v27 }
  0x34   : > { %671 = vmatpush.bf16.msra.mxu0 %v1038_v4  ;;  %v1253_v33 = vld [vmem:[%s1566_s22 + $0x1e8] sm:$0xf]  ;;  %v1332_v34 = vld [vmem:[%s1566_s22 + $0x1f4] sm:$0xf0]  ;;  %v1265_v37 = vld [vmem:[%s1795_s0 + $0x4] sm:$0xf]  ;;  %v1130_v40 = vor.u32 %v1298_v29, %v1127_v30  ;;  %v1655_v44 = vor.u32 %v1266_v32, %v989_v28 }
  0x35   : > { %690 = vmatpush.bf16.msra.mxu1 %v1166_v5  ;;  %v991_v38 = vld [vmem:[%s1795_s0 + $0x8] sm:$0xf0]  ;;  %v1125_v41 = vld [vmem:[%s1566_s22 + $0xe8] sm:$0xf]  ;;  %v1300_v42 = vld [vmem:[%s1566_s22 + $0xf4] sm:$0xf0]  ;;  %v1254_v45 = vor.u32 %v1332_v34, %v1253_v33 }
  0x36   : > { %709 = vmatpush.bf16.msra.mxu2 %v1042_v6  ;;  %v1330_v43 = vld [vmem:[%s1566_s22 + $0x1ec] sm:$0xf]  ;;  %v1255_v46 = vld [vmem:[%s1566_s22 + $0x1f8] sm:$0xf0]  ;;  %v1660_v49 = vor.u32 %v1265_v37, %v991_v38  ;;  %v1237_v50 = vld [vmem:[%s1566_s22 + $0x1c8] sm:$0xf]  ;;  %v1126_v52 = vor.u32 %v1300_v42, %v1125_v41 }
  0x37   : > { %728 = vmatpush.bf16.msra.mxu3 %v1170_v10  ;;  %v1294_v47 = vld [vmem:[%s1566_s22 + $0xcc] sm:$0xf]  ;;  %v1111_v48 = vld [vmem:[%s1566_s22 + $0xd8] sm:$0xf0]  ;;  %v1328_v51 = vld [vmem:[%s1566_s22 + $0x1d4] sm:$0xf0]  ;;  %v1258_v53 = vor.u32 %v1330_v43, %v1255_v46 }
  0x38   : > { %672 = vmatpush.bf16.msra.mxu0 %v1022_v16  ;;  %v1114_v54 = vor.u32 %v1294_v47, %v1111_v48  ;;  %v1109_v55 = vld [vmem:[%s1566_s22 + $0xc8] sm:$0xf]  ;;  %v1296_v56 = vld [vmem:[%s1566_s22 + $0xd4] sm:$0xf0]  ;;  %v1326_v57 = vld [vmem:[%s1566_s22 + $0x1cc] sm:$0xf]  ;;  %v1238_v58 = vor.u32 %v1328_v51, %v1237_v50 }
  0x39   : > { %691 = vmatpush.bf16.msra.mxu1 %v1150_v19  ;;  %v1239_v59 = vld [vmem:[%s1566_s22 + $0x1d8] sm:$0xf0]  ;;  %v1290_v60 = vld [vmem:[%s1566_s22 + $0xac] sm:$0xf]  ;;  %v1221_v62 = vld [vmem:[%s1566_s22 + $0x1a8] sm:$0xf]  ;;  %v1110_v0 = vor.u32 %v1296_v56, %v1109_v55 }
  0x3a   : > { %710 = vmatpush.bf16.msra.mxu2 %v1026_v20  ;;  %v1095_v61 = vld [vmem:[%s1566_s22 + $0xb8] sm:$0xf0]  ;;  %v1324_v63 = vld [vmem:[%s1566_s22 + $0x1b4] sm:$0xf0]  ;;  %v1242_v1 = vor.u32 %v1326_v57, %v1239_v59  ;;  %v1093_v3 = vld [vmem:[%s1566_s22 + $0xa8] sm:$0xf] }
  0x3b   : > { %729 = vmatpush.bf16.msra.mxu3 %v1154_v24  ;;  %v1098_v2 = vor.u32 %v1290_v60, %v1095_v61  ;;  %v1292_v4 = vld [vmem:[%s1566_s22 + $0xb4] sm:$0xf0]  ;;  %v1322_v5 = vld [vmem:[%s1566_s22 + $0x1ac] sm:$0xf]  ;;  %v1222_v6 = vor.u32 %v1324_v63, %v1221_v62  ;;  %v1223_v7 = vld [vmem:[%s1566_s22 + $0x1b8] sm:$0xf0] }
  0x3c   : > { %673 = vmatpush.bf16.msra.mxu0 %v1006_v31  ;;  %v1286_v8 = vld [vmem:[%s1566_s22 + $0x8c] sm:$0xf]  ;;  %v1079_v9 = vld [vmem:[%s1566_s22 + $0x98] sm:$0xf0]  ;;  %v1205_v10 = vld [vmem:[%s1566_s22 + $0x188] sm:$0xf]  ;;  %v1094_v12 = vor.u32 %v1292_v4, %v1093_v3  ;;  %v1226_v14 = vor.u32 %v1322_v5, %v1223_v7 }
  0x3d   : > { %692 = vmatpush.bf16.msra.mxu1 %v1134_v35  ;;  %v1320_v11 = vld [vmem:[%s1566_s22 + $0x194] sm:$0xf0]  ;;  %v1077_v13 = vld [vmem:[%s1566_s22 + $0x88] sm:$0xf]  ;;  %v1082_v15 = vor.u32 %v1286_v8, %v1079_v9  ;;  %v1318_v17 = vld [vmem:[%s1566_s22 + $0x18c] sm:$0xf] }
  0x3e   : > { %711 = vmatpush.bf16.msra.mxu2 %v1010_v36  ;;  %v1288_v16 = vld [vmem:[%s1566_s22 + $0x94] sm:$0xf0]  ;;  %v1207_v18 = vld [vmem:[%s1566_s22 + $0x198] sm:$0xf0]  ;;  %v1206_v19 = vor.u32 %v1320_v11, %v1205_v10  ;;  %v997_v20 = vld [vmem:[%s1795_s0 + $0x10] sm:$0xf] }
  0x3f   : > { %730 = vmatpush.bf16.msra.mxu3 %v1138_v39  ;;  %674 = vmatmul.bf16.vlgmr.msra.gmra.mxu0 %v1655_v44  ;;  %v1282_v21 = vld [vmem:[%s1566_s22 + $0x6c] sm:$0xf]  ;;  %v1063_v22 = vld [vmem:[%s1566_s22 + $0x78] sm:$0xf0]  ;;  %v1268_v23 = vld [vmem:[%s1795_s0 + $0x14] sm:$0xf0]  ;;  %v1078_v26 = vor.u32 %v1288_v16, %v1077_v13  ;;  %v1210_v29 = vor.u32 %v1318_v17, %v1207_v18 }
  0x40   : > { %693 = vmatmul.bf16.vlgmr.msra.gmra.mxu1 %v1660_v49  ;;  %742 = vmatpush.bf16.msrb.mxu0 %v1126_v52  ;;  %v1189_v24 = vld [vmem:[%s1566_s22 + $0x168] sm:$0xf]  ;;  %v1316_v25 = vld [vmem:[%s1566_s22 + $0x174] sm:$0xf0]  ;;  %v1267_v27 = vld [vmem:[%s1795_s0 + $0x14] sm:$0xf]  ;;  %v1066_v30 = vor.u32 %v1282_v21, %v1063_v22  ;;  %v1707_v34 = vor.u32 %v1268_v23, %v997_v20 }
  0x41   : > { %761 = vmatpush.bf16.msrb.mxu1 %v1254_v45  ;;  %712 = vmatmul.bf16.vlgmr.msra.gmra.mxu2 %v1655_v44  ;;  %v999_v28 = vld [vmem:[%s1795_s0 + $0x18] sm:$0xf0]  ;;  %v1061_v31 = vld [vmem:[%s1566_s22 + $0x68] sm:$0xf]  ;;  %v1284_v32 = vld [vmem:[%s1566_s22 + $0x74] sm:$0xf0]  ;;  %v1190_v35 = vor.u32 %v1316_v25, %v1189_v24 }
  0x42   : > { %780 = vmatpush.bf16.msrb.mxu2 %v1130_v40  ;;  %731 = vmatmul.bf16.vlgmr.msra.gmra.mxu3 %v1660_v49  ;;  %v1314_v33 = vld [vmem:[%s1566_s22 + $0x16c] sm:$0xf]  ;;  %v1191_v36 = vld [vmem:[%s1566_s22 + $0x178] sm:$0xf0]  ;;  %v1712_v39 = vor.u32 %v1267_v27, %v999_v28  ;;  %v1173_v40 = vld [vmem:[%s1566_s22 + $0x148] sm:$0xf]  ;;  %v1062_v42 = vor.u32 %v1284_v32, %v1061_v31 }
  0x43   : > { %799 = vmatpush.bf16.msrb.mxu3 %v1258_v53  ;;  %v1278_v37 = vld [vmem:[%s1566_s22 + $0x4c] sm:$0xf]  ;;  %v1047_v38 = vld [vmem:[%s1566_s22 + $0x58] sm:$0xf0]  ;;  %v1312_v41 = vld [vmem:[%s1566_s22 + $0x154] sm:$0xf0]  ;;  %v1194_v43 = vor.u32 %v1314_v33, %v1191_v36 }
  0x44   : > { %743 = vmatpush.bf16.msrb.mxu0 %v1110_v0  ;;  %v1050_v45 = vor.u32 %v1278_v37, %v1047_v38  ;;  %v1045_v46 = vld [vmem:[%s1566_s22 + $0x48] sm:$0xf]  ;;  %v1280_v47 = vld [vmem:[%s1566_s22 + $0x54] sm:$0xf0]  ;;  %v1310_v48 = vld [vmem:[%s1566_s22 + $0x14c] sm:$0xf]  ;;  %v1174_v50 = vor.u32 %v1312_v41, %v1173_v40 }
  0x45   : > { %762 = vmatpush.bf16.msrb.mxu1 %v1238_v58  ;;  %v1175_v51 = vld [vmem:[%s1566_s22 + $0x158] sm:$0xf0]  ;;  %v1274_v52 = vld [vmem:[%s1566_s22 + $0x2c] sm:$0xf]  ;;  %v1308_v55 = vld [vmem:[%s1566_s22 + $0x134] sm:$0xf0]  ;;  %v1046_v56 = vor.u32 %v1280_v47, %v1045_v46 }
  0x46   : > { %781 = vmatpush.bf16.msrb.mxu2 %v1114_v54  ;;  %v1031_v53 = vld [vmem:[%s1566_s22 + $0x38] sm:$0xf0]  ;;  %v1157_v54 = vld [vmem:[%s1566_s22 + $0x128] sm:$0xf]  ;;  %v1178_v57 = vor.u32 %v1310_v48, %v1175_v51  ;;  %v1276_v60 = vld [vmem:[%s1566_s22 + $0x34] sm:$0xf0] }
  0x47   : > { %800 = vmatpush.bf16.msrb.mxu3 %v1242_v1  ;;  %v1034_v58 = vor.u32 %v1274_v52, %v1031_v53  ;;  %v1029_v59 = vld [vmem:[%s1566_s22 + $0x28] sm:$0xf]  ;;  %v1306_v61 = vld [vmem:[%s1566_s22 + $0x12c] sm:$0xf]  ;;  %v1158_v62 = vor.u32 %v1308_v55, %v1157_v54  ;;  %v1159_v63 = vld [vmem:[%s1566_s22 + $0x138] sm:$0xf0] }
  0x48   : > { %744 = vmatpush.bf16.msrb.mxu0 %v1094_v12  ;;  %v1270_v0 = vld [vmem:[%s1566_s22 + $0xc] sm:$0xf]  ;;  %v1015_v1 = vld [vmem:[%s1566_s22 + $0x18] sm:$0xf0]  ;;  %v1304_v3 = vld [vmem:[%s1566_s22 + $0x114] sm:$0xf0]  ;;  %v1030_v4 = vor.u32 %v1276_v60, %v1029_v59  ;;  %v1162_v5 = vor.u32 %v1306_v61, %v1159_v63 }
  0x49   : > { %763 = vmatpush.bf16.msrb.mxu1 %v1222_v6  ;;  %v1018_v6 = vor.u32 %v1270_v0, %v1015_v1  ;;  %v1013_v7 = vld [vmem:[%s1566_s22 + $0x8] sm:$0xf]  ;;  %v1272_v8 = vld [vmem:[%s1566_s22 + $0x14] sm:$0xf0]  ;;  %v1302_v10 = vld [vmem:[%s1566_s22 + $0x10c] sm:$0xf] }
  0x4a   : > { %782 = vmatpush.bf16.msrb.mxu2 %v1098_v2  ;;  %v1141_v2 = vld [vmem:[%s1566_s22 + $0x108] sm:$0xf]  ;;  %v1143_v11 = vld [vmem:[%s1566_s22 + $0x118] sm:$0xf0]  ;;  %v1014_v12 = vor.u32 %v1272_v8, %v1013_v7  ;;  %p242_p1 = scmp.lt.s32.totalorder %s986_s20, 11  ;;  %s985_s26 = sshll.u32 %s1562_s12, 6 }
  0x4b   : > { %801 = vmatpush.bf16.msrb.mxu3 %v1226_v14  ;;  %v1142_v9 = vor.u32 %v1304_v3, %v1141_v2  ;;  %v1146_v13 = vor.u32 %v1302_v10, %v1143_v11  ;;  %s1753_s27 = scalar_lea.vmem [#allocation4], %s985_s26  ;;  %s1333_s12 = sshll.u32 (%p1547_p9), %s1464_s15, 4 }
  0x4c   : > { %745 = vmatpush.bf16.msrb.mxu0 %v1078_v26  ;;  %s1810_s20 = smov (!%p242_p1, %s986_s20), 11  ;;  %s846_s30 = scalar_lea.vmem (%p1547_p9), %s1798_s3, %s1333_s12 }
  0x4d   : > { %764 = vmatpush.bf16.msrb.mxu1 %v1206_v19  ;;  %s244_s23 = scalar_lea.vmem %s1797_s2, %s1810_s20 }
  0x4e   : > { %783 = vmatpush.bf16.msrb.mxu2 %v1082_v15  ;;  %v316_v14 = vld [vmem:[%s244_s23] sm:$0xf] }
  0x4f   : > { %802 = vmatpush.bf16.msrb.mxu3 %v1210_v29  ;;  %679 = vmatmul.bf16.gmra.mxu0 %v1707_v34  ;;  %v319_v17 = vperm.slane %v316_v14, 1 }
  0x50   : > { %698 = vmatmul.bf16.gmra.mxu1 %v1712_v39  ;;  %746 = vmatpush.bf16.msrb.mxu0 %v1062_v42 }
  0x51   : > { %765 = vmatpush.bf16.msrb.mxu1 %v1190_v35  ;;  %717 = vmatmul.bf16.gmra.mxu2 %v1707_v34 }
  0x52   : > { %784 = vmatpush.bf16.msrb.mxu2 %v1066_v30  ;;  %736 = vmatmul.bf16.gmra.mxu3 %v1712_v39 }
  0x53   : > { %803 = vmatpush.bf16.msrb.mxu3 %v1194_v43 }
  0x54   : > { %747 = vmatpush.bf16.msrb.mxu0 %v1046_v56 }
  0x55   : > { %766 = vmatpush.bf16.msrb.mxu1 %v1174_v50  ;;  %v320_v50 = vperm.slane %v316_v14, 2 }
  0x56   : > { %785 = vmatpush.bf16.msrb.mxu2 %v1050_v45 }
  0x57   : > { %804 = vmatpush.bf16.msrb.mxu3 %v1178_v57  ;;  %v321_v57 = vperm.slane %v316_v14, 3 }
  0x58   : > { %748 = vmatpush.bf16.msrb.mxu0 %v1030_v4 }
  0x59   : > { %767 = vmatpush.bf16.msrb.mxu1 %v1158_v62 }
  0x5a   : > { %786 = vmatpush.bf16.msrb.mxu2 %v1034_v58 }
  0x5b   : > { %805 = vmatpush.bf16.msrb.mxu3 %v1162_v5 }
  0x5c   : > { %749 = vmatpush.bf16.msrb.mxu0 %v1014_v12 }
  0x5d   : > { %768 = vmatpush.bf16.msrb.mxu1 %v1142_v9 }
  0x5e   : > { %787 = vmatpush.bf16.msrb.mxu2 %v1018_v6 }
  0x5f   : > { %806 = vmatpush.bf16.msrb.mxu3 %v1146_v13  ;;  %750 = vmatmul.bf16.vlgmr.msrb.gmra.mxu0 %v1655_v44 }
  0x60   : > { %769 = vmatmul.bf16.vlgmr.msrb.gmra.mxu1 %v1660_v49 }
  0x61   : > { %788 = vmatmul.bf16.vlgmr.msrb.gmra.mxu2 %v1655_v44  ;;  %v318_v44 = vperm.slane %v316_v14, 0 }
  0x62   : > { %807 = vmatmul.bf16.vlgmr.msrb.gmra.mxu3 %v1660_v49 }
  0x6f   : > { %755 = vmatmul.bf16.gmra.mxu0 %v1707_v34 }
  0x70   : > { %774 = vmatmul.bf16.gmra.mxu1 %v1712_v39 }
  0x71   : > { %793 = vmatmul.bf16.gmra.mxu2 %v1707_v34 }
  0x72   : > { %812 = vmatmul.bf16.gmra.mxu3 %v1712_v39 }
  0xbc   : > { %v675_v15 = vpop.f32.mrf.mxu0 }
  0xbd   : > { %v694_v49 = vpop.f32.mrf.mxu1  ;;  %v676_v16 = vadd.f32 %v675_v15, %v318_v44 }
  0xbf   : > { %v695_v19 = vadd.f32 %v694_v49, %v676_v16 }
  0xc4   : > { %v713_v18 = vpop.f32.mrf.mxu2  ;;  %v677_v22 = vpop.f32.mrf.mxu0 }
  0xc5   : > { %v714_v20 = vadd.f32 %v713_v18, %v319_v17  ;;  %v732_v21 = vpop.f32.mrf.mxu3  ;;  %v696_v23 = vpop.f32.mrf.mxu1  ;;  %v678_v26 = vadd.f32 %v677_v22, %v318_v44 }
  0xc7   : > { %v733_v24 = vadd.f32 %v732_v21, %v714_v20  ;;  %v697_v32 = vadd.f32 %v696_v23, %v678_v26 }
  0xc9   : > { %v818_v25 = vpack.c.bf16 %v733_v24, %v695_v19 }
  0xcb   : > { %826 = vst [vmem:[%s1753_s27] sm:$0xff] %v818_v25 }
  0xcc   : > { %v715_v27 = vpop.f32.mrf.mxu2  ;;  %v680_v30 = vpop.f32.mrf.mxu0 }
  0xcd   : > { %v716_v28 = vadd.f32 %v715_v27, %v319_v17  ;;  %v734_v29 = vpop.f32.mrf.mxu3  ;;  %v699_v31 = vpop.f32.mrf.mxu1  ;;  %v681_v35 = vadd.f32 %v680_v30, %v318_v44 }
  0xcf   : > { %v735_v33 = vadd.f32 %v734_v29, %v716_v28  ;;  %v700_v37 = vadd.f32 %v699_v31, %v681_v35 }
  0xd1   : > { %v820_v34 = vpack.c.bf16 %v735_v33, %v697_v32 }
  0xd2   : > { %v859_v25 = vld [vmem:[%s1753_s27] sm:$0xff] (%p1547_p9) }
  0xd3   : > { %828 = vst [vmem:[%s1753_s27 + $0x10] sm:$0xff] %v820_v34 }
  0xd4   : > { %v718_v36 = vpop.f32.mrf.mxu2  ;;  %v682_v40 = vpop.f32.mrf.mxu0  ;;  %860 = vst [vmem:[%s846_s30] sm:$0xff] (%p1547_p9), %v859_v25 }
  0xd5   : > { %v719_v38 = vadd.f32 %v718_v36, %v319_v17  ;;  %v737_v39 = vpop.f32.mrf.mxu3  ;;  %v701_v41 = vpop.f32.mrf.mxu1  ;;  %v683_v45 = vadd.f32 %v682_v40, %v318_v44 }
  0xd7   : > { %v738_v42 = vadd.f32 %v737_v39, %v719_v38  ;;  %v702_v52 = vadd.f32 %v701_v41, %v683_v45 }
  0xd9   : > { %v822_v43 = vpack.c.bf16 %v738_v42, %v700_v37 }
  0xda   : > { %v863_v27 = vld [vmem:[%s1753_s27 + $0x10] sm:$0xff] (%p1547_p9) }
  0xdb   : > { %830 = vst [vmem:[%s1753_s27 + $0x20] sm:$0xff] %v822_v43 }
  0xdc   : > { %v720_v46 = vpop.f32.mrf.mxu2  ;;  %v751_v51 = vpop.f32.mrf.mxu0  ;;  %864 = vst [vmem:[%s846_s30 + $0x30] sm:$0xff] (%p1547_p9), %v863_v27 }
  0xdd   : > { %v721_v47 = vadd.f32 %v720_v46, %v319_v17  ;;  %v739_v48 = vpop.f32.mrf.mxu3  ;;  %v770_v54 = vpop.f32.mrf.mxu1  ;;  %v752_v56 = vadd.f32 %v751_v51, %v320_v50 }
  0xdf   : > { %v740_v53 = vadd.f32 %v739_v48, %v721_v47  ;;  %v771_v60 = vadd.f32 %v770_v54, %v752_v56 }
  0xe1   : > { %v824_v55 = vpack.c.bf16 %v740_v53, %v702_v52 }
  0xe2   : > { %v867_v29 = vld [vmem:[%s1753_s27 + $0x20] sm:$0xff] (%p1547_p9) }
  0xe3   : > { %832 = vst [vmem:[%s1753_s27 + $0x30] sm:$0xff] %v824_v55 }
  0xe4   : > { %v789_v58 = vpop.f32.mrf.mxu2  ;;  %v753_v62 = vpop.f32.mrf.mxu0  ;;  %868 = vst [vmem:[%s846_s30 + $0x60] sm:$0xff] (%p1547_p9), %v867_v29 }
  0xe5   : > { %v808_v59 = vpop.f32.mrf.mxu3  ;;  %v790_v61 = vadd.f32 %v789_v58, %v321_v57  ;;  %v772_v1 = vpop.f32.mrf.mxu1  ;;  %v754_v2 = vadd.f32 %v753_v62, %v320_v50 }
  0xe7   : > { %v809_v63 = vadd.f32 %v808_v59, %v790_v61  ;;  %v773_v7 = vadd.f32 %v772_v1, %v754_v2 }
  0xe9   : > { %v819_v0 = vpack.c.bf16 %v809_v63, %v771_v60 }
  0xea   : > { %v871_v31 = vld [vmem:[%s1753_s27 + $0x30] sm:$0xff] (%p1547_p9) }
  0xeb   : > { %827 = vst [vmem:[%s1753_s27 + $0x8] sm:$0xff] %v819_v0 }
  0xec   : > { %v791_v3 = vpop.f32.mrf.mxu2  ;;  %v756_v6 = vpop.f32.mrf.mxu0  ;;  %872 = vst [vmem:[%s846_s30 + $0x90] sm:$0xff] (%p1547_p9), %v871_v31 }
  0xed   : > { %v810_v4 = vpop.f32.mrf.mxu3  ;;  %v792_v5 = vadd.f32 %v791_v3, %v321_v57  ;;  %v757_v10 = vadd.f32 %v756_v6, %v320_v50  ;;  %v775_v11 = vpop.f32.mrf.mxu1 }
  0xef   : > { %v811_v8 = vadd.f32 %v810_v4, %v792_v5  ;;  %v776_v14 = vadd.f32 %v775_v11, %v757_v10 }
  0xf1   : > { %v821_v9 = vpack.c.bf16 %v811_v8, %v773_v7 }
  0xf2   : > { %v861_v26 = vld [vmem:[%s1753_s27 + $0x8] sm:$0xff] (%p1547_p9) }
  0xf3   : > { %829 = vst [vmem:[%s1753_s27 + $0x18] sm:$0xff] %v821_v9 }
  0xf4   : > { %v794_v12 = vpop.f32.mrf.mxu2  ;;  %v758_v49 = vpop.f32.mrf.mxu0  ;;  %862 = vst [vmem:[%s846_s30 + $0x8] sm:$0xff] (%p1547_p9), %v861_v26 }
  0xf5   : > { %v813_v13 = vpop.f32.mrf.mxu3  ;;  %v795_v44 = vadd.f32 %v794_v12, %v321_v57  ;;  %v759_v17 = vadd.f32 %v758_v49, %v320_v50  ;;  %v777_v20 = vpop.f32.mrf.mxu1 }
  0xf7   : > { %v814_v15 = vadd.f32 %v813_v13, %v795_v44  ;;  %v778_v22 = vadd.f32 %v777_v20, %v759_v17 }
  0xf9   : > { %v823_v16 = vpack.c.bf16 %v814_v15, %v776_v14 }
  0xfa   : > { %v865_v28 = vld [vmem:[%s1753_s27 + $0x18] sm:$0xff] (%p1547_p9) }
  0xfb   : > { %831 = vst [vmem:[%s1753_s27 + $0x28] sm:$0xff] %v823_v16 }
  0xfc   : > { %v796_v18 = vpop.f32.mrf.mxu2  ;;  %866 = vst [vmem:[%s846_s30 + $0x38] sm:$0xff] (%p1547_p9), %v865_v28 }
  0xfd   : > { %v797_v19 = vadd.f32 %v796_v18, %v321_v57  ;;  %v815_v21 = vpop.f32.mrf.mxu3 }
  0xff   : > { %v816_v23 = vadd.f32 %v815_v21, %v797_v19  ;;  %840 = sbr.rel (!%p1547_p9) target bundleno = 268 (0x10c), region = 40 }
 0x101   : > { %v825_v24 = vpack.c.bf16 %v816_v23, %v778_v22 }
 0x102   : > { %v869_v30 = vld [vmem:[%s1753_s27 + $0x28] sm:$0xff] (%p1547_p9) }
 0x103   : > { %833 = vst [vmem:[%s1753_s27 + $0x38] sm:$0xff] %v825_v24 }
 0x104   : > { %870 = vst [vmem:[%s846_s30 + $0x68] sm:$0xff] %v869_v30 }
 0x10a   : > { %v873_v32 = vld [vmem:[%s1753_s27 + $0x38] sm:$0xff] }
 0x10b   : > { %874 = vst [vmem:[%s846_s30 + $0x98] sm:$0xff] %v873_v32 }
 0x10c PF: > { %s16_s17 = sadd.s32 1, %s1472_s17   ;;  %s1802_s12 = smov %s1456_s13 }
 0x10d   : > { %p13_p2 = scmp.ge.s32.totalorder %s16_s17, 5   ;;  %s1803_s13 = smov %s1460_s14 }
 0x10e   : > { %s1804_s14 = smov %s1545_s24  ;;  %s1805_s15 = smov %s1468_s16 }
 0x10f   : > { %s1806_s16 = smov %s1808_s19  ;;  %15 = sbr.rel (!%p13_p2) target bundleno = 4 (0x4), region = 101 }
 0x114   :  { %890 = vsyncpa [#allocation3], 1 }
 0x115   :  { %892 = vsyncpa [#allocation3 + $0x1], 1 }

// kernel: _lambda_.20
= control target key start
LH: loop header
LB: loop body
LE: loop exit
PB: predicated region body
PF: predicated region fallthrough
CT: control target
= control target key end

     0   :  { %s2173_s0 = inlined_call_operand.vmem [shape: bf16[32,256], index: 0, kind: input, shape index: {}]   ;;  %s2174_s1 = inlined_call_operand.vmem [shape: bf16[32,1536], index: 1, kind: input, shape index: {}, may-alias: {1,2}]   ;;  %s2175_s2 = inlined_call_operand.vmem [shape: bf16[32,1536], index: 2, kind: input, shape index: {}, may-alias: {1,2}]   ;;  %s2176_s3 = inlined_call_operand.hbm [shape: bf16[256,768], index: 3, kind: input, shape index: {}]   ;;  %s2177_s4 = inlined_call_operand.hbm [shape: f32[1,768], index: 4, kind: input, shape index: {}]   ;;  %s2178_s5 = inlined_call_operand.vmem [shape: bf16[32,768], index: 5, kind: output, shape index: {}]  }
   0x1   :  { %2179 = sst [smem:[#allocation12_spill]] %s2174_s1 }
   0x2   :  { %2180 = sst [smem:[#allocation13_spill]] %s2175_s2 }
   0x3   :  { %2181 = sst [smem:[#allocation14_spill]] %s2176_s3 }
   0x4   :  { %10 = vsyncpa [#allocation6], 0 }
   0x5   :  { %12 = vsyncpa [#allocation6 + $0x1], 0 }
   0x6   :  { %13 = vsyncpa [#allocation8], 0 }
   0x7   :  { %15 = vsyncpa [#allocation8 + $0x1], 0  ;;  %s1834_s18 = smov 0   ;;  %s1836_s19 = smov 0  }
   0x8   :  { %s1838_s20 = smov 0   ;;  %s1840_s21 = smov 0  }
   0x9   :  { %s1842_s22 = smov 0   ;;  %s1844_s23 = smov 0  }
   0xa LB: > { %s1863_s24 = sadd.s32 4294967295, %s1798_s23   ;;  %s30_s25 = sadd.s32 1, %s1794_s22  ;;  %s1798_s23 = sphi %s1844_s23, %s21_s23   ;;  %s1794_s22 = sphi %s1842_s22, %s2194_s22   ;;  %s1790_s21 = sphi %s1840_s21, %s2193_s21   ;;  %s1786_s20 = sphi %s1838_s20, %s2192_s20   ;;  %s1782_s19 = sphi %s1836_s19, %s2191_s19   ;;  %s1778_s18 = sphi %s1834_s18, %s2190_s18  }
   0xb   : > { %p31_p0 = scmp.ge.s32.totalorder %s30_s25, 2  ;;  %s118_s26 = sadd.s32 1, %s1786_s20 }
   0xc   : > { %p125_p1 = scmp.ne.s32.totalorder %s1786_s20, %s1782_s19  ;;  %p126_p2 = scmp.eq.s32.totalorder %s1798_s23, 0 }
   0xd   : > { %s2196_s25 = smov (%p31_p0, %s30_s25), 0  ;;  %p131_p4 = scmp.ne.s32.totalorder %s1782_s19, %s1778_s18 }
   0xe   : > { %p1872_p3 = por %p126_p2, %p125_p1  ;;  %s115_s28 = ssub.s32 %s1794_s22, %s2196_s25 }
   0xf   : > { %p132_p5 = scmp.eq.s32.totalorder %s1863_s24, 0  ;;  %p116_p6 = scmp.eq.s32.totalorder %s115_s28, 0 }
  0x10   : > { %p183_p7 = scmp.eq.s32.totalorder %s1863_s24, 1  ;;  %p1304_p9 = scmp.ge.s32.totalorder %s1798_s23, 1 }
  0x11   : > { %p1881_p8 = por %p132_p5, %p131_p4  ;;  %p196_p11 = scmp.lt.s32.totalorder %s1798_s23, 3 }
  0x12   : > { %s1887_s30 = scalar_select %p116_p6, %s1786_s20, %s118_s26  }
  0x13   : > { %p1889_p10 = por %p183_p7, %p125_p1  ;;  %p1894_p12 = pnand %p1304_p9, %p196_p11 }
  0x14   : > { %p1306_p13 = scmp.ne.s32.totalorder (!%p1894_p12), %s1863_s24, 0 }
  0x15   : > { %200 = sbr.rel (%p1894_p12) target bundleno = 48 (0x30), region = 12 }
  0x1a   : > { %214 = sbr.rel (%p1306_p13) target bundleno = 37 (0x25), region = 20  ;;  %s2186_s1 = sld [smem:[#allocation12_spill]] (!%p1306_p13) }
  0x20   : > { %v253_v0 = vld [vmem:[%s2186_s1] sm:$0xff]  ;;  %v255_v1 = vld [vmem:[%s2186_s1 + $0x30] sm:$0xff] }
  0x21   : > { %v257_v2 = vld [vmem:[%s2186_s1 + $0x60] sm:$0xff]  ;;  %254 = vst [vmem:[#allocation3 + $0x10] sm:$0xff] %v253_v0  ;;  %v259_v3 = vld [vmem:[%s2186_s1 + $0x90] sm:$0xff] }
  0x22   : > { %256 = vst [vmem:[#allocation3] sm:$0xff] %v255_v1 }
  0x23   : > { %258 = vst [vmem:[#allocation3 + $0x18] sm:$0xff] %v257_v2 }
  0x24   : > { %260 = vst [vmem:[#allocation3 + $0x8] sm:$0xff] %v259_v3 }
  0x25 PF: > { %266 = sbr.rel (%p1306_p13) target bundleno = 48 (0x30), region = 58  ;;  %s2187_s2 = sld [smem:[#allocation13_spill]] (!%p1306_p13) }
  0x2b   : > { %v1308_v4 = vld [vmem:[%s2187_s2 + $0x8] sm:$0xff]  ;;  %v1309_v5 = vld [vmem:[%s2187_s2 + $0x38] sm:$0xff] }
  0x2c   : > { %v1310_v6 = vld [vmem:[%s2187_s2 + $0x68] sm:$0xff]  ;;  %307 = vst [vmem:[#allocation4] sm:$0xff] %v1308_v4  ;;  %v1311_v7 = vld [vmem:[%s2187_s2 + $0x98] sm:$0xff] }
  0x2d   : > { %309 = vst [vmem:[#allocation4 + $0x18] sm:$0xff] %v1309_v5 }
  0x2e   : > { %311 = vst [vmem:[#allocation4 + $0x8] sm:$0xff] %v1310_v6 }
  0x2f   : > { %313 = vst [vmem:[#allocation4 + $0x10] sm:$0xff] %v1311_v7 }
  0x30 PF: > { %p1621_p0 = scmp.lt.s32.totalorder %s1798_s23, 2  ;;  %s324_s10 = sand.u32 1, %s1786_s20  }
  0x31   : > { %s1535_s11 = smul.u32 12, %s1794_s22  ;;  %s2188_s3 = sld [smem:[#allocation14_spill]] }
  0x32   : > { %s1605_s12 = smul.u32 384, %s324_s10  ;;  %p1933_p1 = pnand %p1621_p0, %p1872_p3 }
  0x33   : > { %s325_s26 = scalar_lea.sflag [#allocation6], %s324_s10  ;;  %s1800_s28 = smov 384  }
  0x34   : > { %s328_s18 = scalar_lea.vmem [#allocation5], %s1605_s12  ;;  %s1801_s8 = smov 192  }
  0x35   : > { %s336_s24 = sshll.u32 %s328_s18, 4  ;;  %s1802_s9 = smov 12   ;;  %s337_s24 = int_to_ptr.vmem [resolvable:$true] %s336_s24 }
  0x36   : > { %s1606_s13 = smul.u32 3, %s324_s10  ;;  %s347_s12 = scalar_lea.sflag [#allocation8], %s324_s10 }
  0x37   : > { %s333_s15 = scalar_lea.hbm %s2188_s3, %s1535_s11  ;;  %s351_s11 = smul.u32 3, %s1794_s22 }
  0x38   : > { %s334_s17 = sshll.u32 %s333_s15, 4  ;;  %s350_s2 = scalar_lea.vmem [#allocation7], %s1606_s13  ;;  %s335_s17 = int_to_ptr.hbm [resolvable:$true] %s334_s17 }
  0x39   : > { %1617 = dma.hbm_to_vmem [thread:$0]  (!%p1933_p1), %s335_s17, 6144, %s337_s24, %s325_s26, %s1800_s28, %s1801_s8, %s1802_s9  }
  0x3a   : > { %s354_s1 = scalar_lea.hbm %s2177_s4, %s351_s11  ;;  %s358_s3 = sshll.u32 %s350_s2, 4  ;;  %s359_s3 = int_to_ptr.vmem [resolvable:$true] %s358_s3 }
  0x3b   : > { %s356_s15 = sshll.u32 %s354_s1, 4  ;;  %367 = sbr.rel (%p1894_p12) target bundleno = 584 (0x248), region = 108  ;;  %s357_s15 = int_to_ptr.hbm [resolvable:$true] %s356_s15 }
  0x3c   : > { %1620 = dma.hbm_to_vmem [thread:$0]  (!%p1933_p1), %s357_s15, 48, %s359_s3, %s347_s12  }
  0x3d   : > { %s375_s17 = sand.u32 (!%p1894_p12), 1, %s1782_s19  }
  0x3e   : > { %s1607_s18 = smul.u32 (!%p1894_p12), 384, %s375_s17  ;;  %s376_s24 = scalar_lea.sflag (!%p1894_p12), [#allocation6], %s375_s17 }
  0x40   : > { %s1948_s26 = scalar_lea.vmem [#allocation5], %s1607_s18 }
  0x41   : > { %1769 = dma.done.wait (%p1881_p8), %s376_s24, 6144  }
  0x42   : > { %1771 = vsyncadd (%p1881_p8), %s376_s24, 4294961152  ;;  %s1608_s1 = smul.u32 3, %s375_s17  ;;  %s386_s2 = scalar_lea.sflag [#allocation8], %s375_s17 }
  0x44   : > { %s1954_s10 = scalar_lea.vmem [#allocation7], %s1608_s1 }
  0x45   : > { %1773 = dma.done.wait (%p1881_p8), %s386_s2, 48  }
  0x46   : > { %1775 = vsyncadd (%p1881_p8), %s386_s2, 4294967248  ;;  %s1609_s3 = smul.u32 48, %s375_s17  ;;  %p1315_p2 = scmp.ne.s32.totalorder %s1790_s21, 0 }
  0x48   : > { %s1960_s7 = scalar_lea.vmem [#allocation9], %s1609_s3  ;;  %443 = sbr.rel (%p1315_p2) target bundleno = 362 (0x16a), region = 128 }
  0x4d   : > { %v446_v8 = vld [vmem:[%s2173_s0 + $0x10] sm:$0xff]  ;;  %v444_v9 = vld [vmem:[%s2173_s0] sm:$0xff]  ;;  %v447_v14 = vld [vmem:[%s2173_s0 + $0x18] sm:$0xff]  ;;  %v1803_v24 = vmov 256.0  }
  0x4e   : > { %v460_v10 = vunpack.c.l.bf16 %v446_v8  ;;  %v461_v11 = vunpack.c.h.bf16 %v446_v8  ;;  %v456_v12 = vunpack.c.l.bf16 %v444_v9  ;;  %v457_v13 = vunpack.c.h.bf16 %v444_v9  ;;  %v445_v15 = vld [vmem:[%s2173_s0 + $0x8] sm:$0xff]  ;;  %v452_v5 = vld [vmem:[#allocation4] sm:$0xff] }
  0x4f   : > { %v462_v18 = vunpack.c.l.bf16 %v447_v14  ;;  %v463_v19 = vunpack.c.h.bf16 %v447_v14  ;;  %v458_v20 = vunpack.c.l.bf16 %v445_v15  ;;  %v459_v21 = vunpack.c.h.bf16 %v445_v15  ;;  %v454_v7 = vld [vmem:[#allocation4 + $0x8] sm:$0xff] }
  0x50   : > { %v470_v16 = vadd.f32 %v461_v11, %v460_v10  ;;  %v464_v17 = vadd.f32 %v457_v13, %v456_v12  ;;  %1674 = vrcp.f32 %v1803_v24  ;;  %v572_v14 = vunpack.c.h.bf16 %v452_v5 }
  0x51   : > { %v473_v22 = vadd.f32 %v463_v19, %v462_v18  ;;  %v467_v23 = vadd.f32 %v459_v21, %v458_v20 }
  0x52   : > { %471 = vadd.xlane.f32.xlu1 %v470_v16  ;;  %465 = vadd.xlane.f32.xlu0 %v464_v17  ;;  %v575_v17 = vunpack.c.l.bf16 %v454_v7  ;;  %v580_v24 = vadd.f32 1.0, %v572_v14 }
  0x56   : > { %v1675_v25 = vpop.eup %1674 }
  0x57   : > { %v477_v26 = vmul.f32 256.0, %v1675_v25  ;;  %vm481_vm0 = vweird.f32 %v1675_v25 }
  0x59   : > { %v478_v27 = vsub.f32 1.0, %v477_v26 }
  0x5a   : > { %474 = vadd.xlane.f32.xlu1 %v473_v22  ;;  %468 = vadd.xlane.f32.xlu0 %v467_v23  ;;  %v450_v22 = vld [vmem:[#allocation3 + $0x18] sm:$0xff] }
  0x5b   : > { %v479_v28 = vmul.f32 %v1675_v25, %v478_v27  ;;  %v455_v27 = vld [vmem:[#allocation4 + $0x10] sm:$0xff] }
  0x5d   : > { %v480_v29 = vadd.f32 %v1675_v25, %v479_v28 }
  0x5f   : > { %v482_v30 = vsel %vm481_vm0, %v1675_v25, %v480_v29  ;;  %v583_v29 = vadd.f32 1.0, %v575_v17 }
  0xc5   : > { %v472_v31 = vpop.xlane.xlu1 %471  ;;  %v466_v32 = vpop.xlane.xlu0 %465 }
  0xc6   : > { %v485_v33 = vmul.f32 %v482_v30, %v472_v31  ;;  %v483_v34 = vmul.f32 %v482_v30, %v466_v32  ;;  %v599_v32 = vunpack.c.l.bf16 %v450_v22 }
  0xc8   : > { %v1975_v35 = vsub.f32 %v460_v10, %v485_v33  ;;  %v1977_v36 = vsub.f32 %v461_v11, %v485_v33  ;;  %v1979_v37 = vsub.f32 %v456_v12, %v483_v34  ;;  %v1981_v38 = vsub.f32 %v457_v13, %v483_v34  ;;  %v448_v12 = vld [vmem:[#allocation3 + $0x10] sm:$0xff] }
  0xc9   : > { %v571_v13 = vunpack.c.l.bf16 %v452_v5  ;;  %v596_v25 = vunpack.c.h.bf16 %v448_v12  ;;  %v600_v33 = vunpack.c.h.bf16 %v450_v22 }
  0xca   : > { %v499_v39 = vmul.f32 %v1975_v35, %v1975_v35  ;;  %v500_v40 = vmul.f32 %v1977_v36, %v1977_v36  ;;  %v495_v41 = vmul.f32 %v1979_v37, %v1979_v37  ;;  %v496_v42 = vmul.f32 %v1981_v38, %v1981_v38 }
  0xcb   : > { %v579_v23 = vadd.f32 1.0, %v571_v13 }
  0xcc   : > { %v509_v43 = vadd.f32 %v500_v40, %v499_v39  ;;  %v503_v44 = vadd.f32 %v496_v42, %v495_v41  ;;  %v453_v39 = vld [vmem:[#allocation4 + $0x18] sm:$0xff]  ;;  %v577_v42 = vunpack.c.l.bf16 %v455_v27 }
  0xcd   : > { %v475_v45 = vpop.xlane.xlu1 %474  ;;  %v469_v46 = vpop.xlane.xlu0 %468 }
  0xce   : > { %v486_v47 = vmul.f32 %v482_v30, %v475_v45  ;;  %v484_v48 = vmul.f32 %v482_v30, %v469_v46  ;;  %510 = vadd.xlane.f32.xlu0 %v509_v43  ;;  %504 = vadd.xlane.f32.xlu2 %v503_v44  ;;  %v578_v45 = vunpack.c.h.bf16 %v455_v27 }
  0xd0   : > { %v1991_v49 = vsub.f32 %v462_v18, %v486_v47  ;;  %v1993_v50 = vsub.f32 %v463_v19, %v486_v47  ;;  %v1995_v51 = vsub.f32 %v458_v20, %v484_v48  ;;  %v1997_v52 = vsub.f32 %v459_v21, %v484_v48 }
  0xd1   : > { %v576_v18 = vunpack.c.h.bf16 %v454_v7  ;;  %v595_v20 = vunpack.c.l.bf16 %v448_v12  ;;  %v451_v7 = vld [vmem:[#allocation3 + $0x8] sm:$0xff]  ;;  %v449_v12 = vld [vmem:[#allocation3] sm:$0xff] }
  0xd2   : > { %v501_v53 = vmul.f32 %v1991_v49, %v1991_v49  ;;  %v502_v54 = vmul.f32 %v1993_v50, %v1993_v50  ;;  %v497_v55 = vmul.f32 %v1995_v51, %v1995_v51  ;;  %v498_v56 = vmul.f32 %v1997_v52, %v1997_v52 }
  0xd3   : > { %v597_v22 = vunpack.c.l.bf16 %v449_v12 }
  0xd4   : > { %v512_v57 = vadd.f32 %v502_v54, %v501_v53  ;;  %v506_v58 = vadd.f32 %v498_v56, %v497_v55  ;;  %v573_v53 = vunpack.c.l.bf16 %v453_v39  ;;  %v574_v54 = vunpack.c.h.bf16 %v453_v39 }
  0xd6   : > { %513 = vadd.xlane.f32.xlu1 %v512_v57  ;;  %507 = vadd.xlane.f32.xlu2 %v506_v58  ;;  %v581_v13 = vadd.f32 1.0, %v573_v53 }
 0x141   : > { %v505_v59 = vpop.xlane.xlu2 %504  ;;  %v511_v60 = vpop.xlane.xlu0 %510 }
 0x142   : > { %v515_v61 = vmul.f32 %v505_v59, %v482_v30  ;;  %v517_v62 = vmul.f32 %v511_v60, %v482_v30 }
 0x144   : > { %v519_v63 = vadd.f32 1e-06, %v515_v61  ;;  %v521_v0 = vadd.f32 1e-06, %v517_v62  ;;  %v585_v61 = vadd.f32 1.0, %v577_v42 }
 0x146   : > { %1676 = vrsqrt.f32 %v519_v63  ;;  %vm529_vm3 = vweird.f32 %v519_v63  ;;  %vm549_vm5 = vweird.f32 %v521_v0 }
 0x147   : > { %1678 = vrsqrt.f32 %v521_v0 }
 0x149   : > { %v514_v1 = vpop.xlane.xlu1 %513  ;;  %v508_v2 = vpop.xlane.xlu2 %507 }
 0x14a   : > { %v518_v3 = vmul.f32 %v514_v1, %v482_v30  ;;  %v516_v4 = vmul.f32 %v508_v2, %v482_v30  ;;  %v584_v30 = vadd.f32 1.0, %v576_v18  ;;  %v586_v1 = vadd.f32 1.0, %v578_v45 }
 0x14b   : > { %v582_v18 = vadd.f32 1.0, %v574_v54 }
 0x14c   : > { %v1677_v6 = vpop.eup %1676  ;;  %v2007_v8 = vadd.f32 1e-06, %v518_v3  ;;  %v2009_v9 = vadd.f32 1e-06, %v516_v4 }
 0x14d   : > { %v1679_v10 = vpop.eup %1678  ;;  %v524_v11 = vmul.f32 %v1677_v6, %v519_v63  ;;  %vm530_vm1 = vweird.f32 %v1677_v6 }
 0x14e   : > { %v544_v15 = vmul.f32 %v1679_v10, %v521_v0  ;;  %1680 = vrsqrt.f32 %v2007_v8  ;;  %vm550_vm2 = vweird.f32 %v1679_v10  ;;  %vm531_vm4 = vmor %vm529_vm3, %vm530_vm1  ;;  %vm559_vm9 = vweird.f32 %v2007_v8 }
 0x14f   : > { %v525_v16 = vmul.f32 %v1677_v6, %v524_v11  ;;  %1682 = vrsqrt.f32 %v2009_v9  ;;  %vm551_vm6 = vmor %vm549_vm5, %vm550_vm2  ;;  %vm539_vm11 = vweird.f32 %v2009_v9 }
 0x150   : > { %v545_v19 = vmul.f32 %v1679_v10, %v544_v15 }
 0x151   : > { %v526_v21 = vmul.f32 0.5, %v525_v16  ;;  %v601_v16 = vunpack.c.l.bf16 %v451_v7 }
 0x152   : > { %v546_v26 = vmul.f32 0.5, %v545_v19  ;;  %v602_v19 = vunpack.c.h.bf16 %v451_v7 }
 0x153   : > { %v527_v28 = vsub.f32 1.5, %v526_v21 }
 0x154   : > { %v1681_v31 = vpop.eup %1680  ;;  %v547_v34 = vsub.f32 1.5, %v546_v26 }
 0x155   : > { %v1683_v40 = vpop.eup %1682  ;;  %v528_v41 = vmul.f32 %v1677_v6, %v527_v28  ;;  %v554_v43 = vmul.f32 %v1681_v31, %v2007_v8  ;;  %vm560_vm7 = vweird.f32 %v1681_v31 }
 0x156   : > { %v548_v44 = vmul.f32 %v1679_v10, %v547_v34  ;;  %v534_v46 = vmul.f32 %v1683_v40, %v2009_v9  ;;  %vm540_vm8 = vweird.f32 %v1683_v40  ;;  %vm561_vm10 = vmor %vm559_vm9, %vm560_vm7 }
 0x157   : > { %v532_v47 = vsel %vm531_vm4, %v1677_v6, %v528_v41  ;;  %v555_v48 = vmul.f32 %v1681_v31, %v554_v43  ;;  %vm541_vm12 = vmor %vm539_vm11, %vm540_vm8 }
 0x158   : > { %v563_v55 = vmul.f32 %v532_v47, %v1979_v37  ;;  %v564_v56 = vmul.f32 %v532_v47, %v1981_v38  ;;  %v552_v57 = vsel %vm551_vm6, %v1679_v10, %v548_v44  ;;  %v535_v58 = vmul.f32 %v1683_v40, %v534_v46 }
 0x159   : > { %v567_v59 = vmul.f32 %v552_v57, %v1975_v35  ;;  %v568_v60 = vmul.f32 %v552_v57, %v1977_v36  ;;  %v556_v62 = vmul.f32 0.5, %v555_v48 }
 0x15a   : > { %v587_v63 = vmul.f32 %v579_v23, %v563_v55  ;;  %v588_v0 = vmul.f32 %v580_v24, %v564_v56  ;;  %v536_v2 = vmul.f32 0.5, %v535_v58  ;;  %v598_v23 = vunpack.c.h.bf16 %v449_v12 }
 0x15b   : > { %v591_v3 = vmul.f32 %v583_v29, %v567_v59  ;;  %v592_v4 = vmul.f32 %v584_v30, %v568_v60  ;;  %v557_v5 = vsub.f32 1.5, %v556_v62 }
 0x15c   : > { %v603_v6 = vadd.f32 %v595_v20, %v587_v63  ;;  %v604_v37 = vadd.f32 %v596_v25, %v588_v0  ;;  %v537_v38 = vsub.f32 1.5, %v536_v2 }
 0x15d   : > { %v607_v10 = vadd.f32 %v599_v32, %v591_v3  ;;  %v608_v11 = vadd.f32 %v600_v33, %v592_v4  ;;  %v558_v35 = vmul.f32 %v1681_v31, %v557_v5 }
 0x15e   : > { %v611_v36 = vpack.c.bf16 %v604_v37, %v603_v6  ;;  %v538_v14 = vmul.f32 %v1683_v40, %v537_v38 }
 0x15f   : > { %v613_v15 = vpack.c.bf16 %v608_v11, %v607_v10  ;;  %v562_v17 = vsel %vm561_vm10, %v1681_v31, %v558_v35 }
 0x160   : > { %615 = vst [vmem:[#allocation2] sm:$0xff] %v611_v36  ;;  %v569_v20 = vmul.f32 %v562_v17, %v1991_v49  ;;  %v570_v21 = vmul.f32 %v562_v17, %v1993_v50  ;;  %v542_v8 = vsel %vm541_vm12, %v1683_v40, %v538_v14 }
 0x161   : > { %617 = vst [vmem:[#allocation2 + $0x10] sm:$0xff] %v613_v15  ;;  %v565_v24 = vmul.f32 %v542_v8, %v1995_v51  ;;  %v566_v9 = vmul.f32 %v542_v8, %v1997_v52 }
 0x162   : > { %v593_v25 = vmul.f32 %v585_v61, %v569_v20  ;;  %v594_v26 = vmul.f32 %v586_v1, %v570_v21 }
 0x163   : > { %v589_v27 = vmul.f32 %v581_v13, %v565_v24  ;;  %v590_v28 = vmul.f32 %v582_v18, %v566_v9 }
 0x164   : > { %v609_v29 = vadd.f32 %v601_v16, %v593_v25  ;;  %v610_v30 = vadd.f32 %v602_v19, %v594_v26 }
 0x165   : > { %v605_v31 = vadd.f32 %v597_v22, %v589_v27  ;;  %v606_v32 = vadd.f32 %v598_v23, %v590_v28 }
 0x166   : > { %v614_v33 = vpack.c.bf16 %v610_v30, %v609_v29 }
 0x167   : > { %v612_v49 = vpack.c.bf16 %v606_v32, %v605_v31 }
 0x168   : > { %618 = vst [vmem:[#allocation2 + $0x18] sm:$0xff] %v614_v33 }
 0x169   : > { %616 = vst [vmem:[#allocation2 + $0x8] sm:$0xff] %v612_v49 }
 0x16a PF: > { %v1418_v50 = vld [vmem:[%s1948_s26 + $0xa8] sm:$0xf]  ;;  %v1562_v51 = vld [vmem:[%s1948_s26 + $0xb0] sm:$0xf0]  ;;  %v1561_v40 = vld [vmem:[%s1948_s26 + $0xac] sm:$0xf] }
 0x16b   : > { %v1514_v52 = vld [vmem:[%s1948_s26 + $0x168] sm:$0xf]  ;;  %v1419_v34 = vor.u32 %v1562_v51, %v1418_v50  ;;  %v1586_v39 = vld [vmem:[%s1948_s26 + $0x170] sm:$0xf0]  ;;  %v1420_v41 = vld [vmem:[%s1948_s26 + $0xb4] sm:$0xf0] }
 0x16c   : > { %v1515_v42 = vor.u32 %v1586_v39, %v1514_v52  ;;  %v1423_v43 = vor.u32 %v1561_v40, %v1420_v41  ;;  %v1585_v44 = vld [vmem:[%s1948_s26 + $0x16c] sm:$0xf]  ;;  %v1516_v45 = vld [vmem:[%s1948_s26 + $0x174] sm:$0xf0]  ;;  %v1406_v46 = vld [vmem:[%s1948_s26 + $0x90] sm:$0xf] }
 0x16d   : > { %971 = vmatpush.bf16.msra.mxu0 %v1419_v34  ;;  %v1519_v47 = vor.u32 %v1585_v44, %v1516_v45  ;;  %v1559_v48 = vld [vmem:[%s1948_s26 + $0x98] sm:$0xf0]  ;;  %v1502_v53 = vld [vmem:[%s1948_s26 + $0x150] sm:$0xf]  ;;  %v1558_v57 = vld [vmem:[%s1948_s26 + $0x94] sm:$0xf] }
 0x16e   : > { %v1583_v54 = vld [vmem:[%s1948_s26 + $0x158] sm:$0xf0]  ;;  %990 = vmatpush.bf16.msra.mxu1 %v1515_v42  ;;  %1009 = vmatpush.bf16.msra.mxu2 %v1423_v43  ;;  %v1407_v55 = vor.u32 %v1559_v48, %v1406_v46  ;;  %v1408_v58 = vld [vmem:[%s1948_s26 + $0x9c] sm:$0xf0]  ;;  %v1582_v59 = vld [vmem:[%s1948_s26 + $0x154] sm:$0xf] }
 0x16f   : > { %v1503_v56 = vor.u32 %v1583_v54, %v1502_v53  ;;  %1028 = vmatpush.bf16.msra.mxu3 %v1519_v47  ;;  %v1411_v60 = vor.u32 %v1558_v57, %v1408_v58  ;;  %v1504_v61 = vld [vmem:[%s1948_s26 + $0x15c] sm:$0xf0]  ;;  %v1394_v62 = vld [vmem:[%s1948_s26 + $0x78] sm:$0xf]  ;;  %v1556_v63 = vld [vmem:[%s1948_s26 + $0x80] sm:$0xf0] }
 0x170   : > { %v1507_v0 = vor.u32 %v1582_v59, %v1504_v61  ;;  %v1490_v1 = vld [vmem:[%s1948_s26 + $0x138] sm:$0xf]  ;;  %v1580_v2 = vld [vmem:[%s1948_s26 + $0x140] sm:$0xf0]  ;;  %v1555_v3 = vld [vmem:[%s1948_s26 + $0x7c] sm:$0xf]  ;;  %v1395_v4 = vor.u32 %v1556_v63, %v1394_v62 }
 0x171   : > { %972 = vmatpush.bf16.msra.mxu0 %v1407_v55  ;;  %v1396_v5 = vld [vmem:[%s1948_s26 + $0x84] sm:$0xf0]  ;;  %v1579_v6 = vld [vmem:[%s1948_s26 + $0x13c] sm:$0xf]  ;;  %v1491_v7 = vor.u32 %v1580_v2, %v1490_v1  ;;  %v1382_v10 = vld [vmem:[%s1948_s26 + $0x60] sm:$0xf] }
 0x172   : > { %v1492_v37 = vld [vmem:[%s1948_s26 + $0x144] sm:$0xf0]  ;;  %991 = vmatpush.bf16.msra.mxu1 %v1503_v56  ;;  %1010 = vmatpush.bf16.msra.mxu2 %v1411_v60  ;;  %v1399_v38 = vor.u32 %v1555_v3, %v1396_v5  ;;  %v1553_v11 = vld [vmem:[%s1948_s26 + $0x68] sm:$0xf0]  ;;  %v1478_v35 = vld [vmem:[%s1948_s26 + $0x120] sm:$0xf] }
 0x173   : > { %1029 = vmatpush.bf16.msra.mxu3 %v1507_v0  ;;  %v1495_v36 = vor.u32 %v1579_v6, %v1492_v37  ;;  %v1577_v12 = vld [vmem:[%s1948_s26 + $0x128] sm:$0xf0]  ;;  %v1552_v13 = vld [vmem:[%s1948_s26 + $0x64] sm:$0xf]  ;;  %v1384_v14 = vld [vmem:[%s1948_s26 + $0x6c] sm:$0xf0]  ;;  %v1383_v17 = vor.u32 %v1553_v11, %v1382_v10 }
 0x174   : > { %v1576_v15 = vld [vmem:[%s1948_s26 + $0x124] sm:$0xf]  ;;  %v1480_v16 = vld [vmem:[%s1948_s26 + $0x12c] sm:$0xf0]  ;;  %v1479_v18 = vor.u32 %v1577_v12, %v1478_v35  ;;  %v1387_v19 = vor.u32 %v1552_v13, %v1384_v14  ;;  %v1370_v20 = vld [vmem:[%s1948_s26 + $0x48] sm:$0xf] }
 0x175   : > { %973 = vmatpush.bf16.msra.mxu0 %v1395_v4  ;;  %v1550_v21 = vld [vmem:[%s1948_s26 + $0x50] sm:$0xf0]  ;;  %v1466_v8 = vld [vmem:[%s1948_s26 + $0x108] sm:$0xf]  ;;  %v1483_v22 = vor.u32 %v1576_v15, %v1480_v16  ;;  %v1549_v24 = vld [vmem:[%s1948_s26 + $0x4c] sm:$0xf] }
 0x176   : > { %992 = vmatpush.bf16.msra.mxu1 %v1491_v7  ;;  %1011 = vmatpush.bf16.msra.mxu2 %v1399_v38  ;;  %v1574_v23 = vld [vmem:[%s1948_s26 + $0x110] sm:$0xf0]  ;;  %v1372_v9 = vld [vmem:[%s1948_s26 + $0x54] sm:$0xf0]  ;;  %v1573_v25 = vld [vmem:[%s1948_s26 + $0x10c] sm:$0xf]  ;;  %v1371_v27 = vor.u32 %v1550_v21, %v1370_v20 }
 0x177   : > { %1030 = vmatpush.bf16.msra.mxu3 %v1495_v36  ;;  %v1468_v26 = vld [vmem:[%s1948_s26 + $0x114] sm:$0xf0]  ;;  %v1467_v28 = vor.u32 %v1574_v23, %v1466_v8  ;;  %v1375_v29 = vor.u32 %v1549_v24, %v1372_v9  ;;  %v1358_v30 = vld [vmem:[%s1948_s26 + $0x30] sm:$0xf]  ;;  %v1547_v31 = vld [vmem:[%s1948_s26 + $0x38] sm:$0xf0] }
 0x178   : > { %v1454_v32 = vld [vmem:[%s1948_s26 + $0xf0] sm:$0xf]  ;;  %v1471_v33 = vor.u32 %v1573_v25, %v1468_v26  ;;  %v1571_v49 = vld [vmem:[%s1948_s26 + $0xf8] sm:$0xf0]  ;;  %v1546_v50 = vld [vmem:[%s1948_s26 + $0x34] sm:$0xf]  ;;  %v1359_v39 = vor.u32 %v1547_v31, %v1358_v30 }
 0x179   : > { %974 = vmatpush.bf16.msra.mxu0 %v1383_v17  ;;  %v1360_v51 = vld [vmem:[%s1948_s26 + $0x3c] sm:$0xf0]  ;;  %v1570_v52 = vld [vmem:[%s1948_s26 + $0xf4] sm:$0xf]  ;;  %v1455_v40 = vor.u32 %v1571_v49, %v1454_v32  ;;  %v1346_v42 = vld [vmem:[%s1948_s26 + $0x18] sm:$0xf] }
 0x17a   : > { %993 = vmatpush.bf16.msra.mxu1 %v1479_v18  ;;  %1012 = vmatpush.bf16.msra.mxu2 %v1387_v19  ;;  %v1456_v34 = vld [vmem:[%s1948_s26 + $0xfc] sm:$0xf0]  ;;  %v1363_v41 = vor.u32 %v1546_v50, %v1360_v51  ;;  %v1544_v43 = vld [vmem:[%s1948_s26 + $0x20] sm:$0xf0]  ;;  %v1442_v44 = vld [vmem:[%s1948_s26 + $0xd8] sm:$0xf] }
 0x17b   : > { %1031 = vmatpush.bf16.msra.mxu3 %v1483_v22  ;;  %v1459_v45 = vor.u32 %v1570_v52, %v1456_v34  ;;  %v1568_v46 = vld [vmem:[%s1948_s26 + $0xe0] sm:$0xf0]  ;;  %v1543_v47 = vld [vmem:[%s1948_s26 + $0x1c] sm:$0xf]  ;;  %v1348_v48 = vld [vmem:[%s1948_s26 + $0x24] sm:$0xf0]  ;;  %v1347_v55 = vor.u32 %v1544_v43, %v1346_v42 }
 0x17c   : > { %v1567_v53 = vld [vmem:[%s1948_s26 + $0xdc] sm:$0xf]  ;;  %v1444_v54 = vld [vmem:[%s1948_s26 + $0xe4] sm:$0xf0]  ;;  %v1334_v56 = vld [vmem:[%s1948_s26] sm:$0xf]  ;;  %v1443_v58 = vor.u32 %v1568_v46, %v1442_v44  ;;  %v1351_v59 = vor.u32 %v1543_v47, %v1348_v48 }
 0x17d   : > { %975 = vmatpush.bf16.msra.mxu0 %v1371_v27  ;;  %v1541_v57 = vld [vmem:[%s1948_s26 + $0x8] sm:$0xf0]  ;;  %v1430_v60 = vld [vmem:[%s1948_s26 + $0xc0] sm:$0xf]  ;;  %v1540_v62 = vld [vmem:[%s1948_s26 + $0x4] sm:$0xf]  ;;  %v1447_v63 = vor.u32 %v1567_v53, %v1444_v54 }
 0x17e   : > { %994 = vmatpush.bf16.msra.mxu1 %v1467_v28  ;;  %1013 = vmatpush.bf16.msra.mxu2 %v1375_v29  ;;  %v1565_v61 = vld [vmem:[%s1948_s26 + $0xc8] sm:$0xf0]  ;;  %v1336_v0 = vld [vmem:[%s1948_s26 + $0xc] sm:$0xf0]  ;;  %v1564_v1 = vld [vmem:[%s1948_s26 + $0xc4] sm:$0xf]  ;;  %v1335_v6 = vor.u32 %v1541_v57, %v1334_v56 }
 0x17f   : > { %1032 = vmatpush.bf16.msra.mxu3 %v1471_v33  ;;  %v1432_v2 = vld [vmem:[%s1948_s26 + $0xcc] sm:$0xf0]  ;;  %v1318_v3 = vld [vmem:[#allocation2] sm:$0xf]  ;;  %v1563_v5 = vld [vmem:[%s1948_s26 + $0xb8] sm:$0xf0]  ;;  %v1431_v10 = vor.u32 %v1565_v61, %v1430_v60  ;;  %v1339_v11 = vor.u32 %v1540_v62, %v1336_v0 }
 0x180   : > { %v1426_v4 = vld [vmem:[%s1948_s26 + $0xb0] sm:$0xf]  ;;  %v1537_v37 = vld [vmem:[#allocation2 + $0x4] sm:$0xf0]  ;;  %v1587_v38 = vld [vmem:[%s1948_s26 + $0x178] sm:$0xf0]  ;;  %v1435_v12 = vor.u32 %v1564_v1, %v1432_v2 }
 0x181   : > { %976 = vmatpush.bf16.msra.mxu0 %v1359_v39  ;;  %v1522_v7 = vld [vmem:[%s1948_s26 + $0x170] sm:$0xf]  ;;  %v1536_v35 = vld [vmem:[#allocation2 + $0x4] sm:$0xf]  ;;  %v1320_v36 = vld [vmem:[#allocation2 + $0x8] sm:$0xf0]  ;;  %v1427_v13 = vor.u32 %v1563_v5, %v1426_v4  ;;  %v2094_v14 = vor.u32 %v1537_v37, %v1318_v3 }
 0x182   : > { %995 = vmatpush.bf16.msra.mxu1 %v1455_v40  ;;  %1014 = vmatpush.bf16.msra.mxu2 %v1363_v41  ;;  %v1523_v15 = vor.u32 %v1587_v38, %v1522_v7  ;;  %v1414_v16 = vld [vmem:[%s1948_s26 + $0x98] sm:$0xf]  ;;  %v1560_v17 = vld [vmem:[%s1948_s26 + $0xa0] sm:$0xf0]  ;;  %v2098_v18 = vor.u32 %v1536_v35, %v1320_v36  ;;  %v1402_v22 = vld [vmem:[%s1948_s26 + $0x80] sm:$0xf] }
 0x183   : > { %1033 = vmatpush.bf16.msra.mxu3 %v1459_v45  ;;  %v1510_v19 = vld [vmem:[%s1948_s26 + $0x158] sm:$0xf]  ;;  %v1584_v20 = vld [vmem:[%s1948_s26 + $0x160] sm:$0xf0]  ;;  %v1415_v21 = vor.u32 %v1560_v17, %v1414_v16  ;;  %v1557_v23 = vld [vmem:[%s1948_s26 + $0x88] sm:$0xf0] }
 0x184   : > { %v1511_v8 = vor.u32 %v1584_v20, %v1510_v19  ;;  %v1498_v24 = vld [vmem:[%s1948_s26 + $0x140] sm:$0xf]  ;;  %v1581_v9 = vld [vmem:[%s1948_s26 + $0x148] sm:$0xf0]  ;;  %v1403_v25 = vor.u32 %v1557_v23, %v1402_v22  ;;  %v1390_v27 = vld [vmem:[%s1948_s26 + $0x68] sm:$0xf] }
 0x185   : > { %977 = vmatpush.bf16.msra.mxu0 %v1347_v55  ;;  %v1499_v26 = vor.u32 %v1581_v9, %v1498_v24  ;;  %v1554_v28 = vld [vmem:[%s1948_s26 + $0x70] sm:$0xf0]  ;;  %v1486_v29 = vld [vmem:[%s1948_s26 + $0x128] sm:$0xf]  ;;  %v1326_v33 = vld [vmem:[#allocation2 + $0x10] sm:$0xf] }
 0x186   : > { %996 = vmatpush.bf16.msra.mxu1 %v1443_v58  ;;  %1015 = vmatpush.bf16.msra.mxu2 %v1351_v59  ;;  %v1578_v30 = vld [vmem:[%s1948_s26 + $0x130] sm:$0xf0]  ;;  %v1391_v31 = vor.u32 %v1554_v28, %v1390_v27  ;;  %v1378_v49 = vld [vmem:[%s1948_s26 + $0x50] sm:$0xf]  ;;  %v1551_v50 = vld [vmem:[%s1948_s26 + $0x58] sm:$0xf0] }
 0x187   : > { %1034 = vmatpush.bf16.msra.mxu3 %v1447_v63  ;;  %v1487_v32 = vor.u32 %v1578_v30, %v1486_v29  ;;  %v1539_v51 = vld [vmem:[#allocation2 + $0x14] sm:$0xf0]  ;;  %v1474_v52 = vld [vmem:[%s1948_s26 + $0x110] sm:$0xf]  ;;  %v1575_v34 = vld [vmem:[%s1948_s26 + $0x118] sm:$0xf0]  ;;  %v1379_v41 = vor.u32 %v1551_v50, %v1378_v49 }
 0x188   : > { %v1538_v39 = vld [vmem:[#allocation2 + $0x14] sm:$0xf]  ;;  %v1328_v40 = vld [vmem:[#allocation2 + $0x18] sm:$0xf0]  ;;  %v1327_v42 = vor.u32 %v1539_v51, %v1326_v33  ;;  %v1475_v43 = vor.u32 %v1575_v34, %v1474_v52  ;;  %v1366_v44 = vld [vmem:[%s1948_s26 + $0x38] sm:$0xf] }
 0x189   : > { %978 = vmatpush.bf16.msra.mxu0 %v1335_v6  ;;  %v1548_v45 = vld [vmem:[%s1948_s26 + $0x40] sm:$0xf0]  ;;  %v1331_v46 = vor.u32 %v1538_v39, %v1328_v40  ;;  %v1462_v47 = vld [vmem:[%s1948_s26 + $0xf8] sm:$0xf]  ;;  %v1354_v55 = vld [vmem:[%s1948_s26 + $0x20] sm:$0xf] }
 0x18a   : > { %997 = vmatpush.bf16.msra.mxu1 %v1431_v10  ;;  %1016 = vmatpush.bf16.msra.mxu2 %v1339_v11  ;;  %v1572_v48 = vld [vmem:[%s1948_s26 + $0x100] sm:$0xf0]  ;;  %v1367_v53 = vor.u32 %v1548_v45, %v1366_v44  ;;  %v1545_v56 = vld [vmem:[%s1948_s26 + $0x28] sm:$0xf0]  ;;  %v1450_v57 = vld [vmem:[%s1948_s26 + $0xe0] sm:$0xf] }
 0x18b   : > { %1035 = vmatpush.bf16.msra.mxu3 %v1435_v12  ;;  %v1463_v54 = vor.u32 %v1572_v48, %v1462_v47  ;;  %v1569_v58 = vld [vmem:[%s1948_s26 + $0xe8] sm:$0xf0]  ;;  %v1355_v59 = vor.u32 %v1545_v56, %v1354_v55  ;;  %v1342_v61 = vld [vmem:[%s1948_s26 + $0x8] sm:$0xf]  ;;  %v1542_v62 = vld [vmem:[%s1948_s26 + $0x10] sm:$0xf0] }
 0x18c   : > { %979 = vmatmul.bf16.vlgmr.msra.gmra.mxu0 %v2094_v14  ;;  %v1451_v60 = vor.u32 %v1569_v58, %v1450_v57  ;;  %v1438_v63 = vld [vmem:[%s1948_s26 + $0xc8] sm:$0xf]  ;;  %v1566_v0 = vld [vmem:[%s1948_s26 + $0xd0] sm:$0xf0]  ;;  %v1343_v1 = vor.u32 %v1542_v62, %v1342_v61  ;;  %v687_v3 = vld [vmem:[%s1954_s10] sm:$0x7] }
 0x18d   : > { %998 = vmatmul.bf16.vlgmr.msra.gmra.mxu1 %v2098_v18  ;;  %1017 = vmatmul.bf16.vlgmr.msra.gmra.mxu2 %v2094_v14  ;;  %v1439_v2 = vor.u32 %v1566_v0, %v1438_v63  ;;  %v689_v4 = vperm.slane %v687_v3, 0  ;;  %v690_v7 = vperm.slane %v687_v3, 1  ;;  %s1588_s14 = smul.u32 (%p1889_p10), 12, %s1790_s21 }
 0x18e   : > { %1589 = vmatpush.bf16.msrb.mxu2 %v1427_v13  ;;  %1066 = vmatpush.bf16.msrb.mxu1 %v1523_v15 }
 0x18f   : > { %1036 = vmatmul.bf16.vlgmr.msra.gmra.mxu3 %v2098_v18  ;;  %1047 = vmatpush.bf16.msrb.mxu0 %v1427_v13  ;;  %s1113_s17 = scalar_lea.vmem (%p1889_p10), %s2178_s5, %s1588_s14 }
 0x190   : > { %1597 = vmatpush.bf16.msrb.mxu3 %v1523_v15 }
 0x192   : > { %1590 = vmatpush.bf16.msrb.mxu2 %v1415_v21  ;;  %1067 = vmatpush.bf16.msrb.mxu1 %v1511_v8 }
 0x193   : > { %1048 = vmatpush.bf16.msrb.mxu0 %v1415_v21 }
 0x194   : > { %1598 = vmatpush.bf16.msrb.mxu3 %v1511_v8 }
 0x196   : > { %1591 = vmatpush.bf16.msrb.mxu2 %v1403_v25  ;;  %1068 = vmatpush.bf16.msrb.mxu1 %v1499_v26 }
 0x197   : > { %1049 = vmatpush.bf16.msrb.mxu0 %v1403_v25 }
 0x198   : > { %1599 = vmatpush.bf16.msrb.mxu3 %v1499_v26 }
 0x19a   : > { %1592 = vmatpush.bf16.msrb.mxu2 %v1391_v31  ;;  %1069 = vmatpush.bf16.msrb.mxu1 %v1487_v32 }
 0x19b   : > { %1050 = vmatpush.bf16.msrb.mxu0 %v1391_v31 }
 0x19c   : > { %1600 = vmatpush.bf16.msrb.mxu3 %v1487_v32  ;;  %984 = vmatmul.bf16.gmra.mxu0 %v1327_v42  ;;  %v691_v32 = vperm.slane %v687_v3, 2 }
 0x19d   : > { %1003 = vmatmul.bf16.gmra.mxu1 %v1331_v46  ;;  %1022 = vmatmul.bf16.gmra.mxu2 %v1327_v42 }
 0x19e   : > { %1593 = vmatpush.bf16.msrb.mxu2 %v1379_v41  ;;  %1070 = vmatpush.bf16.msrb.mxu1 %v1475_v43 }
 0x19f   : > { %1041 = vmatmul.bf16.gmra.mxu3 %v1331_v46  ;;  %1051 = vmatpush.bf16.msrb.mxu0 %v1379_v41 }
 0x1a0   : > { %1601 = vmatpush.bf16.msrb.mxu3 %v1475_v43 }
 0x1a2   : > { %1594 = vmatpush.bf16.msrb.mxu2 %v1367_v53  ;;  %1071 = vmatpush.bf16.msrb.mxu1 %v1463_v54 }
 0x1a3   : > { %1052 = vmatpush.bf16.msrb.mxu0 %v1367_v53 }
 0x1a4   : > { %1602 = vmatpush.bf16.msrb.mxu3 %v1463_v54 }
 0x1a6   : > { %1595 = vmatpush.bf16.msrb.mxu2 %v1355_v59  ;;  %1072 = vmatpush.bf16.msrb.mxu1 %v1451_v60 }
 0x1a7   : > { %1053 = vmatpush.bf16.msrb.mxu0 %v1355_v59 }
 0x1a8   : > { %1603 = vmatpush.bf16.msrb.mxu3 %v1451_v60 }
 0x1aa   : > { %1596 = vmatpush.bf16.msrb.mxu2 %v1343_v1  ;;  %1073 = vmatpush.bf16.msrb.mxu1 %v1439_v2 }
 0x1ab   : > { %1054 = vmatpush.bf16.msrb.mxu0 %v1343_v1 }
 0x1ac   : > { %1604 = vmatpush.bf16.msrb.mxu3 %v1439_v2 }
 0x1ad   : > { %1060 = vmatmul.bf16.vlgmr.msrb.gmra.mxu2 %v1327_v42  ;;  %1074 = vmatmul.bf16.vlgmr.msrb.gmra.mxu1 %v2098_v18 }
 0x1ae   : > { %1055 = vmatmul.bf16.vlgmr.msrb.gmra.mxu0 %v2094_v14 }
 0x1af   : > { %1079 = vmatmul.bf16.vlgmr.msrb.gmra.mxu3 %v1331_v46 }
 0x209   : > { %v980_v5 = vpop.f32.mrf.mxu0 }
 0x20a   : > { %v999_v6 = vpop.f32.mrf.mxu1  ;;  %v981_v37 = vadd.f32 %v980_v5, %v689_v4 }
 0x20c   : > { %v1000_v10 = vadd.f32 %v999_v6, %v981_v37 }
 0x210   : > { %v1018_v38 = vpop.f32.mrf.mxu2 }
 0x211   : > { %v1019_v11 = vadd.f32 %v1018_v38, %v690_v7  ;;  %v982_v36 = vpop.f32.mrf.mxu0 }
 0x212   : > { %v1037_v35 = vpop.f32.mrf.mxu3  ;;  %v1001_v12 = vpop.f32.mrf.mxu1  ;;  %v983_v15 = vadd.f32 %v982_v36, %v689_v4 }
 0x213   : > { %v1038_v13 = vadd.f32 %v1037_v35, %v1019_v11 }
 0x214   : > { %v1002_v21 = vadd.f32 %v1001_v12, %v983_v15 }
 0x215   : > { %v1085_v14 = vpack.c.bf16 %v1038_v13, %v1000_v10 }
 0x217   : > { %1093 = vst [vmem:[%s1960_s7] sm:$0xff] %v1085_v14 }
 0x218   : > { %v1020_v16 = vpop.f32.mrf.mxu2 }
 0x219   : > { %v1021_v17 = vadd.f32 %v1020_v16, %v690_v7  ;;  %v985_v19 = vpop.f32.mrf.mxu0 }
 0x21a   : > { %v1039_v18 = vpop.f32.mrf.mxu3  ;;  %v1004_v20 = vpop.f32.mrf.mxu1  ;;  %v986_v23 = vadd.f32 %v985_v19, %v689_v4 }
 0x21b   : > { %v1040_v8 = vadd.f32 %v1039_v18, %v1021_v17 }
 0x21c   : > { %v1005_v9 = vadd.f32 %v1004_v20, %v986_v23 }
 0x21d   : > { %v1087_v22 = vpack.c.bf16 %v1040_v8, %v1002_v21 }
 0x21e   : > { %v1128_v63 = vld [vmem:[%s1960_s7] sm:$0xff] (%p1889_p10) }
 0x21f   : > { %1095 = vst [vmem:[%s1960_s7 + $0xc] sm:$0xff] %v1087_v22 }
 0x220   : > { %v1023_v24 = vpop.f32.mrf.mxu2  ;;  %1129 = vst [vmem:[%s1113_s17] sm:$0xff] (%p1889_p10), %v1128_v63 }
 0x221   : > { %v1024_v25 = vadd.f32 %v1023_v24, %v690_v7  ;;  %v987_v27 = vpop.f32.mrf.mxu0 }
 0x222   : > { %v1042_v26 = vpop.f32.mrf.mxu3  ;;  %v1006_v28 = vpop.f32.mrf.mxu1  ;;  %v988_v31 = vadd.f32 %v987_v27, %v689_v4 }
 0x223   : > { %v1043_v29 = vadd.f32 %v1042_v26, %v1024_v25 }
 0x224   : > { %v1007_v52 = vadd.f32 %v1006_v28, %v988_v31 }
 0x225   : > { %v1089_v30 = vpack.c.bf16 %v1043_v29, %v1005_v9 }
 0x226   : > { %v1130_v0 = vld [vmem:[%s1960_s7 + $0xc] sm:$0xff] (%p1889_p10) }
 0x227   : > { %1097 = vst [vmem:[%s1960_s7 + $0x18] sm:$0xff] %v1089_v30 }
 0x228   : > { %v1025_v33 = vpop.f32.mrf.mxu2  ;;  %1131 = vst [vmem:[%s1113_s17 + $0x18] sm:$0xff] (%p1889_p10), %v1130_v0 }
 0x229   : > { %v1026_v49 = vadd.f32 %v1025_v33, %v690_v7 }
 0x22a   : > { %v1044_v50 = vpop.f32.mrf.mxu3  ;;  %v1075_v40 = vpop.f32.mrf.mxu1 }
 0x22b   : > { %v1056_v51 = vpop.f32.mrf.mxu0  ;;  %v1045_v34 = vadd.f32 %v1044_v50, %v1026_v49 }
 0x22c   : > { %v1057_v39 = vadd.f32 %v1056_v51, %v691_v32 }
 0x22d   : > { %v1091_v41 = vpack.c.bf16 %v1045_v34, %v1007_v52 }
 0x22e   : > { %v1076_v42 = vadd.f32 %v1075_v40, %v1057_v39  ;;  %v1132_v1 = vld [vmem:[%s1960_s7 + $0x18] sm:$0xff] (%p1889_p10) }
 0x22f   : > { %1099 = vst [vmem:[%s1960_s7 + $0x24] sm:$0xff] %v1091_v41 }
 0x230   : > { %v1086_v43 = vpack.c.bf16 %v1076_v42, %v1076_v42  ;;  %v1061_v44 = vpop.f32.mrf.mxu2  ;;  %1133 = vst [vmem:[%s1113_s17 + $0x30] sm:$0xff] (%p1889_p10), %v1132_v1 }
 0x231   : > { %v1062_v45 = vadd.f32 %v1061_v44, %v691_v32 }
 0x232   : > { %1094 = vst [vmem:[%s1960_s7 + $0x8] sm:$0xf] %v1086_v43  ;;  %v1080_v46 = vpop.f32.mrf.mxu3  ;;  %v1077_v54 = vpop.f32.mrf.mxu1 }
 0x233   : > { %v1058_v47 = vpop.f32.mrf.mxu0  ;;  %v1081_v48 = vadd.f32 %v1080_v46, %v1062_v45 }
 0x234   : > { %v1059_v53 = vadd.f32 %v1058_v47, %v691_v32 }
 0x235   : > { %v1090_v55 = vpack.c.bf16 %v1081_v48, %v1081_v48 }
 0x236   : > { %v1078_v56 = vadd.f32 %v1077_v54, %v1059_v53  ;;  %v1134_v2 = vld [vmem:[%s1960_s7 + $0x24] sm:$0xff] (%p1889_p10) }
 0x237   : > { %1098 = vst [vmem:[%s1960_s7 + $0x20] sm:$0xf] %v1090_v55 }
 0x238   : > { %v1088_v57 = vpack.c.bf16 %v1078_v56, %v1078_v56  ;;  %v1063_v58 = vpop.f32.mrf.mxu2  ;;  %1135 = vst [vmem:[%s1113_s17 + $0x48] sm:$0xff] (%p1889_p10), %v1134_v2 }
 0x239   : > { %v1064_v59 = vadd.f32 %v1063_v58, %v691_v32  ;;  %v1525_v3 = vld [vmem:[%s1960_s7 + $0x8] sm:$0xf] (%p1889_p10) }
 0x23a   : > { %1096 = vst [vmem:[%s1960_s7 + $0x14] sm:$0xf] %v1088_v57  ;;  %v1082_v60 = vpop.f32.mrf.mxu3 }
 0x23b   : > { %v1083_v61 = vadd.f32 %v1082_v60, %v1064_v59  ;;  %1107 = sbr.rel (!%p1889_p10) target bundleno = 584 (0x248), region = 132  ;;  %1526 = vst [vmem:[%s1113_s17 + $0x8] sm:$0xf] (%p1889_p10), %v1525_v3 }
 0x23d   : > { %v1092_v62 = vpack.c.bf16 %v1083_v61, %v1083_v61 }
 0x23e   : > { %v1529_v5 = vld [vmem:[%s1960_s7 + $0x20] sm:$0xf] (%p1889_p10) }
 0x23f   : > { %1100 = vst [vmem:[%s1960_s7 + $0x2c] sm:$0xf] %v1092_v62 }
 0x240   : > { %1530 = vst [vmem:[%s1113_s17 + $0x38] sm:$0xf] %v1529_v5 }
 0x241   : > { %v1527_v4 = vld [vmem:[%s1960_s7 + $0x14] sm:$0xf] }
 0x242   : > { %1528 = vst [vmem:[%s1113_s17 + $0x20] sm:$0xf] %v1527_v4 }
 0x246   : > { %v1531_v6 = vld [vmem:[%s1960_s7 + $0x2c] sm:$0xf] }
 0x247   : > { %1532 = vst [vmem:[%s1113_s17 + $0x50] sm:$0xf] %v1531_v6 }
 0x248 PF: > { %s21_s23 = sadd.s32 1, %s1798_s23   ;;  %s2190_s18 = smov %s1782_s19 }
 0x249   : > { %p18_p3 = scmp.ge.s32.totalorder %s21_s23, 4   ;;  %s2191_s19 = smov %s1786_s20 }
 0x24a   : > { %s2192_s20 = smov %s1887_s30  ;;  %s2193_s21 = smov %s1794_s22 }
 0x24b   : > { %s2194_s22 = smov %s2196_s25  ;;  %20 = sbr.rel (!%p18_p3) target bundleno = 10 (0xa), region = 218 }
 0x250   :  { %1167 = vsyncpa [#allocation6], 1 }
 0x251   :  { %1169 = vsyncpa [#allocation6 + $0x1], 1 }
 0x252   :  { %1170 = vsyncpa [#allocation8], 1 }
 0x253   :  { %1172 = vsyncpa [#allocation8 + $0x1], 1 }

// kernel: _lambda_.17
= control target key start
LH: loop header
LB: loop body
LE: loop exit
PB: predicated region body
PF: predicated region fallthrough
CT: control target
= control target key end

     0   :  { %s3893_s0 = inlined_call_operand.vmem [shape: bf16[32,256], index: 0, kind: input, shape index: {}]   ;;  %s3894_s1 = inlined_call_operand.vmem [shape: bf16[32,1536], index: 1, kind: input, shape index: {}, may-alias: {1,2}]   ;;  %s3895_s2 = inlined_call_operand.vmem [shape: bf16[32,1536], index: 2, kind: input, shape index: {}, may-alias: {1,2}]   ;;  %s3896_s3 = inlined_call_operand.hbm [shape: bf16[256,1024], index: 3, kind: input, shape index: {}]   ;;  %s3897_s4 = inlined_call_operand.hbm [shape: bf16[256,1024], index: 4, kind: input, shape index: {}]   ;;  %s3898_s5 = inlined_call_operand.vmem [shape: f32[1,1024], index: 5, kind: input, shape index: {}]   ;;  %s3899_s6 = inlined_call_operand.vmem [shape: f32[1,1024], index: 6, kind: input, shape index: {}]   ;;  %s3900_s7 = inlined_call_operand.vmem [shape: bf16[32,1024], index: 7, kind: output, shape index: {}]  }
   0x1   :  { %3904 = sst [smem:[#allocation16_spill]] %s3894_s1 }
   0x2   :  { %3905 = sst [smem:[#allocation17_spill]] %s3895_s2 }
   0x3   :  { %12 = vsyncpa [#allocation6], 0 }
   0x4   :  { %14 = vsyncpa [#allocation6 + $0x1], 0 }
   0x5   :  { %15 = vsyncpa [#allocation8], 0 }
   0x6   :  { %17 = vsyncpa [#allocation8 + $0x1], 0  ;;  %s3176_s24 = smov 0   ;;  %s3178_s25 = smov 0  }
   0x7   :  { %s3180_s26 = smov 0   ;;  %s3182_s27 = smov 0  }
   0x8   :  { %s3184_s28 = smov 0   ;;  %s3186_s29 = smov 0  }
   0x9 LB: > { %3906 = sst [smem:[#allocation12_spill]] %s3118_s26  ;;  %s3205_s30 = sadd.s32 4294967295, %s3130_s29   ;;  %s3130_s29 = sphi %s3186_s29, %s23_s29   ;;  %s3126_s28 = sphi %s3184_s28, %s3919_s28   ;;  %s3122_s27 = sphi %s3182_s27, %s3922_s27   ;;  %s3118_s26 = sphi %s3180_s26, %s3917_s26   ;;  %s3114_s25 = sphi %s3178_s25, %s3921_s25   ;;  %s3110_s24 = sphi %s3176_s24, %s3920_s24  }
   0xa   : > { %3907 = sst [smem:[#allocation13_spill]] %s3126_s28  ;;  %s32_s8 = sadd.s32 1, %s3126_s28 }
   0xb   : > { %p33_p0 = scmp.ge.s32.totalorder %s32_s8, 2  ;;  %s120_s9 = sadd.s32 1, %s3118_s26 }
   0xc   : > { %p127_p1 = scmp.ne.s32.totalorder %s3118_s26, %s3114_s25  ;;  %p128_p2 = scmp.eq.s32.totalorder %s3130_s29, 0 }
   0xd   : > { %s3924_s8 = smov (%p33_p0, %s32_s8), 0  ;;  %p133_p4 = scmp.ne.s32.totalorder %s3114_s25, %s3110_s24 }
   0xe   : > { %3908 = sst [smem:[#allocation14_spill]] %s3924_s8  ;;  %p3214_p3 = por %p128_p2, %p127_p1 }
   0xf   : > { %s117_s11 = ssub.s32 %s3126_s28, %s3924_s8  ;;  %p134_p5 = scmp.eq.s32.totalorder %s3205_s30, 0 }
  0x10   : > { %p118_p6 = scmp.eq.s32.totalorder %s117_s11, 0  ;;  %p237_p7 = scmp.eq.s32.totalorder %s3205_s30, 1 }
  0x11   : > { %p3223_p8 = por %p134_p5, %p133_p4  ;;  %p2216_p9 = scmp.ge.s32.totalorder %s3130_s29, 1 }
  0x12   : > { %s3229_s13 = scalar_select %p118_p6, %s3118_s26, %s120_s9  }
  0x13   : > { %p3231_p10 = por %p237_p7, %p127_p1  ;;  %p250_p11 = scmp.lt.s32.totalorder %s3130_s29, 3 }
  0x14   : > { %3911 = sst [smem:[#allocation15_spill]] %s3229_s13 }
  0x15   : > { %p3236_p12 = pnand %p2216_p9, %p250_p11 }
  0x16   : > { %p2218_p13 = scmp.ne.s32.totalorder (!%p3236_p12), %s3205_s30, 0 }
  0x17   : > { %254 = sbr.rel (%p3236_p12) target bundleno = 50 (0x32), region = 12 }
  0x1c   : > { %268 = sbr.rel (%p2218_p13) target bundleno = 39 (0x27), region = 20  ;;  %s3914_s1 = sld [smem:[#allocation16_spill]] (!%p2218_p13) }
  0x22   : > { %v2219_v0 = vld [vmem:[%s3914_s1 + $0x18] sm:$0xff]  ;;  %v2220_v1 = vld [vmem:[%s3914_s1 + $0x48] sm:$0xff] }
  0x23   : > { %v2221_v2 = vld [vmem:[%s3914_s1 + $0x78] sm:$0xff]  ;;  %309 = vst [vmem:[#allocation3 + $0x10] sm:$0xff] %v2219_v0  ;;  %v2222_v3 = vld [vmem:[%s3914_s1 + $0xa8] sm:$0xff] }
  0x24   : > { %311 = vst [vmem:[#allocation3] sm:$0xff] %v2220_v1 }
  0x25   : > { %313 = vst [vmem:[#allocation3 + $0x18] sm:$0xff] %v2221_v2 }
  0x26   : > { %315 = vst [vmem:[#allocation3 + $0x8] sm:$0xff] %v2222_v3 }
  0x27 PF: > { %321 = sbr.rel (%p2218_p13) target bundleno = 50 (0x32), region = 58  ;;  %s3915_s2 = sld [smem:[#allocation17_spill]] (!%p2218_p13) }
  0x2d   : > { %v2224_v4 = vld [vmem:[%s3915_s2 + $0x20] sm:$0xff]  ;;  %v2225_v5 = vld [vmem:[%s3915_s2 + $0x50] sm:$0xff] }
  0x2e   : > { %v2226_v6 = vld [vmem:[%s3915_s2 + $0x80] sm:$0xff]  ;;  %362 = vst [vmem:[#allocation4] sm:$0xff] %v2224_v4  ;;  %v2227_v7 = vld [vmem:[%s3915_s2 + $0xb0] sm:$0xff] }
  0x2f   : > { %364 = vst [vmem:[#allocation4 + $0x18] sm:$0xff] %v2225_v5 }
  0x30   : > { %366 = vst [vmem:[#allocation4 + $0x8] sm:$0xff] %v2226_v6 }
  0x31   : > { %368 = vst [vmem:[#allocation4 + $0x10] sm:$0xff] %v2227_v7 }
  0x32 PF: > { %p2921_p0 = scmp.lt.s32.totalorder %s3130_s29, 2  ;;  %s379_s20 = sand.u32 1, %s3118_s26  }
  0x33   : > { %s2775_s21 = sshll.u32 %s3126_s28, 4  ;;  %s2229_s22 = sshll.u32 %s379_s20, 9 }
  0x34   : > { %s388_s30 = scalar_lea.hbm %s3896_s3, %s2775_s21  ;;  %s383_s11 = scalar_lea.vmem [#allocation5], %s2229_s22 }
  0x35   : > { %s389_s9 = sshll.u32 %s388_s30, 4  ;;  %s391_s16 = sshll.u32 %s383_s11, 4  ;;  %s390_s9 = int_to_ptr.hbm [resolvable:$true] %s389_s9  ;;  %s392_s16 = int_to_ptr.vmem [resolvable:$true] %s391_s16 }
  0x36   : > { %p2915_p1 = pnand %p2921_p0, %p3214_p3  ;;  %s380_s17 = scalar_lea.sflag [#allocation6], %s379_s20 }
  0x37   : > { %s3132_s18 = smov 512   ;;  %s3133_s19 = smov 256  }
  0x38   : > { %s3134_s1 = smov 16   ;;  %s410_s28 = scalar_lea.hbm %s3897_s4, %s2775_s21 }
  0x39   : > { %2917 = dma.hbm_to_vmem [thread:$0]  (!%p2915_p1), %s390_s9, 8192, %s392_s16, %s380_s17, %s3132_s18, %s3133_s19, %s3134_s1  }
  0x3a   : > { %s411_s13 = sshll.u32 %s410_s28, 4  ;;  %s405_s26 = scalar_lea.vmem [#allocation7], %s2229_s22  ;;  %s412_s13 = int_to_ptr.hbm [resolvable:$true] %s411_s13 }
  0x3b   : > { %s413_s23 = sshll.u32 %s405_s26, 4  ;;  %s402_s24 = scalar_lea.sflag [#allocation8], %s379_s20  ;;  %s414_s23 = int_to_ptr.vmem [resolvable:$true] %s413_s23 }
  0x3c   : > { %2920 = dma.hbm_to_vmem [thread:$0]  (!%p2915_p1), %s412_s13, 8192, %s414_s23, %s402_s24, %s3132_s18, %s3133_s19, %s3134_s1  }
  0x3d   : > { %441 = sbr.rel (%p3236_p12) target bundleno = 691 (0x2b3), region = 116  ;;  %s449_s10 = sand.u32 (!%p3236_p12), 1, %s3114_s25  }
  0x3e   : > { %s2236_s30 = sshll.u32 (!%p3236_p12), %s449_s10, 9  ;;  %s450_s11 = scalar_lea.sflag (!%p3236_p12), [#allocation6], %s449_s10 }
  0x3f   : > { %s3281_s9 = scalar_lea.vmem (!%p3236_p12), [#allocation5], %s2236_s30 }
  0x42   : > { %3101 = dma.done.wait (%p3223_p8), %s450_s11, 8192  }
  0x43   : > { %3103 = vsyncadd (%p3223_p8), %s450_s11, 4294959104  ;;  %s460_s2 = scalar_lea.sflag [#allocation8], %s449_s10  ;;  %s3287_s26 = scalar_lea.vmem [#allocation7], %s2236_s30 }
  0x44   : > { %3105 = dma.done.wait (%p3223_p8), %s460_s2, 8192  }
  0x45   : > { %3107 = vsyncadd (%p3223_p8), %s460_s2, 4294959104  ;;  %s2238_s1 = sshll.u32 %s449_s10, 6  ;;  %s2239_s28 = sshll.u32 %s3122_s27, 2 }
  0x46   : > { %p525_p2 = scmp.lt.s32.totalorder %s2239_s28, 7  ;;  %s3304_s16 = scalar_lea.vmem [#allocation9], %s2238_s1 }
  0x47   : > { %p2241_p3 = scmp.ne.s32.totalorder %s3122_s27, 0 }
  0x48   : > { %s3926_s28 = smov (!%p525_p2, %s2239_s28), 7 }
  0x49   : > { %s527_s15 = scalar_lea.vmem %s3898_s5, %s3926_s28  ;;  %s532_s22 = scalar_lea.vmem %s3899_s6, %s3926_s28 }
  0x4a   : > { %539 = sbr.rel (%p2241_p3) target bundleno = 364 (0x16c), region = 136 }
  0x4f   : > { %v542_v8 = vld [vmem:[%s3893_s0 + $0x10] sm:$0xff]  ;;  %v540_v9 = vld [vmem:[%s3893_s0] sm:$0xff]  ;;  %v543_v14 = vld [vmem:[%s3893_s0 + $0x18] sm:$0xff]  ;;  %v3135_v24 = vmov 256.0  }
  0x50   : > { %v556_v10 = vunpack.c.l.bf16 %v542_v8  ;;  %v557_v11 = vunpack.c.h.bf16 %v542_v8  ;;  %v552_v12 = vunpack.c.l.bf16 %v540_v9  ;;  %v553_v13 = vunpack.c.h.bf16 %v540_v9  ;;  %v541_v15 = vld [vmem:[%s3893_s0 + $0x8] sm:$0xff]  ;;  %v548_v5 = vld [vmem:[#allocation4] sm:$0xff] }
  0x51   : > { %v558_v18 = vunpack.c.l.bf16 %v543_v14  ;;  %v559_v19 = vunpack.c.h.bf16 %v543_v14  ;;  %v554_v20 = vunpack.c.l.bf16 %v541_v15  ;;  %v555_v21 = vunpack.c.h.bf16 %v541_v15  ;;  %v550_v7 = vld [vmem:[#allocation4 + $0x8] sm:$0xff] }
  0x52   : > { %v566_v16 = vadd.f32 %v557_v11, %v556_v10  ;;  %v560_v17 = vadd.f32 %v553_v13, %v552_v12  ;;  %2974 = vrcp.f32 %v3135_v24  ;;  %v668_v14 = vunpack.c.h.bf16 %v548_v5 }
  0x53   : > { %v569_v22 = vadd.f32 %v559_v19, %v558_v18  ;;  %v563_v23 = vadd.f32 %v555_v21, %v554_v20 }
  0x54   : > { %567 = vadd.xlane.f32.xlu1 %v566_v16  ;;  %561 = vadd.xlane.f32.xlu0 %v560_v17  ;;  %v671_v17 = vunpack.c.l.bf16 %v550_v7  ;;  %v676_v24 = vadd.f32 1.0, %v668_v14 }
  0x58   : > { %v2975_v25 = vpop.eup %2974 }
  0x59   : > { %v573_v26 = vmul.f32 256.0, %v2975_v25  ;;  %vm577_vm0 = vweird.f32 %v2975_v25 }
  0x5b   : > { %v574_v27 = vsub.f32 1.0, %v573_v26 }
  0x5c   : > { %570 = vadd.xlane.f32.xlu1 %v569_v22  ;;  %564 = vadd.xlane.f32.xlu0 %v563_v23  ;;  %v546_v22 = vld [vmem:[#allocation3 + $0x18] sm:$0xff] }
  0x5d   : > { %v575_v28 = vmul.f32 %v2975_v25, %v574_v27  ;;  %v551_v27 = vld [vmem:[#allocation4 + $0x10] sm:$0xff] }
  0x5f   : > { %v576_v29 = vadd.f32 %v2975_v25, %v575_v28 }
  0x61   : > { %v578_v30 = vsel %vm577_vm0, %v2975_v25, %v576_v29  ;;  %v679_v29 = vadd.f32 1.0, %v671_v17 }
  0xc7   : > { %v568_v31 = vpop.xlane.xlu1 %567  ;;  %v562_v32 = vpop.xlane.xlu0 %561 }
  0xc8   : > { %v581_v33 = vmul.f32 %v578_v30, %v568_v31  ;;  %v579_v34 = vmul.f32 %v578_v30, %v562_v32  ;;  %v695_v32 = vunpack.c.l.bf16 %v546_v22 }
  0xca   : > { %v3319_v35 = vsub.f32 %v556_v10, %v581_v33  ;;  %v3321_v36 = vsub.f32 %v557_v11, %v581_v33  ;;  %v3323_v37 = vsub.f32 %v552_v12, %v579_v34  ;;  %v3325_v38 = vsub.f32 %v553_v13, %v579_v34  ;;  %v544_v12 = vld [vmem:[#allocation3 + $0x10] sm:$0xff] }
  0xcb   : > { %v667_v13 = vunpack.c.l.bf16 %v548_v5  ;;  %v692_v25 = vunpack.c.h.bf16 %v544_v12  ;;  %v696_v33 = vunpack.c.h.bf16 %v546_v22 }
  0xcc   : > { %v595_v39 = vmul.f32 %v3319_v35, %v3319_v35  ;;  %v596_v40 = vmul.f32 %v3321_v36, %v3321_v36  ;;  %v591_v41 = vmul.f32 %v3323_v37, %v3323_v37  ;;  %v592_v42 = vmul.f32 %v3325_v38, %v3325_v38 }
  0xcd   : > { %v675_v23 = vadd.f32 1.0, %v667_v13 }
  0xce   : > { %v605_v43 = vadd.f32 %v596_v40, %v595_v39  ;;  %v599_v44 = vadd.f32 %v592_v42, %v591_v41  ;;  %v549_v39 = vld [vmem:[#allocation4 + $0x18] sm:$0xff]  ;;  %v673_v42 = vunpack.c.l.bf16 %v551_v27 }
  0xcf   : > { %v571_v45 = vpop.xlane.xlu1 %570  ;;  %v565_v46 = vpop.xlane.xlu0 %564 }
  0xd0   : > { %v582_v47 = vmul.f32 %v578_v30, %v571_v45  ;;  %v580_v48 = vmul.f32 %v578_v30, %v565_v46  ;;  %606 = vadd.xlane.f32.xlu0 %v605_v43  ;;  %600 = vadd.xlane.f32.xlu2 %v599_v44  ;;  %v674_v45 = vunpack.c.h.bf16 %v551_v27 }
  0xd2   : > { %v3335_v49 = vsub.f32 %v558_v18, %v582_v47  ;;  %v3337_v50 = vsub.f32 %v559_v19, %v582_v47  ;;  %v3339_v51 = vsub.f32 %v554_v20, %v580_v48  ;;  %v3341_v52 = vsub.f32 %v555_v21, %v580_v48 }
  0xd3   : > { %v672_v18 = vunpack.c.h.bf16 %v550_v7  ;;  %v691_v20 = vunpack.c.l.bf16 %v544_v12  ;;  %v547_v7 = vld [vmem:[#allocation3 + $0x8] sm:$0xff]  ;;  %v545_v12 = vld [vmem:[#allocation3] sm:$0xff] }
  0xd4   : > { %v597_v53 = vmul.f32 %v3335_v49, %v3335_v49  ;;  %v598_v54 = vmul.f32 %v3337_v50, %v3337_v50  ;;  %v593_v55 = vmul.f32 %v3339_v51, %v3339_v51  ;;  %v594_v56 = vmul.f32 %v3341_v52, %v3341_v52 }
  0xd5   : > { %v693_v22 = vunpack.c.l.bf16 %v545_v12 }
  0xd6   : > { %v608_v57 = vadd.f32 %v598_v54, %v597_v53  ;;  %v602_v58 = vadd.f32 %v594_v56, %v593_v55  ;;  %v669_v53 = vunpack.c.l.bf16 %v549_v39  ;;  %v670_v54 = vunpack.c.h.bf16 %v549_v39 }
  0xd8   : > { %609 = vadd.xlane.f32.xlu1 %v608_v57  ;;  %603 = vadd.xlane.f32.xlu2 %v602_v58  ;;  %v677_v13 = vadd.f32 1.0, %v669_v53 }
 0x143   : > { %v601_v59 = vpop.xlane.xlu2 %600  ;;  %v607_v60 = vpop.xlane.xlu0 %606 }
 0x144   : > { %v611_v61 = vmul.f32 %v601_v59, %v578_v30  ;;  %v613_v62 = vmul.f32 %v607_v60, %v578_v30 }
 0x146   : > { %v615_v63 = vadd.f32 1e-06, %v611_v61  ;;  %v617_v0 = vadd.f32 1e-06, %v613_v62  ;;  %v681_v61 = vadd.f32 1.0, %v673_v42 }
 0x148   : > { %2976 = vrsqrt.f32 %v615_v63  ;;  %vm625_vm3 = vweird.f32 %v615_v63  ;;  %vm645_vm5 = vweird.f32 %v617_v0 }
 0x149   : > { %2978 = vrsqrt.f32 %v617_v0 }
 0x14b   : > { %v610_v1 = vpop.xlane.xlu1 %609  ;;  %v604_v2 = vpop.xlane.xlu2 %603 }
 0x14c   : > { %v614_v3 = vmul.f32 %v610_v1, %v578_v30  ;;  %v612_v4 = vmul.f32 %v604_v2, %v578_v30  ;;  %v680_v30 = vadd.f32 1.0, %v672_v18  ;;  %v682_v1 = vadd.f32 1.0, %v674_v45 }
 0x14d   : > { %v678_v18 = vadd.f32 1.0, %v670_v54 }
 0x14e   : > { %v2977_v6 = vpop.eup %2976  ;;  %v3351_v8 = vadd.f32 1e-06, %v614_v3  ;;  %v3353_v9 = vadd.f32 1e-06, %v612_v4 }
 0x14f   : > { %v2979_v10 = vpop.eup %2978  ;;  %v620_v11 = vmul.f32 %v2977_v6, %v615_v63  ;;  %vm626_vm1 = vweird.f32 %v2977_v6 }
 0x150   : > { %v640_v15 = vmul.f32 %v2979_v10, %v617_v0  ;;  %2980 = vrsqrt.f32 %v3351_v8  ;;  %vm646_vm2 = vweird.f32 %v2979_v10  ;;  %vm627_vm4 = vmor %vm625_vm3, %vm626_vm1  ;;  %vm655_vm9 = vweird.f32 %v3351_v8 }
 0x151   : > { %v621_v16 = vmul.f32 %v2977_v6, %v620_v11  ;;  %2982 = vrsqrt.f32 %v3353_v9  ;;  %vm647_vm6 = vmor %vm645_vm5, %vm646_vm2  ;;  %vm635_vm11 = vweird.f32 %v3353_v9 }
 0x152   : > { %v641_v19 = vmul.f32 %v2979_v10, %v640_v15 }
 0x153   : > { %v622_v21 = vmul.f32 0.5, %v621_v16  ;;  %v697_v16 = vunpack.c.l.bf16 %v547_v7 }
 0x154   : > { %v642_v26 = vmul.f32 0.5, %v641_v19  ;;  %v698_v19 = vunpack.c.h.bf16 %v547_v7 }
 0x155   : > { %v623_v28 = vsub.f32 1.5, %v622_v21 }
 0x156   : > { %v2981_v31 = vpop.eup %2980  ;;  %v643_v34 = vsub.f32 1.5, %v642_v26 }
 0x157   : > { %v2983_v40 = vpop.eup %2982  ;;  %v624_v41 = vmul.f32 %v2977_v6, %v623_v28  ;;  %v650_v43 = vmul.f32 %v2981_v31, %v3351_v8  ;;  %vm656_vm7 = vweird.f32 %v2981_v31 }
 0x158   : > { %v644_v44 = vmul.f32 %v2979_v10, %v643_v34  ;;  %v630_v46 = vmul.f32 %v2983_v40, %v3353_v9  ;;  %vm636_vm8 = vweird.f32 %v2983_v40  ;;  %vm657_vm10 = vmor %vm655_vm9, %vm656_vm7 }
 0x159   : > { %v628_v47 = vsel %vm627_vm4, %v2977_v6, %v624_v41  ;;  %v651_v48 = vmul.f32 %v2981_v31, %v650_v43  ;;  %vm637_vm12 = vmor %vm635_vm11, %vm636_vm8 }
 0x15a   : > { %v659_v55 = vmul.f32 %v628_v47, %v3323_v37  ;;  %v660_v56 = vmul.f32 %v628_v47, %v3325_v38  ;;  %v648_v57 = vsel %vm647_vm6, %v2979_v10, %v644_v44  ;;  %v631_v58 = vmul.f32 %v2983_v40, %v630_v46 }
 0x15b   : > { %v663_v59 = vmul.f32 %v648_v57, %v3319_v35  ;;  %v664_v60 = vmul.f32 %v648_v57, %v3321_v36  ;;  %v652_v62 = vmul.f32 0.5, %v651_v48 }
 0x15c   : > { %v683_v63 = vmul.f32 %v675_v23, %v659_v55  ;;  %v684_v0 = vmul.f32 %v676_v24, %v660_v56  ;;  %v632_v2 = vmul.f32 0.5, %v631_v58  ;;  %v694_v23 = vunpack.c.h.bf16 %v545_v12 }
 0x15d   : > { %v687_v3 = vmul.f32 %v679_v29, %v663_v59  ;;  %v688_v4 = vmul.f32 %v680_v30, %v664_v60  ;;  %v653_v5 = vsub.f32 1.5, %v652_v62 }
 0x15e   : > { %v699_v6 = vadd.f32 %v691_v20, %v683_v63  ;;  %v700_v37 = vadd.f32 %v692_v25, %v684_v0  ;;  %v633_v38 = vsub.f32 1.5, %v632_v2 }
 0x15f   : > { %v703_v10 = vadd.f32 %v695_v32, %v687_v3  ;;  %v704_v11 = vadd.f32 %v696_v33, %v688_v4  ;;  %v654_v35 = vmul.f32 %v2981_v31, %v653_v5 }
 0x160   : > { %v707_v36 = vpack.c.bf16 %v700_v37, %v699_v6  ;;  %v634_v14 = vmul.f32 %v2983_v40, %v633_v38 }
 0x161   : > { %v709_v15 = vpack.c.bf16 %v704_v11, %v703_v10  ;;  %v658_v17 = vsel %vm657_vm10, %v2981_v31, %v654_v35 }
 0x162   : > { %711 = vst [vmem:[#allocation2] sm:$0xff] %v707_v36  ;;  %v665_v20 = vmul.f32 %v658_v17, %v3335_v49  ;;  %v666_v21 = vmul.f32 %v658_v17, %v3337_v50  ;;  %v638_v8 = vsel %vm637_vm12, %v2983_v40, %v634_v14 }
 0x163   : > { %713 = vst [vmem:[#allocation2 + $0x10] sm:$0xff] %v709_v15  ;;  %v661_v24 = vmul.f32 %v638_v8, %v3339_v51  ;;  %v662_v9 = vmul.f32 %v638_v8, %v3341_v52 }
 0x164   : > { %v689_v25 = vmul.f32 %v681_v61, %v665_v20  ;;  %v690_v26 = vmul.f32 %v682_v1, %v666_v21 }
 0x165   : > { %v685_v27 = vmul.f32 %v677_v13, %v661_v24  ;;  %v686_v28 = vmul.f32 %v678_v18, %v662_v9 }
 0x166   : > { %v705_v29 = vadd.f32 %v697_v16, %v689_v25  ;;  %v706_v30 = vadd.f32 %v698_v19, %v690_v26 }
 0x167   : > { %v701_v31 = vadd.f32 %v693_v22, %v685_v27  ;;  %v702_v32 = vadd.f32 %v694_v23, %v686_v28 }
 0x168   : > { %v710_v33 = vpack.c.bf16 %v706_v30, %v705_v29 }
 0x169   : > { %v708_v49 = vpack.c.bf16 %v702_v32, %v701_v31 }
 0x16a   : > { %714 = vst [vmem:[#allocation2 + $0x18] sm:$0xff] %v710_v33 }
 0x16b   : > { %712 = vst [vmem:[#allocation2 + $0x8] sm:$0xff] %v708_v49 }
 0x16c PF: > { %v2372_v50 = vld [vmem:[%s3281_s9 + $0xe0] sm:$0xf]  ;;  %v2811_v51 = vld [vmem:[%s3281_s9 + $0xec] sm:$0xf0]  ;;  %v2809_v40 = vld [vmem:[%s3281_s9 + $0xe4] sm:$0xf] }
 0x16d   : > { %v2500_v52 = vld [vmem:[%s3281_s9 + $0x1e0] sm:$0xf]  ;;  %v2373_v34 = vor.u32 %v2811_v51, %v2372_v50  ;;  %v2843_v39 = vld [vmem:[%s3281_s9 + $0x1ec] sm:$0xf0]  ;;  %v2374_v41 = vld [vmem:[%s3281_s9 + $0xf0] sm:$0xf0] }
 0x16e   : > { %v2501_v42 = vor.u32 %v2843_v39, %v2500_v52  ;;  %v2377_v43 = vor.u32 %v2809_v40, %v2374_v41  ;;  %v2841_v44 = vld [vmem:[%s3281_s9 + $0x1e4] sm:$0xf]  ;;  %v2502_v45 = vld [vmem:[%s3281_s9 + $0x1f0] sm:$0xf0]  ;;  %v2356_v46 = vld [vmem:[%s3281_s9 + $0xc0] sm:$0xf] }
 0x16f   : > { %1133 = vmatpush.bf16.msra.mxu0 %v2373_v34  ;;  %v2505_v47 = vor.u32 %v2841_v44, %v2502_v45  ;;  %v2807_v48 = vld [vmem:[%s3281_s9 + $0xcc] sm:$0xf0]  ;;  %v2484_v53 = vld [vmem:[%s3281_s9 + $0x1c0] sm:$0xf]  ;;  %v2805_v57 = vld [vmem:[%s3281_s9 + $0xc4] sm:$0xf] }
 0x170   : > { %v2839_v54 = vld [vmem:[%s3281_s9 + $0x1cc] sm:$0xf0]  ;;  %1152 = vmatpush.bf16.msra.mxu1 %v2501_v42  ;;  %1171 = vmatpush.bf16.msra.mxu2 %v2377_v43  ;;  %v2357_v55 = vor.u32 %v2807_v48, %v2356_v46  ;;  %v2358_v58 = vld [vmem:[%s3281_s9 + $0xd0] sm:$0xf0]  ;;  %v2837_v59 = vld [vmem:[%s3281_s9 + $0x1c4] sm:$0xf] }
 0x171   : > { %v2485_v56 = vor.u32 %v2839_v54, %v2484_v53  ;;  %1190 = vmatpush.bf16.msra.mxu3 %v2505_v47  ;;  %v2361_v60 = vor.u32 %v2805_v57, %v2358_v58  ;;  %v2486_v61 = vld [vmem:[%s3281_s9 + $0x1d0] sm:$0xf0]  ;;  %v2340_v62 = vld [vmem:[%s3281_s9 + $0xa0] sm:$0xf]  ;;  %v2803_v63 = vld [vmem:[%s3281_s9 + $0xac] sm:$0xf0] }
 0x172   : > { %v2489_v0 = vor.u32 %v2837_v59, %v2486_v61  ;;  %v2468_v1 = vld [vmem:[%s3281_s9 + $0x1a0] sm:$0xf]  ;;  %v2835_v2 = vld [vmem:[%s3281_s9 + $0x1ac] sm:$0xf0]  ;;  %v2801_v3 = vld [vmem:[%s3281_s9 + $0xa4] sm:$0xf]  ;;  %v2341_v4 = vor.u32 %v2803_v63, %v2340_v62 }
 0x173   : > { %1134 = vmatpush.bf16.msra.mxu0 %v2357_v55  ;;  %v2342_v5 = vld [vmem:[%s3281_s9 + $0xb0] sm:$0xf0]  ;;  %v2833_v6 = vld [vmem:[%s3281_s9 + $0x1a4] sm:$0xf]  ;;  %v2469_v7 = vor.u32 %v2835_v2, %v2468_v1  ;;  %v2324_v10 = vld [vmem:[%s3281_s9 + $0x80] sm:$0xf] }
 0x174   : > { %v2470_v37 = vld [vmem:[%s3281_s9 + $0x1b0] sm:$0xf0]  ;;  %1153 = vmatpush.bf16.msra.mxu1 %v2485_v56  ;;  %1172 = vmatpush.bf16.msra.mxu2 %v2361_v60  ;;  %v2345_v38 = vor.u32 %v2801_v3, %v2342_v5  ;;  %v2799_v11 = vld [vmem:[%s3281_s9 + $0x8c] sm:$0xf0]  ;;  %v2452_v35 = vld [vmem:[%s3281_s9 + $0x180] sm:$0xf] }
 0x175   : > { %1191 = vmatpush.bf16.msra.mxu3 %v2489_v0  ;;  %v2473_v36 = vor.u32 %v2833_v6, %v2470_v37  ;;  %v2831_v12 = vld [vmem:[%s3281_s9 + $0x18c] sm:$0xf0]  ;;  %v2797_v13 = vld [vmem:[%s3281_s9 + $0x84] sm:$0xf]  ;;  %v2326_v14 = vld [vmem:[%s3281_s9 + $0x90] sm:$0xf0]  ;;  %v2325_v17 = vor.u32 %v2799_v11, %v2324_v10 }
 0x176   : > { %v2829_v15 = vld [vmem:[%s3281_s9 + $0x184] sm:$0xf]  ;;  %v2454_v16 = vld [vmem:[%s3281_s9 + $0x190] sm:$0xf0]  ;;  %v2453_v18 = vor.u32 %v2831_v12, %v2452_v35  ;;  %v2329_v19 = vor.u32 %v2797_v13, %v2326_v14  ;;  %v2308_v20 = vld [vmem:[%s3281_s9 + $0x60] sm:$0xf] }
 0x177   : > { %1135 = vmatpush.bf16.msra.mxu0 %v2341_v4  ;;  %v2795_v21 = vld [vmem:[%s3281_s9 + $0x6c] sm:$0xf0]  ;;  %v2436_v8 = vld [vmem:[%s3281_s9 + $0x160] sm:$0xf]  ;;  %v2457_v22 = vor.u32 %v2829_v15, %v2454_v16  ;;  %v2793_v24 = vld [vmem:[%s3281_s9 + $0x64] sm:$0xf] }
 0x178   : > { %1154 = vmatpush.bf16.msra.mxu1 %v2469_v7  ;;  %1173 = vmatpush.bf16.msra.mxu2 %v2345_v38  ;;  %v2827_v23 = vld [vmem:[%s3281_s9 + $0x16c] sm:$0xf0]  ;;  %v2310_v9 = vld [vmem:[%s3281_s9 + $0x70] sm:$0xf0]  ;;  %v2825_v25 = vld [vmem:[%s3281_s9 + $0x164] sm:$0xf]  ;;  %v2309_v27 = vor.u32 %v2795_v21, %v2308_v20 }
 0x179   : > { %1192 = vmatpush.bf16.msra.mxu3 %v2473_v36  ;;  %v2438_v26 = vld [vmem:[%s3281_s9 + $0x170] sm:$0xf0]  ;;  %v2437_v28 = vor.u32 %v2827_v23, %v2436_v8  ;;  %v2313_v29 = vor.u32 %v2793_v24, %v2310_v9  ;;  %v2292_v30 = vld [vmem:[%s3281_s9 + $0x40] sm:$0xf]  ;;  %v2791_v31 = vld [vmem:[%s3281_s9 + $0x4c] sm:$0xf0] }
 0x17a   : > { %v2420_v32 = vld [vmem:[%s3281_s9 + $0x140] sm:$0xf]  ;;  %v2441_v33 = vor.u32 %v2825_v25, %v2438_v26  ;;  %v2823_v49 = vld [vmem:[%s3281_s9 + $0x14c] sm:$0xf0]  ;;  %v2789_v50 = vld [vmem:[%s3281_s9 + $0x44] sm:$0xf]  ;;  %v2293_v39 = vor.u32 %v2791_v31, %v2292_v30 }
 0x17b   : > { %1136 = vmatpush.bf16.msra.mxu0 %v2325_v17  ;;  %v2294_v51 = vld [vmem:[%s3281_s9 + $0x50] sm:$0xf0]  ;;  %v2821_v52 = vld [vmem:[%s3281_s9 + $0x144] sm:$0xf]  ;;  %v2421_v40 = vor.u32 %v2823_v49, %v2420_v32  ;;  %v2276_v42 = vld [vmem:[%s3281_s9 + $0x20] sm:$0xf] }
 0x17c   : > { %1155 = vmatpush.bf16.msra.mxu1 %v2453_v18  ;;  %1174 = vmatpush.bf16.msra.mxu2 %v2329_v19  ;;  %v2422_v34 = vld [vmem:[%s3281_s9 + $0x150] sm:$0xf0]  ;;  %v2297_v41 = vor.u32 %v2789_v50, %v2294_v51  ;;  %v2787_v43 = vld [vmem:[%s3281_s9 + $0x2c] sm:$0xf0]  ;;  %v2404_v44 = vld [vmem:[%s3281_s9 + $0x120] sm:$0xf] }
 0x17d   : > { %1193 = vmatpush.bf16.msra.mxu3 %v2457_v22  ;;  %v2425_v45 = vor.u32 %v2821_v52, %v2422_v34  ;;  %v2819_v46 = vld [vmem:[%s3281_s9 + $0x12c] sm:$0xf0]  ;;  %v2785_v47 = vld [vmem:[%s3281_s9 + $0x24] sm:$0xf]  ;;  %v2278_v48 = vld [vmem:[%s3281_s9 + $0x30] sm:$0xf0]  ;;  %v2277_v55 = vor.u32 %v2787_v43, %v2276_v42 }
 0x17e   : > { %v2817_v53 = vld [vmem:[%s3281_s9 + $0x124] sm:$0xf]  ;;  %v2406_v54 = vld [vmem:[%s3281_s9 + $0x130] sm:$0xf0]  ;;  %v2260_v56 = vld [vmem:[%s3281_s9] sm:$0xf]  ;;  %v2405_v58 = vor.u32 %v2819_v46, %v2404_v44  ;;  %v2281_v59 = vor.u32 %v2785_v47, %v2278_v48 }
 0x17f   : > { %1137 = vmatpush.bf16.msra.mxu0 %v2309_v27  ;;  %v2783_v57 = vld [vmem:[%s3281_s9 + $0xc] sm:$0xf0]  ;;  %v2388_v60 = vld [vmem:[%s3281_s9 + $0x100] sm:$0xf]  ;;  %v2781_v62 = vld [vmem:[%s3281_s9 + $0x4] sm:$0xf]  ;;  %v2409_v63 = vor.u32 %v2817_v53, %v2406_v54 }
 0x180   : > { %1156 = vmatpush.bf16.msra.mxu1 %v2437_v28  ;;  %1175 = vmatpush.bf16.msra.mxu2 %v2313_v29  ;;  %v2815_v61 = vld [vmem:[%s3281_s9 + $0x10c] sm:$0xf0]  ;;  %v2262_v0 = vld [vmem:[%s3281_s9 + $0x10] sm:$0xf0]  ;;  %v2813_v1 = vld [vmem:[%s3281_s9 + $0x104] sm:$0xf]  ;;  %v2261_v6 = vor.u32 %v2783_v57, %v2260_v56 }
 0x181   : > { %1194 = vmatpush.bf16.msra.mxu3 %v2441_v33  ;;  %v2390_v2 = vld [vmem:[%s3281_s9 + $0x110] sm:$0xf0]  ;;  %v2244_v3 = vld [vmem:[#allocation2] sm:$0xf]  ;;  %v2810_v4 = vld [vmem:[%s3281_s9 + $0xec] sm:$0xf]  ;;  %v2389_v10 = vor.u32 %v2815_v61, %v2388_v60  ;;  %v2265_v11 = vor.u32 %v2781_v62, %v2262_v0 }
 0x182   : > { %v2382_v5 = vld [vmem:[%s3281_s9 + $0xf8] sm:$0xf0]  ;;  %v2778_v37 = vld [vmem:[#allocation2 + $0x4] sm:$0xf0]  ;;  %v2844_v38 = vld [vmem:[%s3281_s9 + $0x1f4] sm:$0xf0]  ;;  %v2393_v12 = vor.u32 %v2813_v1, %v2390_v2 }
 0x183   : > { %1138 = vmatpush.bf16.msra.mxu0 %v2293_v39  ;;  %v2508_v7 = vld [vmem:[%s3281_s9 + $0x1e8] sm:$0xf]  ;;  %v2777_v35 = vld [vmem:[#allocation2 + $0x4] sm:$0xf]  ;;  %v2246_v36 = vld [vmem:[#allocation2 + $0x8] sm:$0xf0]  ;;  %v2385_v13 = vor.u32 %v2810_v4, %v2382_v5  ;;  %v3441_v17 = vor.u32 %v2778_v37, %v2244_v3 }
 0x184   : > { %1157 = vmatpush.bf16.msra.mxu1 %v2421_v40  ;;  %1176 = vmatpush.bf16.msra.mxu2 %v2297_v41  ;;  %v2380_v14 = vld [vmem:[%s3281_s9 + $0xe8] sm:$0xf]  ;;  %v2812_v15 = vld [vmem:[%s3281_s9 + $0xf4] sm:$0xf0]  ;;  %v2842_v16 = vld [vmem:[%s3281_s9 + $0x1ec] sm:$0xf]  ;;  %v2509_v18 = vor.u32 %v2844_v38, %v2508_v7  ;;  %v3446_v8 = vor.u32 %v2777_v35, %v2246_v36 }
 0x185   : > { %1195 = vmatpush.bf16.msra.mxu3 %v2425_v45  ;;  %v2510_v19 = vld [vmem:[%s3281_s9 + $0x1f8] sm:$0xf0]  ;;  %v2806_v20 = vld [vmem:[%s3281_s9 + $0xcc] sm:$0xf]  ;;  %v2492_v22 = vld [vmem:[%s3281_s9 + $0x1c8] sm:$0xf]  ;;  %v2381_v24 = vor.u32 %v2812_v15, %v2380_v14 }
 0x186   : > { %v2366_v21 = vld [vmem:[%s3281_s9 + $0xd8] sm:$0xf0]  ;;  %v2840_v23 = vld [vmem:[%s3281_s9 + $0x1d4] sm:$0xf0]  ;;  %v2513_v9 = vor.u32 %v2842_v16, %v2510_v19  ;;  %v2364_v26 = vld [vmem:[%s3281_s9 + $0xc8] sm:$0xf] }
 0x187   : > { %1139 = vmatpush.bf16.msra.mxu0 %v2277_v55  ;;  %v2369_v25 = vor.u32 %v2806_v20, %v2366_v21  ;;  %v2808_v27 = vld [vmem:[%s3281_s9 + $0xd4] sm:$0xf0]  ;;  %v2838_v28 = vld [vmem:[%s3281_s9 + $0x1cc] sm:$0xf]  ;;  %v2493_v29 = vor.u32 %v2840_v23, %v2492_v22  ;;  %v2494_v30 = vld [vmem:[%s3281_s9 + $0x1d8] sm:$0xf0] }
 0x188   : > { %1158 = vmatpush.bf16.msra.mxu1 %v2405_v58  ;;  %1177 = vmatpush.bf16.msra.mxu2 %v2281_v59  ;;  %v2802_v31 = vld [vmem:[%s3281_s9 + $0xac] sm:$0xf]  ;;  %v2350_v32 = vld [vmem:[%s3281_s9 + $0xb8] sm:$0xf0]  ;;  %v2476_v33 = vld [vmem:[%s3281_s9 + $0x1a8] sm:$0xf]  ;;  %v2365_v50 = vor.u32 %v2808_v27, %v2364_v26  ;;  %v2497_v51 = vor.u32 %v2838_v28, %v2494_v30 }
 0x189   : > { %1196 = vmatpush.bf16.msra.mxu3 %v2409_v63  ;;  %v2836_v49 = vld [vmem:[%s3281_s9 + $0x1b4] sm:$0xf0]  ;;  %v2353_v52 = vor.u32 %v2802_v31, %v2350_v32  ;;  %v2348_v34 = vld [vmem:[%s3281_s9 + $0xa8] sm:$0xf]  ;;  %v2834_v40 = vld [vmem:[%s3281_s9 + $0x1ac] sm:$0xf] }
 0x18a   : > { %v2804_v39 = vld [vmem:[%s3281_s9 + $0xb4] sm:$0xf0]  ;;  %v2477_v41 = vor.u32 %v2836_v49, %v2476_v33  ;;  %v2478_v42 = vld [vmem:[%s3281_s9 + $0x1b8] sm:$0xf0]  ;;  %v2798_v43 = vld [vmem:[%s3281_s9 + $0x8c] sm:$0xf] }
 0x18b   : > { %1140 = vmatpush.bf16.msra.mxu0 %v2261_v6  ;;  %v2334_v44 = vld [vmem:[%s3281_s9 + $0x98] sm:$0xf0]  ;;  %v2460_v45 = vld [vmem:[%s3281_s9 + $0x188] sm:$0xf]  ;;  %v2832_v46 = vld [vmem:[%s3281_s9 + $0x194] sm:$0xf0]  ;;  %v2349_v47 = vor.u32 %v2804_v39, %v2348_v34  ;;  %v2481_v53 = vor.u32 %v2834_v40, %v2478_v42 }
 0x18c   : > { %1159 = vmatpush.bf16.msra.mxu1 %v2389_v10  ;;  %1178 = vmatpush.bf16.msra.mxu2 %v2265_v11  ;;  %v2332_v48 = vld [vmem:[%s3281_s9 + $0x88] sm:$0xf]  ;;  %v2337_v54 = vor.u32 %v2798_v43, %v2334_v44  ;;  %v2800_v55 = vld [vmem:[%s3281_s9 + $0x94] sm:$0xf0]  ;;  %v2830_v56 = vld [vmem:[%s3281_s9 + $0x18c] sm:$0xf]  ;;  %v2461_v58 = vor.u32 %v2832_v46, %v2460_v45 }
 0x18d   : > { %1197 = vmatpush.bf16.msra.mxu3 %v2393_v12  ;;  %v2462_v57 = vld [vmem:[%s3281_s9 + $0x198] sm:$0xf0]  ;;  %v2252_v59 = vld [vmem:[#allocation2 + $0x10] sm:$0xf]  ;;  %v2794_v60 = vld [vmem:[%s3281_s9 + $0x6c] sm:$0xf]  ;;  %v2333_v1 = vor.u32 %v2800_v55, %v2332_v48 }
 0x18e   : > { %1141 = vmatmul.bf16.vlgmr.msra.gmra.mxu0 %v3441_v17  ;;  %v2318_v61 = vld [vmem:[%s3281_s9 + $0x78] sm:$0xf0]  ;;  %v2780_v62 = vld [vmem:[#allocation2 + $0x14] sm:$0xf0]  ;;  %v2444_v63 = vld [vmem:[%s3281_s9 + $0x168] sm:$0xf]  ;;  %v2465_v4 = vor.u32 %v2830_v56, %v2462_v57 }
 0x18f   : > { %1160 = vmatmul.bf16.vlgmr.msra.gmra.mxu1 %v3446_v8  ;;  %1179 = vmatmul.bf16.vlgmr.msra.gmra.mxu2 %v3441_v17  ;;  %v2828_v0 = vld [vmem:[%s3281_s9 + $0x174] sm:$0xf0]  ;;  %v2779_v2 = vld [vmem:[#allocation2 + $0x14] sm:$0xf]  ;;  %v2254_v3 = vld [vmem:[#allocation2 + $0x18] sm:$0xf0]  ;;  %v2321_v5 = vor.u32 %v2794_v60, %v2318_v61  ;;  %v3481_v38 = vor.u32 %v2780_v62, %v2252_v59 }
 0x190   : > { %1247 = vmatpush.bf16.msrb.mxu2 %v2385_v13  ;;  %1228 = vmatpush.bf16.msrb.mxu1 %v2509_v18  ;;  %v2316_v6 = vld [vmem:[%s3281_s9 + $0x68] sm:$0xf]  ;;  %v2796_v37 = vld [vmem:[%s3281_s9 + $0x74] sm:$0xf0]  ;;  %v2826_v7 = vld [vmem:[%s3281_s9 + $0x16c] sm:$0xf]  ;;  %v2445_v10 = vor.u32 %v2828_v0, %v2444_v63  ;;  %v3486_v12 = vor.u32 %v2779_v2, %v2254_v3 }
 0x191   : > { %1198 = vmatmul.bf16.vlgmr.msra.gmra.mxu3 %v3446_v8  ;;  %1209 = vmatpush.bf16.msrb.mxu0 %v2381_v24  ;;  %v2446_v11 = vld [vmem:[%s3281_s9 + $0x178] sm:$0xf0]  ;;  %v2790_v35 = vld [vmem:[%s3281_s9 + $0x4c] sm:$0xf]  ;;  %v2428_v13 = vld [vmem:[%s3281_s9 + $0x148] sm:$0xf]  ;;  %v2317_v15 = vor.u32 %v2796_v37, %v2316_v6 }
 0x192   : > { %1266 = vmatpush.bf16.msrb.mxu3 %v2513_v9  ;;  %v2302_v36 = vld [vmem:[%s3281_s9 + $0x58] sm:$0xf0]  ;;  %v2824_v14 = vld [vmem:[%s3281_s9 + $0x154] sm:$0xf0]  ;;  %v2449_v16 = vor.u32 %v2826_v7, %v2446_v11  ;;  %v2300_v19 = vld [vmem:[%s3281_s9 + $0x48] sm:$0xf] }
 0x193   : > { %v2305_v18 = vor.u32 %v2790_v35, %v2302_v36  ;;  %v2792_v20 = vld [vmem:[%s3281_s9 + $0x54] sm:$0xf0]  ;;  %v2822_v21 = vld [vmem:[%s3281_s9 + $0x14c] sm:$0xf]  ;;  %v2429_v22 = vor.u32 %v2824_v14, %v2428_v13  ;;  %v2430_v23 = vld [vmem:[%s3281_s9 + $0x158] sm:$0xf0] }
 0x194   : > { %1248 = vmatpush.bf16.msrb.mxu2 %v2369_v25  ;;  %1229 = vmatpush.bf16.msrb.mxu1 %v2493_v29  ;;  %v2786_v24 = vld [vmem:[%s3281_s9 + $0x2c] sm:$0xf]  ;;  %v2286_v9 = vld [vmem:[%s3281_s9 + $0x38] sm:$0xf0]  ;;  %v2412_v25 = vld [vmem:[%s3281_s9 + $0x128] sm:$0xf]  ;;  %v2301_v27 = vor.u32 %v2792_v20, %v2300_v19  ;;  %v2433_v29 = vor.u32 %v2822_v21, %v2430_v23 }
 0x195   : > { %1210 = vmatpush.bf16.msrb.mxu0 %v2365_v50  ;;  %v2820_v26 = vld [vmem:[%s3281_s9 + $0x134] sm:$0xf0]  ;;  %v2284_v28 = vld [vmem:[%s3281_s9 + $0x28] sm:$0xf]  ;;  %v2289_v30 = vor.u32 %v2786_v24, %v2286_v9  ;;  %v2818_v32 = vld [vmem:[%s3281_s9 + $0x12c] sm:$0xf] }
 0x196   : > { %1267 = vmatpush.bf16.msrb.mxu3 %v2497_v51  ;;  %v2788_v31 = vld [vmem:[%s3281_s9 + $0x34] sm:$0xf0]  ;;  %v2414_v33 = vld [vmem:[%s3281_s9 + $0x138] sm:$0xf0]  ;;  %v2413_v49 = vor.u32 %v2820_v26, %v2412_v25  ;;  %v2782_v50 = vld [vmem:[%s3281_s9 + $0xc] sm:$0xf] }
 0x197   : > { %v2270_v51 = vld [vmem:[%s3281_s9 + $0x18] sm:$0xf0]  ;;  %v2816_v34 = vld [vmem:[%s3281_s9 + $0x114] sm:$0xf0]  ;;  %v2873_v39 = vld [vmem:[%s3287_s26 + $0xe4] sm:$0xf]  ;;  %v2417_v45 = vor.u32 %v2818_v32, %v2414_v33 }
 0x198   : > { %1249 = vmatpush.bf16.msrb.mxu2 %v2353_v52  ;;  %1230 = vmatpush.bf16.msrb.mxu1 %v2477_v41  ;;  %v2396_v52 = vld [vmem:[%s3281_s9 + $0x108] sm:$0xf]  ;;  %v2630_v40 = vld [vmem:[%s3287_s26 + $0xf0] sm:$0xf0]  ;;  %v2285_v41 = vor.u32 %v2788_v31, %v2284_v28  ;;  %v2756_v43 = vld [vmem:[%s3287_s26 + $0x1e0] sm:$0xf]  ;;  %v2273_v46 = vor.u32 %v2782_v50, %v2270_v51 }
 0x199   : > { %1211 = vmatpush.bf16.msrb.mxu0 %v2349_v47  ;;  %v2268_v42 = vld [vmem:[%s3281_s9 + $0x8] sm:$0xf]  ;;  %v2907_v44 = vld [vmem:[%s3287_s26 + $0x1ec] sm:$0xf0]  ;;  %v2784_v47 = vld [vmem:[%s3281_s9 + $0x14] sm:$0xf0]  ;;  %v2633_v55 = vor.u32 %v2873_v39, %v2630_v40 }
 0x19a   : > { %1268 = vmatpush.bf16.msrb.mxu3 %v2481_v53  ;;  %v2814_v48 = vld [vmem:[%s3281_s9 + $0x10c] sm:$0xf]  ;;  %v2398_v53 = vld [vmem:[%s3281_s9 + $0x118] sm:$0xf0]  ;;  %v2628_v56 = vld [vmem:[%s3287_s26 + $0xe0] sm:$0xf]  ;;  %v2757_v59 = vor.u32 %v2907_v44, %v2756_v43  ;;  %v2269_v63 = vor.u32 %v2784_v47, %v2268_v42 }
 0x19b   : > { %v2875_v57 = vld [vmem:[%s3287_s26 + $0xec] sm:$0xf0]  ;;  %v2758_v60 = vld [vmem:[%s3287_s26 + $0x1f0] sm:$0xf0]  ;;  %v2869_v61 = vld [vmem:[%s3287_s26 + $0xc4] sm:$0xf]  ;;  %v2401_v0 = vor.u32 %v2814_v48, %v2398_v53 }
 0x19c   : > { %1250 = vmatpush.bf16.msrb.mxu2 %v2337_v54  ;;  %1231 = vmatpush.bf16.msrb.mxu1 %v2461_v58  ;;  %v2397_v54 = vor.u32 %v2816_v34, %v2396_v52  ;;  %v2905_v58 = vld [vmem:[%s3287_s26 + $0x1e4] sm:$0xf]  ;;  %v2614_v62 = vld [vmem:[%s3287_s26 + $0xd0] sm:$0xf0]  ;;  %v2612_v2 = vld [vmem:[%s3287_s26 + $0xc0] sm:$0xf] }
 0x19d   : > { %1212 = vmatpush.bf16.msrb.mxu0 %v2333_v1  ;;  %v2629_v1 = vor.u32 %v2875_v57, %v2628_v56  ;;  %v2871_v3 = vld [vmem:[%s3287_s26 + $0xcc] sm:$0xf0]  ;;  %v2740_v6 = vld [vmem:[%s3287_s26 + $0x1c0] sm:$0xf]  ;;  %v2901_v7 = vld [vmem:[%s3287_s26 + $0x1c4] sm:$0xf] }
 0x19e   : > { %1269 = vmatpush.bf16.msrb.mxu3 %v2465_v4  ;;  %1146 = vmatmul.bf16.gmra.mxu0 %v3481_v38  ;;  %v2761_v4 = vor.u32 %v2905_v58, %v2758_v60  ;;  %v2903_v37 = vld [vmem:[%s3287_s26 + $0x1cc] sm:$0xf0]  ;;  %v2865_v11 = vld [vmem:[%s3287_s26 + $0xa4] sm:$0xf]  ;;  %v2598_v35 = vld [vmem:[%s3287_s26 + $0xb0] sm:$0xf0]  ;;  %v2613_v36 = vor.u32 %v2871_v3, %v2612_v2 }
 0x19f   : > { %1165 = vmatmul.bf16.gmra.mxu1 %v3486_v12  ;;  %1184 = vmatmul.bf16.gmra.mxu2 %v3481_v38  ;;  %v2741_v13 = vor.u32 %v2903_v37, %v2740_v6  ;;  %v2596_v14 = vld [vmem:[%s3287_s26 + $0xa0] sm:$0xf]  ;;  %v2899_v20 = vld [vmem:[%s3287_s26 + $0x1ac] sm:$0xf0]  ;;  %v2897_v21 = vld [vmem:[%s3287_s26 + $0x1a4] sm:$0xf] }
 0x1a0   : > { %1251 = vmatpush.bf16.msrb.mxu2 %v2321_v5  ;;  %1232 = vmatpush.bf16.msrb.mxu1 %v2445_v10  ;;  %v2617_v5 = vor.u32 %v2869_v61, %v2614_v62  ;;  %v2742_v10 = vld [vmem:[%s3287_s26 + $0x1d0] sm:$0xf0]  ;;  %v2724_v19 = vld [vmem:[%s3287_s26 + $0x1a0] sm:$0xf]  ;;  %v2861_v23 = vld [vmem:[%s3287_s26 + $0x84] sm:$0xf] }
 0x1a1   : > { %1203 = vmatmul.bf16.gmra.mxu3 %v3486_v12  ;;  %1213 = vmatpush.bf16.msrb.mxu0 %v2317_v15  ;;  %v2867_v15 = vld [vmem:[%s3287_s26 + $0xac] sm:$0xf0]  ;;  %v2582_v24 = vld [vmem:[%s3287_s26 + $0x90] sm:$0xf0]  ;;  %v2725_v25 = vor.u32 %v2899_v20, %v2724_v19  ;;  %v2580_v26 = vld [vmem:[%s3287_s26 + $0x80] sm:$0xf] }
 0x1a2   : > { %1270 = vmatpush.bf16.msrb.mxu3 %v2449_v16  ;;  %v2745_v16 = vor.u32 %v2901_v7, %v2742_v10  ;;  %v2597_v9 = vor.u32 %v2867_v15, %v2596_v14  ;;  %v2895_v31 = vld [vmem:[%s3287_s26 + $0x18c] sm:$0xf0]  ;;  %v2893_v32 = vld [vmem:[%s3287_s26 + $0x184] sm:$0xf]  ;;  %v2710_v33 = vld [vmem:[%s3287_s26 + $0x190] sm:$0xf0] }
 0x1a3   : > { %v2566_v50 = vld [vmem:[%s3287_s26 + $0x70] sm:$0xf0]  ;;  %v2564_v34 = vld [vmem:[%s3287_s26 + $0x60] sm:$0xf]  ;;  %v2859_v39 = vld [vmem:[%s3287_s26 + $0x6c] sm:$0xf0]  ;;  %v2713_v40 = vor.u32 %v2893_v32, %v2710_v33 }
 0x1a4   : > { %1252 = vmatpush.bf16.msrb.mxu2 %v2305_v18  ;;  %1233 = vmatpush.bf16.msrb.mxu1 %v2429_v22  ;;  %v2601_v18 = vor.u32 %v2865_v11, %v2598_v35  ;;  %v2726_v22 = vld [vmem:[%s3287_s26 + $0x1b0] sm:$0xf0]  ;;  %v2692_v42 = vld [vmem:[%s3287_s26 + $0x160] sm:$0xf]  ;;  %v2891_v43 = vld [vmem:[%s3287_s26 + $0x16c] sm:$0xf0]  ;;  %v2565_v48 = vor.u32 %v2859_v39, %v2564_v34 }
 0x1a5   : > { %1214 = vmatpush.bf16.msrb.mxu0 %v2301_v27  ;;  %v2863_v27 = vld [vmem:[%s3287_s26 + $0x8c] sm:$0xf0]  ;;  %v2729_v28 = vor.u32 %v2897_v21, %v2726_v22  ;;  %v2889_v44 = vld [vmem:[%s3287_s26 + $0x164] sm:$0xf]  ;;  %v2550_v47 = vld [vmem:[%s3287_s26 + $0x50] sm:$0xf0]  ;;  %v2693_v53 = vor.u32 %v2891_v43, %v2692_v42 }
 0x1a6   : > { %1271 = vmatpush.bf16.msrb.mxu3 %v2433_v29  ;;  %v2585_v29 = vor.u32 %v2861_v23, %v2582_v24  ;;  %v2581_v51 = vor.u32 %v2863_v27, %v2580_v26  ;;  %v2676_v58 = vld [vmem:[%s3287_s26 + $0x140] sm:$0xf]  ;;  %v2885_v60 = vld [vmem:[%s3287_s26 + $0x144] sm:$0xf]  ;;  %v2678_v61 = vld [vmem:[%s3287_s26 + $0x150] sm:$0xf0] }
 0x1a7   : > { %v2849_v62 = vld [vmem:[%s3287_s26 + $0x24] sm:$0xf]  ;;  %v2532_v2 = vld [vmem:[%s3287_s26 + $0x20] sm:$0xf]  ;;  %v2851_v3 = vld [vmem:[%s3287_s26 + $0x2c] sm:$0xf0] }
 0x1a8   : > { %1253 = vmatpush.bf16.msrb.mxu2 %v2289_v30  ;;  %1234 = vmatpush.bf16.msrb.mxu1 %v2413_v49  ;;  %v2708_v30 = vld [vmem:[%s3287_s26 + $0x180] sm:$0xf]  ;;  %v2857_v49 = vld [vmem:[%s3287_s26 + $0x64] sm:$0xf]  ;;  %v2883_v37 = vld [vmem:[%s3287_s26 + $0x12c] sm:$0xf0]  ;;  %v2533_v14 = vor.u32 %v2851_v3, %v2532_v2 }
 0x1a9   : > { %1215 = vmatpush.bf16.msrb.mxu0 %v2285_v41  ;;  %v2709_v52 = vor.u32 %v2895_v31, %v2708_v30  ;;  %v2569_v41 = vor.u32 %v2857_v49, %v2566_v50  ;;  %v2660_v6 = vld [vmem:[%s3287_s26 + $0x120] sm:$0xf]  ;;  %v2881_v7 = vld [vmem:[%s3287_s26 + $0x124] sm:$0xf]  ;;  %v2662_v10 = vld [vmem:[%s3287_s26 + $0x130] sm:$0xf0] }
 0x1aa   : > { %1272 = vmatpush.bf16.msrb.mxu3 %v2417_v45  ;;  %v2694_v45 = vld [vmem:[%s3287_s26 + $0x170] sm:$0xf0]  ;;  %v2845_v11 = vld [vmem:[%s3287_s26 + $0x4] sm:$0xf]  ;;  %v2661_v15 = vor.u32 %v2883_v37, %v2660_v6  ;;  %v2644_v19 = vld [vmem:[%s3287_s26 + $0x100] sm:$0xf]  ;;  %v2665_v20 = vor.u32 %v2881_v7, %v2662_v10 }
 0x1ab   : > { %v2697_v56 = vor.u32 %v2889_v44, %v2694_v45  ;;  %v2518_v35 = vld [vmem:[%s3287_s26 + $0x10] sm:$0xf0]  ;;  %v2879_v22 = vld [vmem:[%s3287_s26 + $0x10c] sm:$0xf0]  ;;  %v2877_v23 = vld [vmem:[%s3287_s26 + $0x104] sm:$0xf] }
 0x1ac   : > { %1254 = vmatpush.bf16.msrb.mxu2 %v2273_v46  ;;  %1235 = vmatpush.bf16.msrb.mxu1 %v2397_v54  ;;  %v2853_v46 = vld [vmem:[%s3287_s26 + $0x44] sm:$0xf]  ;;  %v2548_v54 = vld [vmem:[%s3287_s26 + $0x40] sm:$0xf]  ;;  %v2521_v21 = vor.u32 %v2845_v11, %v2518_v35  ;;  %v2646_v24 = vld [vmem:[%s3287_s26 + $0x110] sm:$0xf0]  ;;  %v2645_v32 = vor.u32 %v2879_v22, %v2644_v19 }
 0x1ad   : > { %1216 = vmatpush.bf16.msrb.mxu0 %v2269_v63  ;;  %v2553_v57 = vor.u32 %v2853_v46, %v2550_v47  ;;  %v2534_v63 = vld [vmem:[%s3287_s26 + $0x30] sm:$0xf0]  ;;  %v2876_v26 = vld [vmem:[%s3287_s26 + $0xf4] sm:$0xf0]  ;;  %v2764_v27 = vld [vmem:[%s3287_s26 + $0x1e8] sm:$0xf]  ;;  %v2649_v50 = vor.u32 %v2877_v23, %v2646_v24 }
 0x1ae   : > { %1273 = vmatpush.bf16.msrb.mxu3 %v2401_v0  ;;  %v2766_v30 = vld [vmem:[%s3287_s26 + $0x1f8] sm:$0xf0]  ;;  %v2870_v33 = vld [vmem:[%s3287_s26 + $0xcc] sm:$0xf]  ;;  %v2620_v39 = vld [vmem:[%s3287_s26 + $0xc8] sm:$0xf] }
 0x1af   : > { %1236 = vmatmul.bf16.vlgmr.msrb.gmra.mxu1 %v3446_v8  ;;  %1255 = vmatmul.bf16.vlgmr.msrb.gmra.mxu2 %v3441_v17  ;;  %v2622_v49 = vld [vmem:[%s3287_s26 + $0xd8] sm:$0xf0]  ;;  %v2748_v42 = vld [vmem:[%s3287_s26 + $0x1c8] sm:$0xf]  ;;  %v2904_v43 = vld [vmem:[%s3287_s26 + $0x1d4] sm:$0xf0] }
 0x1b0   : > { %1717 = vmatpush.bf16.msra.mxu2 %v2633_v55  ;;  %1698 = vmatpush.bf16.msra.mxu1 %v2757_v59  ;;  %v2855_v55 = vld [vmem:[%s3287_s26 + $0x4c] sm:$0xf0]  ;;  %v2902_v45 = vld [vmem:[%s3287_s26 + $0x1cc] sm:$0xf]  ;;  %v2750_v46 = vld [vmem:[%s3287_s26 + $0x1d8] sm:$0xf0] }
 0x1b1   : > { %1679 = vmatpush.bf16.msra.mxu0 %v2629_v1  ;;  %1274 = vmatmul.bf16.vlgmr.msrb.gmra.mxu3 %v3446_v8  ;;  %v2887_v59 = vld [vmem:[%s3287_s26 + $0x14c] sm:$0xf0]  ;;  %v2549_v0 = vor.u32 %v2855_v55, %v2548_v54  ;;  %v2866_v47 = vld [vmem:[%s3287_s26 + $0xac] sm:$0xf]  ;;  %v2868_v54 = vld [vmem:[%s3287_s26 + $0xb4] sm:$0xf0]  ;;  %v2749_v55 = vor.u32 %v2904_v43, %v2748_v42 }
 0x1b2   : > { %1736 = vmatpush.bf16.msra.mxu3 %v2761_v4  ;;  %1217 = vmatmul.bf16.vlgmr.msrb.gmra.mxu0 %v3441_v17  ;;  %v2677_v1 = vor.u32 %v2887_v59, %v2676_v58  ;;  %v2681_v4 = vor.u32 %v2885_v60, %v2678_v61  ;;  %v2900_v58 = vld [vmem:[%s3287_s26 + $0x1b4] sm:$0xf0]  ;;  %v2898_v61 = vld [vmem:[%s3287_s26 + $0x1ac] sm:$0xf]  ;;  %v2718_v11 = vld [vmem:[%s3287_s26 + $0x198] sm:$0xf0] }
 0x1b3   : > { %v2864_v2 = vld [vmem:[%s3287_s26 + $0x94] sm:$0xf0]  ;;  %v2894_v10 = vld [vmem:[%s3287_s26 + $0x18c] sm:$0xf]  ;;  %v2702_v23 = vld [vmem:[%s3287_s26 + $0x178] sm:$0xf0] }
 0x1b4   : > { %1718 = vmatpush.bf16.msra.mxu2 %v2617_v5  ;;  %1699 = vmatpush.bf16.msra.mxu1 %v2741_v13  ;;  %v2537_v5 = vor.u32 %v2849_v62, %v2534_v63  ;;  %v2638_v13 = vld [vmem:[%s3287_s26 + $0xf8] sm:$0xf0]  ;;  %v2862_v63 = vld [vmem:[%s3287_s26 + $0x8c] sm:$0xf]  ;;  %v2896_v6 = vld [vmem:[%s3287_s26 + $0x194] sm:$0xf0] }
 0x1b5   : > { %1680 = vmatpush.bf16.msra.mxu0 %v2613_v36  ;;  %v2874_v36 = vld [vmem:[%s3287_s26 + $0xec] sm:$0xf]  ;;  %v2734_v62 = vld [vmem:[%s3287_s26 + $0x1b8] sm:$0xf0]  ;;  %v2892_v19 = vld [vmem:[%s3287_s26 + $0x174] sm:$0xf0] }
 0x1b6   : > { %1737 = vmatpush.bf16.msra.mxu3 %v2745_v16  ;;  %v2516_v16 = vld [vmem:[%s3287_s26] sm:$0xf]  ;;  %v2858_v35 = vld [vmem:[%s3287_s26 + $0x6c] sm:$0xf]  ;;  %v2884_v42 = vld [vmem:[%s3287_s26 + $0x134] sm:$0xf0] }
 0x1b7   : > { %v2890_v22 = vld [vmem:[%s3287_s26 + $0x16c] sm:$0xf]  ;;  %s2909_s1 = sshll.u32 (%p3231_p10), %s3122_s27, 4 }
 0x1b8   : > { %1719 = vmatpush.bf16.msra.mxu2 %v2601_v18  ;;  %1700 = vmatpush.bf16.msra.mxu1 %v2725_v25  ;;  %v2847_v18 = vld [vmem:[%s3287_s26 + $0xc] sm:$0xf0]  ;;  %v2636_v25 = vld [vmem:[%s3287_s26 + $0xe8] sm:$0xf]  ;;  %v2854_v24 = vld [vmem:[%s3287_s26 + $0x4c] sm:$0xf]  ;;  %s2019_s13 = scalar_lea.vmem (%p3231_p10), %s3900_s7, %s2909_s1 }
 0x1b9   : > { %1681 = vmatpush.bf16.msra.mxu0 %v2597_v9  ;;  %v2641_v9 = vor.u32 %v2874_v36, %v2638_v13  ;;  %v2517_v31 = vor.u32 %v2847_v18, %v2516_v16  ;;  %v2574_v36 = vld [vmem:[%s3287_s26 + $0x78] sm:$0xf0]  ;;  %v2572_v13 = vld [vmem:[%s3287_s26 + $0x68] sm:$0xf]  ;;  %v2721_v16 = vor.u32 %v2894_v10, %v2718_v11 }
 0x1ba   : > { %1738 = vmatpush.bf16.msra.mxu3 %v2729_v28  ;;  %v2908_v28 = vld [vmem:[%s3287_s26 + $0x1f4] sm:$0xf0]  ;;  %v2700_v18 = vld [vmem:[%s3287_s26 + $0x168] sm:$0xf] }
 0x1bc   : > { %1720 = vmatpush.bf16.msra.mxu2 %v2585_v29  ;;  %1701 = vmatpush.bf16.msra.mxu1 %v2709_v52  ;;  %v2906_v29 = vld [vmem:[%s3287_s26 + $0x1ec] sm:$0xf]  ;;  %v2765_v52 = vor.u32 %v2908_v28, %v2764_v27  ;;  %v2701_v27 = vor.u32 %v2892_v19, %v2700_v18  ;;  %v2705_v28 = vor.u32 %v2890_v22, %v2702_v23 }
 0x1bd   : > { %1682 = vmatpush.bf16.msra.mxu0 %v2581_v51  ;;  %v2637_v51 = vor.u32 %v2876_v26, %v2636_v25  ;;  %v2769_v34 = vor.u32 %v2906_v29, %v2766_v30  ;;  %v2556_v25 = vld [vmem:[%s3287_s26 + $0x48] sm:$0xf]  ;;  %v2856_v26 = vld [vmem:[%s3287_s26 + $0x54] sm:$0xf0] }
 0x1be   : > { %1739 = vmatpush.bf16.msra.mxu3 %v2713_v40  ;;  %v2872_v40 = vld [vmem:[%s3287_s26 + $0xd4] sm:$0xf0]  ;;  %v2684_v29 = vld [vmem:[%s3287_s26 + $0x148] sm:$0xf] }
 0x1bf   : > { %1241 = vmatmul.bf16.gmra.mxu1 %v3486_v12  ;;  %1260 = vmatmul.bf16.gmra.mxu2 %v3481_v38  ;;  %v2621_v44 = vor.u32 %v2872_v40, %v2620_v39  ;;  %v2888_v30 = vld [vmem:[%s3287_s26 + $0x154] sm:$0xf0] }
 0x1c0   : > { %1721 = vmatpush.bf16.msra.mxu2 %v2569_v41  ;;  %1702 = vmatpush.bf16.msra.mxu1 %v2693_v53  ;;  %v2625_v41 = vor.u32 %v2870_v33, %v2622_v49  ;;  %v2604_v53 = vld [vmem:[%s3287_s26 + $0xa8] sm:$0xf]  ;;  %v2886_v33 = vld [vmem:[%s3287_s26 + $0x14c] sm:$0xf]  ;;  %v2686_v49 = vld [vmem:[%s3287_s26 + $0x158] sm:$0xf0]  ;;  %v2685_v39 = vor.u32 %v2888_v30, %v2684_v29 }
 0x1c1   : > { %1683 = vmatpush.bf16.msra.mxu0 %v2565_v48  ;;  %1279 = vmatmul.bf16.gmra.mxu3 %v3486_v12  ;;  %v2606_v48 = vld [vmem:[%s3287_s26 + $0xb8] sm:$0xf0]  ;;  %v2605_v60 = vor.u32 %v2868_v54, %v2604_v53  ;;  %v2689_v40 = vor.u32 %v2886_v33, %v2686_v49  ;;  %v2524_v53 = vld [vmem:[%s3287_s26 + $0x8] sm:$0xf]  ;;  %v2848_v54 = vld [vmem:[%s3287_s26 + $0x14] sm:$0xf0] }
 0x1c2   : > { %1740 = vmatpush.bf16.msra.mxu3 %v2697_v56  ;;  %1222 = vmatmul.bf16.gmra.mxu0 %v3481_v38  ;;  %v2753_v56 = vor.u32 %v2902_v45, %v2750_v46  ;;  %v2609_v59 = vor.u32 %v2866_v47, %v2606_v48  ;;  %v2882_v45 = vld [vmem:[%s3287_s26 + $0x12c] sm:$0xf]  ;;  %v2670_v46 = vld [vmem:[%s3287_s26 + $0x138] sm:$0xf0] }
 0x1c3   : > { %v2846_v47 = vld [vmem:[%s3287_s26 + $0xc] sm:$0xf]  ;;  %v2526_v48 = vld [vmem:[%s3287_s26 + $0x18] sm:$0xf0] }
 0x1c4   : > { %1722 = vmatpush.bf16.msra.mxu2 %v2553_v57  ;;  %1703 = vmatpush.bf16.msra.mxu1 %v2677_v1  ;;  %v2732_v57 = vld [vmem:[%s3287_s26 + $0x1a8] sm:$0xf] }
 0x1c5   : > { %1684 = vmatpush.bf16.msra.mxu0 %v2549_v0  ;;  %v2590_v0 = vld [vmem:[%s3287_s26 + $0x98] sm:$0xf0]  ;;  %v2588_v1 = vld [vmem:[%s3287_s26 + $0x88] sm:$0xf]  ;;  %v2733_v3 = vor.u32 %v2900_v58, %v2732_v57  ;;  %v2529_v58 = vor.u32 %v2846_v47, %v2526_v48 }
 0x1c6   : > { %1741 = vmatpush.bf16.msra.mxu3 %v2681_v4  ;;  %v2737_v4 = vor.u32 %v2898_v61, %v2734_v62  ;;  %v2593_v37 = vor.u32 %v2862_v63, %v2590_v0  ;;  %v2589_v7 = vor.u32 %v2864_v2, %v2588_v1  ;;  %v2652_v57 = vld [vmem:[%s3287_s26 + $0x108] sm:$0xf]  ;;  %v2878_v61 = vld [vmem:[%s3287_s26 + $0x10c] sm:$0xf]  ;;  %v2654_v62 = vld [vmem:[%s3287_s26 + $0x118] sm:$0xf0] }
 0x1c7   : > { %v2657_v0 = vor.u32 %v2878_v61, %v2654_v62  ;;  %v783_v1 = vld [vmem:[%s527_s15] sm:$0xf] }
 0x1c8   : > { %1723 = vmatpush.bf16.msra.mxu2 %v2537_v5  ;;  %1704 = vmatpush.bf16.msra.mxu1 %v2661_v15  ;;  %v2716_v5 = vld [vmem:[%s3287_s26 + $0x188] sm:$0xf]  ;;  %v785_v2 = vperm.slane %v783_v1, 0 }
 0x1c9   : > { %1685 = vmatpush.bf16.msra.mxu0 %v2533_v14  ;;  %v2860_v14 = vld [vmem:[%s3287_s26 + $0x74] sm:$0xf0]  ;;  %v2717_v15 = vor.u32 %v2896_v6, %v2716_v5 }
 0x1ca   : > { %1742 = vmatpush.bf16.msra.mxu3 %v2665_v20  ;;  %v2577_v20 = vor.u32 %v2858_v35, %v2574_v36 }
 0x1cc   : > { %1724 = vmatpush.bf16.msra.mxu2 %v2521_v21  ;;  %1705 = vmatpush.bf16.msra.mxu1 %v2645_v32  ;;  %v2573_v21 = vor.u32 %v2860_v14, %v2572_v13  ;;  %v2557_v32 = vor.u32 %v2856_v26, %v2556_v25 }
 0x1cd   : > { %1686 = vmatpush.bf16.msra.mxu0 %v2517_v31 }
 0x1ce   : > { %1743 = vmatpush.bf16.msra.mxu3 %v2649_v50  ;;  %v2850_v50 = vld [vmem:[%s3287_s26 + $0x2c] sm:$0xf] }
 0x1cf   : > { %1706 = vmatmul.bf16.vlgmr.msra.gmra.mxu1 %v3446_v8  ;;  %1725 = vmatmul.bf16.vlgmr.msra.gmra.mxu2 %v3441_v17 }
 0x1d0   : > { %1793 = vmatpush.bf16.msrb.mxu2 %v2641_v9  ;;  %1774 = vmatpush.bf16.msrb.mxu1 %v2765_v52  ;;  %v2558_v9 = vld [vmem:[%s3287_s26 + $0x58] sm:$0xf0]  ;;  %v2540_v52 = vld [vmem:[%s3287_s26 + $0x28] sm:$0xf] }
 0x1d1   : > { %1755 = vmatpush.bf16.msrb.mxu0 %v2637_v51  ;;  %1744 = vmatmul.bf16.vlgmr.msra.gmra.mxu3 %v3446_v8  ;;  %v2561_v31 = vor.u32 %v2854_v24, %v2558_v9  ;;  %v2542_v51 = vld [vmem:[%s3287_s26 + $0x38] sm:$0xf0] }
 0x1d2   : > { %1812 = vmatpush.bf16.msrb.mxu3 %v2769_v34  ;;  %1687 = vmatmul.bf16.vlgmr.msra.gmra.mxu0 %v3441_v17  ;;  %v2852_v34 = vld [vmem:[%s3287_s26 + $0x34] sm:$0xf0]  ;;  %v2545_v43 = vor.u32 %v2850_v50, %v2542_v51 }
 0x1d4   : > { %1794 = vmatpush.bf16.msrb.mxu2 %v2625_v41  ;;  %1775 = vmatpush.bf16.msrb.mxu1 %v2749_v55  ;;  %v2668_v41 = vld [vmem:[%s3287_s26 + $0x128] sm:$0xf] }
 0x1d5   : > { %1756 = vmatpush.bf16.msrb.mxu0 %v2621_v44  ;;  %v2541_v44 = vor.u32 %v2852_v34, %v2540_v52  ;;  %v2669_v55 = vor.u32 %v2884_v42, %v2668_v41  ;;  %v788_v52 = vperm.slane %v783_v1, 3 }
 0x1d6   : > { %1813 = vmatpush.bf16.msrb.mxu3 %v2753_v56  ;;  %v2673_v56 = vor.u32 %v2882_v45, %v2670_v46 }
 0x1d8   : > { %1795 = vmatpush.bf16.msrb.mxu2 %v2609_v59  ;;  %1776 = vmatpush.bf16.msrb.mxu1 %v2733_v3  ;;  %v2525_v59 = vor.u32 %v2848_v54, %v2524_v53 }
 0x1d9   : > { %1757 = vmatpush.bf16.msrb.mxu0 %v2605_v60  ;;  %v2880_v60 = vld [vmem:[%s3287_s26 + $0x114] sm:$0xf0] }
 0x1da   : > { %1814 = vmatpush.bf16.msrb.mxu3 %v2737_v4  ;;  %v2653_v63 = vor.u32 %v2880_v60, %v2652_v57 }
 0x1dc   : > { %1796 = vmatpush.bf16.msrb.mxu2 %v2593_v37  ;;  %1777 = vmatpush.bf16.msrb.mxu1 %v2717_v15 }
 0x1dd   : > { %1758 = vmatpush.bf16.msrb.mxu0 %v2589_v7 }
 0x1de   : > { %1815 = vmatpush.bf16.msrb.mxu3 %v2721_v16 }
 0x1df   : > { %1711 = vmatmul.bf16.gmra.mxu1 %v3486_v12  ;;  %1730 = vmatmul.bf16.gmra.mxu2 %v3481_v38 }
 0x1e0   : > { %1797 = vmatpush.bf16.msrb.mxu2 %v2577_v20  ;;  %1778 = vmatpush.bf16.msrb.mxu1 %v2701_v27 }
 0x1e1   : > { %1759 = vmatpush.bf16.msrb.mxu0 %v2573_v21  ;;  %1749 = vmatmul.bf16.gmra.mxu3 %v3486_v12 }
 0x1e2   : > { %1816 = vmatpush.bf16.msrb.mxu3 %v2705_v28  ;;  %1692 = vmatmul.bf16.gmra.mxu0 %v3481_v38  ;;  %v787_v28 = vperm.slane %v783_v1, 2 }
 0x1e4   : > { %1798 = vmatpush.bf16.msrb.mxu2 %v2561_v31  ;;  %1779 = vmatpush.bf16.msrb.mxu1 %v2685_v39 }
 0x1e5   : > { %1760 = vmatpush.bf16.msrb.mxu0 %v2557_v32 }
 0x1e6   : > { %1817 = vmatpush.bf16.msrb.mxu3 %v2689_v40 }
 0x1e8   : > { %1799 = vmatpush.bf16.msrb.mxu2 %v2545_v43  ;;  %1780 = vmatpush.bf16.msrb.mxu1 %v2669_v55 }
 0x1e9   : > { %1761 = vmatpush.bf16.msrb.mxu0 %v2541_v44 }
 0x1ea   : > { %1818 = vmatpush.bf16.msrb.mxu3 %v2673_v56 }
 0x1ec   : > { %1800 = vmatpush.bf16.msrb.mxu2 %v2529_v58  ;;  %1781 = vmatpush.bf16.msrb.mxu1 %v2653_v63 }
 0x1ed   : > { %1762 = vmatpush.bf16.msrb.mxu0 %v2525_v59 }
 0x1ee   : > { %1819 = vmatpush.bf16.msrb.mxu3 %v2657_v0 }
 0x1ef   : > { %1782 = vmatmul.bf16.vlgmr.msrb.gmra.mxu1 %v3446_v8  ;;  %1801 = vmatmul.bf16.vlgmr.msrb.gmra.mxu2 %v3441_v17 }
 0x1f1   : > { %1820 = vmatmul.bf16.vlgmr.msrb.gmra.mxu3 %v3446_v8  ;;  %v786_v8 = vperm.slane %v783_v1, 1  ;;  %v3704_v1 = vld [vmem:[%s532_s22] sm:$0xf] }
 0x1f2   : > { %1763 = vmatmul.bf16.vlgmr.msrb.gmra.mxu0 %v3441_v17 }
 0x1ff   : > { %1787 = vmatmul.bf16.gmra.mxu1 %v3486_v12  ;;  %1806 = vmatmul.bf16.gmra.mxu2 %v3481_v38 }
 0x201   : > { %1825 = vmatmul.bf16.gmra.mxu3 %v3486_v12 }
 0x202   : > { %1768 = vmatmul.bf16.gmra.mxu0 %v3481_v38 }
 0x20b   : > { %v1142_v3 = vpop.f32.mrf.mxu0 }
 0x20c   : > { %v1143_v4 = vadd.f32 %v1142_v3, %v785_v2  ;;  %v1161_v5 = vpop.f32.mrf.mxu1  ;;  %v1351_v3 = vperm.slane %v3704_v1, 0 }
 0x20e   : > { %v3671_v17 = vadd.f32 %v1161_v5, %v1143_v4 }
 0x212   : > { %v1180_v6 = vpop.f32.mrf.mxu2 }
 0x213   : > { %v1181_v37 = vadd.f32 %v1180_v6, %v786_v8  ;;  %v1144_v10 = vpop.f32.mrf.mxu0 }
 0x214   : > { %v1199_v7 = vpop.f32.mrf.mxu3  ;;  %v1145_v11 = vadd.f32 %v1144_v10, %v785_v2  ;;  %v1163_v38 = vpop.f32.mrf.mxu1 }
 0x215   : > { %v3673_v35 = vadd.f32 %v1199_v7, %v1181_v37 }
 0x216   : > { %v3675_v12 = vadd.f32 %v1163_v38, %v1145_v11  ;;  %v3714_v38 = vperm.slane %v3704_v1, 1 }
 0x21a   : > { %v1182_v36 = vpop.f32.mrf.mxu2 }
 0x21b   : > { %v1183_v13 = vadd.f32 %v1182_v36, %v786_v8  ;;  %v1147_v15 = vpop.f32.mrf.mxu0 }
 0x21c   : > { %v1201_v14 = vpop.f32.mrf.mxu3  ;;  %v1148_v16 = vadd.f32 %v1147_v15, %v785_v2  ;;  %v1166_v18 = vpop.f32.mrf.mxu1 }
 0x21d   : > { %v3677_v19 = vadd.f32 %v1201_v14, %v1183_v13 }
 0x21e   : > { %v3679_v20 = vadd.f32 %v1166_v18, %v1148_v16 }
 0x222   : > { %v1185_v21 = vpop.f32.mrf.mxu2 }
 0x223   : > { %v1186_v22 = vadd.f32 %v1185_v21, %v786_v8  ;;  %v1149_v24 = vpop.f32.mrf.mxu0 }
 0x224   : > { %v1204_v23 = vpop.f32.mrf.mxu3  ;;  %v1150_v9 = vadd.f32 %v1149_v24, %v785_v2  ;;  %v1168_v25 = vpop.f32.mrf.mxu1 }
 0x225   : > { %v3681_v26 = vadd.f32 %v1204_v23, %v1186_v22 }
 0x226   : > { %v3683_v27 = vadd.f32 %v1168_v25, %v1150_v9 }
 0x22a   : > { %v1187_v29 = vpop.f32.mrf.mxu2 }
 0x22b   : > { %v1188_v30 = vadd.f32 %v1187_v29, %v786_v8 }
 0x22c   : > { %v1206_v31 = vpop.f32.mrf.mxu3  ;;  %v1237_v33 = vpop.f32.mrf.mxu1 }
 0x22d   : > { %v3685_v49 = vadd.f32 %v1206_v31, %v1188_v30 }
 0x22f   : > { %v1218_v32 = vpop.f32.mrf.mxu0 }
 0x230   : > { %v1219_v50 = vadd.f32 %v1218_v32, %v787_v28 }
 0x232   : > { %v3687_v51 = vadd.f32 %v1237_v33, %v1219_v50  ;;  %v1256_v34 = vpop.f32.mrf.mxu2 }
 0x233   : > { %v1257_v40 = vadd.f32 %v1256_v34, %v788_v52 }
 0x234   : > { %v1275_v39 = vpop.f32.mrf.mxu3  ;;  %v1239_v42 = vpop.f32.mrf.mxu1 }
 0x235   : > { %v3689_v44 = vadd.f32 %v1275_v39, %v1257_v40 }
 0x237   : > { %v1220_v41 = vpop.f32.mrf.mxu0 }
 0x238   : > { %v1221_v43 = vadd.f32 %v1220_v41, %v787_v28 }
 0x23a   : > { %v3691_v45 = vadd.f32 %v1239_v42, %v1221_v43  ;;  %v1258_v46 = vpop.f32.mrf.mxu2 }
 0x23b   : > { %v1259_v48 = vadd.f32 %v1258_v46, %v788_v52 }
 0x23c   : > { %v1277_v47 = vpop.f32.mrf.mxu3  ;;  %v1242_v54 = vpop.f32.mrf.mxu1 }
 0x23d   : > { %v3693_v56 = vadd.f32 %v1277_v47, %v1259_v48 }
 0x23f   : > { %v1223_v53 = vpop.f32.mrf.mxu0 }
 0x240   : > { %v1224_v55 = vadd.f32 %v1223_v53, %v787_v28 }
 0x242   : > { %v3695_v57 = vadd.f32 %v1242_v54, %v1224_v55  ;;  %v1261_v58 = vpop.f32.mrf.mxu2 }
 0x243   : > { %v1262_v60 = vadd.f32 %v1261_v58, %v788_v52 }
 0x244   : > { %v1280_v59 = vpop.f32.mrf.mxu3  ;;  %v1244_v62 = vpop.f32.mrf.mxu1 }
 0x245   : > { %v3697_v0 = vadd.f32 %v1280_v59, %v1262_v60 }
 0x247   : > { %v1225_v61 = vpop.f32.mrf.mxu0 }
 0x248   : > { %v1226_v63 = vadd.f32 %v1225_v61, %v787_v28 }
 0x24a   : > { %v3706_v2 = vadd.f32 %v1244_v62, %v1226_v63  ;;  %v1263_v4 = vpop.f32.mrf.mxu2 }
 0x24b   : > { %v1264_v8 = vadd.f32 %v1263_v4, %v788_v52 }
 0x24c   : > { %v1282_v5 = vpop.f32.mrf.mxu3  ;;  %v1707_v37 = vpop.f32.mrf.mxu1 }
 0x24d   : > { %v3709_v10 = vadd.f32 %v1282_v5, %v1264_v8 }
 0x24f   : > { %v1688_v6 = vpop.f32.mrf.mxu0 }
 0x250   : > { %v1689_v7 = vadd.f32 %v1688_v6, %v1351_v3 }
 0x252   : > { %v3711_v11 = vadd.f32 %v1707_v37, %v1689_v7  ;;  %v1726_v14 = vpop.f32.mrf.mxu2 }
 0x253   : > { %v1727_v16 = vadd.f32 %v1726_v14, %v3714_v38 }
 0x254   : > { %v1831_v36 = vmul.f32 %v3711_v11, %v3711_v11  ;;  %v1745_v15 = vpop.f32.mrf.mxu3  ;;  %v1709_v21 = vpop.f32.mrf.mxu1 }
 0x255   : > { %v3720_v24 = vadd.f32 %v1745_v15, %v1727_v16 }
 0x256   : > { %v1847_v13 = vmul.f32 %v1831_v36, %v3711_v11 }
 0x257   : > { %v1690_v18 = vpop.f32.mrf.mxu0  ;;  %v1832_v28 = vmul.f32 %v3720_v24, %v3720_v24 }
 0x258   : > { %v1863_v22 = vmul.f32 0.044715, %v1847_v13  ;;  %v1691_v23 = vadd.f32 %v1690_v18, %v1351_v3 }
 0x259   : > { %v1848_v31 = vmul.f32 %v1832_v28, %v3720_v24 }
 0x25a   : > { %v1879_v9 = vadd.f32 %v1863_v22, %v3711_v11  ;;  %v3723_v25 = vadd.f32 %v1709_v21, %v1691_v23  ;;  %v1728_v33 = vpop.f32.mrf.mxu2 }
 0x25b   : > { %v1864_v52 = vmul.f32 0.044715, %v1848_v31  ;;  %v1729_v34 = vadd.f32 %v1728_v33, %v3714_v38 }
 0x25c   : > { %v1895_v29 = vmul.f32 0.7978846, %v1879_v9  ;;  %v1835_v30 = vmul.f32 %v3723_v25, %v3723_v25  ;;  %v1747_v50 = vpop.f32.mrf.mxu3  ;;  %v1712_v40 = vpop.f32.mrf.mxu1 }
 0x25d   : > { %v1880_v43 = vadd.f32 %v1864_v52, %v3720_v24  ;;  %v3733_v46 = vadd.f32 %v1747_v50, %v1729_v34 }
 0x25e   : > { %2984 = vtanh.f32 %v1895_v29  ;;  %v1851_v32 = vmul.f32 %v1835_v30, %v3723_v25  ;;  %v3756_v30 = vperm.slane %v3704_v1, 2 }
 0x25f   : > { %v1693_v39 = vpop.f32.mrf.mxu0  ;;  %v1896_v53 = vmul.f32 0.7978846, %v1880_v43  ;;  %v1836_v54 = vmul.f32 %v3733_v46, %v3733_v46 }
 0x260   : > { %v1867_v41 = vmul.f32 0.044715, %v1851_v32  ;;  %v1694_v42 = vadd.f32 %v1693_v39, %v1351_v3 }
 0x261   : > { %2986 = vtanh.f32 %v1896_v53  ;;  %v1852_v61 = vmul.f32 %v1836_v54, %v3733_v46 }
 0x262   : > { %v1883_v47 = vadd.f32 %v1867_v41, %v3723_v25  ;;  %v3736_v48 = vadd.f32 %v1712_v40, %v1694_v42  ;;  %v1731_v63 = vpop.f32.mrf.mxu2 }
 0x263   : > { %v1868_v5 = vmul.f32 0.044715, %v1852_v61  ;;  %v1732_v8 = vadd.f32 %v1731_v63, %v3714_v38 }
 0x264   : > { %v2985_v55 = vpop.eup %2984  ;;  %v1899_v58 = vmul.f32 0.7978846, %v1883_v47  ;;  %v1839_v59 = vmul.f32 %v3736_v48, %v3736_v48  ;;  %v1750_v4 = vpop.f32.mrf.mxu3 }
 0x265   : > { %v1927_v60 = vadd.f32 1.0, %v2985_v55  ;;  %v1714_v37 = vpop.f32.mrf.mxu1  ;;  %v1884_v14 = vadd.f32 %v1868_v5, %v3733_v46  ;;  %v3746_v15 = vadd.f32 %v1750_v4, %v1732_v8  ;;  %v3775_v4 = vperm.slane %v3704_v1, 3 }
 0x266   : > { %2988 = vtanh.f32 %v1899_v58  ;;  %v1855_v62 = vmul.f32 %v1839_v59, %v3736_v48 }
 0x267   : > { %v1695_v6 = vpop.f32.mrf.mxu0  ;;  %v1943_v13 = vmul.f32 0.5, %v1927_v60  ;;  %v2987_v21 = vpop.eup %2986  ;;  %v1900_v22 = vmul.f32 0.7978846, %v1884_v14  ;;  %v1840_v23 = vmul.f32 %v3746_v15, %v3746_v15 }
 0x268   : > { %v1871_v7 = vmul.f32 0.044715, %v1855_v62  ;;  %v1696_v36 = vadd.f32 %v1695_v6, %v1351_v3  ;;  %v1928_v28 = vadd.f32 1.0, %v2987_v21 }
 0x269   : > { %v1959_v31 = vmul.f32 %v1943_v13, %v3711_v11  ;;  %2990 = vtanh.f32 %v1900_v22  ;;  %v1856_v32 = vmul.f32 %v1840_v23, %v3746_v15 }
 0x26a   : > { %v1887_v16 = vadd.f32 %v1871_v7, %v3736_v48  ;;  %v3749_v18 = vadd.f32 %v1714_v37, %v1696_v36  ;;  %v1944_v33 = vmul.f32 0.5, %v1928_v28  ;;  %v1733_v34 = vpop.f32.mrf.mxu2 }
 0x26b   : > { %v1872_v40 = vmul.f32 0.044715, %v1856_v32  ;;  %v1734_v41 = vadd.f32 %v1733_v34, %v3714_v38  ;;  %v1975_v54 = vmul.f32 %v1959_v31, %v3671_v17 }
 0x26c   : > { %v2989_v9 = vpop.eup %2988  ;;  %v1903_v29 = vmul.f32 0.7978846, %v1887_v16  ;;  %v1843_v3 = vmul.f32 %v3749_v18, %v3749_v18  ;;  %v1752_v39 = vpop.f32.mrf.mxu3  ;;  %v1960_v47 = vmul.f32 %v1944_v33, %v3720_v24 }
 0x26d   : > { %v1931_v50 = vadd.f32 1.0, %v2989_v9  ;;  %v1783_v43 = vpop.f32.mrf.mxu1  ;;  %v1888_v55 = vadd.f32 %v1872_v40, %v3746_v15  ;;  %v3766_v58 = vadd.f32 %v1752_v39, %v1734_v41 }
 0x26e   : > { %2992 = vtanh.f32 %v1903_v29  ;;  %v1859_v52 = vmul.f32 %v1843_v3, %v3749_v18  ;;  %v1976_v59 = vmul.f32 %v1960_v47, %v3673_v35 }
 0x26f   : > { %v1764_v42 = vpop.f32.mrf.mxu0  ;;  %v1947_v60 = vmul.f32 0.5, %v1931_v50  ;;  %v2991_v62 = vpop.eup %2990  ;;  %v1904_v63 = vmul.f32 0.7978846, %v1888_v55  ;;  %v1844_v24 = vmul.f32 %v3766_v58, %v3766_v58 }
 0x270   : > { %v1875_v53 = vmul.f32 0.044715, %v1859_v52  ;;  %v1765_v11 = vadd.f32 %v1764_v42, %v3756_v30  ;;  %v1991_v5 = vpack.c.bf16 %v1976_v59, %v1975_v54  ;;  %v1932_v8 = vadd.f32 1.0, %v2991_v62 }
 0x271   : > { %2994 = vtanh.f32 %v1904_v63  ;;  %v1860_v7 = vmul.f32 %v1844_v24, %v3766_v58  ;;  %v1963_v36 = vmul.f32 %v1947_v60, %v3723_v25 }
 0x272   : > { %v1891_v61 = vadd.f32 %v1875_v53, %v3749_v18  ;;  %v3770_v38 = vadd.f32 %v1783_v43, %v1765_v11  ;;  %1999 = vst [vmem:[%s3304_s16] sm:$0xff] %v1991_v5  ;;  %v1948_v13 = vmul.f32 0.5, %v1932_v8  ;;  %v1802_v1 = vpop.f32.mrf.mxu2 }
 0x273   : > { %v1876_v21 = vmul.f32 0.044715, %v1860_v7  ;;  %v1803_v22 = vadd.f32 %v1802_v1, %v3775_v4  ;;  %v1979_v33 = vmul.f32 %v1963_v36, %v3675_v12 }
 0x274   : > { %v2993_v17 = vpop.eup %2992  ;;  %v1907_v6 = vmul.f32 0.7978846, %v1891_v61  ;;  %v1833_v35 = vmul.f32 %v3770_v38, %v3770_v38  ;;  %v1821_v16 = vpop.f32.mrf.mxu3  ;;  %v1964_v28 = vmul.f32 %v1948_v13, %v3733_v46 }
 0x275   : > { %v1935_v37 = vadd.f32 1.0, %v2993_v17  ;;  %v1785_v9 = vpop.f32.mrf.mxu1  ;;  %v1892_v32 = vadd.f32 %v1876_v21, %v3766_v58  ;;  %v3787_v25 = vadd.f32 %v1821_v16, %v1803_v22 }
 0x276   : > { %2996 = vtanh.f32 %v1907_v6  ;;  %v1849_v14 = vmul.f32 %v1833_v35, %v3770_v38  ;;  %v1980_v50 = vmul.f32 %v1964_v28, %v3677_v19 }
 0x277   : > { %v1766_v23 = vpop.f32.mrf.mxu0  ;;  %v1951_v31 = vmul.f32 0.5, %v1935_v37  ;;  %v2995_v39 = vpop.eup %2994  ;;  %v1908_v40 = vmul.f32 0.7978846, %v1892_v32  ;;  %v1834_v46 = vmul.f32 %v3787_v25, %v3787_v25 }
 0x278   : > { %v1865_v29 = vmul.f32 0.044715, %v1849_v14  ;;  %v1767_v3 = vadd.f32 %v1766_v23, %v3756_v30  ;;  %v1993_v42 = vpack.c.bf16 %v1980_v50, %v1979_v33  ;;  %v1936_v43 = vadd.f32 1.0, %v2995_v39 }
 0x279   : > { %v1967_v12 = vmul.f32 %v1951_v31, %v3736_v48  ;;  %2998 = vtanh.f32 %v1908_v40  ;;  %v1850_v19 = vmul.f32 %v1834_v46, %v3787_v25 }
 0x27a   : > { %v1881_v52 = vadd.f32 %v1865_v29, %v3770_v38  ;;  %v3792_v34 = vadd.f32 %v1785_v9, %v1767_v3  ;;  %2001 = vst [vmem:[%s3304_s16 + $0x10] sm:$0xff] %v1993_v42  ;;  %v1952_v11 = vmul.f32 0.5, %v1936_v43  ;;  %v1804_v59 = vpop.f32.mrf.mxu2 }
 0x27b   : > { %v1866_v61 = vmul.f32 0.044715, %v1850_v19  ;;  %v1805_v62 = vadd.f32 %v1804_v59, %v3775_v4  ;;  %v1983_v8 = vmul.f32 %v1967_v12, %v3679_v20 }
 0x27c   : > { %v2997_v41 = vpop.eup %2996  ;;  %v1897_v47 = vmul.f32 0.7978846, %v1881_v52  ;;  %v1837_v53 = vmul.f32 %v3792_v34, %v3792_v34  ;;  %v1823_v60 = vpop.f32.mrf.mxu3  ;;  %v1968_v17 = vmul.f32 %v1952_v11, %v3746_v15 }
 0x27d   : > { %v1939_v54 = vadd.f32 1.0, %v2997_v41  ;;  %v1788_v24 = vpop.f32.mrf.mxu1  ;;  %v1882_v6 = vadd.f32 %v1866_v61, %v3787_v25  ;;  %v3807_v35 = vadd.f32 %v1823_v60, %v1805_v62 }
 0x27e   : > { %3000 = vtanh.f32 %v1897_v47  ;;  %v1853_v55 = vmul.f32 %v1837_v53, %v3792_v34  ;;  %v1984_v37 = vmul.f32 %v1968_v17, %v3681_v26 }
 0x27f   : > { %v1769_v63 = vpop.f32.mrf.mxu0  ;;  %v1955_v7 = vmul.f32 0.5, %v1939_v54  ;;  %v2999_v14 = vpop.eup %2998  ;;  %v1898_v1 = vmul.f32 0.7978846, %v1882_v6  ;;  %v1838_v15 = vmul.f32 %v3807_v35, %v3807_v35 }
 0x280   : > { %v1869_v5 = vmul.f32 0.044715, %v1853_v55  ;;  %v1770_v48 = vadd.f32 %v1769_v63, %v3756_v30  ;;  %v1995_v21 = vpack.c.bf16 %v1984_v37, %v1983_v8  ;;  %v1940_v20 = vadd.f32 1.0, %v2999_v14 }
 0x281   : > { %3002 = vtanh.f32 %v1898_v1  ;;  %v1854_v26 = vmul.f32 %v1838_v15, %v3807_v35  ;;  %v1971_v28 = vmul.f32 %v1955_v7, %v3749_v18 }
 0x282   : > { %v1885_v36 = vadd.f32 %v1869_v5, %v3792_v34  ;;  %v3811_v13 = vadd.f32 %v1788_v24, %v1770_v48  ;;  %2003 = vst [vmem:[%s3304_s16 + $0x20] sm:$0xff] %v1995_v21  ;;  %v1956_v29 = vmul.f32 0.5, %v1940_v20  ;;  %v1807_v31 = vpop.f32.mrf.mxu2 }
 0x283   : > { %v1870_v33 = vmul.f32 0.044715, %v1854_v26  ;;  %v1808_v50 = vadd.f32 %v1807_v31, %v3775_v4  ;;  %v1987_v47 = vmul.f32 %v1971_v28, %v3683_v27 }
 0x284   : > { %v3001_v16 = vpop.eup %3000  ;;  %v1901_v22 = vmul.f32 0.7978846, %v1885_v36  ;;  %v1841_v23 = vmul.f32 %v3811_v13, %v3811_v13  ;;  %v1826_v32 = vpop.f32.mrf.mxu3  ;;  %v1972_v39 = vmul.f32 %v1956_v29, %v3766_v58 }
 0x285   : > { %v1929_v9 = vadd.f32 1.0, %v3001_v16  ;;  %v1886_v42 = vadd.f32 %v1870_v33, %v3807_v35  ;;  %v3825_v43 = vadd.f32 %v1826_v32, %v1808_v50  ;;  %v1790_v18 = vpop.f32.mrf.mxu1 }
 0x286   : > { %3004 = vtanh.f32 %v1901_v22  ;;  %v1857_v3 = vmul.f32 %v1841_v23, %v3811_v13  ;;  %v1988_v53 = vmul.f32 %v1972_v39, %v3685_v49 }
 0x287   : > { %v1771_v52 = vpop.f32.mrf.mxu0  ;;  %v1945_v41 = vmul.f32 0.5, %v1929_v9  ;;  %v3003_v11 = vpop.eup %3002  ;;  %v1902_v58 = vmul.f32 0.7978846, %v1886_v42 }
 0x288   : > { %v1873_v40 = vmul.f32 0.044715, %v1857_v3  ;;  %v1772_v46 = vadd.f32 %v1771_v52, %v3756_v30  ;;  %v1842_v30 = vmul.f32 %v3825_v43, %v3825_v43  ;;  %v1997_v55 = vpack.c.bf16 %v1988_v53, %v1987_v47 }
 0x289   : > { %v1930_v59 = vadd.f32 1.0, %v3003_v11  ;;  %v1961_v27 = vmul.f32 %v1945_v41, %v3770_v38  ;;  %3006 = vtanh.f32 %v1902_v58 }
 0x28a   : > { %v1889_v12 = vadd.f32 %v1873_v40, %v3811_v13  ;;  %v3830_v19 = vadd.f32 %v1790_v18, %v1772_v46  ;;  %v1858_v49 = vmul.f32 %v1842_v30, %v3825_v43  ;;  %2005 = vst [vmem:[%s3304_s16 + $0x30] sm:$0xff] %v1997_v55  ;;  %v1809_v17 = vpop.f32.mrf.mxu2 }
 0x28b   : > { %v1946_v62 = vmul.f32 0.5, %v1930_v59  ;;  %v1810_v48 = vadd.f32 %v1809_v17, %v3775_v4  ;;  %v1977_v36 = vmul.f32 %v1961_v27, %v3687_v51 }
 0x28c   : > { %v3005_v54 = vpop.eup %3004  ;;  %v1905_v60 = vmul.f32 0.7978846, %v1889_v12  ;;  %v1845_v61 = vmul.f32 %v3830_v19, %v3830_v19  ;;  %v1874_v5 = vmul.f32 0.044715, %v1858_v49  ;;  %v1828_v37 = vpop.f32.mrf.mxu3 }
 0x28d   : > { %v1933_v63 = vadd.f32 1.0, %v3005_v54  ;;  %v1962_v8 = vmul.f32 %v1946_v62, %v3787_v25  ;;  %v1829_v7 = vadd.f32 %v1828_v37, %v1810_v48 }
 0x28e   : > { %3008 = vtanh.f32 %v1905_v60  ;;  %v1861_v24 = vmul.f32 %v1845_v61, %v3830_v19  ;;  %v1890_v38 = vadd.f32 %v1874_v5, %v3825_v43 }
 0x28f   : > { %v1978_v14 = vmul.f32 %v1962_v8, %v3689_v44  ;;  %v1949_v1 = vmul.f32 0.5, %v1933_v63  ;;  %v3007_v16 = vpop.eup %3006  ;;  %v1846_v20 = vmul.f32 %v1829_v7, %v1829_v7 }
 0x290   : > { %v1877_v6 = vmul.f32 0.044715, %v1861_v24  ;;  %v1906_v21 = vmul.f32 0.7978846, %v1890_v38  ;;  %v1934_v23 = vadd.f32 1.0, %v3007_v16 }
 0x291   : > { %v1992_v4 = vpack.c.bf16 %v1978_v14, %v1977_v36  ;;  %v1862_v9 = vmul.f32 %v1846_v20, %v1829_v7  ;;  %v1965_v26 = vmul.f32 %v1949_v1, %v3792_v34  ;;  %v2044_v59 = vld [vmem:[%s3304_s16 + $0x30] sm:$0xff] (%p3231_p10) }
 0x292   : > { %v1893_v15 = vadd.f32 %v1877_v6, %v3830_v19  ;;  %3010 = vtanh.f32 %v1906_v21  ;;  %v1950_v28 = vmul.f32 0.5, %v1934_v23  ;;  %2045 = vst [vmem:[%s2019_s13 + $0x60] sm:$0xff] (%p3231_p10), %v2044_v59 }
 0x293   : > { %2000 = vst [vmem:[%s3304_s16 + $0x8] sm:$0xff] %v1992_v4  ;;  %v1878_v44 = vmul.f32 0.044715, %v1862_v9  ;;  %v1981_v31 = vmul.f32 %v1965_v26, %v3691_v45 }
 0x294   : > { %v3009_v22 = vpop.eup %3008  ;;  %v1909_v25 = vmul.f32 0.7978846, %v1893_v15  ;;  %v1966_v29 = vmul.f32 %v1950_v28, %v3807_v35 }
 0x295   : > { %v1937_v51 = vadd.f32 1.0, %v3009_v22  ;;  %v1894_v3 = vadd.f32 %v1878_v44, %v1829_v7 }
 0x296   : > { %3012 = vtanh.f32 %v1909_v25  ;;  %v1982_v32 = vmul.f32 %v1966_v29, %v3693_v56 }
 0x297   : > { %v1953_v33 = vmul.f32 0.5, %v1937_v51  ;;  %v1910_v52 = vmul.f32 0.7978846, %v1894_v3 }
 0x298   : > { %v3011_v50 = vpop.eup %3010  ;;  %v1994_v40 = vpack.c.bf16 %v1982_v32, %v1981_v31 }
 0x299   : > { %v1938_v46 = vadd.f32 1.0, %v3011_v50  ;;  %3014 = vtanh.f32 %v1910_v52  ;;  %v1969_v34 = vmul.f32 %v1953_v33, %v3811_v13 }
 0x29a   : > { %2002 = vst [vmem:[%s3304_s16 + $0x18] sm:$0xff] %v1994_v40 }
 0x29b   : > { %v1954_v41 = vmul.f32 0.5, %v1938_v46  ;;  %v1985_v45 = vmul.f32 %v1969_v34, %v3695_v57  ;;  %v2032_v57 = vld [vmem:[%s3304_s16] sm:$0xff] (%p3231_p10) }
 0x29c   : > { %v3013_v39 = vpop.eup %3012  ;;  %2033 = vst [vmem:[%s2019_s13] sm:$0xff] (%p3231_p10), %v2032_v57 }
 0x29d   : > { %v1941_v42 = vadd.f32 1.0, %v3013_v39  ;;  %v1970_v35 = vmul.f32 %v1954_v41, %v3825_v43  ;;  %v2040_v43 = vld [vmem:[%s3304_s16 + $0x20] sm:$0xff] (%p3231_p10) }
 0x29e   : > { %2041 = vst [vmem:[%s2019_s13 + $0x40] sm:$0xff] (%p3231_p10), %v2040_v43 }
 0x29f   : > { %v1986_v56 = vmul.f32 %v1970_v35, %v3697_v0  ;;  %v1957_v18 = vmul.f32 0.5, %v1941_v42  ;;  %v3015_v47 = vpop.eup %3014  ;;  %v2034_v0 = vld [vmem:[%s3304_s16 + $0x8] sm:$0xff] (%p3231_p10) }
 0x2a0   : > { %v1942_v12 = vadd.f32 1.0, %v3015_v47  ;;  %2035 = vst [vmem:[%s2019_s13 + $0x8] sm:$0xff] (%p3231_p10), %v2034_v0 }
 0x2a1   : > { %v1996_v53 = vpack.c.bf16 %v1986_v56, %v1985_v45  ;;  %v1973_v11 = vmul.f32 %v1957_v18, %v3830_v19 }
 0x2a2   : > { %v1958_v58 = vmul.f32 0.5, %v1942_v12 }
 0x2a3   : > { %2004 = vst [vmem:[%s3304_s16 + $0x28] sm:$0xff] %v1996_v53  ;;  %v1989_v13 = vmul.f32 %v1973_v11, %v3706_v2  ;;  %v2036_v2 = vld [vmem:[%s3304_s16 + $0x10] sm:$0xff] (%p3231_p10) }
 0x2a4   : > { %v1974_v30 = vmul.f32 %v1958_v58, %v1829_v7  ;;  %2037 = vst [vmem:[%s2019_s13 + $0x20] sm:$0xff] (%p3231_p10), %v2036_v2 }
 0x2a6   : > { %v1990_v54 = vmul.f32 %v1974_v30, %v3709_v10  ;;  %2013 = sbr.rel (!%p3231_p10) target bundleno = 691 (0x2b3), region = 140  ;;  %v2038_v10 = vld [vmem:[%s3304_s16 + $0x18] sm:$0xff] (%p3231_p10) }
 0x2a7   : > { %2039 = vst [vmem:[%s2019_s13 + $0x28] sm:$0xff] (%p3231_p10), %v2038_v10 }
 0x2a8   : > { %v1998_v55 = vpack.c.bf16 %v1990_v54, %v1989_v13 }
 0x2aa   : > { %2006 = vst [vmem:[%s3304_s16 + $0x38] sm:$0xff] %v1998_v55  ;;  %v2042_v19 = vld [vmem:[%s3304_s16 + $0x28] sm:$0xff] (%p3231_p10) }
 0x2ab   : > { %2043 = vst [vmem:[%s2019_s13 + $0x48] sm:$0xff] %v2042_v19 }
 0x2b1   : > { %v2046_v60 = vld [vmem:[%s3304_s16 + $0x38] sm:$0xff] }
 0x2b2   : > { %2047 = vst [vmem:[%s2019_s13 + $0x68] sm:$0xff] %v2046_v60 }
 0x2b3 PF: > { %s23_s29 = sadd.s32 1, %s3130_s29   ;;  %s3916_s27 = sld [smem:[#allocation12_spill]] }
 0x2b4   : > { %p20_p4 = scmp.ge.s32.totalorder %s23_s29, 4   ;;  %s3917_s26 = sld [smem:[#allocation15_spill]] }
 0x2b5   : > { %s3918_s14 = sld [smem:[#allocation13_spill]]  ;;  %s3920_s24 = smov %s3114_s25 }
 0x2b6   : > { %s3919_s28 = sld [smem:[#allocation14_spill]] }
 0x2b7   :  { %22 = sbr.rel (!%p20_p4) target bundleno = 9 (0x9), region = 223 }
 0x2b9   : > { %s3921_s25 = smov %s3916_s27 }
 0x2bb   : > { %s3922_s27 = smov %s3918_s14 }
 0x2bc   :  { %2063 = vsyncpa [#allocation6], 1 }
 0x2bd   :  { %2065 = vsyncpa [#allocation6 + $0x1], 1 }
 0x2be   :  { %2066 = vsyncpa [#allocation8], 1 }
 0x2bf   :  { %2068 = vsyncpa [#allocation8 + $0x1], 1 }

// kernel: _lambda_.18
= control target key start
LH: loop header
LB: loop body
LE: loop exit
PB: predicated region body
PF: predicated region fallthrough
CT: control target
= control target key end

     0   :  { %10 = vsyncpa [#allocation3], 0  ;;  %s2381_s0 = inlined_call_operand.vmem [shape: bf16[32,1024], index: 0, kind: input, shape index: {}]   ;;  %s2382_s1 = inlined_call_operand.hbm [shape: bf16[1024,256], index: 1, kind: input, shape index: {}]   ;;  %s2383_s2 = inlined_call_operand.hbm [shape: f32[1,256], index: 2, kind: input, shape index: {}]   ;;  %s2384_s3 = inlined_call_operand.vmem [shape: bf16[32,256], index: 3, kind: input, shape index: {}]   ;;  %s2385_s4 = inlined_call_operand.vmem [shape: bf16[32,1536], index: 4, kind: input, shape index: {}]   ;;  %s2386_s5 = inlined_call_operand.vmem [shape: bf16[32,256], index: 5, kind: output, shape index: {}]  }
   0x1   :  { %s18_s20 = sshll.u32 %s2382_s1, 4  ;;  %s19_s20 = int_to_ptr.hbm [resolvable:$true] %s18_s20 }
   0x2   :  { %11 = vsyncpa [#allocation5], 0  ;;  %v2156_v0 = vld [vmem:[%s2385_s4 + $0x28] sm:$0xff]  ;;  %v2161_v1 = vld [vmem:[%s2385_s4 + $0x58] sm:$0xff]  ;;  %s2116_s25 = smov [#allocation2]   ;;  %s32_s7 = sshll.u32 %s2383_s2, 4  ;;  %s33_s7 = int_to_ptr.hbm [resolvable:$true] %s32_s7 }
   0x3   :  { %s20_s26 = sshll.u32 %s2116_s25, 4  ;;  %v2166_v2 = vld [vmem:[%s2385_s4 + $0x88] sm:$0xff]  ;;  %v2171_v3 = vld [vmem:[%s2385_s4 + $0xb8] sm:$0xff]  ;;  %s2117_s8 = smov 128   ;;  %s21_s26 = int_to_ptr.vmem [resolvable:$true] %s20_s26 }
   0x4   :  { %s2118_s9 = smov 8   ;;  %s2119_s10 = smov [#allocation4]  }
   0x5   :  { %26 = dma.hbm_to_vmem [thread:$0]  %s19_s20, 16384, %s21_s26, [#allocation3], %s2117_s8, %s2117_s8, %s2118_s9  }
   0x6   :  { %s34_s11 = sshll.u32 %s2119_s10, 4  ;;  %s35_s11 = int_to_ptr.vmem [resolvable:$true] %s34_s11 }
   0x7   :  { %37 = dma.hbm_to_vmem [thread:$0]  %s33_s7, 32, %s35_s11, [#allocation5]  }
   0x8   :  { %2112 = dma.done.wait [#allocation3], 16384  }
   0x9   :  { %2113 = vsyncadd [#allocation3], 4294950912 }
   0xa   :  { %2114 = dma.done.wait [#allocation5], 32  }
   0xb   :  { %2115 = vsyncadd [#allocation5], 4294967264  ;;  %v1462_v4 = vld [vmem:[#allocation2 + $0x70] sm:$0xf]  ;;  %v1947_v5 = vld [vmem:[#allocation2 + $0x74] sm:$0xf0] }
   0xc   :  { %v1526_v6 = vld [vmem:[#allocation2 + $0xf0] sm:$0xf]  ;;  %v1463_v7 = vor.u32 %v1947_v5, %v1462_v4  ;;  %v1963_v8 = vld [vmem:[#allocation2 + $0xf4] sm:$0xf0]  ;;  %v1454_v15 = vld [vmem:[#allocation2 + $0x60] sm:$0xf] }
   0xd   :  { %v1590_v9 = vld [vmem:[#allocation2 + $0x170] sm:$0xf]  ;;  %v1979_v10 = vld [vmem:[#allocation2 + $0x174] sm:$0xf0]  ;;  %v1527_v11 = vor.u32 %v1963_v8, %v1526_v6  ;;  %v1945_v17 = vld [vmem:[#allocation2 + $0x64] sm:$0xf0] }
   0xe   :  { %v1591_v12 = vor.u32 %v1979_v10, %v1590_v9  ;;  %v1654_v13 = vld [vmem:[#allocation2 + $0x1f0] sm:$0xf]  ;;  %v1995_v14 = vld [vmem:[#allocation2 + $0x1f4] sm:$0xf0]  ;;  %973 = vmatpush.bf16.msra.mxu0 %v1463_v7  ;;  %v1518_v18 = vld [vmem:[#allocation2 + $0xe0] sm:$0xf]  ;;  %v1455_v20 = vor.u32 %v1945_v17, %v1454_v15 }
   0xf   :  { %v1655_v16 = vor.u32 %v1995_v14, %v1654_v13  ;;  %v1961_v19 = vld [vmem:[#allocation2 + $0xe4] sm:$0xf0]  ;;  %992 = vmatpush.bf16.msra.mxu1 %v1527_v11  ;;  %v1582_v22 = vld [vmem:[#allocation2 + $0x160] sm:$0xf]  ;;  %v1446_v27 = vld [vmem:[#allocation2 + $0x50] sm:$0xf] }
  0x10   :  { %1011 = vmatpush.bf16.msra.mxu2 %v1591_v12  ;;  %v1519_v21 = vor.u32 %v1961_v19, %v1518_v18  ;;  %v1977_v23 = vld [vmem:[#allocation2 + $0x164] sm:$0xf0]  ;;  %v1646_v24 = vld [vmem:[#allocation2 + $0x1e0] sm:$0xf]  ;;  %v1943_v28 = vld [vmem:[#allocation2 + $0x54] sm:$0xf0] }
  0x11   :  { %1030 = vmatpush.bf16.msra.mxu3 %v1655_v16  ;;  %v1583_v25 = vor.u32 %v1977_v23, %v1582_v22  ;;  %v1993_v26 = vld [vmem:[#allocation2 + $0x1e4] sm:$0xf0]  ;;  %v1510_v30 = vld [vmem:[#allocation2 + $0xd0] sm:$0xf]  ;;  %v1959_v31 = vld [vmem:[#allocation2 + $0xd4] sm:$0xf0]  ;;  %v1447_v33 = vor.u32 %v1943_v28, %v1446_v27 }
  0x12   :  { %v1647_v29 = vor.u32 %v1993_v26, %v1646_v24  ;;  %v1574_v32 = vld [vmem:[#allocation2 + $0x150] sm:$0xf]  ;;  %974 = vmatpush.bf16.msra.mxu0 %v1455_v20  ;;  %v1975_v34 = vld [vmem:[#allocation2 + $0x154] sm:$0xf0]  ;;  %v1511_v37 = vor.u32 %v1959_v31, %v1510_v30  ;;  %v1438_v39 = vld [vmem:[#allocation2 + $0x40] sm:$0xf] }
  0x13   :  { %v1638_v35 = vld [vmem:[#allocation2 + $0x1d0] sm:$0xf]  ;;  %v1991_v36 = vld [vmem:[#allocation2 + $0x1d4] sm:$0xf0]  ;;  %993 = vmatpush.bf16.msra.mxu1 %v1519_v21  ;;  %v1575_v38 = vor.u32 %v1975_v34, %v1574_v32  ;;  %v1941_v40 = vld [vmem:[#allocation2 + $0x44] sm:$0xf0] }
  0x14   :  { %1012 = vmatpush.bf16.msra.mxu2 %v1583_v25  ;;  %v1502_v41 = vld [vmem:[#allocation2 + $0xc0] sm:$0xf]  ;;  %v1639_v42 = vor.u32 %v1991_v36, %v1638_v35  ;;  %v1957_v43 = vld [vmem:[#allocation2 + $0xc4] sm:$0xf0]  ;;  %v1439_v48 = vor.u32 %v1941_v40, %v1438_v39  ;;  %v1430_v51 = vld [vmem:[#allocation2 + $0x30] sm:$0xf] }
  0x15   :  { %1031 = vmatpush.bf16.msra.mxu3 %v1647_v29  ;;  %v1566_v44 = vld [vmem:[#allocation2 + $0x140] sm:$0xf]  ;;  %v1973_v45 = vld [vmem:[#allocation2 + $0x144] sm:$0xf0]  ;;  %v1503_v49 = vor.u32 %v1957_v43, %v1502_v41  ;;  %v1939_v52 = vld [vmem:[#allocation2 + $0x34] sm:$0xf0] }
  0x16   :  { %v1630_v46 = vld [vmem:[#allocation2 + $0x1c0] sm:$0xf]  ;;  %v1989_v47 = vld [vmem:[#allocation2 + $0x1c4] sm:$0xf0]  ;;  %975 = vmatpush.bf16.msra.mxu0 %v1447_v33  ;;  %v1567_v50 = vor.u32 %v1973_v45, %v1566_v44  ;;  %v1494_v53 = vld [vmem:[#allocation2 + $0xb0] sm:$0xf]  ;;  %v1431_v60 = vor.u32 %v1939_v52, %v1430_v51 }
  0x17   :  { %994 = vmatpush.bf16.msra.mxu1 %v1511_v37  ;;  %v1631_v54 = vor.u32 %v1989_v47, %v1630_v46  ;;  %v1955_v55 = vld [vmem:[#allocation2 + $0xb4] sm:$0xf0]  ;;  %v1558_v56 = vld [vmem:[#allocation2 + $0x130] sm:$0xf]  ;;  %v1422_v63 = vld [vmem:[#allocation2 + $0x20] sm:$0xf] }
  0x18   :  { %1013 = vmatpush.bf16.msra.mxu2 %v1575_v38  ;;  %v1971_v57 = vld [vmem:[#allocation2 + $0x134] sm:$0xf0]  ;;  %v1622_v58 = vld [vmem:[#allocation2 + $0x1b0] sm:$0xf]  ;;  %v1495_v61 = vor.u32 %v1955_v55, %v1494_v53  ;;  %v1937_v4 = vld [vmem:[#allocation2 + $0x24] sm:$0xf0] }
  0x19   :  { %1032 = vmatpush.bf16.msra.mxu3 %v1639_v42  ;;  %v1987_v59 = vld [vmem:[#allocation2 + $0x1b4] sm:$0xf0]  ;;  %v1559_v62 = vor.u32 %v1971_v57, %v1558_v56  ;;  %v1486_v5 = vld [vmem:[#allocation2 + $0xa0] sm:$0xf]  ;;  %v1953_v7 = vld [vmem:[#allocation2 + $0xa4] sm:$0xf0]  ;;  %v1423_v12 = vor.u32 %v1937_v4, %v1422_v63 }
  0x1a   :  { %976 = vmatpush.bf16.msra.mxu0 %v1439_v48  ;;  %v1623_v6 = vor.u32 %v1987_v59, %v1622_v58  ;;  %v1550_v8 = vld [vmem:[#allocation2 + $0x120] sm:$0xf]  ;;  %v1969_v9 = vld [vmem:[#allocation2 + $0x124] sm:$0xf0]  ;;  %v1487_v13 = vor.u32 %v1953_v7, %v1486_v5  ;;  %v1414_v15 = vld [vmem:[#allocation2 + $0x10] sm:$0xf] }
  0x1b   :  { %995 = vmatpush.bf16.msra.mxu1 %v1503_v49  ;;  %v1614_v10 = vld [vmem:[#allocation2 + $0x1a0] sm:$0xf]  ;;  %v1985_v11 = vld [vmem:[#allocation2 + $0x1a4] sm:$0xf0]  ;;  %v1551_v14 = vor.u32 %v1969_v9, %v1550_v8  ;;  %v1935_v16 = vld [vmem:[#allocation2 + $0x14] sm:$0xf0] }
  0x1c   :  { %1014 = vmatpush.bf16.msra.mxu2 %v1567_v50  ;;  %v1478_v17 = vld [vmem:[#allocation2 + $0x90] sm:$0xf]  ;;  %v1615_v18 = vor.u32 %v1985_v11, %v1614_v10  ;;  %v1951_v19 = vld [vmem:[#allocation2 + $0x94] sm:$0xf0]  ;;  %v1406_v24 = vld [vmem:[#allocation2] sm:$0xf]  ;;  %v1415_v25 = vor.u32 %v1935_v16, %v1414_v15 }
  0x1d   :  { %1033 = vmatpush.bf16.msra.mxu3 %v1631_v54  ;;  %v1542_v20 = vld [vmem:[#allocation2 + $0x110] sm:$0xf]  ;;  %v1967_v21 = vld [vmem:[#allocation2 + $0x114] sm:$0xf0]  ;;  %v1933_v26 = vld [vmem:[#allocation2 + $0x4] sm:$0xf0]  ;;  %v1479_v29 = vor.u32 %v1951_v19, %v1478_v17 }
  0x1e   :  { %977 = vmatpush.bf16.msra.mxu0 %v1431_v60  ;;  %v1606_v22 = vld [vmem:[#allocation2 + $0x190] sm:$0xf]  ;;  %v1983_v23 = vld [vmem:[#allocation2 + $0x194] sm:$0xf0]  ;;  %v1470_v27 = vld [vmem:[#allocation2 + $0x80] sm:$0xf]  ;;  %v1543_v30 = vor.u32 %v1967_v21, %v1542_v20  ;;  %v1407_v42 = vor.u32 %v1933_v26, %v1406_v24 }
  0x1f   :  { %996 = vmatpush.bf16.msra.mxu1 %v1495_v61  ;;  %v1949_v28 = vld [vmem:[#allocation2 + $0x84] sm:$0xf0]  ;;  %v1534_v31 = vld [vmem:[#allocation2 + $0x100] sm:$0xf]  ;;  %v1607_v34 = vor.u32 %v1983_v23, %v1606_v22  ;;  %v1916_v38 = vld [vmem:[%s2381_s0 + $0x4] sm:$0xf] }
  0x20   :  { %1015 = vmatpush.bf16.msra.mxu2 %v1559_v62  ;;  %v1965_v32 = vld [vmem:[#allocation2 + $0x104] sm:$0xf0]  ;;  %v1598_v33 = vld [vmem:[#allocation2 + $0x180] sm:$0xf]  ;;  %v1344_v39 = vld [vmem:[%s2381_s0 + $0x20] sm:$0xf0]  ;;  %v1471_v46 = vor.u32 %v1949_v28, %v1470_v27 }
  0x21   :  { %1034 = vmatpush.bf16.msra.mxu3 %v1623_v6  ;;  %v1981_v35 = vld [vmem:[#allocation2 + $0x184] sm:$0xf0]  ;;  %v1342_v36 = vld [vmem:[%s2381_s0] sm:$0xf]  ;;  %v1846_v40 = vld [vmem:[#allocation2 + $0x370] sm:$0xf]  ;;  %v1535_v47 = vor.u32 %v1965_v32, %v1534_v31  ;;  %v2202_v61 = vor.u32 %v1916_v38, %v1344_v39 }
  0x22   :  { %978 = vmatpush.bf16.msra.mxu0 %v1423_v12  ;;  %v1920_v37 = vld [vmem:[%s2381_s0 + $0x1c] sm:$0xf0]  ;;  %v2043_v41 = vld [vmem:[#allocation2 + $0x374] sm:$0xf0]  ;;  %v1350_v43 = vld [vmem:[%s2381_s0 + $0x8] sm:$0xf]  ;;  %v1599_v51 = vor.u32 %v1981_v35, %v1598_v33 }
  0x23   :  { %997 = vmatpush.bf16.msra.mxu1 %v1487_v13  ;;  %v1782_v44 = vld [vmem:[#allocation2 + $0x2f0] sm:$0xf]  ;;  %v2027_v45 = vld [vmem:[#allocation2 + $0x2f4] sm:$0xf0]  ;;  %v1921_v48 = vld [vmem:[%s2381_s0 + $0x24] sm:$0xf0]  ;;  %v1847_v52 = vor.u32 %v2043_v41, %v1846_v40  ;;  %v2200_v56 = vor.u32 %v1920_v37, %v1342_v36 }
  0x24   :  { %1016 = vmatpush.bf16.msra.mxu2 %v1551_v14  ;;  %v1917_v49 = vld [vmem:[%s2381_s0 + $0xc] sm:$0xf]  ;;  %v1718_v53 = vld [vmem:[#allocation2 + $0x270] sm:$0xf]  ;;  %v2011_v54 = vld [vmem:[#allocation2 + $0x274] sm:$0xf0]  ;;  %v1783_v57 = vor.u32 %v2027_v45, %v1782_v44  ;;  %v2204_v62 = vor.u32 %v1921_v48, %v1350_v43 }
  0x25   :  { %1035 = vmatpush.bf16.msra.mxu3 %v1615_v18  ;;  %v1352_v50 = vld [vmem:[%s2381_s0 + $0x28] sm:$0xf0]  ;;  %v1910_v55 = vld [vmem:[#allocation2 + $0x3f0] sm:$0xf]  ;;  %v2059_v58 = vld [vmem:[#allocation2 + $0x3f4] sm:$0xf0]  ;;  %v1719_v6 = vor.u32 %v2011_v54, %v1718_v53 }
  0x26   :  { %979 = vmatpush.bf16.msra.mxu0 %v1415_v25  ;;  %v1838_v59 = vld [vmem:[#allocation2 + $0x360] sm:$0xf]  ;;  %v2041_v60 = vld [vmem:[#allocation2 + $0x364] sm:$0xf0]  ;;  %v2206_v5 = vor.u32 %v1917_v49, %v1352_v50  ;;  %v1911_v7 = vor.u32 %v2059_v58, %v1910_v55  ;;  %v1830_v14 = vld [vmem:[#allocation2 + $0x350] sm:$0xf] }
  0x27   :  { %998 = vmatpush.bf16.msra.mxu1 %v1479_v29  ;;  %v1774_v63 = vld [vmem:[#allocation2 + $0x2e0] sm:$0xf]  ;;  %v2025_v4 = vld [vmem:[#allocation2 + $0x2e4] sm:$0xf0]  ;;  %v1839_v8 = vor.u32 %v2041_v60, %v1838_v59  ;;  %v2039_v15 = vld [vmem:[#allocation2 + $0x354] sm:$0xf0] }
  0x28   :  { %1017 = vmatpush.bf16.msra.mxu2 %v1543_v30  ;;  %v1710_v9 = vld [vmem:[#allocation2 + $0x260] sm:$0xf]  ;;  %v2009_v10 = vld [vmem:[#allocation2 + $0x264] sm:$0xf0]  ;;  %v1775_v12 = vor.u32 %v2025_v4, %v1774_v63  ;;  %v1766_v16 = vld [vmem:[#allocation2 + $0x2d0] sm:$0xf]  ;;  %v1831_v20 = vor.u32 %v2039_v15, %v1830_v14 }
  0x29   :  { %1036 = vmatpush.bf16.msra.mxu3 %v1607_v34  ;;  %v1902_v11 = vld [vmem:[#allocation2 + $0x3e0] sm:$0xf]  ;;  %v2057_v13 = vld [vmem:[#allocation2 + $0x3e4] sm:$0xf0]  ;;  %v2023_v17 = vld [vmem:[#allocation2 + $0x2d4] sm:$0xf0]  ;;  %v1711_v18 = vor.u32 %v2009_v10, %v1710_v9 }
  0x2a   :  { %980 = vmatpush.bf16.msra.mxu0 %v1407_v42  ;;  %v1903_v19 = vor.u32 %v2057_v13, %v1902_v11  ;;  %v1702_v21 = vld [vmem:[#allocation2 + $0x250] sm:$0xf]  ;;  %v2007_v22 = vld [vmem:[#allocation2 + $0x254] sm:$0xf0]  ;;  %v1767_v24 = vor.u32 %v2023_v17, %v1766_v16  ;;  %v1822_v26 = vld [vmem:[#allocation2 + $0x340] sm:$0xf] }
  0x2b   :  { %999 = vmatpush.bf16.msra.mxu1 %v1471_v46  ;;  %v1894_v23 = vld [vmem:[#allocation2 + $0x3d0] sm:$0xf]  ;;  %v2055_v25 = vld [vmem:[#allocation2 + $0x3d4] sm:$0xf0]  ;;  %v2037_v27 = vld [vmem:[#allocation2 + $0x344] sm:$0xf0]  ;;  %v1703_v30 = vor.u32 %v2007_v22, %v1702_v21 }
  0x2c   :  { %1018 = vmatpush.bf16.msra.mxu2 %v1535_v47  ;;  %v1758_v28 = vld [vmem:[#allocation2 + $0x2c0] sm:$0xf]  ;;  %v2021_v29 = vld [vmem:[#allocation2 + $0x2c4] sm:$0xf0]  ;;  %v1895_v34 = vor.u32 %v2055_v25, %v1894_v23  ;;  %v1823_v35 = vor.u32 %v2037_v27, %v1822_v26  ;;  %v1924_v40 = vld [vmem:[%s2381_s0 + $0x44] sm:$0xf] }
  0x2d   :  { %1037 = vmatpush.bf16.msra.mxu3 %v1599_v51  ;;  %981 = vmatmul.bf16.vlgmr.msra.gmra.mxu0 %v2200_v56  ;;  %v1694_v31 = vld [vmem:[#allocation2 + $0x240] sm:$0xf]  ;;  %v2005_v32 = vld [vmem:[#allocation2 + $0x244] sm:$0xf0]  ;;  %v1759_v39 = vor.u32 %v2021_v29, %v1758_v28  ;;  %v1376_v41 = vld [vmem:[%s2381_s0 + $0x60] sm:$0xf0] }
  0x2e   :  { %1000 = vmatmul.bf16.vlgmr.msra.gmra.mxu1 %v2202_v61  ;;  %1049 = vmatpush.bf16.msrb.mxu0 %v1719_v6  ;;  %v1886_v33 = vld [vmem:[#allocation2 + $0x3c0] sm:$0xf]  ;;  %v2053_v36 = vld [vmem:[#allocation2 + $0x3c4] sm:$0xf0]  ;;  %v1814_v42 = vld [vmem:[#allocation2 + $0x330] sm:$0xf]  ;;  %v1695_v47 = vor.u32 %v2005_v32, %v1694_v31  ;;  %v2238_v4 = vor.u32 %v1924_v40, %v1376_v41 }
  0x2f   :  { %1068 = vmatpush.bf16.msrb.mxu1 %v1783_v57  ;;  %1019 = vmatmul.bf16.vlgmr.msra.gmra.mxu2 %v2204_v62  ;;  %v1374_v37 = vld [vmem:[%s2381_s0 + $0x40] sm:$0xf]  ;;  %v2035_v43 = vld [vmem:[#allocation2 + $0x334] sm:$0xf0]  ;;  %v1382_v44 = vld [vmem:[%s2381_s0 + $0x48] sm:$0xf]  ;;  %v1887_v51 = vor.u32 %v2053_v36, %v1886_v33 }
  0x30   :  { %1087 = vmatpush.bf16.msrb.mxu2 %v1847_v52  ;;  %1038 = vmatmul.bf16.vlgmr.msra.gmra.mxu3 %v2206_v5  ;;  %v1928_v38 = vld [vmem:[%s2381_s0 + $0x5c] sm:$0xf0]  ;;  %v1750_v45 = vld [vmem:[#allocation2 + $0x2b0] sm:$0xf]  ;;  %v2019_v46 = vld [vmem:[#allocation2 + $0x2b4] sm:$0xf0]  ;;  %v1815_v52 = vor.u32 %v2035_v43, %v1814_v42 }
  0x31   :  { %1106 = vmatpush.bf16.msrb.mxu3 %v1911_v7  ;;  %v1929_v48 = vld [vmem:[%s2381_s0 + $0x64] sm:$0xf0]  ;;  %v1925_v49 = vld [vmem:[%s2381_s0 + $0x4c] sm:$0xf]  ;;  %v1686_v53 = vld [vmem:[#allocation2 + $0x230] sm:$0xf]  ;;  %v2236_v57 = vor.u32 %v1928_v38, %v1374_v37  ;;  %v1751_v58 = vor.u32 %v2019_v46, %v1750_v45 }
  0x32   :  { %1050 = vmatpush.bf16.msrb.mxu0 %v1711_v18  ;;  %v1384_v50 = vld [vmem:[%s2381_s0 + $0x68] sm:$0xf0]  ;;  %v2003_v54 = vld [vmem:[#allocation2 + $0x234] sm:$0xf0]  ;;  %v1878_v55 = vld [vmem:[#allocation2 + $0x3b0] sm:$0xf]  ;;  %v2240_v6 = vor.u32 %v1929_v48, %v1382_v44 }
  0x33   :  { %1069 = vmatpush.bf16.msrb.mxu1 %v1775_v12  ;;  %v2051_v59 = vld [vmem:[#allocation2 + $0x3b4] sm:$0xf0]  ;;  %v1806_v60 = vld [vmem:[#allocation2 + $0x320] sm:$0xf]  ;;  %v2033_v63 = vld [vmem:[#allocation2 + $0x324] sm:$0xf0]  ;;  %v2242_v9 = vor.u32 %v1925_v49, %v1384_v50  ;;  %v1687_v10 = vor.u32 %v2003_v54, %v1686_v53 }
  0x34   :  { %1088 = vmatpush.bf16.msrb.mxu2 %v1839_v8  ;;  %v1742_v7 = vld [vmem:[#allocation2 + $0x2a0] sm:$0xf]  ;;  %v2017_v8 = vld [vmem:[#allocation2 + $0x2a4] sm:$0xf0]  ;;  %v1879_v11 = vor.u32 %v2051_v59, %v1878_v55  ;;  %v1807_v12 = vor.u32 %v2033_v63, %v1806_v60  ;;  %v1798_v18 = vld [vmem:[#allocation2 + $0x310] sm:$0xf] }
  0x35   :  { %1107 = vmatpush.bf16.msrb.mxu3 %v1903_v19  ;;  %v1678_v13 = vld [vmem:[#allocation2 + $0x220] sm:$0xf]  ;;  %v2001_v14 = vld [vmem:[#allocation2 + $0x224] sm:$0xf0]  ;;  %v1743_v16 = vor.u32 %v2017_v8, %v1742_v7  ;;  %v2031_v19 = vld [vmem:[#allocation2 + $0x314] sm:$0xf0] }
  0x36   :  { %1051 = vmatpush.bf16.msrb.mxu0 %v1703_v30  ;;  %v1870_v15 = vld [vmem:[#allocation2 + $0x3a0] sm:$0xf]  ;;  %v2049_v17 = vld [vmem:[#allocation2 + $0x3a4] sm:$0xf0]  ;;  %v2015_v21 = vld [vmem:[#allocation2 + $0x294] sm:$0xf0]  ;;  %v1679_v22 = vor.u32 %v2001_v14, %v1678_v13  ;;  %v1799_v25 = vor.u32 %v2031_v19, %v1798_v18 }
  0x37   :  { %1070 = vmatpush.bf16.msrb.mxu1 %v1767_v24  ;;  %v1670_v23 = vld [vmem:[#allocation2 + $0x210] sm:$0xf]  ;;  %v1871_v24 = vor.u32 %v2049_v17, %v1870_v15  ;;  %v1999_v26 = vld [vmem:[#allocation2 + $0x214] sm:$0xf0]  ;;  %v1790_v30 = vld [vmem:[#allocation2 + $0x300] sm:$0xf] }
  0x38   :  { %1089 = vmatpush.bf16.msrb.mxu2 %v1831_v20  ;;  %v1734_v20 = vld [vmem:[#allocation2 + $0x290] sm:$0xf]  ;;  %v2047_v28 = vld [vmem:[#allocation2 + $0x394] sm:$0xf0]  ;;  %v2029_v31 = vld [vmem:[#allocation2 + $0x304] sm:$0xf0]  ;;  %v1671_v36 = vor.u32 %v1999_v26, %v1670_v23 }
  0x39   :  { %1108 = vmatpush.bf16.msrb.mxu3 %v1895_v34  ;;  %v1862_v27 = vld [vmem:[#allocation2 + $0x390] sm:$0xf]  ;;  %v1735_v29 = vor.u32 %v2015_v21, %v1734_v20  ;;  %v1726_v32 = vld [vmem:[#allocation2 + $0x280] sm:$0xf]  ;;  %v2013_v33 = vld [vmem:[#allocation2 + $0x284] sm:$0xf0]  ;;  %v1791_v41 = vor.u32 %v2029_v31, %v1790_v30 }
  0x3a   :  { %1052 = vmatpush.bf16.msrb.mxu0 %v1695_v47  ;;  %v1978_v34 = vld [vmem:[#allocation2 + $0x174] sm:$0xf]  ;;  %v1662_v37 = vld [vmem:[#allocation2 + $0x200] sm:$0xf]  ;;  %v1863_v40 = vor.u32 %v2047_v28, %v1862_v27  ;;  %v1997_v42 = vld [vmem:[#allocation2 + $0x204] sm:$0xf0]  ;;  %v1727_v45 = vor.u32 %v2013_v33, %v1726_v32 }
  0x3b   :  { %1071 = vmatpush.bf16.msrb.mxu1 %v1759_v39  ;;  %v1962_v38 = vld [vmem:[#allocation2 + $0xf4] sm:$0xf]  ;;  %v1528_v39 = vld [vmem:[#allocation2 + $0xf8] sm:$0xf0]  ;;  %v1854_v43 = vld [vmem:[#allocation2 + $0x380] sm:$0xf]  ;;  %v1663_v60 = vor.u32 %v1997_v42, %v1662_v37 }
  0x3c   :  { %1090 = vmatpush.bf16.msrb.mxu2 %v1823_v35  ;;  %v1592_v35 = vld [vmem:[#allocation2 + $0x178] sm:$0xf0]  ;;  %v2045_v44 = vld [vmem:[#allocation2 + $0x384] sm:$0xf0]  ;;  %v1358_v46 = vld [vmem:[%s2381_s0 + $0x10] sm:$0xf]  ;;  %v1531_v54 = vor.u32 %v1962_v38, %v1528_v39 }
  0x3d   :  { %1109 = vmatpush.bf16.msrb.mxu3 %v1887_v51  ;;  %986 = vmatmul.bf16.gmra.mxu0 %v2236_v57  ;;  %v1922_v47 = vld [vmem:[%s2381_s0 + $0x2c] sm:$0xf0]  ;;  %v1918_v48 = vld [vmem:[%s2381_s0 + $0x14] sm:$0xf]  ;;  %v1595_v50 = vor.u32 %v1978_v34, %v1592_v35  ;;  %v1656_v55 = vld [vmem:[#allocation2 + $0x1f8] sm:$0xf0] }
  0x3e   :  { %1005 = vmatmul.bf16.gmra.mxu1 %v2238_v4  ;;  %1053 = vmatpush.bf16.msrb.mxu0 %v1687_v10  ;;  %v1360_v49 = vld [vmem:[%s2381_s0 + $0x30] sm:$0xf0]  ;;  %v1584_v59 = vld [vmem:[#allocation2 + $0x168] sm:$0xf0]  ;;  %v1366_v63 = vld [vmem:[%s2381_s0 + $0x18] sm:$0xf]  ;;  %v1855_v10 = vor.u32 %v2045_v44, %v1854_v43  ;;  %v2272_v20 = vor.u32 %v1922_v47, %v1358_v46 }
  0x3f   :  { %1072 = vmatpush.bf16.msrb.mxu1 %v1751_v58  ;;  %1024 = vmatmul.bf16.gmra.mxu2 %v2240_v6  ;;  %v1946_v51 = vld [vmem:[#allocation2 + $0x74] sm:$0xf]  ;;  %v1976_v58 = vld [vmem:[#allocation2 + $0x164] sm:$0xf]  ;;  %v1923_v7 = vld [vmem:[%s2381_s0 + $0x34] sm:$0xf0]  ;;  %v2274_v21 = vor.u32 %v1918_v48, %v1360_v49 }
  0x40   :  { %1091 = vmatpush.bf16.msrb.mxu2 %v1815_v52  ;;  %1043 = vmatmul.bf16.gmra.mxu3 %v2242_v9  ;;  %v1464_v52 = vld [vmem:[#allocation2 + $0x78] sm:$0xf0]  ;;  %v1994_v53 = vld [vmem:[#allocation2 + $0x1f4] sm:$0xf]  ;;  %v1944_v13 = vld [vmem:[#allocation2 + $0x64] sm:$0xf] }
  0x41   :  { %1110 = vmatpush.bf16.msrb.mxu3 %v1879_v11  ;;  %v1919_v8 = vld [vmem:[%s2381_s0 + $0x1c] sm:$0xf]  ;;  %v1456_v14 = vld [vmem:[#allocation2 + $0x68] sm:$0xf0]  ;;  %v1659_v15 = vor.u32 %v1994_v53, %v1656_v55  ;;  %v1960_v17 = vld [vmem:[#allocation2 + $0xe4] sm:$0xf] }
  0x42   :  { %1054 = vmatpush.bf16.msrb.mxu0 %v1679_v22  ;;  %v1368_v11 = vld [vmem:[%s2381_s0 + $0x38] sm:$0xf0]  ;;  %v1520_v18 = vld [vmem:[#allocation2 + $0xe8] sm:$0xf0]  ;;  %v1992_v19 = vld [vmem:[#allocation2 + $0x1e4] sm:$0xf]  ;;  %v1459_v27 = vor.u32 %v1944_v13, %v1456_v14 }
  0x43   :  { %1073 = vmatpush.bf16.msrb.mxu1 %v1743_v16  ;;  %v1587_v16 = vor.u32 %v1976_v58, %v1584_v59  ;;  %v1648_v22 = vld [vmem:[#allocation2 + $0x1e8] sm:$0xf0]  ;;  %v1974_v23 = vld [vmem:[#allocation2 + $0x154] sm:$0xf]  ;;  %v2278_v26 = vor.u32 %v1919_v8, %v1368_v11  ;;  %v1523_v28 = vor.u32 %v1960_v17, %v1520_v18  ;;  %v1448_v30 = vld [vmem:[#allocation2 + $0x58] sm:$0xf0] }
  0x44   :  { %1092 = vmatpush.bf16.msrb.mxu2 %v1807_v12  ;;  %v1467_v12 = vor.u32 %v1946_v51, %v1464_v52  ;;  %v1651_v31 = vor.u32 %v1992_v19, %v1648_v22  ;;  %v1958_v33 = vld [vmem:[#allocation2 + $0xd4] sm:$0xf]  ;;  %v1512_v34 = vld [vmem:[#allocation2 + $0xd8] sm:$0xf0]  ;;  %v1972_v37 = vld [vmem:[#allocation2 + $0x144] sm:$0xf] }
  0x45   :  { %1111 = vmatpush.bf16.msrb.mxu3 %v1871_v24  ;;  %v1576_v24 = vld [vmem:[#allocation2 + $0x158] sm:$0xf0]  ;;  %v1990_v35 = vld [vmem:[#allocation2 + $0x1d4] sm:$0xf]  ;;  %v1568_v38 = vld [vmem:[#allocation2 + $0x148] sm:$0xf0] }
  0x46   :  { %1055 = vmatpush.bf16.msrb.mxu0 %v1671_v36  ;;  %v1579_v32 = vor.u32 %v1974_v23, %v1576_v24  ;;  %v1640_v36 = vld [vmem:[#allocation2 + $0x1d8] sm:$0xf0]  ;;  %v1440_v42 = vld [vmem:[#allocation2 + $0x48] sm:$0xf0]  ;;  %v1571_v44 = vor.u32 %v1972_v37, %v1568_v38  ;;  %v1988_v47 = vld [vmem:[#allocation2 + $0x1c4] sm:$0xf] }
  0x47   :  { %1074 = vmatpush.bf16.msrb.mxu1 %v1735_v29  ;;  %v1942_v29 = vld [vmem:[#allocation2 + $0x54] sm:$0xf]  ;;  %v1643_v43 = vor.u32 %v1990_v35, %v1640_v36  ;;  %v1504_v46 = vld [vmem:[#allocation2 + $0xc8] sm:$0xf0]  ;;  %v1390_v58 = vld [vmem:[%s2381_s0 + $0x50] sm:$0xf] }
  0x48   :  { %1093 = vmatpush.bf16.msrb.mxu2 %v1799_v25  ;;  %v2276_v25 = vor.u32 %v1923_v7, %v1366_v63  ;;  %v1451_v39 = vor.u32 %v1942_v29, %v1448_v30  ;;  %v1632_v48 = vld [vmem:[#allocation2 + $0x1c8] sm:$0xf0]  ;;  %v1970_v49 = vld [vmem:[#allocation2 + $0x134] sm:$0xf]  ;;  %v1930_v59 = vld [vmem:[%s2381_s0 + $0x6c] sm:$0xf0] }
  0x49   :  { %1112 = vmatpush.bf16.msrb.mxu3 %v1863_v40  ;;  %v1515_v40 = vor.u32 %v1958_v33, %v1512_v34  ;;  %v1938_v53 = vld [vmem:[#allocation2 + $0x34] sm:$0xf]  ;;  %v1635_v55 = vor.u32 %v1988_v47, %v1632_v48  ;;  %v1968_v13 = vld [vmem:[#allocation2 + $0x124] sm:$0xf]  ;;  %v1552_v14 = vld [vmem:[#allocation2 + $0x128] sm:$0xf0] }
  0x4a   :  { %1056 = vmatpush.bf16.msrb.mxu0 %v1663_v60  ;;  %v1926_v60 = vld [vmem:[%s2381_s0 + $0x54] sm:$0xf]  ;;  %v1927_v17 = vld [vmem:[%s2381_s0 + $0x5c] sm:$0xf]  ;;  %v1936_v23 = vld [vmem:[#allocation2 + $0x24] sm:$0xf] }
  0x4b   :  { %1075 = vmatpush.bf16.msrb.mxu1 %v1727_v45  ;;  %v1956_v45 = vld [vmem:[#allocation2 + $0xc4] sm:$0xf]  ;;  %v1392_v63 = vld [vmem:[%s2381_s0 + $0x70] sm:$0xf0]  ;;  %v1400_v18 = vld [vmem:[%s2381_s0 + $0x78] sm:$0xf0] }
  0x4c   :  { %1094 = vmatpush.bf16.msrb.mxu2 %v1791_v41  ;;  %v1940_v41 = vld [vmem:[#allocation2 + $0x44] sm:$0xf]  ;;  %v1507_v52 = vor.u32 %v1956_v45, %v1504_v46  ;;  %v1954_v8 = vld [vmem:[#allocation2 + $0xb4] sm:$0xf]  ;;  %v1424_v24 = vld [vmem:[#allocation2 + $0x28] sm:$0xf0]  ;;  %v2310_v33 = vor.u32 %v1926_v60, %v1392_v63  ;;  %v2314_v38 = vor.u32 %v1927_v17, %v1400_v18 }
  0x4d   :  { %1113 = vmatpush.bf16.msrb.mxu3 %v1855_v10  ;;  %1057 = vmatmul.bf16.vlgmr.msrb.gmra.mxu0 %v2272_v20  ;;  %v1443_v51 = vor.u32 %v1940_v41, %v1440_v42  ;;  %v1496_v10 = vld [vmem:[#allocation2 + $0xb8] sm:$0xf0]  ;;  %v1986_v11 = vld [vmem:[#allocation2 + $0x1b4] sm:$0xf]  ;;  %v1952_v29 = vld [vmem:[#allocation2 + $0xa4] sm:$0xf] }
  0x4e   :  { %1125 = vmatpush.bf16.msra.mxu0 %v1467_v12  ;;  %1076 = vmatmul.bf16.vlgmr.msrb.gmra.mxu1 %v2274_v21  ;;  %v1624_v12 = vld [vmem:[#allocation2 + $0x1b8] sm:$0xf0]  ;;  %v1499_v22 = vor.u32 %v1954_v8, %v1496_v10  ;;  %v1488_v30 = vld [vmem:[#allocation2 + $0xa8] sm:$0xf0]  ;;  %v1966_v35 = vld [vmem:[#allocation2 + $0x114] sm:$0xf] }
  0x4f   :  { %1144 = vmatpush.bf16.msra.mxu1 %v1531_v54  ;;  %1095 = vmatmul.bf16.vlgmr.msrb.gmra.mxu2 %v2276_v25  ;;  %v1432_v54 = vld [vmem:[#allocation2 + $0x38] sm:$0xf0]  ;;  %v1616_v34 = vld [vmem:[#allocation2 + $0x1a8] sm:$0xf0]  ;;  %v1934_v41 = vld [vmem:[#allocation2 + $0x14] sm:$0xf] }
  0x50   :  { %1163 = vmatpush.bf16.msra.mxu2 %v1595_v50  ;;  %1114 = vmatmul.bf16.vlgmr.msrb.gmra.mxu3 %v2278_v26  ;;  %v1560_v50 = vld [vmem:[#allocation2 + $0x138] sm:$0xf0]  ;;  %v1435_v19 = vor.u32 %v1938_v53, %v1432_v54  ;;  %v1950_v45 = vld [vmem:[#allocation2 + $0x94] sm:$0xf]  ;;  %v1980_v8 = vld [vmem:[#allocation2 + $0x184] sm:$0xf] }
  0x51   :  { %1182 = vmatpush.bf16.msra.mxu3 %v1659_v15  ;;  %v1563_v7 = vor.u32 %v1970_v49, %v1560_v50  ;;  %v1398_v15 = vld [vmem:[%s2381_s0 + $0x58] sm:$0xf]  ;;  %v1544_v36 = vld [vmem:[#allocation2 + $0x118] sm:$0xf0]  ;;  %v1982_v47 = vld [vmem:[#allocation2 + $0x194] sm:$0xf] }
  0x52   :  { %1126 = vmatpush.bf16.msra.mxu0 %v1459_v27  ;;  %v1627_v27 = vor.u32 %v1986_v11, %v1624_v12  ;;  %v1416_v42 = vld [vmem:[#allocation2 + $0x18] sm:$0xf0]  ;;  %v1964_v49 = vld [vmem:[#allocation2 + $0x104] sm:$0xf]  ;;  %v1536_v50 = vld [vmem:[#allocation2 + $0x108] sm:$0xf0] }
  0x53   :  { %1145 = vmatpush.bf16.msra.mxu1 %v1523_v28  ;;  %v1555_v28 = vor.u32 %v1968_v13, %v1552_v14  ;;  %v1480_v46 = vld [vmem:[#allocation2 + $0x98] sm:$0xf0]  ;;  %v1419_v53 = vor.u32 %v1934_v41, %v1416_v42  ;;  %v1539_v63 = vor.u32 %v1964_v49, %v1536_v50  ;;  %v1600_v10 = vld [vmem:[#allocation2 + $0x188] sm:$0xf0]  ;;  %v2010_v12 = vld [vmem:[#allocation2 + $0x274] sm:$0xf] }
  0x54   :  { %1164 = vmatpush.bf16.msra.mxu2 %v1587_v16  ;;  %v1931_v16 = vld [vmem:[%s2381_s0 + $0x74] sm:$0xf0]  ;;  %v1608_v48 = vld [vmem:[#allocation2 + $0x198] sm:$0xf0]  ;;  %v1483_v54 = vor.u32 %v1950_v45, %v1480_v46  ;;  %v2026_v14 = vld [vmem:[#allocation2 + $0x2f4] sm:$0xf] }
  0x55   :  { %1183 = vmatpush.bf16.msra.mxu3 %v1651_v31  ;;  %v1984_v31 = vld [vmem:[#allocation2 + $0x1a4] sm:$0xf]  ;;  %v2312_v37 = vor.u32 %v1931_v16, %v1398_v15  ;;  %v1611_v60 = vor.u32 %v1982_v47, %v1608_v48  ;;  %v1720_v13 = vld [vmem:[#allocation2 + $0x278] sm:$0xf0]  ;;  %v2058_v16 = vld [vmem:[#allocation2 + $0x3f4] sm:$0xf] }
  0x56   :  { %1127 = vmatpush.bf16.msra.mxu0 %v1451_v39  ;;  %v1427_v39 = vor.u32 %v1936_v23, %v1424_v24  ;;  %v1784_v15 = vld [vmem:[#allocation2 + $0x2f8] sm:$0xf0]  ;;  %v1840_v23 = vld [vmem:[#allocation2 + $0x368] sm:$0xf0]  ;;  %v1603_v24 = vor.u32 %v1980_v8, %v1600_v10  ;;  %v2038_v42 = vld [vmem:[#allocation2 + $0x354] sm:$0xf] }
  0x57   :  { %1146 = vmatpush.bf16.msra.mxu1 %v1515_v40  ;;  %v1491_v40 = vor.u32 %v1952_v29, %v1488_v30  ;;  %v1912_v17 = vld [vmem:[#allocation2 + $0x3f8] sm:$0xf0]  ;;  %v2008_v30 = vld [vmem:[#allocation2 + $0x264] sm:$0xf]  ;;  %v1904_v41 = vld [vmem:[#allocation2 + $0x3e8] sm:$0xf0] }
  0x58   :  { %1165 = vmatpush.bf16.msra.mxu2 %v1579_v32  ;;  %v2308_v32 = vor.u32 %v1930_v59, %v1390_v58  ;;  %v1408_v58 = vld [vmem:[#allocation2 + $0x8] sm:$0xf0]  ;;  %v1948_v59 = vld [vmem:[#allocation2 + $0x84] sm:$0xf]  ;;  %v1915_v29 = vor.u32 %v2058_v16, %v1912_v17  ;;  %v1704_v45 = vld [vmem:[#allocation2 + $0x258] sm:$0xf0] }
  0x59   :  { %1184 = vmatpush.bf16.msra.mxu3 %v1643_v43  ;;  %v1619_v43 = vor.u32 %v1984_v31, %v1616_v34  ;;  %v1712_v31 = vld [vmem:[#allocation2 + $0x268] sm:$0xf0]  ;;  %v2022_v48 = vld [vmem:[#allocation2 + $0x2d4] sm:$0xf]  ;;  %v1768_v49 = vld [vmem:[#allocation2 + $0x2d8] sm:$0xf0] }
  0x5a   :  { %1128 = vmatpush.bf16.msra.mxu0 %v1443_v51  ;;  %v2042_v51 = vld [vmem:[#allocation2 + $0x374] sm:$0xf]  ;;  %v1760_v8 = vld [vmem:[#allocation2 + $0x2c8] sm:$0xf0]  ;;  %v1752_v17 = vld [vmem:[#allocation2 + $0x2b8] sm:$0xf0] }
  0x5b   :  { %1147 = vmatpush.bf16.msra.mxu1 %v1507_v52  ;;  %v1848_v52 = vld [vmem:[#allocation2 + $0x378] sm:$0xf0]  ;;  %v2018_v16 = vld [vmem:[#allocation2 + $0x2b4] sm:$0xf] }
  0x5c   :  { %1166 = vmatpush.bf16.msra.mxu2 %v1571_v44  ;;  %v1547_v44 = vor.u32 %v1966_v35, %v1544_v36  ;;  %v1851_v11 = vor.u32 %v2042_v51, %v1848_v52  ;;  %v2024_v35 = vld [vmem:[#allocation2 + $0x2e4] sm:$0xf]  ;;  %v1776_v36 = vld [vmem:[#allocation2 + $0x2e8] sm:$0xf0]  ;;  %v2054_v52 = vld [vmem:[#allocation2 + $0x3d4] sm:$0xf] }
  0x5d   :  { %1185 = vmatpush.bf16.msra.mxu3 %v1635_v55  ;;  %1062 = vmatmul.bf16.gmra.mxu0 %v2308_v32  ;;  %v1932_v55 = vld [vmem:[#allocation2 + $0x4] sm:$0xf]  ;;  %v1779_v46 = vor.u32 %v2024_v35, %v1776_v36  ;;  %v1744_v35 = vld [vmem:[#allocation2 + $0x2a8] sm:$0xf0] }
  0x5e   :  { %1129 = vmatpush.bf16.msra.mxu0 %v1435_v19  ;;  %1081 = vmatmul.bf16.gmra.mxu1 %v2310_v33  ;;  %v1411_v18 = vor.u32 %v1932_v55, %v1408_v58  ;;  %v1824_v55 = vld [vmem:[#allocation2 + $0x348] sm:$0xf0]  ;;  %v2004_v58 = vld [vmem:[#allocation2 + $0x244] sm:$0xf] }
  0x5f   :  { %1148 = vmatpush.bf16.msra.mxu1 %v1499_v22  ;;  %1100 = vmatmul.bf16.gmra.mxu2 %v2312_v37  ;;  %v2040_v22 = vld [vmem:[#allocation2 + $0x364] sm:$0xf] }
  0x60   :  { %1167 = vmatpush.bf16.msra.mxu2 %v1563_v7  ;;  %1119 = vmatmul.bf16.gmra.mxu3 %v2314_v38  ;;  %v1472_v7 = vld [vmem:[#allocation2 + $0x88] sm:$0xf0]  ;;  %v1843_v34 = vor.u32 %v2040_v22, %v1840_v23  ;;  %v2050_v22 = vld [vmem:[#allocation2 + $0x3b4] sm:$0xf]  ;;  %v1880_v23 = vld [vmem:[#allocation2 + $0x3b8] sm:$0xf0] }
  0x61   :  { %1186 = vmatpush.bf16.msra.mxu3 %v1627_v27  ;;  %v1475_v19 = vor.u32 %v1948_v59, %v1472_v7  ;;  %v1723_v27 = vor.u32 %v2010_v12, %v1720_v13  ;;  %v1696_v59 = vld [vmem:[#allocation2 + $0x248] sm:$0xf0]  ;;  %v2020_v7 = vld [vmem:[#allocation2 + $0x2c4] sm:$0xf]  ;;  %v1816_v13 = vld [vmem:[#allocation2 + $0x338] sm:$0xf0] }
  0x62   :  { %1130 = vmatpush.bf16.msra.mxu0 %v1427_v39  ;;  %v1715_v39 = vor.u32 %v2008_v30, %v1712_v31  ;;  %v1888_v12 = vld [vmem:[#allocation2 + $0x3c8] sm:$0xf0]  ;;  %v1755_v30 = vor.u32 %v2018_v16, %v1752_v17  ;;  %v1883_v31 = vor.u32 %v2050_v22, %v1880_v23 }
  0x63   :  { %1149 = vmatpush.bf16.msra.mxu1 %v1491_v40  ;;  %v2056_v40 = vld [vmem:[#allocation2 + $0x3e4] sm:$0xf] }
  0x64   :  { %1168 = vmatpush.bf16.msra.mxu2 %v1555_v28  ;;  %v1787_v28 = vor.u32 %v2026_v14, %v1784_v15  ;;  %v1907_v47 = vor.u32 %v2056_v40, %v1904_v41  ;;  %v2002_v14 = vld [vmem:[#allocation2 + $0x234] sm:$0xf]  ;;  %v1688_v15 = vld [vmem:[#allocation2 + $0x238] sm:$0xf0]  ;;  %v2048_v40 = vld [vmem:[#allocation2 + $0x3a4] sm:$0xf] }
  0x65   :  { %1187 = vmatpush.bf16.msra.mxu3 %v1619_v43  ;;  %v1832_v43 = vld [vmem:[#allocation2 + $0x358] sm:$0xf0]  ;;  %v1872_v41 = vld [vmem:[#allocation2 + $0x3a8] sm:$0xf0] }
  0x66   :  { %1131 = vmatpush.bf16.msra.mxu0 %v1419_v53  ;;  %v1835_v50 = vor.u32 %v2038_v42, %v1832_v43  ;;  %v1896_v53 = vld [vmem:[#allocation2 + $0x3d8] sm:$0xf0]  ;;  %v2030_v42 = vld [vmem:[#allocation2 + $0x314] sm:$0xf] }
  0x67   :  { %1150 = vmatpush.bf16.msra.mxu1 %v1483_v54  ;;  %v2036_v54 = vld [vmem:[#allocation2 + $0x344] sm:$0xf]  ;;  %v1800_v43 = vld [vmem:[#allocation2 + $0x318] sm:$0xf0] }
  0x68   :  { %1169 = vmatpush.bf16.msra.mxu2 %v1547_v44  ;;  %v2006_v44 = vld [vmem:[#allocation2 + $0x254] sm:$0xf]  ;;  %v1827_v10 = vor.u32 %v2036_v54, %v1824_v55  ;;  %v2028_v54 = vld [vmem:[#allocation2 + $0x304] sm:$0xf]  ;;  %v1792_v55 = vld [vmem:[#allocation2 + $0x308] sm:$0xf0] }
  0x69   :  { %1188 = vmatpush.bf16.msra.mxu3 %v1611_v60  ;;  %v1707_v51 = vor.u32 %v2006_v44, %v1704_v45  ;;  %v1771_v60 = vor.u32 %v2022_v48, %v1768_v49  ;;  %v1998_v44 = vld [vmem:[#allocation2 + $0x214] sm:$0xf]  ;;  %v1672_v45 = vld [vmem:[#allocation2 + $0x218] sm:$0xf0] }
  0x6a   :  { %1132 = vmatpush.bf16.msra.mxu0 %v1411_v18  ;;  %v2014_v48 = vld [vmem:[#allocation2 + $0x294] sm:$0xf]  ;;  %v1736_v49 = vld [vmem:[#allocation2 + $0x298] sm:$0xf0] }
  0x6b   :  { %1151 = vmatpush.bf16.msra.mxu1 %v1475_v19  ;;  %v1691_v19 = vor.u32 %v2002_v14, %v1688_v15 }
  0x6c   :  { %1170 = vmatpush.bf16.msra.mxu2 %v1539_v63  ;;  %v1899_v63 = vor.u32 %v2054_v52, %v1896_v53  ;;  %v2046_v52 = vld [vmem:[#allocation2 + $0x394] sm:$0xf]  ;;  %v1864_v53 = vld [vmem:[#allocation2 + $0x398] sm:$0xf0] }
  0x6d   :  { %1189 = vmatpush.bf16.msra.mxu3 %v1603_v24  ;;  %1133 = vmatmul.bf16.vlgmr.msra.gmra.mxu0 %v2200_v56  ;;  %v2052_v56 = vld [vmem:[#allocation2 + $0x3c4] sm:$0xf] }
  0x6e   :  { %1201 = vmatpush.bf16.msrb.mxu0 %v1723_v27  ;;  %1152 = vmatmul.bf16.vlgmr.msra.gmra.mxu1 %v2202_v61  ;;  %v2034_v61 = vld [vmem:[#allocation2 + $0x334] sm:$0xf]  ;;  %v2032_v24 = vld [vmem:[#allocation2 + $0x324] sm:$0xf]  ;;  %v1808_v27 = vld [vmem:[#allocation2 + $0x328] sm:$0xf0] }
  0x6f   :  { %1220 = vmatpush.bf16.msrb.mxu1 %v1787_v28  ;;  %1171 = vmatmul.bf16.vlgmr.msra.gmra.mxu2 %v2204_v62  ;;  %v1763_v62 = vor.u32 %v2020_v7, %v1760_v8  ;;  %v1819_v18 = vor.u32 %v2034_v61, %v1816_v13  ;;  %v2000_v28 = vld [vmem:[#allocation2 + $0x224] sm:$0xf]  ;;  %v1811_v36 = vor.u32 %v2032_v24, %v1808_v27 }
  0x70   :  { %1239 = vmatpush.bf16.msrb.mxu2 %v1851_v11  ;;  %1190 = vmatmul.bf16.vlgmr.msra.gmra.mxu3 %v2206_v5  ;;  %v1699_v11 = vor.u32 %v2004_v58, %v1696_v59  ;;  %v1891_v5 = vor.u32 %v2052_v56, %v1888_v12  ;;  %v1996_v58 = vld [vmem:[#allocation2 + $0x204] sm:$0xf]  ;;  %v1664_v59 = vld [vmem:[#allocation2 + $0x208] sm:$0xf0]  ;;  %v1795_v8 = vor.u32 %v2028_v54, %v1792_v55 }
  0x71   :  { %1258 = vmatpush.bf16.msrb.mxu3 %v1915_v29  ;;  %v1680_v29 = vld [vmem:[#allocation2 + $0x228] sm:$0xf0]  ;;  %v2012_v7 = vld [vmem:[#allocation2 + $0x284] sm:$0xf] }
  0x72   :  { %1202 = vmatpush.bf16.msrb.mxu0 %v1715_v39  ;;  %v1683_v39 = vor.u32 %v2000_v28, %v1680_v29  ;;  %v1856_v56 = vld [vmem:[#allocation2 + $0x388] sm:$0xf0] }
  0x73   :  { %1221 = vmatpush.bf16.msrb.mxu1 %v1779_v46 }
  0x74   :  { %1240 = vmatpush.bf16.msrb.mxu2 %v1843_v34  ;;  %v2016_v34 = vld [vmem:[#allocation2 + $0x2a4] sm:$0xf] }
  0x75   :  { %1259 = vmatpush.bf16.msrb.mxu3 %v1907_v47  ;;  %v1747_v46 = vor.u32 %v2016_v34, %v1744_v35  ;;  %v1875_v47 = vor.u32 %v2048_v40, %v1872_v41 }
  0x76   :  { %1203 = vmatpush.bf16.msrb.mxu0 %v1707_v51  ;;  %v1675_v51 = vor.u32 %v1998_v44, %v1672_v45 }
  0x77   :  { %1222 = vmatpush.bf16.msrb.mxu1 %v1771_v60  ;;  %v1739_v60 = vor.u32 %v2014_v48, %v1736_v49 }
  0x78   :  { %1241 = vmatpush.bf16.msrb.mxu2 %v1835_v50  ;;  %v1803_v50 = vor.u32 %v2030_v42, %v1800_v43 }
  0x79   :  { %1260 = vmatpush.bf16.msrb.mxu3 %v1899_v63  ;;  %v1867_v63 = vor.u32 %v2046_v52, %v1864_v53 }
  0x7a   :  { %1204 = vmatpush.bf16.msrb.mxu0 %v1699_v11  ;;  %v1728_v11 = vld [vmem:[#allocation2 + $0x288] sm:$0xf0] }
  0x7b   :  { %1223 = vmatpush.bf16.msrb.mxu1 %v1763_v62 }
  0x7c   :  { %1242 = vmatpush.bf16.msrb.mxu2 %v1827_v10  ;;  %v1667_v10 = vor.u32 %v1996_v58, %v1664_v59 }
  0x7d   :  { %1261 = vmatpush.bf16.msrb.mxu3 %v1891_v5  ;;  %1138 = vmatmul.bf16.gmra.mxu0 %v2236_v57  ;;  %v2044_v57 = vld [vmem:[#allocation2 + $0x384] sm:$0xf] }
  0x7e   :  { %1205 = vmatpush.bf16.msrb.mxu0 %v1691_v19  ;;  %1157 = vmatmul.bf16.gmra.mxu1 %v2238_v4  ;;  %v1731_v4 = vor.u32 %v2012_v7, %v1728_v11  ;;  %v1859_v12 = vor.u32 %v2044_v57, %v1856_v56 }
  0x7f   :  { %1224 = vmatpush.bf16.msrb.mxu1 %v1755_v30  ;;  %1176 = vmatmul.bf16.gmra.mxu2 %v2240_v6  ;;  %v2336_v6 = vld [vmem:[#allocation4] sm:$0x3] }
  0x80   :  { %1243 = vmatpush.bf16.msrb.mxu2 %v1819_v18  ;;  %1195 = vmatmul.bf16.gmra.mxu3 %v2242_v9  ;;  %v249_v9 = vperm.slane %v2336_v6, 0 }
  0x81   :  { %1262 = vmatpush.bf16.msrb.mxu3 %v1883_v31 }
  0x82   :  { %1206 = vmatpush.bf16.msrb.mxu0 %v1683_v39 }
  0x83   :  { %1225 = vmatpush.bf16.msrb.mxu1 %v1747_v46 }
  0x84   :  { %1244 = vmatpush.bf16.msrb.mxu2 %v1811_v36 }
  0x85   :  { %1263 = vmatpush.bf16.msrb.mxu3 %v1875_v47 }
  0x86   :  { %1207 = vmatpush.bf16.msrb.mxu0 %v1675_v51 }
  0x87   :  { %1226 = vmatpush.bf16.msrb.mxu1 %v1739_v60 }
  0x88   :  { %1245 = vmatpush.bf16.msrb.mxu2 %v1803_v50 }
  0x89   :  { %1264 = vmatpush.bf16.msrb.mxu3 %v1867_v63 }
  0x8a   :  { %1208 = vmatpush.bf16.msrb.mxu0 %v1667_v10 }
  0x8b   :  { %1227 = vmatpush.bf16.msrb.mxu1 %v1731_v4 }
  0x8c   :  { %1246 = vmatpush.bf16.msrb.mxu2 %v1795_v8 }
  0x8d   :  { %1265 = vmatpush.bf16.msrb.mxu3 %v1859_v12  ;;  %1209 = vmatmul.bf16.vlgmr.msrb.gmra.mxu0 %v2272_v20 }
  0x8e   :  { %1228 = vmatmul.bf16.vlgmr.msrb.gmra.mxu1 %v2274_v21 }
  0x8f   :  { %1247 = vmatmul.bf16.vlgmr.msrb.gmra.mxu2 %v2276_v25 }
  0x90   :  { %1266 = vmatmul.bf16.vlgmr.msrb.gmra.mxu3 %v2278_v26 }
  0x9d   :  { %1214 = vmatmul.bf16.gmra.mxu0 %v2308_v32 }
  0x9e   :  { %1233 = vmatmul.bf16.gmra.mxu1 %v2310_v33 }
  0x9f   :  { %1252 = vmatmul.bf16.gmra.mxu2 %v2312_v37 }
  0xa0   :  { %1271 = vmatmul.bf16.gmra.mxu3 %v2314_v38 }
  0xaa   :  { %v982_v61 = vpop.f32.mrf.mxu0 }
  0xab   :  { %v983_v20 = vadd.f32 %v982_v61, %v249_v9  ;;  %v1001_v13 = vpop.f32.mrf.mxu1 }
  0xad   :  { %v1002_v21 = vadd.f32 %v1001_v13, %v983_v20 }
  0xb2   :  { %v1020_v14 = vpop.f32.mrf.mxu2  ;;  %v984_v26 = vpop.f32.mrf.mxu0 }
  0xb3   :  { %v1021_v25 = vadd.f32 %v1020_v14, %v1002_v21  ;;  %v1039_v15 = vpop.f32.mrf.mxu3  ;;  %v985_v62 = vadd.f32 %v984_v26, %v249_v9  ;;  %v1003_v32 = vpop.f32.mrf.mxu1 }
  0xb5   :  { %v1040_v5 = vadd.f32 %v1039_v15, %v1021_v25  ;;  %v1004_v33 = vadd.f32 %v1003_v32, %v985_v62 }
  0xba   :  { %v1022_v16 = vpop.f32.mrf.mxu2  ;;  %v987_v38 = vpop.f32.mrf.mxu0 }
  0xbb   :  { %v1023_v37 = vadd.f32 %v1022_v16, %v1004_v33  ;;  %v1041_v17 = vpop.f32.mrf.mxu3  ;;  %v988_v18 = vadd.f32 %v987_v38, %v249_v9  ;;  %v1006_v19 = vpop.f32.mrf.mxu1 }
  0xbd   :  { %v1042_v22 = vadd.f32 %v1041_v17, %v1023_v37  ;;  %v1007_v23 = vadd.f32 %v1006_v19, %v988_v18  ;;  %v250_v37 = vperm.slane %v2336_v6, 1  ;;  %v1277_v6 = vld [vmem:[%s2384_s3] sm:$0xff] }
  0xc2   :  { %v1025_v24 = vpop.f32.mrf.mxu2  ;;  %v989_v29 = vpop.f32.mrf.mxu0 }
  0xc3   :  { %v1026_v27 = vadd.f32 %v1025_v24, %v1007_v23  ;;  %v1044_v28 = vpop.f32.mrf.mxu3  ;;  %v990_v30 = vadd.f32 %v989_v29, %v249_v9  ;;  %v1008_v31 = vpop.f32.mrf.mxu1 }
  0xc5   :  { %v1045_v34 = vadd.f32 %v1044_v28, %v1026_v27  ;;  %v1009_v35 = vadd.f32 %v1008_v31, %v990_v30 }
  0xca   :  { %v1027_v36 = vpop.f32.mrf.mxu2  ;;  %v1058_v41 = vpop.f32.mrf.mxu0 }
  0xcb   :  { %v1028_v39 = vadd.f32 %v1027_v36, %v1009_v35  ;;  %v1046_v40 = vpop.f32.mrf.mxu3  ;;  %v1077_v42 = vpop.f32.mrf.mxu1  ;;  %v1059_v44 = vadd.f32 %v1058_v41, %v1040_v5 }
  0xcd   :  { %v1047_v43 = vadd.f32 %v1046_v40, %v1028_v39  ;;  %v1078_v45 = vadd.f32 %v1077_v42, %v1059_v44 }
  0xd2   :  { %v1096_v46 = vpop.f32.mrf.mxu2  ;;  %v1060_v49 = vpop.f32.mrf.mxu0 }
  0xd3   :  { %v1115_v47 = vpop.f32.mrf.mxu3  ;;  %v1097_v48 = vadd.f32 %v1096_v46, %v1078_v45  ;;  %v1079_v50 = vpop.f32.mrf.mxu1  ;;  %v1061_v51 = vadd.f32 %v1060_v49, %v1042_v22 }
  0xd5   :  { %v1116_v52 = vadd.f32 %v1115_v47, %v1097_v48  ;;  %v1080_v53 = vadd.f32 %v1079_v50, %v1061_v51  ;;  %v1294_v50 = vunpack.c.h.bf16 %v2156_v0 }
  0xda   :  { %v1098_v54 = vpop.f32.mrf.mxu2  ;;  %v1063_v59 = vpop.f32.mrf.mxu0 }
  0xdb   :  { %v1117_v55 = vpop.f32.mrf.mxu3  ;;  %v1099_v58 = vadd.f32 %v1098_v54, %v1080_v53  ;;  %v1082_v60 = vpop.f32.mrf.mxu1  ;;  %v1064_v63 = vadd.f32 %v1063_v59, %v1045_v34  ;;  %v1281_v53 = vunpack.c.l.bf16 %v1277_v6  ;;  %v1282_v59 = vunpack.c.h.bf16 %v1277_v6 }
  0xdd   :  { %v2339_v7 = vadd.f32 %v1117_v55, %v1099_v58  ;;  %v1083_v8 = vadd.f32 %v1082_v60, %v1064_v63 }
  0xe2   :  { %v1101_v10 = vpop.f32.mrf.mxu2  ;;  %v1065_v56 = vpop.f32.mrf.mxu0 }
  0xe3   :  { %v1120_v11 = vpop.f32.mrf.mxu3  ;;  %v1102_v57 = vadd.f32 %v1101_v10, %v1083_v8  ;;  %v1084_v4 = vpop.f32.mrf.mxu1  ;;  %v1066_v12 = vadd.f32 %v1065_v56, %v1047_v43  ;;  %v1293_v43 = vunpack.c.l.bf16 %v2156_v0  ;;  %v1295_v10 = vunpack.c.l.bf16 %v2161_v1 }
  0xe5   :  { %v2341_v9 = vadd.f32 %v1120_v11, %v1102_v57  ;;  %v1085_v61 = vadd.f32 %v1084_v4, %v1066_v12  ;;  %v1301_v55 = vmul.f32 %v1293_v43, %v1116_v52  ;;  %v1278_v57 = vld [vmem:[%s2384_s3 + $0x8] sm:$0xff] }
  0xe7   :  { %v1309_v11 = vadd.f32 %v1301_v55, %v1281_v53 }
  0xea   :  { %v1103_v20 = vpop.f32.mrf.mxu2  ;;  %v1134_v14 = vpop.f32.mrf.mxu0 }
  0xeb   :  { %v1122_v13 = vpop.f32.mrf.mxu3  ;;  %v1104_v21 = vadd.f32 %v1103_v20, %v1085_v61  ;;  %v1153_v25 = vpop.f32.mrf.mxu1  ;;  %v1135_v18 = vadd.f32 %v1134_v14, %v250_v37 }
  0xed   :  { %v2343_v15 = vadd.f32 %v1122_v13, %v1104_v21  ;;  %v1154_v23 = vadd.f32 %v1153_v25, %v1135_v18  ;;  %v1296_v21 = vunpack.c.h.bf16 %v2161_v1  ;;  %v1283_v25 = vunpack.c.l.bf16 %v1278_v57  ;;  %v1279_v1 = vld [vmem:[%s2384_s3 + $0x10] sm:$0xff] }
  0xee   :  { %v1297_v18 = vunpack.c.l.bf16 %v2166_v2 }
  0xf2   :  { %v1172_v26 = vpop.f32.mrf.mxu2  ;;  %v1136_v32 = vpop.f32.mrf.mxu0 }
  0xf3   :  { %v1191_v62 = vpop.f32.mrf.mxu3  ;;  %v1155_v5 = vpop.f32.mrf.mxu1  ;;  %v1173_v28 = vadd.f32 %v1172_v26, %v1154_v23  ;;  %v1137_v29 = vadd.f32 %v1136_v32, %v250_v37  ;;  %v1303_v26 = vmul.f32 %v1295_v10, %v2339_v7 }
  0xf5   :  { %v1192_v34 = vadd.f32 %v1191_v62, %v1173_v28  ;;  %v1156_v39 = vadd.f32 %v1155_v5, %v1137_v29  ;;  %v1284_v5 = vunpack.c.h.bf16 %v1278_v57  ;;  %v1298_v29 = vunpack.c.h.bf16 %v2166_v2  ;;  %v1280_v2 = vld [vmem:[%s2384_s3 + $0x18] sm:$0xff] }
  0xf6   :  { %v1288_v53 = vunpack.c.h.bf16 %v1280_v2 }
  0xfa   :  { %v1174_v33 = vpop.f32.mrf.mxu2  ;;  %v1139_v17 = vpop.f32.mrf.mxu0 }
  0xfb   :  { %v1193_v16 = vpop.f32.mrf.mxu3  ;;  %v1158_v38 = vpop.f32.mrf.mxu1  ;;  %v1175_v41 = vadd.f32 %v1174_v33, %v1156_v39  ;;  %v1140_v42 = vadd.f32 %v1139_v17, %v250_v37  ;;  %v1286_v39 = vunpack.c.h.bf16 %v1279_v1 }
  0xfd   :  { %v1194_v47 = vadd.f32 %v1193_v16, %v1175_v41  ;;  %v1159_v48 = vadd.f32 %v1158_v38, %v1140_v42  ;;  %v1311_v38 = vadd.f32 %v1303_v26, %v1283_v25 }
 0x102   :  { %v1177_v19 = vpop.f32.mrf.mxu2  ;;  %v1141_v24 = vpop.f32.mrf.mxu0 }
 0x103   :  { %v1196_v22 = vpop.f32.mrf.mxu3  ;;  %v1160_v27 = vpop.f32.mrf.mxu1  ;;  %v1178_v63 = vadd.f32 %v1177_v19, %v1159_v48  ;;  %v1142_v56 = vadd.f32 %v1141_v24, %v250_v37 }
 0x105   :  { %v1197_v20 = vadd.f32 %v1196_v22, %v1178_v63  ;;  %v1161_v62 = vadd.f32 %v1160_v27, %v1142_v56 }
 0x10a   :  { %v1179_v30 = vpop.f32.mrf.mxu2  ;;  %v1210_v35 = vpop.f32.mrf.mxu0 }
 0x10b   :  { %v1198_v31 = vpop.f32.mrf.mxu3  ;;  %v1229_v36 = vpop.f32.mrf.mxu1  ;;  %v1211_v40 = vadd.f32 %v1210_v35, %v1192_v34  ;;  %v1180_v37 = vadd.f32 %v1179_v30, %v1161_v62  ;;  %v1285_v35 = vunpack.c.l.bf16 %v1279_v1  ;;  %v1305_v30 = vmul.f32 %v1297_v18, %v2341_v9 }
 0x10d   :  { %v1230_v44 = vadd.f32 %v1229_v36, %v1211_v40  ;;  %v1199_v24 = vadd.f32 %v1198_v31, %v1180_v37  ;;  %v1313_v6 = vadd.f32 %v1305_v30, %v1285_v35  ;;  %v1299_v31 = vunpack.c.l.bf16 %v2171_v3 }
 0x112   :  { %v1248_v45 = vpop.f32.mrf.mxu2  ;;  %v1212_v51 = vpop.f32.mrf.mxu0 }
 0x113   :  { %v1267_v46 = vpop.f32.mrf.mxu3  ;;  %v1249_v49 = vadd.f32 %v1248_v45, %v1230_v44  ;;  %v1231_v54 = vpop.f32.mrf.mxu1  ;;  %v1213_v60 = vadd.f32 %v1212_v51, %v1194_v47  ;;  %v1300_v47 = vunpack.c.h.bf16 %v2171_v3 }
 0x115   :  { %v1268_v58 = vadd.f32 %v1267_v46, %v1249_v49  ;;  %v1232_v12 = vadd.f32 %v1231_v54, %v1213_v60  ;;  %v1287_v49 = vunpack.c.l.bf16 %v1280_v2 }
 0x117   :  { %v1302_v8 = vmul.f32 %v1294_v50, %v1268_v58  ;;  %v1307_v50 = vmul.f32 %v1299_v31, %v2343_v15 }
 0x119   :  { %v1310_v4 = vadd.f32 %v1302_v8, %v1282_v59  ;;  %v1315_v55 = vadd.f32 %v1307_v50, %v1287_v49 }
 0x11a   :  { %v1250_v0 = vpop.f32.mrf.mxu2  ;;  %v1215_v14 = vpop.f32.mrf.mxu0 }
 0x11b   :  { %v1269_v61 = vpop.f32.mrf.mxu3  ;;  %v1317_v13 = vpack.c.bf16 %v1310_v4, %v1309_v11  ;;  %v1251_v52 = vadd.f32 %v1250_v0, %v1232_v12  ;;  %v1216_v33 = vadd.f32 %v1215_v14, %v1197_v20  ;;  %v1234_v16 = vpop.f32.mrf.mxu1 }
 0x11d   :  { %1321 = vst [vmem:[%s2386_s5] sm:$0xff] %v1317_v13  ;;  %v1270_v32 = vadd.f32 %v1269_v61, %v1251_v52  ;;  %v1235_v7 = vadd.f32 %v1234_v16, %v1216_v33 }
 0x11f   :  { %v1304_v17 = vmul.f32 %v1296_v21, %v1270_v32 }
 0x121   :  { %v1312_v19 = vadd.f32 %v1304_v17, %v1284_v5 }
 0x122   :  { %v1253_v22 = vpop.f32.mrf.mxu2  ;;  %v1217_v34 = vpop.f32.mrf.mxu0 }
 0x123   :  { %v1272_v23 = vpop.f32.mrf.mxu3  ;;  %v1318_v27 = vpack.c.bf16 %v1312_v19, %v1311_v38  ;;  %v1254_v28 = vadd.f32 %v1253_v22, %v1235_v7  ;;  %v1218_v40 = vadd.f32 %v1217_v34, %v1199_v24  ;;  %v1236_v42 = vpop.f32.mrf.mxu1 }
 0x125   :  { %1322 = vst [vmem:[%s2386_s5 + $0x8] sm:$0xff] %v1318_v27  ;;  %v1273_v36 = vadd.f32 %v1272_v23, %v1254_v28  ;;  %v1237_v44 = vadd.f32 %v1236_v42, %v1218_v40 }
 0x127   :  { %v1306_v41 = vmul.f32 %v1298_v29, %v1273_v36 }
 0x129   :  { %v1314_v43 = vadd.f32 %v1306_v41, %v1286_v39 }
 0x12a   :  { %v1255_v45 = vpop.f32.mrf.mxu2 }
 0x12b   :  { %v1319_v9 = vpack.c.bf16 %v1314_v43, %v1313_v6  ;;  %v1256_v46 = vadd.f32 %v1255_v45, %v1237_v44  ;;  %v1274_v48 = vpop.f32.mrf.mxu3 }
 0x12d   :  { %1323 = vst [vmem:[%s2386_s5 + $0x10] sm:$0xff] %v1319_v9  ;;  %v1275_v51 = vadd.f32 %v1274_v48, %v1256_v46 }
 0x12f   :  { %v1308_v54 = vmul.f32 %v1300_v47, %v1275_v51 }
 0x131   :  { %v1316_v58 = vadd.f32 %v1308_v54, %v1288_v53 }
 0x133   :  { %v1320_v59 = vpack.c.bf16 %v1316_v58, %v1315_v55 }
 0x135   :  { %1324 = vst [vmem:[%s2386_s5 + $0x18] sm:$0xff] %v1320_v59 }
 0x136   :  { %1329 = vsyncpa [#allocation3], 1 }
 0x137   :  { %1330 = vsyncpa [#allocation5], 1 }

// kernel: _lambda_.22
= control target key start
LH: loop header
LB: loop body
LE: loop exit
PB: predicated region body
PF: predicated region fallthrough
CT: control target
= control target key end

     0   :  { %10 = vsyncpa [#allocation3], 0  ;;  %s816_s0 = inlined_call_operand.vmem [shape: bf16[32,256], index: 0, kind: input, shape index: {}]   ;;  %s817_s1 = inlined_call_operand.hbm [shape: bf16[256,256], index: 1, kind: input, shape index: {}]   ;;  %s818_s2 = inlined_call_operand.hbm [shape: f32[1,256], index: 2, kind: input, shape index: {}]   ;;  %s819_s3 = inlined_call_operand.vmem [shape: bf16[32,256], index: 3, kind: input, shape index: {}]   ;;  %s820_s4 = inlined_call_operand.vmem [shape: bf16[32,1536], index: 4, kind: input, shape index: {}]   ;;  %s821_s5 = inlined_call_operand.vmem [shape: bf16[32,256], index: 5, kind: output, shape index: {}]  }
   0x1   :  { %s18_s20 = sshll.u32 %s817_s1, 4  ;;  %s19_s20 = int_to_ptr.hbm [resolvable:$true] %s18_s20 }
   0x2   :  { %11 = vsyncpa [#allocation5], 0  ;;  %v740_v0 = vld [vmem:[%s820_s4 + $0x10] sm:$0xff]  ;;  %v745_v1 = vld [vmem:[%s820_s4 + $0x40] sm:$0xff]  ;;  %s700_s25 = smov [#allocation2]   ;;  %s32_s7 = sshll.u32 %s818_s2, 4  ;;  %s33_s7 = int_to_ptr.hbm [resolvable:$true] %s32_s7 }
   0x3   :  { %s20_s26 = sshll.u32 %s700_s25, 4  ;;  %v750_v2 = vld [vmem:[%s820_s4 + $0x70] sm:$0xff]  ;;  %v755_v3 = vld [vmem:[%s820_s4 + $0xa0] sm:$0xff]  ;;  %s701_s8 = smov 128   ;;  %s21_s26 = int_to_ptr.vmem [resolvable:$true] %s20_s26 }
   0x4   :  { %s702_s9 = smov 8   ;;  %s703_s10 = smov [#allocation4]  }
   0x5   :  { %26 = dma.hbm_to_vmem [thread:$0]  %s19_s20, 4096, %s21_s26, [#allocation3], %s701_s8, %s701_s8, %s702_s9  }
   0x6   :  { %s34_s11 = sshll.u32 %s703_s10, 4  ;;  %s35_s11 = int_to_ptr.vmem [resolvable:$true] %s34_s11 }
   0x7   :  { %37 = dma.hbm_to_vmem [thread:$0]  %s33_s7, 32, %s35_s11, [#allocation5]  }
   0x8   :  { %696 = dma.done.wait [#allocation3], 4096  }
   0x9   :  { %697 = vsyncadd [#allocation3], 4294963200 }
   0xa   :  { %698 = dma.done.wait [#allocation5], 32  }
   0xb   :  { %699 = vsyncadd [#allocation5], 4294967264  ;;  %v538_v4 = vld [vmem:[#allocation2 + $0x70] sm:$0xf]  ;;  %v627_v5 = vld [vmem:[#allocation2 + $0x74] sm:$0xf0] }
   0xc   :  { %v602_v6 = vld [vmem:[#allocation2 + $0xf0] sm:$0xf]  ;;  %v539_v7 = vor.u32 %v627_v5, %v538_v4  ;;  %v643_v8 = vld [vmem:[#allocation2 + $0xf4] sm:$0xf0]  ;;  %v626_v9 = vld [vmem:[#allocation2 + $0x74] sm:$0xf] }
   0xd   :  { %v540_v10 = vld [vmem:[#allocation2 + $0x78] sm:$0xf0]  ;;  %v603_v11 = vor.u32 %v643_v8, %v602_v6  ;;  %v642_v13 = vld [vmem:[#allocation2 + $0xf4] sm:$0xf]  ;;  %v530_v15 = vld [vmem:[#allocation2 + $0x60] sm:$0xf] }
   0xe   :  { %v543_v12 = vor.u32 %v626_v9, %v540_v10  ;;  %v604_v14 = vld [vmem:[#allocation2 + $0xf8] sm:$0xf0]  ;;  %325 = vmatpush.bf16.msra.mxu0 %v539_v7  ;;  %v625_v17 = vld [vmem:[#allocation2 + $0x64] sm:$0xf0]  ;;  %v594_v18 = vld [vmem:[#allocation2 + $0xe0] sm:$0xf] }
   0xf   :  { %v607_v16 = vor.u32 %v642_v13, %v604_v14  ;;  %v641_v19 = vld [vmem:[#allocation2 + $0xe4] sm:$0xf0]  ;;  %344 = vmatpush.bf16.msra.mxu1 %v603_v11  ;;  %v531_v20 = vor.u32 %v625_v17, %v530_v15  ;;  %v624_v22 = vld [vmem:[#allocation2 + $0x64] sm:$0xf]  ;;  %v532_v23 = vld [vmem:[#allocation2 + $0x68] sm:$0xf0] }
  0x10   :  { %363 = vmatpush.bf16.msra.mxu2 %v543_v12  ;;  %v595_v21 = vor.u32 %v641_v19, %v594_v18  ;;  %v640_v24 = vld [vmem:[#allocation2 + $0xe4] sm:$0xf]  ;;  %v535_v25 = vor.u32 %v624_v22, %v532_v23  ;;  %v596_v26 = vld [vmem:[#allocation2 + $0xe8] sm:$0xf0]  ;;  %v522_v27 = vld [vmem:[#allocation2 + $0x50] sm:$0xf] }
  0x11   :  { %382 = vmatpush.bf16.msra.mxu3 %v607_v16  ;;  %v623_v28 = vld [vmem:[#allocation2 + $0x54] sm:$0xf0]  ;;  %v599_v29 = vor.u32 %v640_v24, %v596_v26  ;;  %v586_v30 = vld [vmem:[#allocation2 + $0xd0] sm:$0xf]  ;;  %v622_v32 = vld [vmem:[#allocation2 + $0x54] sm:$0xf] }
  0x12   :  { %v639_v31 = vld [vmem:[#allocation2 + $0xd4] sm:$0xf0]  ;;  %326 = vmatpush.bf16.msra.mxu0 %v531_v20  ;;  %v523_v33 = vor.u32 %v623_v28, %v522_v27  ;;  %v524_v34 = vld [vmem:[#allocation2 + $0x58] sm:$0xf0]  ;;  %v638_v35 = vld [vmem:[#allocation2 + $0xd4] sm:$0xf] }
  0x13   :  { %v588_v36 = vld [vmem:[#allocation2 + $0xd8] sm:$0xf0]  ;;  %345 = vmatpush.bf16.msra.mxu1 %v595_v21  ;;  %v587_v37 = vor.u32 %v639_v31, %v586_v30  ;;  %v527_v38 = vor.u32 %v622_v32, %v524_v34  ;;  %v514_v39 = vld [vmem:[#allocation2 + $0x40] sm:$0xf]  ;;  %v621_v40 = vld [vmem:[#allocation2 + $0x44] sm:$0xf0] }
  0x14   :  { %364 = vmatpush.bf16.msra.mxu2 %v535_v25  ;;  %v578_v41 = vld [vmem:[#allocation2 + $0xc0] sm:$0xf]  ;;  %v591_v42 = vor.u32 %v638_v35, %v588_v36  ;;  %v637_v43 = vld [vmem:[#allocation2 + $0xc4] sm:$0xf0]  ;;  %v620_v44 = vld [vmem:[#allocation2 + $0x44] sm:$0xf]  ;;  %v515_v48 = vor.u32 %v621_v40, %v514_v39 }
  0x15   :  { %383 = vmatpush.bf16.msra.mxu3 %v599_v29  ;;  %v516_v45 = vld [vmem:[#allocation2 + $0x48] sm:$0xf0]  ;;  %v636_v46 = vld [vmem:[#allocation2 + $0xc4] sm:$0xf]  ;;  %v579_v49 = vor.u32 %v637_v43, %v578_v41  ;;  %v506_v51 = vld [vmem:[#allocation2 + $0x30] sm:$0xf] }
  0x16   :  { %v580_v47 = vld [vmem:[#allocation2 + $0xc8] sm:$0xf0]  ;;  %327 = vmatpush.bf16.msra.mxu0 %v523_v33  ;;  %v519_v50 = vor.u32 %v620_v44, %v516_v45  ;;  %v619_v52 = vld [vmem:[#allocation2 + $0x34] sm:$0xf0]  ;;  %v570_v53 = vld [vmem:[#allocation2 + $0xb0] sm:$0xf] }
  0x17   :  { %346 = vmatpush.bf16.msra.mxu1 %v587_v37  ;;  %v583_v54 = vor.u32 %v636_v46, %v580_v47  ;;  %v635_v55 = vld [vmem:[#allocation2 + $0xb4] sm:$0xf0]  ;;  %v618_v56 = vld [vmem:[#allocation2 + $0x34] sm:$0xf]  ;;  %v508_v57 = vld [vmem:[#allocation2 + $0x38] sm:$0xf0]  ;;  %v507_v60 = vor.u32 %v619_v52, %v506_v51 }
  0x18   :  { %365 = vmatpush.bf16.msra.mxu2 %v527_v38  ;;  %v634_v58 = vld [vmem:[#allocation2 + $0xb4] sm:$0xf]  ;;  %v572_v59 = vld [vmem:[#allocation2 + $0xb8] sm:$0xf0]  ;;  %v571_v61 = vor.u32 %v635_v55, %v570_v53  ;;  %v511_v62 = vor.u32 %v618_v56, %v508_v57  ;;  %v498_v63 = vld [vmem:[#allocation2 + $0x20] sm:$0xf] }
  0x19   :  { %384 = vmatpush.bf16.msra.mxu3 %v591_v42  ;;  %v617_v4 = vld [vmem:[#allocation2 + $0x24] sm:$0xf0]  ;;  %v562_v5 = vld [vmem:[#allocation2 + $0xa0] sm:$0xf]  ;;  %v575_v6 = vor.u32 %v634_v58, %v572_v59  ;;  %v616_v8 = vld [vmem:[#allocation2 + $0x24] sm:$0xf]  ;;  %v417_v58 = vunpack.c.l.bf16 %v740_v0 }
  0x1a   :  { %328 = vmatpush.bf16.msra.mxu0 %v515_v48  ;;  %v633_v7 = vld [vmem:[#allocation2 + $0xa4] sm:$0xf0]  ;;  %v500_v9 = vld [vmem:[#allocation2 + $0x28] sm:$0xf0]  ;;  %v632_v10 = vld [vmem:[#allocation2 + $0xa4] sm:$0xf]  ;;  %v499_v12 = vor.u32 %v617_v4, %v498_v63 }
  0x1b   :  { %347 = vmatpush.bf16.msra.mxu1 %v579_v49  ;;  %v564_v11 = vld [vmem:[#allocation2 + $0xa8] sm:$0xf0]  ;;  %v563_v13 = vor.u32 %v633_v7, %v562_v5  ;;  %v503_v14 = vor.u32 %v616_v8, %v500_v9  ;;  %v490_v15 = vld [vmem:[#allocation2 + $0x10] sm:$0xf]  ;;  %v615_v16 = vld [vmem:[#allocation2 + $0x14] sm:$0xf0] }
  0x1c   :  { %366 = vmatpush.bf16.msra.mxu2 %v519_v50  ;;  %v554_v17 = vld [vmem:[#allocation2 + $0x90] sm:$0xf]  ;;  %v567_v18 = vor.u32 %v632_v10, %v564_v11  ;;  %v631_v19 = vld [vmem:[#allocation2 + $0x94] sm:$0xf0]  ;;  %v614_v20 = vld [vmem:[#allocation2 + $0x14] sm:$0xf]  ;;  %v491_v24 = vor.u32 %v615_v16, %v490_v15  ;;  %v419_v16 = vunpack.c.l.bf16 %v745_v1 }
  0x1d   :  { %385 = vmatpush.bf16.msra.mxu3 %v583_v54  ;;  %v492_v21 = vld [vmem:[#allocation2 + $0x18] sm:$0xf0]  ;;  %v630_v22 = vld [vmem:[#allocation2 + $0x94] sm:$0xf]  ;;  %v555_v25 = vor.u32 %v631_v19, %v554_v17  ;;  %v482_v27 = vld [vmem:[#allocation2] sm:$0xf] }
  0x1e   :  { %329 = vmatpush.bf16.msra.mxu0 %v507_v60  ;;  %v556_v23 = vld [vmem:[#allocation2 + $0x98] sm:$0xf0]  ;;  %v495_v26 = vor.u32 %v614_v20, %v492_v21  ;;  %v613_v28 = vld [vmem:[#allocation2 + $0x4] sm:$0xf0]  ;;  %v546_v29 = vld [vmem:[#allocation2 + $0x80] sm:$0xf] }
  0x1f   :  { %348 = vmatpush.bf16.msra.mxu1 %v571_v61  ;;  %v559_v30 = vor.u32 %v630_v22, %v556_v23  ;;  %v629_v31 = vld [vmem:[#allocation2 + $0x84] sm:$0xf0]  ;;  %v612_v32 = vld [vmem:[#allocation2 + $0x4] sm:$0xf]  ;;  %v484_v33 = vld [vmem:[#allocation2 + $0x8] sm:$0xf0]  ;;  %v483_v36 = vor.u32 %v613_v28, %v482_v27 }
  0x20   :  { %367 = vmatpush.bf16.msra.mxu2 %v511_v62  ;;  %v628_v34 = vld [vmem:[#allocation2 + $0x84] sm:$0xf]  ;;  %v548_v35 = vld [vmem:[#allocation2 + $0x88] sm:$0xf0]  ;;  %v466_v37 = vld [vmem:[%s816_s0] sm:$0xf]  ;;  %v547_v39 = vor.u32 %v629_v31, %v546_v29  ;;  %v487_v40 = vor.u32 %v612_v32, %v484_v33  ;;  %v421_v31 = vunpack.c.l.bf16 %v750_v2 }
  0x21   :  { %386 = vmatpush.bf16.msra.mxu3 %v575_v6  ;;  %v609_v38 = vld [vmem:[%s816_s0 + $0x4] sm:$0xf0]  ;;  %v608_v41 = vld [vmem:[%s816_s0 + $0x4] sm:$0xf]  ;;  %v468_v42 = vld [vmem:[%s816_s0 + $0x8] sm:$0xf0]  ;;  %v551_v43 = vor.u32 %v628_v34, %v548_v35  ;;  %v418_v6 = vunpack.c.h.bf16 %v740_v0  ;;  %v420_v0 = vunpack.c.h.bf16 %v745_v1  ;;  %v422_v35 = vunpack.c.h.bf16 %v750_v2 }
  0x22   :  { %330 = vmatpush.bf16.msra.mxu0 %v499_v12  ;;  %v467_v44 = vor.u32 %v609_v38, %v466_v37  ;;  %v471_v45 = vor.u32 %v608_v41, %v468_v42  ;;  %v474_v46 = vld [vmem:[%s816_s0 + $0x10] sm:$0xf]  ;;  %v611_v47 = vld [vmem:[%s816_s0 + $0x14] sm:$0xf0]  ;;  %v610_v48 = vld [vmem:[%s816_s0 + $0x14] sm:$0xf]  ;;  %v423_v2 = vunpack.c.l.bf16 %v755_v3 }
  0x23   :  { %349 = vmatpush.bf16.msra.mxu1 %v563_v13  ;;  %v476_v49 = vld [vmem:[%s816_s0 + $0x18] sm:$0xf0]  ;;  %v475_v50 = vor.u32 %v611_v47, %v474_v46  ;;  %v139_v52 = vld [vmem:[#allocation4] sm:$0x3]  ;;  %v402_v17 = vld [vmem:[%s819_s3 + $0x8] sm:$0xff] }
  0x24   :  { %368 = vmatpush.bf16.msra.mxu2 %v503_v14  ;;  %v479_v51 = vor.u32 %v610_v48, %v476_v49  ;;  %v141_v53 = vperm.slane %v139_v52, 0  ;;  %v142_v59 = vperm.slane %v139_v52, 1  ;;  %v401_v60 = vld [vmem:[%s819_s3] sm:$0xff]  ;;  %v408_v27 = vunpack.c.h.bf16 %v402_v17  ;;  %v403_v32 = vld [vmem:[%s819_s3 + $0x10] sm:$0xff] }
  0x25   :  { %387 = vmatpush.bf16.msra.mxu3 %v567_v18  ;;  %v405_v62 = vunpack.c.l.bf16 %v401_v60  ;;  %v406_v10 = vunpack.c.h.bf16 %v401_v60  ;;  %v409_v37 = vunpack.c.l.bf16 %v403_v32 }
  0x26   :  { %331 = vmatpush.bf16.msra.mxu0 %v491_v24  ;;  %v407_v24 = vunpack.c.l.bf16 %v402_v17 }
  0x27   :  { %350 = vmatpush.bf16.msra.mxu1 %v555_v25 }
  0x28   :  { %369 = vmatpush.bf16.msra.mxu2 %v495_v26 }
  0x29   :  { %388 = vmatpush.bf16.msra.mxu3 %v559_v30 }
  0x2a   :  { %332 = vmatpush.bf16.msra.mxu0 %v483_v36 }
  0x2b   :  { %351 = vmatpush.bf16.msra.mxu1 %v547_v39 }
  0x2c   :  { %370 = vmatpush.bf16.msra.mxu2 %v487_v40 }
  0x2d   :  { %389 = vmatpush.bf16.msra.mxu3 %v551_v43  ;;  %333 = vmatmul.bf16.vlgmr.msra.gmra.mxu0 %v467_v44  ;;  %v410_v43 = vunpack.c.h.bf16 %v403_v32 }
  0x2e   :  { %352 = vmatmul.bf16.vlgmr.msra.gmra.mxu1 %v471_v45 }
  0x2f   :  { %371 = vmatmul.bf16.vlgmr.msra.gmra.mxu2 %v467_v44 }
  0x30   :  { %390 = vmatmul.bf16.vlgmr.msra.gmra.mxu3 %v471_v45 }
  0x3d   :  { %338 = vmatmul.bf16.gmra.mxu0 %v475_v50 }
  0x3e   :  { %357 = vmatmul.bf16.gmra.mxu1 %v479_v51 }
  0x3f   :  { %376 = vmatmul.bf16.gmra.mxu2 %v475_v50  ;;  %v404_v50 = vld [vmem:[%s819_s3 + $0x18] sm:$0xff] }
  0x40   :  { %395 = vmatmul.bf16.gmra.mxu3 %v479_v51  ;;  %v412_v60 = vunpack.c.h.bf16 %v404_v50 }
  0xaa   :  { %v334_v54 = vpop.f32.mrf.mxu0 }
  0xab   :  { %v335_v55 = vadd.f32 %v334_v54, %v141_v53  ;;  %v353_v56 = vpop.f32.mrf.mxu1 }
  0xad   :  { %v354_v57 = vadd.f32 %v353_v56, %v335_v55  ;;  %v424_v55 = vunpack.c.h.bf16 %v755_v3 }
  0xaf   :  { %v425_v63 = vmul.f32 %v417_v58, %v354_v57 }
  0xb1   :  { %v433_v12 = vadd.f32 %v425_v63, %v405_v62 }
  0xb2   :  { %v372_v61 = vpop.f32.mrf.mxu2  ;;  %v336_v7 = vpop.f32.mrf.mxu0 }
  0xb3   :  { %v373_v4 = vadd.f32 %v372_v61, %v142_v59  ;;  %v391_v5 = vpop.f32.mrf.mxu3  ;;  %v355_v8 = vpop.f32.mrf.mxu1  ;;  %v337_v11 = vadd.f32 %v336_v7, %v141_v53 }
  0xb5   :  { %v392_v9 = vadd.f32 %v391_v5, %v373_v4  ;;  %v356_v15 = vadd.f32 %v355_v8, %v337_v11 }
  0xb7   :  { %v426_v13 = vmul.f32 %v418_v6, %v392_v9  ;;  %v427_v25 = vmul.f32 %v419_v16, %v356_v15 }
  0xb9   :  { %v434_v14 = vadd.f32 %v426_v13, %v406_v10  ;;  %v435_v1 = vadd.f32 %v427_v25, %v407_v24 }
  0xba   :  { %v374_v18 = vpop.f32.mrf.mxu2  ;;  %v339_v22 = vpop.f32.mrf.mxu0 }
  0xbb   :  { %v441_v19 = vpack.c.bf16 %v434_v14, %v433_v12  ;;  %v375_v20 = vadd.f32 %v374_v18, %v142_v59  ;;  %v393_v21 = vpop.f32.mrf.mxu3  ;;  %v340_v23 = vadd.f32 %v339_v22, %v141_v53  ;;  %v358_v28 = vpop.f32.mrf.mxu1 }
  0xbd   :  { %445 = vst [vmem:[%s821_s5] sm:$0xff] %v441_v19  ;;  %v394_v26 = vadd.f32 %v393_v21, %v375_v20  ;;  %v359_v30 = vadd.f32 %v358_v28, %v340_v23 }
  0xbf   :  { %v428_v29 = vmul.f32 %v420_v0, %v394_v26  ;;  %v429_v38 = vmul.f32 %v421_v31, %v359_v30 }
  0xc1   :  { %v436_v33 = vadd.f32 %v428_v29, %v408_v27  ;;  %v437_v45 = vadd.f32 %v429_v38, %v409_v37 }
  0xc2   :  { %v377_v34 = vpop.f32.mrf.mxu2  ;;  %v341_v41 = vpop.f32.mrf.mxu0 }
  0xc3   :  { %v442_v36 = vpack.c.bf16 %v436_v33, %v435_v1  ;;  %v378_v39 = vadd.f32 %v377_v34, %v142_v59  ;;  %v396_v40 = vpop.f32.mrf.mxu3  ;;  %v342_v44 = vadd.f32 %v341_v41, %v141_v53  ;;  %v360_v47 = vpop.f32.mrf.mxu1  ;;  %v411_v53 = vunpack.c.l.bf16 %v404_v50 }
  0xc5   :  { %446 = vst [vmem:[%s821_s5 + $0x8] sm:$0xff] %v442_v36  ;;  %v397_v42 = vadd.f32 %v396_v40, %v378_v39  ;;  %v361_v49 = vadd.f32 %v360_v47, %v342_v44 }
  0xc7   :  { %v430_v46 = vmul.f32 %v422_v35, %v397_v42  ;;  %v431_v57 = vmul.f32 %v423_v2, %v361_v49 }
  0xc9   :  { %v438_v48 = vadd.f32 %v430_v46, %v410_v43  ;;  %v439_v62 = vadd.f32 %v431_v57, %v411_v53 }
  0xca   :  { %v379_v51 = vpop.f32.mrf.mxu2 }
  0xcb   :  { %v443_v52 = vpack.c.bf16 %v438_v48, %v437_v45  ;;  %v380_v54 = vadd.f32 %v379_v51, %v142_v59  ;;  %v398_v56 = vpop.f32.mrf.mxu3 }
  0xcd   :  { %447 = vst [vmem:[%s821_s5 + $0x10] sm:$0xff] %v443_v52  ;;  %v399_v58 = vadd.f32 %v398_v56, %v380_v54 }
  0xcf   :  { %v432_v61 = vmul.f32 %v424_v55, %v399_v58 }
  0xd1   :  { %v440_v63 = vadd.f32 %v432_v61, %v412_v60 }
  0xd3   :  { %v444_v4 = vpack.c.bf16 %v440_v63, %v439_v62 }
  0xd5   :  { %448 = vst [vmem:[%s821_s5 + $0x18] sm:$0xff] %v444_v4 }
  0xd6   :  { %453 = vsyncpa [#allocation3], 1 }
  0xd7   :  { %454 = vsyncpa [#allocation5], 1 }

// kernel: _lambda_.25
= control target key start
LH: loop header
LB: loop body
LE: loop exit
PB: predicated region body
PF: predicated region fallthrough
CT: control target
= control target key end

     0   :  { %s1423_s1 = inlined_call_operand.vmem [shape: bf16[256,512], index: 1, kind: input, shape index: {}]   ;;  %s1424_s0 = inlined_call_operand.vmem [shape: bf16[32,256], index: 0, kind: input, shape index: {}]   ;;  %s1425_s2 = inlined_call_operand.vmem [shape: f32[1,512], index: 2, kind: input, shape index: {}]   ;;  %s1426_s3 = inlined_call_operand.vmem [shape: bf16[32,512], index: 3, kind: output, shape index: {}]  }
   0x1   :  { %v734_v0 = vld [vmem:[%s1423_s1 + $0xe0] sm:$0xf]  ;;  %v910_v1 = vld [vmem:[%s1423_s1 + $0xec] sm:$0xf0]  ;;  %v908_v5 = vld [vmem:[%s1423_s1 + $0xe4] sm:$0xf] }
   0x2   :  { %v862_v2 = vld [vmem:[%s1423_s1 + $0x1e0] sm:$0xf]  ;;  %v735_v3 = vor.u32 %v910_v1, %v734_v0  ;;  %v942_v4 = vld [vmem:[%s1423_s1 + $0x1ec] sm:$0xf0]  ;;  %v736_v6 = vld [vmem:[%s1423_s1 + $0xf0] sm:$0xf0] }
   0x3   :  { %v863_v7 = vor.u32 %v942_v4, %v862_v2  ;;  %v739_v8 = vor.u32 %v908_v5, %v736_v6  ;;  %v940_v9 = vld [vmem:[%s1423_s1 + $0x1e4] sm:$0xf]  ;;  %v864_v10 = vld [vmem:[%s1423_s1 + $0x1f0] sm:$0xf0]  ;;  %v718_v11 = vld [vmem:[%s1423_s1 + $0xc0] sm:$0xf] }
   0x4   :  { %432 = vmatpush.bf16.msra.mxu0 %v735_v3  ;;  %v867_v12 = vor.u32 %v940_v9, %v864_v10  ;;  %v906_v13 = vld [vmem:[%s1423_s1 + $0xcc] sm:$0xf0]  ;;  %v846_v14 = vld [vmem:[%s1423_s1 + $0x1c0] sm:$0xf]  ;;  %v904_v18 = vld [vmem:[%s1423_s1 + $0xc4] sm:$0xf] }
   0x5   :  { %v938_v15 = vld [vmem:[%s1423_s1 + $0x1cc] sm:$0xf0]  ;;  %451 = vmatpush.bf16.msra.mxu1 %v863_v7  ;;  %470 = vmatpush.bf16.msra.mxu2 %v739_v8  ;;  %v719_v16 = vor.u32 %v906_v13, %v718_v11  ;;  %v720_v19 = vld [vmem:[%s1423_s1 + $0xd0] sm:$0xf0]  ;;  %v936_v20 = vld [vmem:[%s1423_s1 + $0x1c4] sm:$0xf] }
   0x6   :  { %v847_v17 = vor.u32 %v938_v15, %v846_v14  ;;  %489 = vmatpush.bf16.msra.mxu3 %v867_v12  ;;  %v723_v21 = vor.u32 %v904_v18, %v720_v19  ;;  %v848_v22 = vld [vmem:[%s1423_s1 + $0x1d0] sm:$0xf0]  ;;  %v702_v23 = vld [vmem:[%s1423_s1 + $0xa0] sm:$0xf]  ;;  %v902_v24 = vld [vmem:[%s1423_s1 + $0xac] sm:$0xf0] }
   0x7   :  { %v851_v25 = vor.u32 %v936_v20, %v848_v22  ;;  %v830_v26 = vld [vmem:[%s1423_s1 + $0x1a0] sm:$0xf]  ;;  %v934_v27 = vld [vmem:[%s1423_s1 + $0x1ac] sm:$0xf0]  ;;  %v900_v28 = vld [vmem:[%s1423_s1 + $0xa4] sm:$0xf]  ;;  %v703_v29 = vor.u32 %v902_v24, %v702_v23 }
   0x8   :  { %433 = vmatpush.bf16.msra.mxu0 %v719_v16  ;;  %v704_v30 = vld [vmem:[%s1423_s1 + $0xb0] sm:$0xf0]  ;;  %v932_v31 = vld [vmem:[%s1423_s1 + $0x1a4] sm:$0xf]  ;;  %v831_v33 = vor.u32 %v934_v27, %v830_v26  ;;  %v686_v35 = vld [vmem:[%s1423_s1 + $0x80] sm:$0xf] }
   0x9   :  { %v832_v32 = vld [vmem:[%s1423_s1 + $0x1b0] sm:$0xf0]  ;;  %452 = vmatpush.bf16.msra.mxu1 %v847_v17  ;;  %471 = vmatpush.bf16.msra.mxu2 %v723_v21  ;;  %v707_v34 = vor.u32 %v900_v28, %v704_v30  ;;  %v898_v36 = vld [vmem:[%s1423_s1 + $0x8c] sm:$0xf0]  ;;  %v814_v37 = vld [vmem:[%s1423_s1 + $0x180] sm:$0xf] }
   0xa   :  { %490 = vmatpush.bf16.msra.mxu3 %v851_v25  ;;  %v835_v38 = vor.u32 %v932_v31, %v832_v32  ;;  %v930_v39 = vld [vmem:[%s1423_s1 + $0x18c] sm:$0xf0]  ;;  %v896_v40 = vld [vmem:[%s1423_s1 + $0x84] sm:$0xf]  ;;  %v688_v41 = vld [vmem:[%s1423_s1 + $0x90] sm:$0xf0]  ;;  %v687_v44 = vor.u32 %v898_v36, %v686_v35 }
   0xb   :  { %v928_v42 = vld [vmem:[%s1423_s1 + $0x184] sm:$0xf]  ;;  %v816_v43 = vld [vmem:[%s1423_s1 + $0x190] sm:$0xf0]  ;;  %v815_v45 = vor.u32 %v930_v39, %v814_v37  ;;  %v691_v46 = vor.u32 %v896_v40, %v688_v41  ;;  %v670_v47 = vld [vmem:[%s1423_s1 + $0x60] sm:$0xf] }
   0xc   :  { %434 = vmatpush.bf16.msra.mxu0 %v703_v29  ;;  %v894_v48 = vld [vmem:[%s1423_s1 + $0x6c] sm:$0xf0]  ;;  %v798_v49 = vld [vmem:[%s1423_s1 + $0x160] sm:$0xf]  ;;  %v819_v50 = vor.u32 %v928_v42, %v816_v43  ;;  %v892_v52 = vld [vmem:[%s1423_s1 + $0x64] sm:$0xf] }
   0xd   :  { %453 = vmatpush.bf16.msra.mxu1 %v831_v33  ;;  %472 = vmatpush.bf16.msra.mxu2 %v707_v34  ;;  %v926_v51 = vld [vmem:[%s1423_s1 + $0x16c] sm:$0xf0]  ;;  %v672_v53 = vld [vmem:[%s1423_s1 + $0x70] sm:$0xf0]  ;;  %v924_v54 = vld [vmem:[%s1423_s1 + $0x164] sm:$0xf]  ;;  %v671_v56 = vor.u32 %v894_v48, %v670_v47 }
   0xe   :  { %491 = vmatpush.bf16.msra.mxu3 %v835_v38  ;;  %v800_v55 = vld [vmem:[%s1423_s1 + $0x170] sm:$0xf0]  ;;  %v799_v57 = vor.u32 %v926_v51, %v798_v49  ;;  %v675_v58 = vor.u32 %v892_v52, %v672_v53  ;;  %v654_v59 = vld [vmem:[%s1423_s1 + $0x40] sm:$0xf]  ;;  %v890_v60 = vld [vmem:[%s1423_s1 + $0x4c] sm:$0xf0] }
   0xf   :  { %v782_v61 = vld [vmem:[%s1423_s1 + $0x140] sm:$0xf]  ;;  %v803_v62 = vor.u32 %v924_v54, %v800_v55  ;;  %v922_v63 = vld [vmem:[%s1423_s1 + $0x14c] sm:$0xf0]  ;;  %v888_v0 = vld [vmem:[%s1423_s1 + $0x44] sm:$0xf]  ;;  %v655_v4 = vor.u32 %v890_v60, %v654_v59 }
  0x10   :  { %435 = vmatpush.bf16.msra.mxu0 %v687_v44  ;;  %v656_v1 = vld [vmem:[%s1423_s1 + $0x50] sm:$0xf0]  ;;  %v920_v2 = vld [vmem:[%s1423_s1 + $0x144] sm:$0xf]  ;;  %v783_v5 = vor.u32 %v922_v63, %v782_v61  ;;  %v638_v7 = vld [vmem:[%s1423_s1 + $0x20] sm:$0xf] }
  0x11   :  { %454 = vmatpush.bf16.msra.mxu1 %v815_v45  ;;  %473 = vmatpush.bf16.msra.mxu2 %v691_v46  ;;  %v784_v3 = vld [vmem:[%s1423_s1 + $0x150] sm:$0xf0]  ;;  %v659_v6 = vor.u32 %v888_v0, %v656_v1  ;;  %v886_v8 = vld [vmem:[%s1423_s1 + $0x2c] sm:$0xf0]  ;;  %v766_v9 = vld [vmem:[%s1423_s1 + $0x120] sm:$0xf] }
  0x12   :  { %492 = vmatpush.bf16.msra.mxu3 %v819_v50  ;;  %v787_v10 = vor.u32 %v920_v2, %v784_v3  ;;  %v918_v11 = vld [vmem:[%s1423_s1 + $0x12c] sm:$0xf0]  ;;  %v884_v12 = vld [vmem:[%s1423_s1 + $0x24] sm:$0xf]  ;;  %v640_v13 = vld [vmem:[%s1423_s1 + $0x30] sm:$0xf0]  ;;  %v639_v16 = vor.u32 %v886_v8, %v638_v7 }
  0x13   :  { %v916_v14 = vld [vmem:[%s1423_s1 + $0x124] sm:$0xf]  ;;  %v768_v15 = vld [vmem:[%s1423_s1 + $0x130] sm:$0xf0]  ;;  %v622_v17 = vld [vmem:[%s1423_s1] sm:$0xf]  ;;  %v767_v19 = vor.u32 %v918_v11, %v766_v9  ;;  %v643_v20 = vor.u32 %v884_v12, %v640_v13 }
  0x14   :  { %436 = vmatpush.bf16.msra.mxu0 %v671_v56  ;;  %v882_v18 = vld [vmem:[%s1423_s1 + $0xc] sm:$0xf0]  ;;  %v750_v21 = vld [vmem:[%s1423_s1 + $0x100] sm:$0xf]  ;;  %v880_v23 = vld [vmem:[%s1423_s1 + $0x4] sm:$0xf]  ;;  %v771_v24 = vor.u32 %v916_v14, %v768_v15 }
  0x15   :  { %455 = vmatpush.bf16.msra.mxu1 %v799_v57  ;;  %474 = vmatpush.bf16.msra.mxu2 %v675_v58  ;;  %v914_v22 = vld [vmem:[%s1423_s1 + $0x10c] sm:$0xf0]  ;;  %v624_v25 = vld [vmem:[%s1423_s1 + $0x10] sm:$0xf0]  ;;  %v912_v26 = vld [vmem:[%s1423_s1 + $0x104] sm:$0xf]  ;;  %v623_v31 = vor.u32 %v882_v18, %v622_v17 }
  0x16   :  { %493 = vmatpush.bf16.msra.mxu3 %v803_v62  ;;  %v752_v27 = vld [vmem:[%s1423_s1 + $0x110] sm:$0xf0]  ;;  %v606_v28 = vld [vmem:[%s1424_s0] sm:$0xf]  ;;  %v909_v29 = vld [vmem:[%s1423_s1 + $0xec] sm:$0xf]  ;;  %v751_v35 = vor.u32 %v914_v22, %v750_v21  ;;  %v627_v36 = vor.u32 %v880_v23, %v624_v25 }
  0x17   :  { %v744_v30 = vld [vmem:[%s1423_s1 + $0xf8] sm:$0xf0]  ;;  %v877_v32 = vld [vmem:[%s1424_s0 + $0x4] sm:$0xf0]  ;;  %v943_v34 = vld [vmem:[%s1423_s1 + $0x1f4] sm:$0xf0]  ;;  %v755_v39 = vor.u32 %v912_v26, %v752_v27 }
  0x18   :  { %437 = vmatpush.bf16.msra.mxu0 %v655_v4  ;;  %v870_v33 = vld [vmem:[%s1423_s1 + $0x1e8] sm:$0xf]  ;;  %v876_v37 = vld [vmem:[%s1424_s0 + $0x4] sm:$0xf]  ;;  %v608_v38 = vld [vmem:[%s1424_s0 + $0x8] sm:$0xf0]  ;;  %v747_v40 = vor.u32 %v909_v29, %v744_v30  ;;  %v1189_v44 = vor.u32 %v877_v32, %v606_v28 }
  0x19   :  { %456 = vmatpush.bf16.msra.mxu1 %v783_v5  ;;  %475 = vmatpush.bf16.msra.mxu2 %v659_v6  ;;  %v742_v41 = vld [vmem:[%s1423_s1 + $0xe8] sm:$0xf]  ;;  %v911_v42 = vld [vmem:[%s1423_s1 + $0xf4] sm:$0xf0]  ;;  %v941_v43 = vld [vmem:[%s1423_s1 + $0x1ec] sm:$0xf]  ;;  %v871_v45 = vor.u32 %v943_v34, %v870_v33  ;;  %v1200_v49 = vor.u32 %v876_v37, %v608_v38 }
  0x1a   :  { %494 = vmatpush.bf16.msra.mxu3 %v787_v10  ;;  %v872_v46 = vld [vmem:[%s1423_s1 + $0x1f8] sm:$0xf0]  ;;  %v905_v47 = vld [vmem:[%s1423_s1 + $0xcc] sm:$0xf]  ;;  %v854_v50 = vld [vmem:[%s1423_s1 + $0x1c8] sm:$0xf]  ;;  %v743_v52 = vor.u32 %v911_v42, %v742_v41 }
  0x1b   :  { %v728_v48 = vld [vmem:[%s1423_s1 + $0xd8] sm:$0xf0]  ;;  %v939_v51 = vld [vmem:[%s1423_s1 + $0x1d4] sm:$0xf0]  ;;  %v875_v53 = vor.u32 %v941_v43, %v872_v46  ;;  %v726_v55 = vld [vmem:[%s1423_s1 + $0xc8] sm:$0xf] }
  0x1c   :  { %438 = vmatpush.bf16.msra.mxu0 %v639_v16  ;;  %v731_v54 = vor.u32 %v905_v47, %v728_v48  ;;  %v907_v56 = vld [vmem:[%s1423_s1 + $0xd4] sm:$0xf0]  ;;  %v937_v57 = vld [vmem:[%s1423_s1 + $0x1cc] sm:$0xf]  ;;  %v855_v58 = vor.u32 %v939_v51, %v854_v50  ;;  %v856_v59 = vld [vmem:[%s1423_s1 + $0x1d8] sm:$0xf0] }
  0x1d   :  { %457 = vmatpush.bf16.msra.mxu1 %v767_v19  ;;  %476 = vmatpush.bf16.msra.mxu2 %v643_v20  ;;  %v901_v60 = vld [vmem:[%s1423_s1 + $0xac] sm:$0xf]  ;;  %v712_v61 = vld [vmem:[%s1423_s1 + $0xb8] sm:$0xf0]  ;;  %v838_v62 = vld [vmem:[%s1423_s1 + $0x1a8] sm:$0xf]  ;;  %v727_v0 = vor.u32 %v907_v56, %v726_v55  ;;  %v859_v1 = vor.u32 %v937_v57, %v856_v59 }
  0x1e   :  { %495 = vmatpush.bf16.msra.mxu3 %v771_v24  ;;  %v935_v63 = vld [vmem:[%s1423_s1 + $0x1b4] sm:$0xf0]  ;;  %v715_v2 = vor.u32 %v901_v60, %v712_v61  ;;  %v710_v3 = vld [vmem:[%s1423_s1 + $0xa8] sm:$0xf]  ;;  %v933_v5 = vld [vmem:[%s1423_s1 + $0x1ac] sm:$0xf] }
  0x1f   :  { %v903_v4 = vld [vmem:[%s1423_s1 + $0xb4] sm:$0xf0]  ;;  %v839_v6 = vor.u32 %v935_v63, %v838_v62  ;;  %v840_v7 = vld [vmem:[%s1423_s1 + $0x1b8] sm:$0xf0]  ;;  %v897_v8 = vld [vmem:[%s1423_s1 + $0x8c] sm:$0xf] }
  0x20   :  { %439 = vmatpush.bf16.msra.mxu0 %v623_v31  ;;  %v696_v9 = vld [vmem:[%s1423_s1 + $0x98] sm:$0xf0]  ;;  %v822_v10 = vld [vmem:[%s1423_s1 + $0x188] sm:$0xf]  ;;  %v931_v11 = vld [vmem:[%s1423_s1 + $0x194] sm:$0xf0]  ;;  %v711_v12 = vor.u32 %v903_v4, %v710_v3  ;;  %v843_v14 = vor.u32 %v933_v5, %v840_v7 }
  0x21   :  { %458 = vmatpush.bf16.msra.mxu1 %v751_v35  ;;  %477 = vmatpush.bf16.msra.mxu2 %v627_v36  ;;  %v694_v13 = vld [vmem:[%s1423_s1 + $0x88] sm:$0xf]  ;;  %v699_v15 = vor.u32 %v897_v8, %v696_v9  ;;  %v899_v16 = vld [vmem:[%s1423_s1 + $0x94] sm:$0xf0]  ;;  %v929_v17 = vld [vmem:[%s1423_s1 + $0x18c] sm:$0xf]  ;;  %v823_v19 = vor.u32 %v931_v11, %v822_v10 }
  0x22   :  { %496 = vmatpush.bf16.msra.mxu3 %v755_v39  ;;  %v824_v18 = vld [vmem:[%s1423_s1 + $0x198] sm:$0xf0]  ;;  %v614_v20 = vld [vmem:[%s1424_s0 + $0x10] sm:$0xf]  ;;  %v893_v21 = vld [vmem:[%s1423_s1 + $0x6c] sm:$0xf]  ;;  %v695_v26 = vor.u32 %v899_v16, %v694_v13 }
  0x23   :  { %440 = vmatmul.bf16.vlgmr.msra.gmra.mxu0 %v1189_v44  ;;  %v680_v22 = vld [vmem:[%s1423_s1 + $0x78] sm:$0xf0]  ;;  %v879_v23 = vld [vmem:[%s1424_s0 + $0x14] sm:$0xf0]  ;;  %v806_v24 = vld [vmem:[%s1423_s1 + $0x168] sm:$0xf]  ;;  %v827_v29 = vor.u32 %v929_v17, %v824_v18 }
  0x24   :  { %459 = vmatmul.bf16.vlgmr.msra.gmra.mxu1 %v1200_v49  ;;  %478 = vmatmul.bf16.vlgmr.msra.gmra.mxu2 %v1189_v44  ;;  %v927_v25 = vld [vmem:[%s1423_s1 + $0x174] sm:$0xf0]  ;;  %v878_v27 = vld [vmem:[%s1424_s0 + $0x14] sm:$0xf]  ;;  %v616_v28 = vld [vmem:[%s1424_s0 + $0x18] sm:$0xf0]  ;;  %v683_v30 = vor.u32 %v893_v21, %v680_v22  ;;  %v1305_v34 = vor.u32 %v879_v23, %v614_v20 }
  0x25   :  { %546 = vmatpush.bf16.msrb.mxu2 %v747_v40  ;;  %527 = vmatpush.bf16.msrb.mxu1 %v871_v45  ;;  %v678_v31 = vld [vmem:[%s1423_s1 + $0x68] sm:$0xf]  ;;  %v895_v32 = vld [vmem:[%s1423_s1 + $0x74] sm:$0xf0]  ;;  %v925_v33 = vld [vmem:[%s1423_s1 + $0x16c] sm:$0xf]  ;;  %v807_v35 = vor.u32 %v927_v25, %v806_v24  ;;  %v1316_v39 = vor.u32 %v878_v27, %v616_v28 }
  0x26   :  { %497 = vmatmul.bf16.vlgmr.msra.gmra.mxu3 %v1200_v49  ;;  %508 = vmatpush.bf16.msrb.mxu0 %v743_v52  ;;  %v808_v36 = vld [vmem:[%s1423_s1 + $0x178] sm:$0xf0]  ;;  %v889_v37 = vld [vmem:[%s1423_s1 + $0x4c] sm:$0xf]  ;;  %v790_v40 = vld [vmem:[%s1423_s1 + $0x148] sm:$0xf]  ;;  %v679_v42 = vor.u32 %v895_v32, %v678_v31 }
  0x27   :  { %565 = vmatpush.bf16.msrb.mxu3 %v875_v53  ;;  %v664_v38 = vld [vmem:[%s1423_s1 + $0x58] sm:$0xf0]  ;;  %v923_v41 = vld [vmem:[%s1423_s1 + $0x154] sm:$0xf0]  ;;  %v811_v43 = vor.u32 %v925_v33, %v808_v36  ;;  %v662_v46 = vld [vmem:[%s1423_s1 + $0x48] sm:$0xf] }
  0x28   :  { %v667_v45 = vor.u32 %v889_v37, %v664_v38  ;;  %v891_v47 = vld [vmem:[%s1423_s1 + $0x54] sm:$0xf0]  ;;  %v921_v48 = vld [vmem:[%s1423_s1 + $0x14c] sm:$0xf]  ;;  %v791_v50 = vor.u32 %v923_v41, %v790_v40  ;;  %v792_v51 = vld [vmem:[%s1423_s1 + $0x158] sm:$0xf0] }
  0x29   :  { %547 = vmatpush.bf16.msrb.mxu2 %v731_v54  ;;  %528 = vmatpush.bf16.msrb.mxu1 %v855_v58  ;;  %v885_v52 = vld [vmem:[%s1423_s1 + $0x2c] sm:$0xf]  ;;  %v648_v53 = vld [vmem:[%s1423_s1 + $0x38] sm:$0xf0]  ;;  %v774_v54 = vld [vmem:[%s1423_s1 + $0x128] sm:$0xf]  ;;  %v663_v56 = vor.u32 %v891_v47, %v662_v46  ;;  %v795_v57 = vor.u32 %v921_v48, %v792_v51 }
  0x2a   :  { %509 = vmatpush.bf16.msrb.mxu0 %v727_v0  ;;  %v919_v55 = vld [vmem:[%s1423_s1 + $0x134] sm:$0xf0]  ;;  %v651_v58 = vor.u32 %v885_v52, %v648_v53  ;;  %v646_v59 = vld [vmem:[%s1423_s1 + $0x28] sm:$0xf]  ;;  %v917_v61 = vld [vmem:[%s1423_s1 + $0x12c] sm:$0xf] }
  0x2b   :  { %566 = vmatpush.bf16.msrb.mxu3 %v859_v1  ;;  %v887_v60 = vld [vmem:[%s1423_s1 + $0x34] sm:$0xf0]  ;;  %v775_v62 = vor.u32 %v919_v55, %v774_v54  ;;  %v776_v63 = vld [vmem:[%s1423_s1 + $0x138] sm:$0xf0]  ;;  %v881_v0 = vld [vmem:[%s1423_s1 + $0xc] sm:$0xf] }
  0x2c   :  { %v632_v1 = vld [vmem:[%s1423_s1 + $0x18] sm:$0xf0]  ;;  %v915_v3 = vld [vmem:[%s1423_s1 + $0x114] sm:$0xf0]  ;;  %v647_v4 = vor.u32 %v887_v60, %v646_v59  ;;  %v779_v5 = vor.u32 %v917_v61, %v776_v63  ;;  %v630_v7 = vld [vmem:[%s1423_s1 + $0x8] sm:$0xf] }
  0x2d   :  { %548 = vmatpush.bf16.msrb.mxu2 %v715_v2  ;;  %529 = vmatpush.bf16.msrb.mxu1 %v839_v6  ;;  %v758_v2 = vld [vmem:[%s1423_s1 + $0x108] sm:$0xf]  ;;  %v635_v6 = vor.u32 %v881_v0, %v632_v1  ;;  %v883_v8 = vld [vmem:[%s1423_s1 + $0x14] sm:$0xf0]  ;;  %v913_v10 = vld [vmem:[%s1423_s1 + $0x10c] sm:$0xf] }
  0x2e   :  { %510 = vmatpush.bf16.msrb.mxu0 %v711_v12  ;;  %v759_v9 = vor.u32 %v915_v3, %v758_v2  ;;  %v760_v11 = vld [vmem:[%s1423_s1 + $0x118] sm:$0xf0]  ;;  %v631_v12 = vor.u32 %v883_v8, %v630_v7 }
  0x2f   :  { %567 = vmatpush.bf16.msrb.mxu3 %v843_v14  ;;  %v763_v13 = vor.u32 %v913_v10, %v760_v11  ;;  %v82_v14 = vld [vmem:[%s1425_s2] sm:$0xf] }
  0x31   :  { %549 = vmatpush.bf16.msrb.mxu2 %v699_v15  ;;  %530 = vmatpush.bf16.msrb.mxu1 %v823_v19  ;;  %v84_v15 = vperm.slane %v82_v14, 0  ;;  %v85_v19 = vperm.slane %v82_v14, 1 }
  0x32   :  { %511 = vmatpush.bf16.msrb.mxu0 %v695_v26 }
  0x33   :  { %568 = vmatpush.bf16.msrb.mxu3 %v827_v29  ;;  %445 = vmatmul.bf16.gmra.mxu0 %v1305_v34 }
  0x34   :  { %464 = vmatmul.bf16.gmra.mxu1 %v1316_v39  ;;  %483 = vmatmul.bf16.gmra.mxu2 %v1305_v34 }
  0x35   :  { %550 = vmatpush.bf16.msrb.mxu2 %v683_v30  ;;  %531 = vmatpush.bf16.msrb.mxu1 %v807_v35 }
  0x36   :  { %502 = vmatmul.bf16.gmra.mxu3 %v1316_v39  ;;  %512 = vmatpush.bf16.msrb.mxu0 %v679_v42 }
  0x37   :  { %569 = vmatpush.bf16.msrb.mxu3 %v811_v43 }
  0x39   :  { %551 = vmatpush.bf16.msrb.mxu2 %v667_v45  ;;  %532 = vmatpush.bf16.msrb.mxu1 %v791_v50  ;;  %v86_v50 = vperm.slane %v82_v14, 2 }
  0x3a   :  { %513 = vmatpush.bf16.msrb.mxu0 %v663_v56 }
  0x3b   :  { %570 = vmatpush.bf16.msrb.mxu3 %v795_v57  ;;  %v87_v57 = vperm.slane %v82_v14, 3 }
  0x3d   :  { %552 = vmatpush.bf16.msrb.mxu2 %v651_v58  ;;  %533 = vmatpush.bf16.msrb.mxu1 %v775_v62 }
  0x3e   :  { %514 = vmatpush.bf16.msrb.mxu0 %v647_v4 }
  0x3f   :  { %571 = vmatpush.bf16.msrb.mxu3 %v779_v5 }
  0x41   :  { %553 = vmatpush.bf16.msrb.mxu2 %v635_v6  ;;  %534 = vmatpush.bf16.msrb.mxu1 %v759_v9 }
  0x42   :  { %515 = vmatpush.bf16.msrb.mxu0 %v631_v12 }
  0x43   :  { %572 = vmatpush.bf16.msrb.mxu3 %v763_v13 }
  0x44   :  { %535 = vmatmul.bf16.vlgmr.msrb.gmra.mxu1 %v1200_v49  ;;  %554 = vmatmul.bf16.vlgmr.msrb.gmra.mxu2 %v1189_v44 }
  0x45   :  { %516 = vmatmul.bf16.vlgmr.msrb.gmra.mxu0 %v1189_v44 }
  0x46   :  { %573 = vmatmul.bf16.vlgmr.msrb.gmra.mxu3 %v1200_v49 }
  0x54   :  { %540 = vmatmul.bf16.gmra.mxu1 %v1316_v39  ;;  %559 = vmatmul.bf16.gmra.mxu2 %v1305_v34 }
  0x55   :  { %521 = vmatmul.bf16.gmra.mxu0 %v1305_v34 }
  0x56   :  { %578 = vmatmul.bf16.gmra.mxu3 %v1316_v39 }
  0xa0   :  { %v441_v16 = vpop.f32.mrf.mxu0 }
  0xa1   :  { %v460_v17 = vpop.f32.mrf.mxu1  ;;  %v442_v18 = vadd.f32 %v441_v16, %v84_v15 }
  0xa3   :  { %v461_v20 = vadd.f32 %v460_v17, %v442_v18 }
  0xa7   :  { %v479_v44 = vpop.f32.mrf.mxu2 }
  0xa8   :  { %v480_v49 = vadd.f32 %v479_v44, %v85_v19  ;;  %v443_v22 = vpop.f32.mrf.mxu0 }
  0xa9   :  { %v498_v21 = vpop.f32.mrf.mxu3  ;;  %v462_v23 = vpop.f32.mrf.mxu1  ;;  %v444_v26 = vadd.f32 %v443_v22, %v84_v15 }
  0xaa   :  { %v499_v24 = vadd.f32 %v498_v21, %v480_v49 }
  0xab   :  { %v463_v32 = vadd.f32 %v462_v23, %v444_v26 }
  0xac   :  { %v584_v25 = vpack.c.bf16 %v499_v24, %v461_v20 }
  0xae   :  { %592 = vst [vmem:[%s1426_s3] sm:$0xff] %v584_v25 }
  0xaf   :  { %v481_v27 = vpop.f32.mrf.mxu2 }
  0xb0   :  { %v482_v28 = vadd.f32 %v481_v27, %v85_v19  ;;  %v446_v30 = vpop.f32.mrf.mxu0 }
  0xb1   :  { %v500_v29 = vpop.f32.mrf.mxu3  ;;  %v465_v31 = vpop.f32.mrf.mxu1  ;;  %v447_v35 = vadd.f32 %v446_v30, %v84_v15 }
  0xb2   :  { %v501_v33 = vadd.f32 %v500_v29, %v482_v28 }
  0xb3   :  { %v466_v37 = vadd.f32 %v465_v31, %v447_v35 }
  0xb4   :  { %v586_v34 = vpack.c.bf16 %v501_v33, %v463_v32 }
  0xb6   :  { %594 = vst [vmem:[%s1426_s3 + $0x10] sm:$0xff] %v586_v34 }
  0xb7   :  { %v484_v36 = vpop.f32.mrf.mxu2 }
  0xb8   :  { %v485_v38 = vadd.f32 %v484_v36, %v85_v19  ;;  %v448_v40 = vpop.f32.mrf.mxu0 }
  0xb9   :  { %v503_v39 = vpop.f32.mrf.mxu3  ;;  %v467_v41 = vpop.f32.mrf.mxu1  ;;  %v449_v45 = vadd.f32 %v448_v40, %v84_v15 }
  0xba   :  { %v504_v42 = vadd.f32 %v503_v39, %v485_v38 }
  0xbb   :  { %v468_v52 = vadd.f32 %v467_v41, %v449_v45 }
  0xbc   :  { %v588_v43 = vpack.c.bf16 %v504_v42, %v466_v37 }
  0xbe   :  { %596 = vst [vmem:[%s1426_s3 + $0x20] sm:$0xff] %v588_v43 }
  0xbf   :  { %v486_v46 = vpop.f32.mrf.mxu2 }
  0xc0   :  { %v487_v47 = vadd.f32 %v486_v46, %v85_v19 }
  0xc1   :  { %v505_v48 = vpop.f32.mrf.mxu3  ;;  %v536_v54 = vpop.f32.mrf.mxu1 }
  0xc2   :  { %v517_v51 = vpop.f32.mrf.mxu0  ;;  %v506_v53 = vadd.f32 %v505_v48, %v487_v47 }
  0xc3   :  { %v518_v56 = vadd.f32 %v517_v51, %v86_v50 }
  0xc4   :  { %v590_v55 = vpack.c.bf16 %v506_v53, %v468_v52 }
  0xc5   :  { %v537_v60 = vadd.f32 %v536_v54, %v518_v56 }
  0xc6   :  { %598 = vst [vmem:[%s1426_s3 + $0x30] sm:$0xff] %v590_v55 }
  0xc7   :  { %v555_v58 = vpop.f32.mrf.mxu2 }
  0xc8   :  { %v556_v61 = vadd.f32 %v555_v58, %v87_v57 }
  0xc9   :  { %v574_v59 = vpop.f32.mrf.mxu3  ;;  %v538_v1 = vpop.f32.mrf.mxu1 }
  0xca   :  { %v519_v62 = vpop.f32.mrf.mxu0  ;;  %v575_v63 = vadd.f32 %v574_v59, %v556_v61 }
  0xcb   :  { %v520_v2 = vadd.f32 %v519_v62, %v86_v50 }
  0xcc   :  { %v585_v0 = vpack.c.bf16 %v575_v63, %v537_v60 }
  0xcd   :  { %v539_v7 = vadd.f32 %v538_v1, %v520_v2 }
  0xce   :  { %593 = vst [vmem:[%s1426_s3 + $0x8] sm:$0xff] %v585_v0 }
  0xcf   :  { %v557_v3 = vpop.f32.mrf.mxu2 }
  0xd0   :  { %v558_v5 = vadd.f32 %v557_v3, %v87_v57 }
  0xd1   :  { %v576_v4 = vpop.f32.mrf.mxu3  ;;  %v541_v11 = vpop.f32.mrf.mxu1 }
  0xd2   :  { %v522_v6 = vpop.f32.mrf.mxu0  ;;  %v577_v8 = vadd.f32 %v576_v4, %v558_v5 }
  0xd3   :  { %v523_v10 = vadd.f32 %v522_v6, %v86_v50 }
  0xd4   :  { %v587_v9 = vpack.c.bf16 %v577_v8, %v539_v7 }
  0xd5   :  { %v542_v14 = vadd.f32 %v541_v11, %v523_v10 }
  0xd6   :  { %595 = vst [vmem:[%s1426_s3 + $0x18] sm:$0xff] %v587_v9 }
  0xd7   :  { %v560_v12 = vpop.f32.mrf.mxu2 }
  0xd8   :  { %v561_v15 = vadd.f32 %v560_v12, %v87_v57 }
  0xd9   :  { %v579_v13 = vpop.f32.mrf.mxu3  ;;  %v543_v49 = vpop.f32.mrf.mxu1 }
  0xda   :  { %v580_v16 = vadd.f32 %v579_v13, %v561_v15  ;;  %v524_v17 = vpop.f32.mrf.mxu0 }
  0xdb   :  { %v525_v19 = vadd.f32 %v524_v17, %v86_v50 }
  0xdc   :  { %v589_v18 = vpack.c.bf16 %v580_v16, %v542_v14 }
  0xdd   :  { %v544_v22 = vadd.f32 %v543_v49, %v525_v19 }
  0xde   :  { %597 = vst [vmem:[%s1426_s3 + $0x28] sm:$0xff] %v589_v18 }
  0xdf   :  { %v562_v44 = vpop.f32.mrf.mxu2 }
  0xe0   :  { %v563_v20 = vadd.f32 %v562_v44, %v87_v57 }
  0xe1   :  { %v581_v21 = vpop.f32.mrf.mxu3 }
  0xe2   :  { %v582_v23 = vadd.f32 %v581_v21, %v563_v20 }
  0xe4   :  { %v591_v24 = vpack.c.bf16 %v582_v23, %v544_v22 }
  0xe6   :  { %599 = vst [vmem:[%s1426_s3 + $0x38] sm:$0xff] %v591_v24 }

// kernel: _lambda_.24
= control target key start
LH: loop header
LB: loop body
LE: loop exit
PB: predicated region body
PF: predicated region fallthrough
CT: control target
= control target key end

     0   :  { %10 = vsyncpa [#allocation3], 0  ;;  %s2074_s25 = smov [#allocation2]   ;;  %s2075_s30 = smov 128   ;;  %s2338_s0 = inlined_call_operand.vmem [shape: bf16[32,1024], index: 0, kind: input, shape index: {}]   ;;  %s2339_s1 = inlined_call_operand.hbm [shape: bf16[1024,256], index: 1, kind: input, shape index: {}]   ;;  %s2340_s2 = inlined_call_operand.vmem [shape: f32[1,256], index: 2, kind: input, shape index: {}]   ;;  %s2341_s3 = inlined_call_operand.vmem [shape: bf16[32,256], index: 3, kind: input, shape index: {}]   ;;  %s2342_s4 = inlined_call_operand.vmem [shape: bf16[32,1536], index: 4, kind: input, shape index: {}]   ;;  %s2343_s5 = inlined_call_operand.vmem [shape: bf16[32,256], index: 5, kind: output, shape index: {}]  }
   0x1   :  { %s17_s20 = sshll.u32 %s2339_s1, 4  ;;  %v2113_v0 = vld [vmem:[%s2342_s4 + $0x28] sm:$0xff]  ;;  %v2118_v1 = vld [vmem:[%s2342_s4 + $0x58] sm:$0xff]  ;;  %s19_s26 = sshll.u32 %s2074_s25, 4  ;;  %s18_s20 = int_to_ptr.hbm [resolvable:$true] %s17_s20  ;;  %s20_s26 = int_to_ptr.vmem [resolvable:$true] %s19_s26 }
   0x2   :  { %v2123_v2 = vld [vmem:[%s2342_s4 + $0x88] sm:$0xff]  ;;  %v2128_v3 = vld [vmem:[%s2342_s4 + $0xb8] sm:$0xff]  ;;  %s2076_s6 = smov 8  }
   0x3   :  { %25 = dma.hbm_to_vmem [thread:$0]  %s18_s20, 16384, %s20_s26, [#allocation3], %s2075_s30, %s2075_s30, %s2076_s6  }
   0x4   :  { %2072 = dma.done.wait [#allocation3], 16384  }
   0x5   :  { %2073 = vsyncadd [#allocation3], 4294950912  ;;  %v1447_v4 = vld [vmem:[#allocation2 + $0x70] sm:$0xf]  ;;  %v1932_v5 = vld [vmem:[#allocation2 + $0x74] sm:$0xf0] }
   0x6   :  { %v1511_v6 = vld [vmem:[#allocation2 + $0xf0] sm:$0xf]  ;;  %v1448_v7 = vor.u32 %v1932_v5, %v1447_v4  ;;  %v1948_v8 = vld [vmem:[#allocation2 + $0xf4] sm:$0xf0]  ;;  %v1439_v15 = vld [vmem:[#allocation2 + $0x60] sm:$0xf] }
   0x7   :  { %v1575_v9 = vld [vmem:[#allocation2 + $0x170] sm:$0xf]  ;;  %v1964_v10 = vld [vmem:[#allocation2 + $0x174] sm:$0xf0]  ;;  %v1512_v11 = vor.u32 %v1948_v8, %v1511_v6  ;;  %v1930_v17 = vld [vmem:[#allocation2 + $0x64] sm:$0xf0] }
   0x8   :  { %v1576_v12 = vor.u32 %v1964_v10, %v1575_v9  ;;  %v1639_v13 = vld [vmem:[#allocation2 + $0x1f0] sm:$0xf]  ;;  %v1980_v14 = vld [vmem:[#allocation2 + $0x1f4] sm:$0xf0]  ;;  %959 = vmatpush.bf16.msra.mxu0 %v1448_v7  ;;  %v1503_v18 = vld [vmem:[#allocation2 + $0xe0] sm:$0xf]  ;;  %v1440_v20 = vor.u32 %v1930_v17, %v1439_v15 }
   0x9   :  { %v1640_v16 = vor.u32 %v1980_v14, %v1639_v13  ;;  %v1946_v19 = vld [vmem:[#allocation2 + $0xe4] sm:$0xf0]  ;;  %978 = vmatpush.bf16.msra.mxu1 %v1512_v11  ;;  %v1567_v22 = vld [vmem:[#allocation2 + $0x160] sm:$0xf]  ;;  %v1431_v27 = vld [vmem:[#allocation2 + $0x50] sm:$0xf] }
   0xa   :  { %997 = vmatpush.bf16.msra.mxu2 %v1576_v12  ;;  %v1504_v21 = vor.u32 %v1946_v19, %v1503_v18  ;;  %v1962_v23 = vld [vmem:[#allocation2 + $0x164] sm:$0xf0]  ;;  %v1631_v24 = vld [vmem:[#allocation2 + $0x1e0] sm:$0xf]  ;;  %v1928_v28 = vld [vmem:[#allocation2 + $0x54] sm:$0xf0] }
   0xb   :  { %1016 = vmatpush.bf16.msra.mxu3 %v1640_v16  ;;  %v1568_v25 = vor.u32 %v1962_v23, %v1567_v22  ;;  %v1978_v26 = vld [vmem:[#allocation2 + $0x1e4] sm:$0xf0]  ;;  %v1495_v30 = vld [vmem:[#allocation2 + $0xd0] sm:$0xf]  ;;  %v1944_v31 = vld [vmem:[#allocation2 + $0xd4] sm:$0xf0]  ;;  %v1432_v33 = vor.u32 %v1928_v28, %v1431_v27 }
   0xc   :  { %v1632_v29 = vor.u32 %v1978_v26, %v1631_v24  ;;  %v1559_v32 = vld [vmem:[#allocation2 + $0x150] sm:$0xf]  ;;  %960 = vmatpush.bf16.msra.mxu0 %v1440_v20  ;;  %v1960_v34 = vld [vmem:[#allocation2 + $0x154] sm:$0xf0]  ;;  %v1496_v37 = vor.u32 %v1944_v31, %v1495_v30  ;;  %v1423_v39 = vld [vmem:[#allocation2 + $0x40] sm:$0xf] }
   0xd   :  { %v1623_v35 = vld [vmem:[#allocation2 + $0x1d0] sm:$0xf]  ;;  %v1976_v36 = vld [vmem:[#allocation2 + $0x1d4] sm:$0xf0]  ;;  %979 = vmatpush.bf16.msra.mxu1 %v1504_v21  ;;  %v1560_v38 = vor.u32 %v1960_v34, %v1559_v32  ;;  %v1926_v40 = vld [vmem:[#allocation2 + $0x44] sm:$0xf0] }
   0xe   :  { %998 = vmatpush.bf16.msra.mxu2 %v1568_v25  ;;  %v1487_v41 = vld [vmem:[#allocation2 + $0xc0] sm:$0xf]  ;;  %v1624_v42 = vor.u32 %v1976_v36, %v1623_v35  ;;  %v1942_v43 = vld [vmem:[#allocation2 + $0xc4] sm:$0xf0]  ;;  %v1424_v48 = vor.u32 %v1926_v40, %v1423_v39  ;;  %v1415_v51 = vld [vmem:[#allocation2 + $0x30] sm:$0xf] }
   0xf   :  { %1017 = vmatpush.bf16.msra.mxu3 %v1632_v29  ;;  %v1551_v44 = vld [vmem:[#allocation2 + $0x140] sm:$0xf]  ;;  %v1958_v45 = vld [vmem:[#allocation2 + $0x144] sm:$0xf0]  ;;  %v1488_v49 = vor.u32 %v1942_v43, %v1487_v41  ;;  %v1924_v52 = vld [vmem:[#allocation2 + $0x34] sm:$0xf0] }
  0x10   :  { %v1615_v46 = vld [vmem:[#allocation2 + $0x1c0] sm:$0xf]  ;;  %v1974_v47 = vld [vmem:[#allocation2 + $0x1c4] sm:$0xf0]  ;;  %961 = vmatpush.bf16.msra.mxu0 %v1432_v33  ;;  %v1552_v50 = vor.u32 %v1958_v45, %v1551_v44  ;;  %v1479_v53 = vld [vmem:[#allocation2 + $0xb0] sm:$0xf]  ;;  %v1416_v60 = vor.u32 %v1924_v52, %v1415_v51 }
  0x11   :  { %980 = vmatpush.bf16.msra.mxu1 %v1496_v37  ;;  %v1616_v54 = vor.u32 %v1974_v47, %v1615_v46  ;;  %v1940_v55 = vld [vmem:[#allocation2 + $0xb4] sm:$0xf0]  ;;  %v1543_v56 = vld [vmem:[#allocation2 + $0x130] sm:$0xf]  ;;  %v1407_v63 = vld [vmem:[#allocation2 + $0x20] sm:$0xf] }
  0x12   :  { %999 = vmatpush.bf16.msra.mxu2 %v1560_v38  ;;  %v1956_v57 = vld [vmem:[#allocation2 + $0x134] sm:$0xf0]  ;;  %v1607_v58 = vld [vmem:[#allocation2 + $0x1b0] sm:$0xf]  ;;  %v1480_v61 = vor.u32 %v1940_v55, %v1479_v53  ;;  %v1922_v4 = vld [vmem:[#allocation2 + $0x24] sm:$0xf0] }
  0x13   :  { %1018 = vmatpush.bf16.msra.mxu3 %v1624_v42  ;;  %v1972_v59 = vld [vmem:[#allocation2 + $0x1b4] sm:$0xf0]  ;;  %v1544_v62 = vor.u32 %v1956_v57, %v1543_v56  ;;  %v1471_v5 = vld [vmem:[#allocation2 + $0xa0] sm:$0xf]  ;;  %v1938_v7 = vld [vmem:[#allocation2 + $0xa4] sm:$0xf0]  ;;  %v1408_v12 = vor.u32 %v1922_v4, %v1407_v63 }
  0x14   :  { %962 = vmatpush.bf16.msra.mxu0 %v1424_v48  ;;  %v1608_v6 = vor.u32 %v1972_v59, %v1607_v58  ;;  %v1535_v8 = vld [vmem:[#allocation2 + $0x120] sm:$0xf]  ;;  %v1954_v9 = vld [vmem:[#allocation2 + $0x124] sm:$0xf0]  ;;  %v1472_v13 = vor.u32 %v1938_v7, %v1471_v5  ;;  %v1399_v15 = vld [vmem:[#allocation2 + $0x10] sm:$0xf] }
  0x15   :  { %981 = vmatpush.bf16.msra.mxu1 %v1488_v49  ;;  %v1599_v10 = vld [vmem:[#allocation2 + $0x1a0] sm:$0xf]  ;;  %v1970_v11 = vld [vmem:[#allocation2 + $0x1a4] sm:$0xf0]  ;;  %v1536_v14 = vor.u32 %v1954_v9, %v1535_v8  ;;  %v1920_v16 = vld [vmem:[#allocation2 + $0x14] sm:$0xf0] }
  0x16   :  { %1000 = vmatpush.bf16.msra.mxu2 %v1552_v50  ;;  %v1463_v17 = vld [vmem:[#allocation2 + $0x90] sm:$0xf]  ;;  %v1600_v18 = vor.u32 %v1970_v11, %v1599_v10  ;;  %v1936_v19 = vld [vmem:[#allocation2 + $0x94] sm:$0xf0]  ;;  %v1391_v24 = vld [vmem:[#allocation2] sm:$0xf]  ;;  %v1400_v25 = vor.u32 %v1920_v16, %v1399_v15 }
  0x17   :  { %1019 = vmatpush.bf16.msra.mxu3 %v1616_v54  ;;  %v1527_v20 = vld [vmem:[#allocation2 + $0x110] sm:$0xf]  ;;  %v1952_v21 = vld [vmem:[#allocation2 + $0x114] sm:$0xf0]  ;;  %v1918_v26 = vld [vmem:[#allocation2 + $0x4] sm:$0xf0]  ;;  %v1464_v29 = vor.u32 %v1936_v19, %v1463_v17 }
  0x18   :  { %963 = vmatpush.bf16.msra.mxu0 %v1416_v60  ;;  %v1591_v22 = vld [vmem:[#allocation2 + $0x190] sm:$0xf]  ;;  %v1968_v23 = vld [vmem:[#allocation2 + $0x194] sm:$0xf0]  ;;  %v1455_v27 = vld [vmem:[#allocation2 + $0x80] sm:$0xf]  ;;  %v1528_v30 = vor.u32 %v1952_v21, %v1527_v20  ;;  %v1392_v42 = vor.u32 %v1918_v26, %v1391_v24 }
  0x19   :  { %982 = vmatpush.bf16.msra.mxu1 %v1480_v61  ;;  %v1934_v28 = vld [vmem:[#allocation2 + $0x84] sm:$0xf0]  ;;  %v1519_v31 = vld [vmem:[#allocation2 + $0x100] sm:$0xf]  ;;  %v1592_v34 = vor.u32 %v1968_v23, %v1591_v22  ;;  %v1901_v38 = vld [vmem:[%s2338_s0 + $0x4] sm:$0xf] }
  0x1a   :  { %1001 = vmatpush.bf16.msra.mxu2 %v1544_v62  ;;  %v1950_v32 = vld [vmem:[#allocation2 + $0x104] sm:$0xf0]  ;;  %v1583_v33 = vld [vmem:[#allocation2 + $0x180] sm:$0xf]  ;;  %v1329_v39 = vld [vmem:[%s2338_s0 + $0x20] sm:$0xf0]  ;;  %v1456_v46 = vor.u32 %v1934_v28, %v1455_v27 }
  0x1b   :  { %1020 = vmatpush.bf16.msra.mxu3 %v1608_v6  ;;  %v1966_v35 = vld [vmem:[#allocation2 + $0x184] sm:$0xf0]  ;;  %v1327_v36 = vld [vmem:[%s2338_s0] sm:$0xf]  ;;  %v1831_v40 = vld [vmem:[#allocation2 + $0x370] sm:$0xf]  ;;  %v1520_v47 = vor.u32 %v1950_v32, %v1519_v31  ;;  %v2156_v61 = vor.u32 %v1901_v38, %v1329_v39 }
  0x1c   :  { %964 = vmatpush.bf16.msra.mxu0 %v1408_v12  ;;  %v1905_v37 = vld [vmem:[%s2338_s0 + $0x1c] sm:$0xf0]  ;;  %v2028_v41 = vld [vmem:[#allocation2 + $0x374] sm:$0xf0]  ;;  %v1335_v43 = vld [vmem:[%s2338_s0 + $0x8] sm:$0xf]  ;;  %v1584_v51 = vor.u32 %v1966_v35, %v1583_v33 }
  0x1d   :  { %983 = vmatpush.bf16.msra.mxu1 %v1472_v13  ;;  %v1767_v44 = vld [vmem:[#allocation2 + $0x2f0] sm:$0xf]  ;;  %v2012_v45 = vld [vmem:[#allocation2 + $0x2f4] sm:$0xf0]  ;;  %v1906_v48 = vld [vmem:[%s2338_s0 + $0x24] sm:$0xf0]  ;;  %v1832_v52 = vor.u32 %v2028_v41, %v1831_v40  ;;  %v2154_v56 = vor.u32 %v1905_v37, %v1327_v36 }
  0x1e   :  { %1002 = vmatpush.bf16.msra.mxu2 %v1536_v14  ;;  %v1902_v49 = vld [vmem:[%s2338_s0 + $0xc] sm:$0xf]  ;;  %v1703_v53 = vld [vmem:[#allocation2 + $0x270] sm:$0xf]  ;;  %v1996_v54 = vld [vmem:[#allocation2 + $0x274] sm:$0xf0]  ;;  %v1768_v57 = vor.u32 %v2012_v45, %v1767_v44  ;;  %v2158_v62 = vor.u32 %v1906_v48, %v1335_v43 }
  0x1f   :  { %1021 = vmatpush.bf16.msra.mxu3 %v1600_v18  ;;  %v1337_v50 = vld [vmem:[%s2338_s0 + $0x28] sm:$0xf0]  ;;  %v1895_v55 = vld [vmem:[#allocation2 + $0x3f0] sm:$0xf]  ;;  %v2044_v58 = vld [vmem:[#allocation2 + $0x3f4] sm:$0xf0]  ;;  %v1704_v6 = vor.u32 %v1996_v54, %v1703_v53 }
  0x20   :  { %965 = vmatpush.bf16.msra.mxu0 %v1400_v25  ;;  %v1823_v59 = vld [vmem:[#allocation2 + $0x360] sm:$0xf]  ;;  %v2026_v60 = vld [vmem:[#allocation2 + $0x364] sm:$0xf0]  ;;  %v2160_v5 = vor.u32 %v1902_v49, %v1337_v50  ;;  %v1896_v7 = vor.u32 %v2044_v58, %v1895_v55  ;;  %v1815_v14 = vld [vmem:[#allocation2 + $0x350] sm:$0xf] }
  0x21   :  { %984 = vmatpush.bf16.msra.mxu1 %v1464_v29  ;;  %v1759_v63 = vld [vmem:[#allocation2 + $0x2e0] sm:$0xf]  ;;  %v2010_v4 = vld [vmem:[#allocation2 + $0x2e4] sm:$0xf0]  ;;  %v1824_v8 = vor.u32 %v2026_v60, %v1823_v59  ;;  %v2024_v15 = vld [vmem:[#allocation2 + $0x354] sm:$0xf0] }
  0x22   :  { %1003 = vmatpush.bf16.msra.mxu2 %v1528_v30  ;;  %v1695_v9 = vld [vmem:[#allocation2 + $0x260] sm:$0xf]  ;;  %v1994_v10 = vld [vmem:[#allocation2 + $0x264] sm:$0xf0]  ;;  %v1760_v12 = vor.u32 %v2010_v4, %v1759_v63  ;;  %v1751_v16 = vld [vmem:[#allocation2 + $0x2d0] sm:$0xf]  ;;  %v1816_v20 = vor.u32 %v2024_v15, %v1815_v14 }
  0x23   :  { %1022 = vmatpush.bf16.msra.mxu3 %v1592_v34  ;;  %v1887_v11 = vld [vmem:[#allocation2 + $0x3e0] sm:$0xf]  ;;  %v2042_v13 = vld [vmem:[#allocation2 + $0x3e4] sm:$0xf0]  ;;  %v2008_v17 = vld [vmem:[#allocation2 + $0x2d4] sm:$0xf0]  ;;  %v1696_v18 = vor.u32 %v1994_v10, %v1695_v9 }
  0x24   :  { %966 = vmatpush.bf16.msra.mxu0 %v1392_v42  ;;  %v1888_v19 = vor.u32 %v2042_v13, %v1887_v11  ;;  %v1687_v21 = vld [vmem:[#allocation2 + $0x250] sm:$0xf]  ;;  %v1992_v22 = vld [vmem:[#allocation2 + $0x254] sm:$0xf0]  ;;  %v1752_v24 = vor.u32 %v2008_v17, %v1751_v16  ;;  %v1807_v26 = vld [vmem:[#allocation2 + $0x340] sm:$0xf] }
  0x25   :  { %985 = vmatpush.bf16.msra.mxu1 %v1456_v46  ;;  %v1879_v23 = vld [vmem:[#allocation2 + $0x3d0] sm:$0xf]  ;;  %v2040_v25 = vld [vmem:[#allocation2 + $0x3d4] sm:$0xf0]  ;;  %v2022_v27 = vld [vmem:[#allocation2 + $0x344] sm:$0xf0]  ;;  %v1688_v30 = vor.u32 %v1992_v22, %v1687_v21 }
  0x26   :  { %1004 = vmatpush.bf16.msra.mxu2 %v1520_v47  ;;  %v1743_v28 = vld [vmem:[#allocation2 + $0x2c0] sm:$0xf]  ;;  %v2006_v29 = vld [vmem:[#allocation2 + $0x2c4] sm:$0xf0]  ;;  %v1880_v34 = vor.u32 %v2040_v25, %v1879_v23  ;;  %v1808_v35 = vor.u32 %v2022_v27, %v1807_v26  ;;  %v1909_v40 = vld [vmem:[%s2338_s0 + $0x44] sm:$0xf] }
  0x27   :  { %1023 = vmatpush.bf16.msra.mxu3 %v1584_v51  ;;  %967 = vmatmul.bf16.vlgmr.msra.gmra.mxu0 %v2154_v56  ;;  %v1679_v31 = vld [vmem:[#allocation2 + $0x240] sm:$0xf]  ;;  %v1990_v32 = vld [vmem:[#allocation2 + $0x244] sm:$0xf0]  ;;  %v1744_v39 = vor.u32 %v2006_v29, %v1743_v28  ;;  %v1361_v41 = vld [vmem:[%s2338_s0 + $0x60] sm:$0xf0] }
  0x28   :  { %986 = vmatmul.bf16.vlgmr.msra.gmra.mxu1 %v2156_v61  ;;  %1035 = vmatpush.bf16.msrb.mxu0 %v1704_v6  ;;  %v1871_v33 = vld [vmem:[#allocation2 + $0x3c0] sm:$0xf]  ;;  %v2038_v36 = vld [vmem:[#allocation2 + $0x3c4] sm:$0xf0]  ;;  %v1799_v42 = vld [vmem:[#allocation2 + $0x330] sm:$0xf]  ;;  %v1680_v47 = vor.u32 %v1990_v32, %v1679_v31  ;;  %v2192_v4 = vor.u32 %v1909_v40, %v1361_v41 }
  0x29   :  { %1054 = vmatpush.bf16.msrb.mxu1 %v1768_v57  ;;  %1005 = vmatmul.bf16.vlgmr.msra.gmra.mxu2 %v2158_v62  ;;  %v1359_v37 = vld [vmem:[%s2338_s0 + $0x40] sm:$0xf]  ;;  %v2020_v43 = vld [vmem:[#allocation2 + $0x334] sm:$0xf0]  ;;  %v1367_v44 = vld [vmem:[%s2338_s0 + $0x48] sm:$0xf]  ;;  %v1872_v51 = vor.u32 %v2038_v36, %v1871_v33 }
  0x2a   :  { %1073 = vmatpush.bf16.msrb.mxu2 %v1832_v52  ;;  %1024 = vmatmul.bf16.vlgmr.msra.gmra.mxu3 %v2160_v5  ;;  %v1913_v38 = vld [vmem:[%s2338_s0 + $0x5c] sm:$0xf0]  ;;  %v1735_v45 = vld [vmem:[#allocation2 + $0x2b0] sm:$0xf]  ;;  %v2004_v46 = vld [vmem:[#allocation2 + $0x2b4] sm:$0xf0]  ;;  %v1800_v52 = vor.u32 %v2020_v43, %v1799_v42 }
  0x2b   :  { %1092 = vmatpush.bf16.msrb.mxu3 %v1896_v7  ;;  %v1914_v48 = vld [vmem:[%s2338_s0 + $0x64] sm:$0xf0]  ;;  %v1910_v49 = vld [vmem:[%s2338_s0 + $0x4c] sm:$0xf]  ;;  %v1671_v53 = vld [vmem:[#allocation2 + $0x230] sm:$0xf]  ;;  %v2190_v57 = vor.u32 %v1913_v38, %v1359_v37  ;;  %v1736_v58 = vor.u32 %v2004_v46, %v1735_v45 }
  0x2c   :  { %1036 = vmatpush.bf16.msrb.mxu0 %v1696_v18  ;;  %v1369_v50 = vld [vmem:[%s2338_s0 + $0x68] sm:$0xf0]  ;;  %v1988_v54 = vld [vmem:[#allocation2 + $0x234] sm:$0xf0]  ;;  %v1863_v55 = vld [vmem:[#allocation2 + $0x3b0] sm:$0xf]  ;;  %v2194_v6 = vor.u32 %v1914_v48, %v1367_v44 }
  0x2d   :  { %1055 = vmatpush.bf16.msrb.mxu1 %v1760_v12  ;;  %v2036_v59 = vld [vmem:[#allocation2 + $0x3b4] sm:$0xf0]  ;;  %v1791_v60 = vld [vmem:[#allocation2 + $0x320] sm:$0xf]  ;;  %v2018_v63 = vld [vmem:[#allocation2 + $0x324] sm:$0xf0]  ;;  %v2196_v9 = vor.u32 %v1910_v49, %v1369_v50  ;;  %v1672_v10 = vor.u32 %v1988_v54, %v1671_v53 }
  0x2e   :  { %1074 = vmatpush.bf16.msrb.mxu2 %v1824_v8  ;;  %v1727_v7 = vld [vmem:[#allocation2 + $0x2a0] sm:$0xf]  ;;  %v2002_v8 = vld [vmem:[#allocation2 + $0x2a4] sm:$0xf0]  ;;  %v1864_v11 = vor.u32 %v2036_v59, %v1863_v55  ;;  %v1792_v12 = vor.u32 %v2018_v63, %v1791_v60  ;;  %v1783_v18 = vld [vmem:[#allocation2 + $0x310] sm:$0xf] }
  0x2f   :  { %1093 = vmatpush.bf16.msrb.mxu3 %v1888_v19  ;;  %v1663_v13 = vld [vmem:[#allocation2 + $0x220] sm:$0xf]  ;;  %v1986_v14 = vld [vmem:[#allocation2 + $0x224] sm:$0xf0]  ;;  %v1728_v16 = vor.u32 %v2002_v8, %v1727_v7  ;;  %v2016_v19 = vld [vmem:[#allocation2 + $0x314] sm:$0xf0] }
  0x30   :  { %1037 = vmatpush.bf16.msrb.mxu0 %v1688_v30  ;;  %v1855_v15 = vld [vmem:[#allocation2 + $0x3a0] sm:$0xf]  ;;  %v2034_v17 = vld [vmem:[#allocation2 + $0x3a4] sm:$0xf0]  ;;  %v2000_v21 = vld [vmem:[#allocation2 + $0x294] sm:$0xf0]  ;;  %v1664_v22 = vor.u32 %v1986_v14, %v1663_v13  ;;  %v1784_v25 = vor.u32 %v2016_v19, %v1783_v18 }
  0x31   :  { %1056 = vmatpush.bf16.msrb.mxu1 %v1752_v24  ;;  %v1655_v23 = vld [vmem:[#allocation2 + $0x210] sm:$0xf]  ;;  %v1856_v24 = vor.u32 %v2034_v17, %v1855_v15  ;;  %v1984_v26 = vld [vmem:[#allocation2 + $0x214] sm:$0xf0]  ;;  %v1775_v30 = vld [vmem:[#allocation2 + $0x300] sm:$0xf] }
  0x32   :  { %1075 = vmatpush.bf16.msrb.mxu2 %v1816_v20  ;;  %v1719_v20 = vld [vmem:[#allocation2 + $0x290] sm:$0xf]  ;;  %v2032_v28 = vld [vmem:[#allocation2 + $0x394] sm:$0xf0]  ;;  %v2014_v31 = vld [vmem:[#allocation2 + $0x304] sm:$0xf0]  ;;  %v1656_v36 = vor.u32 %v1984_v26, %v1655_v23 }
  0x33   :  { %1094 = vmatpush.bf16.msrb.mxu3 %v1880_v34  ;;  %v1847_v27 = vld [vmem:[#allocation2 + $0x390] sm:$0xf]  ;;  %v1720_v29 = vor.u32 %v2000_v21, %v1719_v20  ;;  %v1711_v32 = vld [vmem:[#allocation2 + $0x280] sm:$0xf]  ;;  %v1998_v33 = vld [vmem:[#allocation2 + $0x284] sm:$0xf0]  ;;  %v1776_v41 = vor.u32 %v2014_v31, %v1775_v30 }
  0x34   :  { %1038 = vmatpush.bf16.msrb.mxu0 %v1680_v47  ;;  %v1963_v34 = vld [vmem:[#allocation2 + $0x174] sm:$0xf]  ;;  %v1647_v37 = vld [vmem:[#allocation2 + $0x200] sm:$0xf]  ;;  %v1848_v40 = vor.u32 %v2032_v28, %v1847_v27  ;;  %v1982_v42 = vld [vmem:[#allocation2 + $0x204] sm:$0xf0]  ;;  %v1712_v45 = vor.u32 %v1998_v33, %v1711_v32 }
  0x35   :  { %1057 = vmatpush.bf16.msrb.mxu1 %v1744_v39  ;;  %v1947_v38 = vld [vmem:[#allocation2 + $0xf4] sm:$0xf]  ;;  %v1513_v39 = vld [vmem:[#allocation2 + $0xf8] sm:$0xf0]  ;;  %v1839_v43 = vld [vmem:[#allocation2 + $0x380] sm:$0xf]  ;;  %v1648_v60 = vor.u32 %v1982_v42, %v1647_v37 }
  0x36   :  { %1076 = vmatpush.bf16.msrb.mxu2 %v1808_v35  ;;  %v1577_v35 = vld [vmem:[#allocation2 + $0x178] sm:$0xf0]  ;;  %v2030_v44 = vld [vmem:[#allocation2 + $0x384] sm:$0xf0]  ;;  %v1343_v46 = vld [vmem:[%s2338_s0 + $0x10] sm:$0xf]  ;;  %v1516_v54 = vor.u32 %v1947_v38, %v1513_v39 }
  0x37   :  { %1095 = vmatpush.bf16.msrb.mxu3 %v1872_v51  ;;  %972 = vmatmul.bf16.gmra.mxu0 %v2190_v57  ;;  %v1907_v47 = vld [vmem:[%s2338_s0 + $0x2c] sm:$0xf0]  ;;  %v1903_v48 = vld [vmem:[%s2338_s0 + $0x14] sm:$0xf]  ;;  %v1580_v50 = vor.u32 %v1963_v34, %v1577_v35  ;;  %v1641_v55 = vld [vmem:[#allocation2 + $0x1f8] sm:$0xf0] }
  0x38   :  { %991 = vmatmul.bf16.gmra.mxu1 %v2192_v4  ;;  %1039 = vmatpush.bf16.msrb.mxu0 %v1672_v10  ;;  %v1345_v49 = vld [vmem:[%s2338_s0 + $0x30] sm:$0xf0]  ;;  %v1569_v59 = vld [vmem:[#allocation2 + $0x168] sm:$0xf0]  ;;  %v1351_v63 = vld [vmem:[%s2338_s0 + $0x18] sm:$0xf]  ;;  %v1840_v10 = vor.u32 %v2030_v44, %v1839_v43  ;;  %v2226_v20 = vor.u32 %v1907_v47, %v1343_v46 }
  0x39   :  { %1058 = vmatpush.bf16.msrb.mxu1 %v1736_v58  ;;  %1010 = vmatmul.bf16.gmra.mxu2 %v2194_v6  ;;  %v1931_v51 = vld [vmem:[#allocation2 + $0x74] sm:$0xf]  ;;  %v1961_v58 = vld [vmem:[#allocation2 + $0x164] sm:$0xf]  ;;  %v1908_v7 = vld [vmem:[%s2338_s0 + $0x34] sm:$0xf0]  ;;  %v2228_v21 = vor.u32 %v1903_v48, %v1345_v49 }
  0x3a   :  { %1077 = vmatpush.bf16.msrb.mxu2 %v1800_v52  ;;  %1029 = vmatmul.bf16.gmra.mxu3 %v2196_v9  ;;  %v1449_v52 = vld [vmem:[#allocation2 + $0x78] sm:$0xf0]  ;;  %v1979_v53 = vld [vmem:[#allocation2 + $0x1f4] sm:$0xf]  ;;  %v1929_v13 = vld [vmem:[#allocation2 + $0x64] sm:$0xf] }
  0x3b   :  { %1096 = vmatpush.bf16.msrb.mxu3 %v1864_v11  ;;  %v1904_v8 = vld [vmem:[%s2338_s0 + $0x1c] sm:$0xf]  ;;  %v1441_v14 = vld [vmem:[#allocation2 + $0x68] sm:$0xf0]  ;;  %v1644_v15 = vor.u32 %v1979_v53, %v1641_v55  ;;  %v1945_v17 = vld [vmem:[#allocation2 + $0xe4] sm:$0xf] }
  0x3c   :  { %1040 = vmatpush.bf16.msrb.mxu0 %v1664_v22  ;;  %v1353_v11 = vld [vmem:[%s2338_s0 + $0x38] sm:$0xf0]  ;;  %v1505_v18 = vld [vmem:[#allocation2 + $0xe8] sm:$0xf0]  ;;  %v1977_v19 = vld [vmem:[#allocation2 + $0x1e4] sm:$0xf]  ;;  %v1444_v27 = vor.u32 %v1929_v13, %v1441_v14 }
  0x3d   :  { %1059 = vmatpush.bf16.msrb.mxu1 %v1728_v16  ;;  %v1572_v16 = vor.u32 %v1961_v58, %v1569_v59  ;;  %v1633_v22 = vld [vmem:[#allocation2 + $0x1e8] sm:$0xf0]  ;;  %v1959_v23 = vld [vmem:[#allocation2 + $0x154] sm:$0xf]  ;;  %v2232_v26 = vor.u32 %v1904_v8, %v1353_v11  ;;  %v1508_v28 = vor.u32 %v1945_v17, %v1505_v18  ;;  %v1433_v30 = vld [vmem:[#allocation2 + $0x58] sm:$0xf0] }
  0x3e   :  { %1078 = vmatpush.bf16.msrb.mxu2 %v1792_v12  ;;  %v1452_v12 = vor.u32 %v1931_v51, %v1449_v52  ;;  %v1636_v31 = vor.u32 %v1977_v19, %v1633_v22  ;;  %v1943_v33 = vld [vmem:[#allocation2 + $0xd4] sm:$0xf]  ;;  %v1497_v34 = vld [vmem:[#allocation2 + $0xd8] sm:$0xf0]  ;;  %v1957_v37 = vld [vmem:[#allocation2 + $0x144] sm:$0xf] }
  0x3f   :  { %1097 = vmatpush.bf16.msrb.mxu3 %v1856_v24  ;;  %v1561_v24 = vld [vmem:[#allocation2 + $0x158] sm:$0xf0]  ;;  %v1975_v35 = vld [vmem:[#allocation2 + $0x1d4] sm:$0xf]  ;;  %v1553_v38 = vld [vmem:[#allocation2 + $0x148] sm:$0xf0] }
  0x40   :  { %1041 = vmatpush.bf16.msrb.mxu0 %v1656_v36  ;;  %v1564_v32 = vor.u32 %v1959_v23, %v1561_v24  ;;  %v1625_v36 = vld [vmem:[#allocation2 + $0x1d8] sm:$0xf0]  ;;  %v1425_v42 = vld [vmem:[#allocation2 + $0x48] sm:$0xf0]  ;;  %v1556_v44 = vor.u32 %v1957_v37, %v1553_v38  ;;  %v1973_v47 = vld [vmem:[#allocation2 + $0x1c4] sm:$0xf] }
  0x41   :  { %1060 = vmatpush.bf16.msrb.mxu1 %v1720_v29  ;;  %v1927_v29 = vld [vmem:[#allocation2 + $0x54] sm:$0xf]  ;;  %v1628_v43 = vor.u32 %v1975_v35, %v1625_v36  ;;  %v1489_v46 = vld [vmem:[#allocation2 + $0xc8] sm:$0xf0]  ;;  %v1375_v58 = vld [vmem:[%s2338_s0 + $0x50] sm:$0xf] }
  0x42   :  { %1079 = vmatpush.bf16.msrb.mxu2 %v1784_v25  ;;  %v2230_v25 = vor.u32 %v1908_v7, %v1351_v63  ;;  %v1436_v39 = vor.u32 %v1927_v29, %v1433_v30  ;;  %v1617_v48 = vld [vmem:[#allocation2 + $0x1c8] sm:$0xf0]  ;;  %v1955_v49 = vld [vmem:[#allocation2 + $0x134] sm:$0xf]  ;;  %v1915_v59 = vld [vmem:[%s2338_s0 + $0x6c] sm:$0xf0] }
  0x43   :  { %1098 = vmatpush.bf16.msrb.mxu3 %v1848_v40  ;;  %v1500_v40 = vor.u32 %v1943_v33, %v1497_v34  ;;  %v1923_v53 = vld [vmem:[#allocation2 + $0x34] sm:$0xf]  ;;  %v1620_v55 = vor.u32 %v1973_v47, %v1617_v48  ;;  %v1953_v13 = vld [vmem:[#allocation2 + $0x124] sm:$0xf]  ;;  %v1537_v14 = vld [vmem:[#allocation2 + $0x128] sm:$0xf0] }
  0x44   :  { %1042 = vmatpush.bf16.msrb.mxu0 %v1648_v60  ;;  %v1911_v60 = vld [vmem:[%s2338_s0 + $0x54] sm:$0xf]  ;;  %v1912_v17 = vld [vmem:[%s2338_s0 + $0x5c] sm:$0xf]  ;;  %v1921_v23 = vld [vmem:[#allocation2 + $0x24] sm:$0xf] }
  0x45   :  { %1061 = vmatpush.bf16.msrb.mxu1 %v1712_v45  ;;  %v1941_v45 = vld [vmem:[#allocation2 + $0xc4] sm:$0xf]  ;;  %v1377_v63 = vld [vmem:[%s2338_s0 + $0x70] sm:$0xf0]  ;;  %v1385_v18 = vld [vmem:[%s2338_s0 + $0x78] sm:$0xf0] }
  0x46   :  { %1080 = vmatpush.bf16.msrb.mxu2 %v1776_v41  ;;  %v1925_v41 = vld [vmem:[#allocation2 + $0x44] sm:$0xf]  ;;  %v1492_v52 = vor.u32 %v1941_v45, %v1489_v46  ;;  %v1939_v8 = vld [vmem:[#allocation2 + $0xb4] sm:$0xf]  ;;  %v1409_v24 = vld [vmem:[#allocation2 + $0x28] sm:$0xf0]  ;;  %v2264_v33 = vor.u32 %v1911_v60, %v1377_v63  ;;  %v2268_v38 = vor.u32 %v1912_v17, %v1385_v18 }
  0x47   :  { %1099 = vmatpush.bf16.msrb.mxu3 %v1840_v10  ;;  %1043 = vmatmul.bf16.vlgmr.msrb.gmra.mxu0 %v2226_v20  ;;  %v1428_v51 = vor.u32 %v1925_v41, %v1425_v42  ;;  %v1481_v10 = vld [vmem:[#allocation2 + $0xb8] sm:$0xf0]  ;;  %v1971_v11 = vld [vmem:[#allocation2 + $0x1b4] sm:$0xf]  ;;  %v1937_v29 = vld [vmem:[#allocation2 + $0xa4] sm:$0xf] }
  0x48   :  { %1111 = vmatpush.bf16.msra.mxu0 %v1452_v12  ;;  %1062 = vmatmul.bf16.vlgmr.msrb.gmra.mxu1 %v2228_v21  ;;  %v1609_v12 = vld [vmem:[#allocation2 + $0x1b8] sm:$0xf0]  ;;  %v1484_v22 = vor.u32 %v1939_v8, %v1481_v10  ;;  %v1473_v30 = vld [vmem:[#allocation2 + $0xa8] sm:$0xf0]  ;;  %v1951_v35 = vld [vmem:[#allocation2 + $0x114] sm:$0xf] }
  0x49   :  { %1130 = vmatpush.bf16.msra.mxu1 %v1516_v54  ;;  %1081 = vmatmul.bf16.vlgmr.msrb.gmra.mxu2 %v2230_v25  ;;  %v1417_v54 = vld [vmem:[#allocation2 + $0x38] sm:$0xf0]  ;;  %v1601_v34 = vld [vmem:[#allocation2 + $0x1a8] sm:$0xf0]  ;;  %v1919_v41 = vld [vmem:[#allocation2 + $0x14] sm:$0xf] }
  0x4a   :  { %1149 = vmatpush.bf16.msra.mxu2 %v1580_v50  ;;  %1100 = vmatmul.bf16.vlgmr.msrb.gmra.mxu3 %v2232_v26  ;;  %v1545_v50 = vld [vmem:[#allocation2 + $0x138] sm:$0xf0]  ;;  %v1420_v19 = vor.u32 %v1923_v53, %v1417_v54  ;;  %v1935_v45 = vld [vmem:[#allocation2 + $0x94] sm:$0xf]  ;;  %v1965_v8 = vld [vmem:[#allocation2 + $0x184] sm:$0xf] }
  0x4b   :  { %1168 = vmatpush.bf16.msra.mxu3 %v1644_v15  ;;  %v1548_v7 = vor.u32 %v1955_v49, %v1545_v50  ;;  %v1383_v15 = vld [vmem:[%s2338_s0 + $0x58] sm:$0xf]  ;;  %v1529_v36 = vld [vmem:[#allocation2 + $0x118] sm:$0xf0]  ;;  %v1967_v47 = vld [vmem:[#allocation2 + $0x194] sm:$0xf] }
  0x4c   :  { %1112 = vmatpush.bf16.msra.mxu0 %v1444_v27  ;;  %v1612_v27 = vor.u32 %v1971_v11, %v1609_v12  ;;  %v1401_v42 = vld [vmem:[#allocation2 + $0x18] sm:$0xf0]  ;;  %v1949_v49 = vld [vmem:[#allocation2 + $0x104] sm:$0xf]  ;;  %v1521_v50 = vld [vmem:[#allocation2 + $0x108] sm:$0xf0] }
  0x4d   :  { %1131 = vmatpush.bf16.msra.mxu1 %v1508_v28  ;;  %v1540_v28 = vor.u32 %v1953_v13, %v1537_v14  ;;  %v1465_v46 = vld [vmem:[#allocation2 + $0x98] sm:$0xf0]  ;;  %v1404_v53 = vor.u32 %v1919_v41, %v1401_v42  ;;  %v1524_v63 = vor.u32 %v1949_v49, %v1521_v50  ;;  %v1585_v10 = vld [vmem:[#allocation2 + $0x188] sm:$0xf0]  ;;  %v1995_v12 = vld [vmem:[#allocation2 + $0x274] sm:$0xf] }
  0x4e   :  { %1150 = vmatpush.bf16.msra.mxu2 %v1572_v16  ;;  %v1916_v16 = vld [vmem:[%s2338_s0 + $0x74] sm:$0xf0]  ;;  %v1593_v48 = vld [vmem:[#allocation2 + $0x198] sm:$0xf0]  ;;  %v1468_v54 = vor.u32 %v1935_v45, %v1465_v46  ;;  %v2011_v14 = vld [vmem:[#allocation2 + $0x2f4] sm:$0xf] }
  0x4f   :  { %1169 = vmatpush.bf16.msra.mxu3 %v1636_v31  ;;  %v1969_v31 = vld [vmem:[#allocation2 + $0x1a4] sm:$0xf]  ;;  %v2266_v37 = vor.u32 %v1916_v16, %v1383_v15  ;;  %v1596_v60 = vor.u32 %v1967_v47, %v1593_v48  ;;  %v1705_v13 = vld [vmem:[#allocation2 + $0x278] sm:$0xf0]  ;;  %v2043_v16 = vld [vmem:[#allocation2 + $0x3f4] sm:$0xf] }
  0x50   :  { %1113 = vmatpush.bf16.msra.mxu0 %v1436_v39  ;;  %v1412_v39 = vor.u32 %v1921_v23, %v1409_v24  ;;  %v1769_v15 = vld [vmem:[#allocation2 + $0x2f8] sm:$0xf0]  ;;  %v1825_v23 = vld [vmem:[#allocation2 + $0x368] sm:$0xf0]  ;;  %v1588_v24 = vor.u32 %v1965_v8, %v1585_v10  ;;  %v2023_v42 = vld [vmem:[#allocation2 + $0x354] sm:$0xf] }
  0x51   :  { %1132 = vmatpush.bf16.msra.mxu1 %v1500_v40  ;;  %v1476_v40 = vor.u32 %v1937_v29, %v1473_v30  ;;  %v1897_v17 = vld [vmem:[#allocation2 + $0x3f8] sm:$0xf0]  ;;  %v1993_v30 = vld [vmem:[#allocation2 + $0x264] sm:$0xf]  ;;  %v1889_v41 = vld [vmem:[#allocation2 + $0x3e8] sm:$0xf0] }
  0x52   :  { %1151 = vmatpush.bf16.msra.mxu2 %v1564_v32  ;;  %v2262_v32 = vor.u32 %v1915_v59, %v1375_v58  ;;  %v1393_v58 = vld [vmem:[#allocation2 + $0x8] sm:$0xf0]  ;;  %v1933_v59 = vld [vmem:[#allocation2 + $0x84] sm:$0xf]  ;;  %v1900_v29 = vor.u32 %v2043_v16, %v1897_v17  ;;  %v1689_v45 = vld [vmem:[#allocation2 + $0x258] sm:$0xf0] }
  0x53   :  { %1170 = vmatpush.bf16.msra.mxu3 %v1628_v43  ;;  %v1604_v43 = vor.u32 %v1969_v31, %v1601_v34  ;;  %v1697_v31 = vld [vmem:[#allocation2 + $0x268] sm:$0xf0]  ;;  %v2007_v48 = vld [vmem:[#allocation2 + $0x2d4] sm:$0xf]  ;;  %v1753_v49 = vld [vmem:[#allocation2 + $0x2d8] sm:$0xf0] }
  0x54   :  { %1114 = vmatpush.bf16.msra.mxu0 %v1428_v51  ;;  %v2027_v51 = vld [vmem:[#allocation2 + $0x374] sm:$0xf]  ;;  %v1745_v8 = vld [vmem:[#allocation2 + $0x2c8] sm:$0xf0]  ;;  %v1737_v17 = vld [vmem:[#allocation2 + $0x2b8] sm:$0xf0] }
  0x55   :  { %1133 = vmatpush.bf16.msra.mxu1 %v1492_v52  ;;  %v1833_v52 = vld [vmem:[#allocation2 + $0x378] sm:$0xf0]  ;;  %v2003_v16 = vld [vmem:[#allocation2 + $0x2b4] sm:$0xf] }
  0x56   :  { %1152 = vmatpush.bf16.msra.mxu2 %v1556_v44  ;;  %v1532_v44 = vor.u32 %v1951_v35, %v1529_v36  ;;  %v1836_v11 = vor.u32 %v2027_v51, %v1833_v52  ;;  %v2009_v35 = vld [vmem:[#allocation2 + $0x2e4] sm:$0xf]  ;;  %v1761_v36 = vld [vmem:[#allocation2 + $0x2e8] sm:$0xf0]  ;;  %v2039_v52 = vld [vmem:[#allocation2 + $0x3d4] sm:$0xf] }
  0x57   :  { %1171 = vmatpush.bf16.msra.mxu3 %v1620_v55  ;;  %1048 = vmatmul.bf16.gmra.mxu0 %v2262_v32  ;;  %v1917_v55 = vld [vmem:[#allocation2 + $0x4] sm:$0xf]  ;;  %v1764_v46 = vor.u32 %v2009_v35, %v1761_v36  ;;  %v1729_v35 = vld [vmem:[#allocation2 + $0x2a8] sm:$0xf0] }
  0x58   :  { %1115 = vmatpush.bf16.msra.mxu0 %v1420_v19  ;;  %1067 = vmatmul.bf16.gmra.mxu1 %v2264_v33  ;;  %v1396_v18 = vor.u32 %v1917_v55, %v1393_v58  ;;  %v1809_v55 = vld [vmem:[#allocation2 + $0x348] sm:$0xf0]  ;;  %v1989_v58 = vld [vmem:[#allocation2 + $0x244] sm:$0xf] }
  0x59   :  { %1134 = vmatpush.bf16.msra.mxu1 %v1484_v22  ;;  %1086 = vmatmul.bf16.gmra.mxu2 %v2266_v37  ;;  %v2025_v22 = vld [vmem:[#allocation2 + $0x364] sm:$0xf] }
  0x5a   :  { %1153 = vmatpush.bf16.msra.mxu2 %v1548_v7  ;;  %1105 = vmatmul.bf16.gmra.mxu3 %v2268_v38  ;;  %v1457_v7 = vld [vmem:[#allocation2 + $0x88] sm:$0xf0]  ;;  %v1828_v34 = vor.u32 %v2025_v22, %v1825_v23  ;;  %v2035_v22 = vld [vmem:[#allocation2 + $0x3b4] sm:$0xf]  ;;  %v1865_v23 = vld [vmem:[#allocation2 + $0x3b8] sm:$0xf0] }
  0x5b   :  { %1172 = vmatpush.bf16.msra.mxu3 %v1612_v27  ;;  %v1460_v19 = vor.u32 %v1933_v59, %v1457_v7  ;;  %v1708_v27 = vor.u32 %v1995_v12, %v1705_v13  ;;  %v1681_v59 = vld [vmem:[#allocation2 + $0x248] sm:$0xf0]  ;;  %v2005_v7 = vld [vmem:[#allocation2 + $0x2c4] sm:$0xf]  ;;  %v1801_v13 = vld [vmem:[#allocation2 + $0x338] sm:$0xf0] }
  0x5c   :  { %1116 = vmatpush.bf16.msra.mxu0 %v1412_v39  ;;  %v1700_v39 = vor.u32 %v1993_v30, %v1697_v31  ;;  %v1873_v12 = vld [vmem:[#allocation2 + $0x3c8] sm:$0xf0]  ;;  %v1740_v30 = vor.u32 %v2003_v16, %v1737_v17  ;;  %v1868_v31 = vor.u32 %v2035_v22, %v1865_v23 }
  0x5d   :  { %1135 = vmatpush.bf16.msra.mxu1 %v1476_v40  ;;  %v2041_v40 = vld [vmem:[#allocation2 + $0x3e4] sm:$0xf] }
  0x5e   :  { %1154 = vmatpush.bf16.msra.mxu2 %v1540_v28  ;;  %v1772_v28 = vor.u32 %v2011_v14, %v1769_v15  ;;  %v1892_v47 = vor.u32 %v2041_v40, %v1889_v41  ;;  %v1987_v14 = vld [vmem:[#allocation2 + $0x234] sm:$0xf]  ;;  %v1673_v15 = vld [vmem:[#allocation2 + $0x238] sm:$0xf0]  ;;  %v2033_v40 = vld [vmem:[#allocation2 + $0x3a4] sm:$0xf] }
  0x5f   :  { %1173 = vmatpush.bf16.msra.mxu3 %v1604_v43  ;;  %v1817_v43 = vld [vmem:[#allocation2 + $0x358] sm:$0xf0]  ;;  %v1857_v41 = vld [vmem:[#allocation2 + $0x3a8] sm:$0xf0] }
  0x60   :  { %1117 = vmatpush.bf16.msra.mxu0 %v1404_v53  ;;  %v1820_v50 = vor.u32 %v2023_v42, %v1817_v43  ;;  %v1881_v53 = vld [vmem:[#allocation2 + $0x3d8] sm:$0xf0]  ;;  %v2015_v42 = vld [vmem:[#allocation2 + $0x314] sm:$0xf] }
  0x61   :  { %1136 = vmatpush.bf16.msra.mxu1 %v1468_v54  ;;  %v2021_v54 = vld [vmem:[#allocation2 + $0x344] sm:$0xf]  ;;  %v1785_v43 = vld [vmem:[#allocation2 + $0x318] sm:$0xf0] }
  0x62   :  { %1155 = vmatpush.bf16.msra.mxu2 %v1532_v44  ;;  %v1991_v44 = vld [vmem:[#allocation2 + $0x254] sm:$0xf]  ;;  %v1812_v10 = vor.u32 %v2021_v54, %v1809_v55  ;;  %v2013_v54 = vld [vmem:[#allocation2 + $0x304] sm:$0xf]  ;;  %v1777_v55 = vld [vmem:[#allocation2 + $0x308] sm:$0xf0] }
  0x63   :  { %1174 = vmatpush.bf16.msra.mxu3 %v1596_v60  ;;  %v1692_v51 = vor.u32 %v1991_v44, %v1689_v45  ;;  %v1756_v60 = vor.u32 %v2007_v48, %v1753_v49  ;;  %v1983_v44 = vld [vmem:[#allocation2 + $0x214] sm:$0xf]  ;;  %v1657_v45 = vld [vmem:[#allocation2 + $0x218] sm:$0xf0] }
  0x64   :  { %1118 = vmatpush.bf16.msra.mxu0 %v1396_v18  ;;  %v1999_v48 = vld [vmem:[#allocation2 + $0x294] sm:$0xf]  ;;  %v1721_v49 = vld [vmem:[#allocation2 + $0x298] sm:$0xf0] }
  0x65   :  { %1137 = vmatpush.bf16.msra.mxu1 %v1460_v19  ;;  %v1676_v19 = vor.u32 %v1987_v14, %v1673_v15 }
  0x66   :  { %1156 = vmatpush.bf16.msra.mxu2 %v1524_v63  ;;  %v1884_v63 = vor.u32 %v2039_v52, %v1881_v53  ;;  %v2031_v52 = vld [vmem:[#allocation2 + $0x394] sm:$0xf]  ;;  %v1849_v53 = vld [vmem:[#allocation2 + $0x398] sm:$0xf0] }
  0x67   :  { %1175 = vmatpush.bf16.msra.mxu3 %v1588_v24  ;;  %1119 = vmatmul.bf16.vlgmr.msra.gmra.mxu0 %v2154_v56  ;;  %v2037_v56 = vld [vmem:[#allocation2 + $0x3c4] sm:$0xf] }
  0x68   :  { %1187 = vmatpush.bf16.msrb.mxu0 %v1708_v27  ;;  %1138 = vmatmul.bf16.vlgmr.msra.gmra.mxu1 %v2156_v61  ;;  %v2019_v61 = vld [vmem:[#allocation2 + $0x334] sm:$0xf]  ;;  %v2017_v24 = vld [vmem:[#allocation2 + $0x324] sm:$0xf]  ;;  %v1793_v27 = vld [vmem:[#allocation2 + $0x328] sm:$0xf0] }
  0x69   :  { %1206 = vmatpush.bf16.msrb.mxu1 %v1772_v28  ;;  %1157 = vmatmul.bf16.vlgmr.msra.gmra.mxu2 %v2158_v62  ;;  %v1748_v62 = vor.u32 %v2005_v7, %v1745_v8  ;;  %v1804_v18 = vor.u32 %v2019_v61, %v1801_v13  ;;  %v1985_v28 = vld [vmem:[#allocation2 + $0x224] sm:$0xf]  ;;  %v1796_v36 = vor.u32 %v2017_v24, %v1793_v27 }
  0x6a   :  { %1225 = vmatpush.bf16.msrb.mxu2 %v1836_v11  ;;  %1176 = vmatmul.bf16.vlgmr.msra.gmra.mxu3 %v2160_v5  ;;  %v1684_v11 = vor.u32 %v1989_v58, %v1681_v59  ;;  %v1876_v5 = vor.u32 %v2037_v56, %v1873_v12  ;;  %v1981_v58 = vld [vmem:[#allocation2 + $0x204] sm:$0xf]  ;;  %v1649_v59 = vld [vmem:[#allocation2 + $0x208] sm:$0xf0]  ;;  %v1780_v8 = vor.u32 %v2013_v54, %v1777_v55 }
  0x6b   :  { %1244 = vmatpush.bf16.msrb.mxu3 %v1900_v29  ;;  %v1665_v29 = vld [vmem:[#allocation2 + $0x228] sm:$0xf0]  ;;  %v1997_v7 = vld [vmem:[#allocation2 + $0x284] sm:$0xf] }
  0x6c   :  { %1188 = vmatpush.bf16.msrb.mxu0 %v1700_v39  ;;  %v1668_v39 = vor.u32 %v1985_v28, %v1665_v29  ;;  %v1841_v56 = vld [vmem:[#allocation2 + $0x388] sm:$0xf0] }
  0x6d   :  { %1207 = vmatpush.bf16.msrb.mxu1 %v1764_v46 }
  0x6e   :  { %1226 = vmatpush.bf16.msrb.mxu2 %v1828_v34  ;;  %v2001_v34 = vld [vmem:[#allocation2 + $0x2a4] sm:$0xf] }
  0x6f   :  { %1245 = vmatpush.bf16.msrb.mxu3 %v1892_v47  ;;  %v1732_v46 = vor.u32 %v2001_v34, %v1729_v35  ;;  %v1860_v47 = vor.u32 %v2033_v40, %v1857_v41 }
  0x70   :  { %1189 = vmatpush.bf16.msrb.mxu0 %v1692_v51  ;;  %v1660_v51 = vor.u32 %v1983_v44, %v1657_v45 }
  0x71   :  { %1208 = vmatpush.bf16.msrb.mxu1 %v1756_v60  ;;  %v1724_v60 = vor.u32 %v1999_v48, %v1721_v49 }
  0x72   :  { %1227 = vmatpush.bf16.msrb.mxu2 %v1820_v50  ;;  %v1788_v50 = vor.u32 %v2015_v42, %v1785_v43 }
  0x73   :  { %1246 = vmatpush.bf16.msrb.mxu3 %v1884_v63  ;;  %v1852_v63 = vor.u32 %v2031_v52, %v1849_v53 }
  0x74   :  { %1190 = vmatpush.bf16.msrb.mxu0 %v1684_v11  ;;  %v1713_v11 = vld [vmem:[#allocation2 + $0x288] sm:$0xf0] }
  0x75   :  { %1209 = vmatpush.bf16.msrb.mxu1 %v1748_v62 }
  0x76   :  { %1228 = vmatpush.bf16.msrb.mxu2 %v1812_v10  ;;  %v1652_v10 = vor.u32 %v1981_v58, %v1649_v59 }
  0x77   :  { %1247 = vmatpush.bf16.msrb.mxu3 %v1876_v5  ;;  %1124 = vmatmul.bf16.gmra.mxu0 %v2190_v57  ;;  %v2029_v57 = vld [vmem:[#allocation2 + $0x384] sm:$0xf] }
  0x78   :  { %1191 = vmatpush.bf16.msrb.mxu0 %v1676_v19  ;;  %1143 = vmatmul.bf16.gmra.mxu1 %v2192_v4  ;;  %v1716_v4 = vor.u32 %v1997_v7, %v1713_v11  ;;  %v1844_v12 = vor.u32 %v2029_v57, %v1841_v56 }
  0x79   :  { %1210 = vmatpush.bf16.msrb.mxu1 %v1740_v30  ;;  %1162 = vmatmul.bf16.gmra.mxu2 %v2194_v6  ;;  %v2293_v6 = vld [vmem:[%s2340_s2] sm:$0x3] }
  0x7a   :  { %1229 = vmatpush.bf16.msrb.mxu2 %v1804_v18  ;;  %1181 = vmatmul.bf16.gmra.mxu3 %v2196_v9  ;;  %v235_v9 = vperm.slane %v2293_v6, 0 }
  0x7b   :  { %1248 = vmatpush.bf16.msrb.mxu3 %v1868_v31 }
  0x7c   :  { %1192 = vmatpush.bf16.msrb.mxu0 %v1668_v39 }
  0x7d   :  { %1211 = vmatpush.bf16.msrb.mxu1 %v1732_v46 }
  0x7e   :  { %1230 = vmatpush.bf16.msrb.mxu2 %v1796_v36 }
  0x7f   :  { %1249 = vmatpush.bf16.msrb.mxu3 %v1860_v47 }
  0x80   :  { %1193 = vmatpush.bf16.msrb.mxu0 %v1660_v51 }
  0x81   :  { %1212 = vmatpush.bf16.msrb.mxu1 %v1724_v60 }
  0x82   :  { %1231 = vmatpush.bf16.msrb.mxu2 %v1788_v50 }
  0x83   :  { %1250 = vmatpush.bf16.msrb.mxu3 %v1852_v63 }
  0x84   :  { %1194 = vmatpush.bf16.msrb.mxu0 %v1652_v10 }
  0x85   :  { %1213 = vmatpush.bf16.msrb.mxu1 %v1716_v4 }
  0x86   :  { %1232 = vmatpush.bf16.msrb.mxu2 %v1780_v8 }
  0x87   :  { %1251 = vmatpush.bf16.msrb.mxu3 %v1844_v12  ;;  %1195 = vmatmul.bf16.vlgmr.msrb.gmra.mxu0 %v2226_v20 }
  0x88   :  { %1214 = vmatmul.bf16.vlgmr.msrb.gmra.mxu1 %v2228_v21 }
  0x89   :  { %1233 = vmatmul.bf16.vlgmr.msrb.gmra.mxu2 %v2230_v25 }
  0x8a   :  { %1252 = vmatmul.bf16.vlgmr.msrb.gmra.mxu3 %v2232_v26 }
  0x97   :  { %1200 = vmatmul.bf16.gmra.mxu0 %v2262_v32 }
  0x98   :  { %1219 = vmatmul.bf16.gmra.mxu1 %v2264_v33 }
  0x99   :  { %1238 = vmatmul.bf16.gmra.mxu2 %v2266_v37 }
  0x9a   :  { %1257 = vmatmul.bf16.gmra.mxu3 %v2268_v38 }
  0xa4   :  { %v968_v20 = vpop.f32.mrf.mxu0 }
  0xa5   :  { %v969_v21 = vadd.f32 %v968_v20, %v235_v9  ;;  %v987_v25 = vpop.f32.mrf.mxu1 }
  0xa7   :  { %v988_v61 = vadd.f32 %v987_v25, %v969_v21 }
  0xac   :  { %v1006_v26 = vpop.f32.mrf.mxu2  ;;  %v970_v14 = vpop.f32.mrf.mxu0 }
  0xad   :  { %v1007_v13 = vadd.f32 %v1006_v26, %v988_v61  ;;  %v1025_v32 = vpop.f32.mrf.mxu3  ;;  %v971_v33 = vadd.f32 %v970_v14, %v235_v9  ;;  %v989_v15 = vpop.f32.mrf.mxu1 }
  0xaf   :  { %v1026_v37 = vadd.f32 %v1025_v32, %v1007_v13  ;;  %v990_v62 = vadd.f32 %v989_v15, %v971_v33 }
  0xb4   :  { %v1008_v38 = vpop.f32.mrf.mxu2  ;;  %v973_v17 = vpop.f32.mrf.mxu0 }
  0xb5   :  { %v1009_v5 = vadd.f32 %v1008_v38, %v990_v62  ;;  %v1027_v16 = vpop.f32.mrf.mxu3  ;;  %v974_v18 = vadd.f32 %v973_v17, %v235_v9  ;;  %v992_v19 = vpop.f32.mrf.mxu1 }
  0xb7   :  { %v1028_v22 = vadd.f32 %v1027_v16, %v1009_v5  ;;  %v993_v23 = vadd.f32 %v992_v19, %v974_v18  ;;  %v236_v5 = vperm.slane %v2293_v6, 1  ;;  %v1263_v6 = vld [vmem:[%s2341_s3] sm:$0xff] }
  0xbc   :  { %v1011_v24 = vpop.f32.mrf.mxu2  ;;  %v975_v29 = vpop.f32.mrf.mxu0 }
  0xbd   :  { %v1012_v27 = vadd.f32 %v1011_v24, %v993_v23  ;;  %v1030_v28 = vpop.f32.mrf.mxu3  ;;  %v976_v30 = vadd.f32 %v975_v29, %v235_v9  ;;  %v994_v31 = vpop.f32.mrf.mxu1 }
  0xbf   :  { %v1031_v34 = vadd.f32 %v1030_v28, %v1012_v27  ;;  %v995_v35 = vadd.f32 %v994_v31, %v976_v30 }
  0xc4   :  { %v1013_v36 = vpop.f32.mrf.mxu2  ;;  %v1044_v41 = vpop.f32.mrf.mxu0 }
  0xc5   :  { %v1014_v39 = vadd.f32 %v1013_v36, %v995_v35  ;;  %v1032_v40 = vpop.f32.mrf.mxu3  ;;  %v1063_v42 = vpop.f32.mrf.mxu1  ;;  %v1045_v44 = vadd.f32 %v1044_v41, %v1026_v37 }
  0xc7   :  { %v1033_v43 = vadd.f32 %v1032_v40, %v1014_v39  ;;  %v1064_v45 = vadd.f32 %v1063_v42, %v1045_v44 }
  0xcc   :  { %v1082_v46 = vpop.f32.mrf.mxu2  ;;  %v1046_v49 = vpop.f32.mrf.mxu0 }
  0xcd   :  { %v1101_v47 = vpop.f32.mrf.mxu3  ;;  %v1083_v48 = vadd.f32 %v1082_v46, %v1064_v45  ;;  %v1065_v50 = vpop.f32.mrf.mxu1  ;;  %v1047_v51 = vadd.f32 %v1046_v49, %v1028_v22 }
  0xcf   :  { %v1102_v52 = vadd.f32 %v1101_v47, %v1083_v48  ;;  %v1066_v53 = vadd.f32 %v1065_v50, %v1047_v51  ;;  %v1280_v50 = vunpack.c.h.bf16 %v2113_v0 }
  0xd4   :  { %v1084_v54 = vpop.f32.mrf.mxu2  ;;  %v1049_v59 = vpop.f32.mrf.mxu0 }
  0xd5   :  { %v1103_v55 = vpop.f32.mrf.mxu3  ;;  %v1085_v58 = vadd.f32 %v1084_v54, %v1066_v53  ;;  %v1068_v60 = vpop.f32.mrf.mxu1  ;;  %v1050_v63 = vadd.f32 %v1049_v59, %v1031_v34  ;;  %v1267_v53 = vunpack.c.l.bf16 %v1263_v6  ;;  %v1268_v59 = vunpack.c.h.bf16 %v1263_v6 }
  0xd7   :  { %v2296_v7 = vadd.f32 %v1103_v55, %v1085_v58  ;;  %v1069_v8 = vadd.f32 %v1068_v60, %v1050_v63 }
  0xdc   :  { %v1087_v10 = vpop.f32.mrf.mxu2  ;;  %v1051_v56 = vpop.f32.mrf.mxu0 }
  0xdd   :  { %v1106_v11 = vpop.f32.mrf.mxu3  ;;  %v1088_v57 = vadd.f32 %v1087_v10, %v1069_v8  ;;  %v1070_v4 = vpop.f32.mrf.mxu1  ;;  %v1052_v12 = vadd.f32 %v1051_v56, %v1033_v43  ;;  %v1279_v43 = vunpack.c.l.bf16 %v2113_v0  ;;  %v1281_v10 = vunpack.c.l.bf16 %v2118_v1 }
  0xdf   :  { %v2298_v9 = vadd.f32 %v1106_v11, %v1088_v57  ;;  %v1071_v20 = vadd.f32 %v1070_v4, %v1052_v12  ;;  %v1287_v55 = vmul.f32 %v1279_v43, %v1102_v52  ;;  %v1264_v57 = vld [vmem:[%s2341_s3 + $0x8] sm:$0xff] }
  0xe1   :  { %v1295_v11 = vadd.f32 %v1287_v55, %v1267_v53 }
  0xe4   :  { %v1089_v21 = vpop.f32.mrf.mxu2  ;;  %v1120_v26 = vpop.f32.mrf.mxu0 }
  0xe5   :  { %v1108_v25 = vpop.f32.mrf.mxu3  ;;  %v1090_v61 = vadd.f32 %v1089_v21, %v1071_v20  ;;  %v1139_v13 = vpop.f32.mrf.mxu1  ;;  %v1121_v18 = vadd.f32 %v1120_v26, %v236_v5 }
  0xe7   :  { %v2300_v32 = vadd.f32 %v1108_v25, %v1090_v61  ;;  %v1140_v23 = vadd.f32 %v1139_v13, %v1121_v18  ;;  %v1282_v61 = vunpack.c.h.bf16 %v2118_v1  ;;  %v1269_v13 = vunpack.c.l.bf16 %v1264_v57  ;;  %v1265_v1 = vld [vmem:[%s2341_s3 + $0x10] sm:$0xff] }
  0xe8   :  { %v1283_v18 = vunpack.c.l.bf16 %v2123_v2 }
  0xec   :  { %v1158_v14 = vpop.f32.mrf.mxu2  ;;  %v1122_v15 = vpop.f32.mrf.mxu0 }
  0xed   :  { %v1177_v33 = vpop.f32.mrf.mxu3  ;;  %v1141_v37 = vpop.f32.mrf.mxu1  ;;  %v1159_v28 = vadd.f32 %v1158_v14, %v1140_v23  ;;  %v1123_v29 = vadd.f32 %v1122_v15, %v236_v5  ;;  %v1289_v14 = vmul.f32 %v1281_v10, %v2296_v7 }
  0xef   :  { %v1178_v34 = vadd.f32 %v1177_v33, %v1159_v28  ;;  %v1142_v39 = vadd.f32 %v1141_v37, %v1123_v29  ;;  %v1270_v37 = vunpack.c.h.bf16 %v1264_v57  ;;  %v1284_v29 = vunpack.c.h.bf16 %v2123_v2  ;;  %v1266_v2 = vld [vmem:[%s2341_s3 + $0x18] sm:$0xff] }
  0xf0   :  { %v1274_v53 = vunpack.c.h.bf16 %v1266_v2 }
  0xf4   :  { %v1160_v62 = vpop.f32.mrf.mxu2  ;;  %v1125_v16 = vpop.f32.mrf.mxu0 }
  0xf5   :  { %v1179_v38 = vpop.f32.mrf.mxu3  ;;  %v1144_v17 = vpop.f32.mrf.mxu1  ;;  %v1161_v41 = vadd.f32 %v1160_v62, %v1142_v39  ;;  %v1126_v42 = vadd.f32 %v1125_v16, %v236_v5  ;;  %v1272_v39 = vunpack.c.h.bf16 %v1265_v1 }
  0xf7   :  { %v1180_v47 = vadd.f32 %v1179_v38, %v1161_v41  ;;  %v1145_v48 = vadd.f32 %v1144_v17, %v1126_v42  ;;  %v1297_v17 = vadd.f32 %v1289_v14, %v1269_v13 }
  0xfc   :  { %v1163_v19 = vpop.f32.mrf.mxu2  ;;  %v1127_v24 = vpop.f32.mrf.mxu0 }
  0xfd   :  { %v1182_v22 = vpop.f32.mrf.mxu3  ;;  %v1146_v27 = vpop.f32.mrf.mxu1  ;;  %v1164_v63 = vadd.f32 %v1163_v19, %v1145_v48  ;;  %v1128_v56 = vadd.f32 %v1127_v24, %v236_v5 }
  0xff   :  { %v1183_v21 = vadd.f32 %v1182_v22, %v1164_v63  ;;  %v1147_v33 = vadd.f32 %v1146_v27, %v1128_v56 }
 0x104   :  { %v1165_v30 = vpop.f32.mrf.mxu2  ;;  %v1196_v35 = vpop.f32.mrf.mxu0 }
 0x105   :  { %v1184_v31 = vpop.f32.mrf.mxu3  ;;  %v1215_v36 = vpop.f32.mrf.mxu1  ;;  %v1197_v40 = vadd.f32 %v1196_v35, %v1178_v34  ;;  %v1166_v5 = vadd.f32 %v1165_v30, %v1147_v33  ;;  %v1271_v35 = vunpack.c.l.bf16 %v1265_v1  ;;  %v1291_v30 = vmul.f32 %v1283_v18, %v2298_v9 }
 0x107   :  { %v1216_v44 = vadd.f32 %v1215_v36, %v1197_v40  ;;  %v1185_v24 = vadd.f32 %v1184_v31, %v1166_v5  ;;  %v1299_v6 = vadd.f32 %v1291_v30, %v1271_v35  ;;  %v1285_v31 = vunpack.c.l.bf16 %v2128_v3 }
 0x10c   :  { %v1234_v45 = vpop.f32.mrf.mxu2  ;;  %v1198_v51 = vpop.f32.mrf.mxu0 }
 0x10d   :  { %v1253_v46 = vpop.f32.mrf.mxu3  ;;  %v1235_v49 = vadd.f32 %v1234_v45, %v1216_v44  ;;  %v1217_v54 = vpop.f32.mrf.mxu1  ;;  %v1199_v60 = vadd.f32 %v1198_v51, %v1180_v47  ;;  %v1286_v47 = vunpack.c.h.bf16 %v2128_v3 }
 0x10f   :  { %v1254_v58 = vadd.f32 %v1253_v46, %v1235_v49  ;;  %v1218_v12 = vadd.f32 %v1217_v54, %v1199_v60  ;;  %v1273_v49 = vunpack.c.l.bf16 %v1266_v2 }
 0x111   :  { %v1288_v8 = vmul.f32 %v1280_v50, %v1254_v58  ;;  %v1293_v50 = vmul.f32 %v1285_v31, %v2300_v32 }
 0x113   :  { %v1296_v4 = vadd.f32 %v1288_v8, %v1268_v59  ;;  %v1301_v55 = vadd.f32 %v1293_v50, %v1273_v49 }
 0x114   :  { %v1236_v0 = vpop.f32.mrf.mxu2  ;;  %v1201_v26 = vpop.f32.mrf.mxu0 }
 0x115   :  { %v1255_v20 = vpop.f32.mrf.mxu3  ;;  %v1303_v25 = vpack.c.bf16 %v1296_v4, %v1295_v11  ;;  %v1237_v52 = vadd.f32 %v1236_v0, %v1218_v12  ;;  %v1202_v62 = vadd.f32 %v1201_v26, %v1183_v21  ;;  %v1220_v38 = vpop.f32.mrf.mxu1 }
 0x117   :  { %1307 = vst [vmem:[%s2343_s5] sm:$0xff] %v1303_v25  ;;  %v1256_v15 = vadd.f32 %v1255_v20, %v1237_v52  ;;  %v1221_v7 = vadd.f32 %v1220_v38, %v1202_v62 }
 0x119   :  { %v1290_v16 = vmul.f32 %v1282_v61, %v1256_v15 }
 0x11b   :  { %v1298_v19 = vadd.f32 %v1290_v16, %v1270_v37 }
 0x11c   :  { %v1239_v22 = vpop.f32.mrf.mxu2  ;;  %v1203_v34 = vpop.f32.mrf.mxu0 }
 0x11d   :  { %v1258_v23 = vpop.f32.mrf.mxu3  ;;  %v1304_v27 = vpack.c.bf16 %v1298_v19, %v1297_v17  ;;  %v1240_v28 = vadd.f32 %v1239_v22, %v1221_v7  ;;  %v1204_v40 = vadd.f32 %v1203_v34, %v1185_v24  ;;  %v1222_v42 = vpop.f32.mrf.mxu1 }
 0x11f   :  { %1308 = vst [vmem:[%s2343_s5 + $0x8] sm:$0xff] %v1304_v27  ;;  %v1259_v36 = vadd.f32 %v1258_v23, %v1240_v28  ;;  %v1223_v44 = vadd.f32 %v1222_v42, %v1204_v40 }
 0x121   :  { %v1292_v41 = vmul.f32 %v1284_v29, %v1259_v36 }
 0x123   :  { %v1300_v43 = vadd.f32 %v1292_v41, %v1272_v39 }
 0x124   :  { %v1241_v45 = vpop.f32.mrf.mxu2 }
 0x125   :  { %v1305_v9 = vpack.c.bf16 %v1300_v43, %v1299_v6  ;;  %v1242_v46 = vadd.f32 %v1241_v45, %v1223_v44  ;;  %v1260_v48 = vpop.f32.mrf.mxu3 }
 0x127   :  { %1309 = vst [vmem:[%s2343_s5 + $0x10] sm:$0xff] %v1305_v9  ;;  %v1261_v51 = vadd.f32 %v1260_v48, %v1242_v46 }
 0x129   :  { %v1294_v54 = vmul.f32 %v1286_v47, %v1261_v51 }
 0x12b   :  { %v1302_v58 = vadd.f32 %v1294_v54, %v1274_v53 }
 0x12d   :  { %v1306_v59 = vpack.c.bf16 %v1302_v58, %v1301_v55 }
 0x12f   :  { %1310 = vst [vmem:[%s2343_s5 + $0x18] sm:$0xff] %v1306_v59 }
 0x130   :  { %1315 = vsyncpa [#allocation3], 1 }

</bundles_post_ra>
